<compile_context>
chip_gen: v7x
topology: tpu7x:2x2x1
jax: 0.10.0
libtpu: 0.0.40
codegen_flags: <defaults>
</compile_context>

<pallas_src>
import functools

import jax
import jax.numpy as jnp
from jax.experimental import pallas as pl
from jax.experimental.pallas import tpu as pltpu

_BN_EPS = 1e-5
_LANE = 128


def _round_up(x, m):
    return (x + m - 1) // m * m


def _pick_row_tile(H, W, target_rows=128):
    """Largest divisor of H whose strip (rows*W) stays within ~16 f32 vregs."""
    best = 1
    for d in range(1, H + 1):
        if H % d == 0 and d * W <= target_rows:
            best = d
    return best


# ------------------------------ Pallas kernel -------------------------------

def _basic_block_kernel(x_ref, w1_ref, w2_ref, b1_ref, b2_ref, o_ref, y1_ref,
                        *, H, W, C, RT):
    # x_ref : (1, H+2, W+2, C) bf16   zero-padded NHWC input tile (one image)
    # w*_ref: (3, 3*C, C)      bf16   per-ky kx-merged, BN-scale-folded weights
    # b*_ref: (1, C)           f32    folded BatchNorm bias
    # o_ref : (1, H, W, C)     bf16   output tile
    # y1_ref: (H+2, W+2, C)    bf16   VMEM scratch: relu(bn1(conv1)) + zero halo
    bias1 = b1_ref[...]
    bias2 = b2_ref[...]

    # Zero ONLY the halo ring of the scratch (interior is fully overwritten
    # below; re-zeroed every step so it is correct under megacore sharding).
    zrow = jnp.zeros((1, W + 2, C), y1_ref.dtype)
    zcol = jnp.zeros((H + 2, 1, C), y1_ref.dtype)
    y1_ref[0:1, :, :] = zrow
    y1_ref[H + 1:H + 2, :, :] = zrow
    y1_ref[:, 0:1, :] = zcol
    y1_ref[:, W + 1:W + 2, :] = zcol

    def conv_strip(slab_fn, w_ref):
        # One output-row strip of a 3x3 conv: 3 MXU matmuls with K = 3*C.
        acc = jnp.zeros((RT * W, C), jnp.float32)
        for ky in range(3):
            slab = slab_fn(ky)                           # (RT, W+2, C) bf16
            patch = jnp.concatenate(
                [slab[:, 0:W, :], slab[:, 1:W + 1, :], slab[:, 2:W + 2, :]],
                axis=-1).reshape(RT * W, 3 * C)
            acc = acc + jnp.dot(patch, w_ref[ky],
                                preferred_element_type=jnp.float32)
        return acc

    # ---- pass 1: conv1 (BN scale folded) + bias + ReLU -> y1 interior -------
    for r0 in range(0, H, RT):
        acc1 = conv_strip(
            lambda ky, r0=r0: x_ref[0, r0 + ky:r0 + ky + RT, :, :], w1_ref)
        y1 = jnp.maximum(acc1 + bias1, 0.0)
        y1_ref[1 + r0:1 + r0 + RT, 1:W + 1, :] = (
            y1.reshape(RT, W, C).astype(y1_ref.dtype))

    # ---- pass 2: conv2 + bias + residual add + ReLU -> output (bf16) --------
    for r0 in range(0, H, RT):
        acc2 = conv_strip(
            lambda ky, r0=r0: y1_ref[r0 + ky:r0 + ky + RT, :, :], w2_ref)
        ident = x_ref[0, 1 + r0:1 + r0 + RT, 1:W + 1, :].astype(jnp.float32)
        out = jnp.maximum(acc2 + bias2 + ident.reshape(RT * W, C), 0.0)
        o_ref[0, r0:r0 + RT, :, :] = out.reshape(RT, W, C).astype(o_ref.dtype)


# ------------------------------ JAX-side glue --------------------------------

def fold_bn(gamma, beta, mean, var, eps=_BN_EPS):
    scale = gamma / jnp.sqrt(var + eps)
    bias = beta - mean * scale
    return scale, bias


def _prep_conv_weight(w_oihw, scale, c_pad):
    # Fold BN scale into output channels, PyTorch (O, I, 3, 3) -> (ky, kx, I, O),
    # zero-pad channels, merge the 3 kx taps along cin (K = 3*Cp), bf16 for MXU.
    w = w_oihw * scale[:, None, None, None]
    w = jnp.transpose(w, (2, 3, 1, 0))                   # (ky, kx, cin, cout)
    _, _, ci, co = w.shape
    w = jnp.pad(w, ((0, 0), (0, 0), (0, c_pad - ci), (0, c_pad - co)))
    return w.reshape(3, 3 * c_pad, c_pad).astype(jnp.bfloat16)


def _prep_bias(bias, c_pad):
    c = bias.shape[0]
    return jnp.pad(bias, (0, c_pad - c)).reshape(1, c_pad).astype(jnp.float32)


def _vmem_limit_bytes(working_set_bytes):
    # Per-generation VMEM budget: v7x has 64 MiB physical, v5e/v6e have 128 MiB.
    try:
        cap = int(pltpu.get_tpu_info().vmem_capacity_bytes)
    except Exception:
        cap = 64 * 1024 * 1024                           # conservative (v7x)
    want = max(32 * 1024 * 1024, 2 * int(working_set_bytes))
    return int(min(want, (cap * 3) // 4))


def basic_block_forward(x_nchw, params):
    N, C, H, W = x_nchw.shape
    planes = params["w1"].shape[0]
    assert params["w1"].shape == (planes, C, 3, 3)
    assert params["w2"].shape == (planes, planes, 3, 3)
    assert C == planes, "stride=1 / downsample=None requires inplanes == planes"
    Cp = _round_up(C, _LANE)
    RT = _pick_row_tile(H, W)

    # NCHW -> NHWC, bf16 FIRST (so the single pad pass moves half the bytes),
    # then spatial halo pad + channel pad to a lane-dense multiple of 128.
    x_nhwc = jnp.transpose(x_nchw, (0, 2, 3, 1)).astype(jnp.bfloat16)
    x_pad = jnp.pad(x_nhwc, ((0, 0), (1, 1), (1, 1), (0, Cp - C)))

    s1, b1 = fold_bn(*params["bn1"])
    s2, b2 = fold_bn(*params["bn2"])
    w1 = _prep_conv_weight(params["w1"], s1, Cp)
    w2 = _prep_conv_weight(params["w2"], s2, Cp)
    b1 = _prep_bias(b1, Cp)
    b2 = _prep_bias(b2, Cp)

    kernel = functools.partial(_basic_block_kernel, H=H, W=W, C=Cp, RT=RT)

    flops = 2 * 2 * 9 * N * H * W * Cp * Cp              # two 3x3 convs
    bytes_accessed = (x_pad.size * 2 + w1.size * 2 + w2.size * 2
                      + (b1.size + b2.size) * 4 + N * H * W * Cp * 2)

    # Rough per-step VMEM working set (double-buffered x/out blocks, both
    # weight sets, the y1 scratch and the strip-sized temporaries).
    xblk = (H + 2) * (W + 2) * Cp * 2
    oblk = H * W * Cp * 2
    wblk = 2 * 9 * Cp * Cp * 2
    y1blk = (H + 2) * (W + 2) * Cp * 2
    tmp = 2 * RT * W * (3 * Cp * 2 + Cp * 4)
    working_set = 2 * xblk + 2 * oblk + 2 * wblk + y1blk + tmp

    out_p = pl.pallas_call(
        kernel,
        out_shape=jax.ShapeDtypeStruct((N, H, W, Cp), jnp.bfloat16),
        grid=(N,),
        in_specs=[
            pl.BlockSpec((1, H + 2, W + 2, Cp), lambda n: (n, 0, 0, 0)),
            pl.BlockSpec((3, 3 * Cp, Cp), lambda n: (0, 0, 0)),
            pl.BlockSpec((3, 3 * Cp, Cp), lambda n: (0, 0, 0)),
            pl.BlockSpec((1, Cp), lambda n: (0, 0)),
            pl.BlockSpec((1, Cp), lambda n: (0, 0)),
        ],
        out_specs=pl.BlockSpec((1, H, W, Cp), lambda n: (n, 0, 0, 0)),
        scratch_shapes=[pltpu.VMEM((H + 2, W + 2, Cp), jnp.bfloat16)],
        compiler_params=pltpu.CompilerParams(
            dimension_semantics=("parallel",),
            vmem_limit_bytes=_vmem_limit_bytes(working_set)),
        cost_estimate=pl.CostEstimate(
            flops=flops, transcendentals=0, bytes_accessed=bytes_accessed),
    )(x_pad, w1, w2, b1, b2)

    out = out_p[..., :C].astype(jnp.float32)              # drop channel padding
    return jnp.transpose(out, (0, 3, 1, 2))                # back to NCHW


# --------------------------------- Reference ----------------------------------

def reference_forward(x, p, eps=_BN_EPS):
    def conv(x, w):
        return jax.lax.conv_general_dilated(
            x, w, window_strides=(1, 1), padding=((1, 1), (1, 1)),
            dimension_numbers=("NCHW", "OIHW", "NCHW"))

    def bn(x, params):
        g, b, m, v = params
        inv = g / jnp.sqrt(v + eps)
        return (x - m[None, :, None, None]) * inv[None, :, None, None] \
            + b[None, :, None, None]

    out = jax.nn.relu(bn(conv(x, p["w1"]), p["bn1"]))
    out = bn(conv(out, p["w2"]), p["bn2"])
    return jax.nn.relu(out + x)


# ----------------------------------- Main -------------------------------------

if __name__ == "__main__":
    key = jax.random.PRNGKey(0)

    N, H, W = 2, 16, 16
    planes = 4
    inplanes = planes                # stride=1, downsample=None

    ks = jax.random.split(key, 5)
    x = jax.random.normal(ks[0], (N, inplanes, H, W), jnp.float32)
    w1 = 0.1 * jax.random.normal(ks[1], (planes, inplanes, 3, 3), jnp.float32)
    w2 = 0.1 * jax.random.normal(ks[2], (planes, planes, 3, 3), jnp.float32)

    def bn_params(k, C):
        k1, k2, k3, k4 = jax.random.split(k, 4)
        gamma = jax.random.uniform(k1, (C,), jnp.float32, 0.5, 1.5)
        beta = 0.1 * jax.random.normal(k2, (C,), jnp.float32)
        mean = 0.1 * jax.random.normal(k3, (C,), jnp.float32)
        var = jax.random.uniform(k4, (C,), jnp.float32, 0.5, 1.5)
        return gamma, beta, mean, var

    params = {
        "w1": w1, "bn1": bn_params(ks[3], planes),
        "w2": w2, "bn2": bn_params(ks[4], planes),
    }

    out = jax.block_until_ready(basic_block_forward(x, params))
    ref = jax.block_until_ready(reference_forward(x, params))

    assert out.shape == (N, inplanes, H, W), out.shape
    max_err = float(jnp.max(jnp.abs(out - ref)))
    # bf16 activations/weights on the MXU (f32 accumulation) + bf16 output
    # + bf16 identity in the skip connection -> loosened tolerance vs f32 ref.
    assert jnp.allclose(out, ref, atol=5e-2, rtol=5e-2), max_err

    print("KERNEL_OK")
</pallas_src>

<mosaic_0001>
module attributes {stable_mosaic.version = 11 : i64} {
  func.func @_basic_block_kernel(%arg0: i32, %arg1: memref<1x18x18x128xbf16, #tpu.memory_space<vmem>>, %arg2: memref<3x384x128xbf16, #tpu.memory_space<vmem>>, %arg3: memref<3x384x128xbf16, #tpu.memory_space<vmem>>, %arg4: memref<1x128xf32, #tpu.memory_space<vmem>>, %arg5: memref<1x128xf32, #tpu.memory_space<vmem>>, %arg6: memref<1x16x16x128xbf16, #tpu.memory_space<vmem>>, %arg7: memref<18x18x128xbf16, #tpu.memory_space<vmem>>) attributes {dimension_semantics = [#tpu.dimension_semantics<parallel>], iteration_bounds = array<i64: 2>, scalar_prefetch = 0 : i64, scratch_operands = 1 : i64, tpu.core_type = #tpu.core_type<tc>, window_params = [{transform_indices = @transform_0, window_bounds = array<i64: 1, 18, 18, 128>}, {pipeline_mode = #tpu.pipeline_mode<synchronous>, transform_indices = @transform_1, window_bounds = array<i64: 3, 384, 128>}, {pipeline_mode = #tpu.pipeline_mode<synchronous>, transform_indices = @transform_2, window_bounds = array<i64: 3, 384, 128>}, {pipeline_mode = #tpu.pipeline_mode<synchronous>, transform_indices = @transform_3, window_bounds = array<i64: 1, 128>}, {pipeline_mode = #tpu.pipeline_mode<synchronous>, transform_indices = @transform_4, window_bounds = array<i64: 1, 128>}, {transform_indices = @transform_5, window_bounds = array<i64: 1, 16, 16, 128>}]} {
    %c0 = arith.constant 0 : index
    %c0_0 = arith.constant 0 : index
    %0 = vector.load %arg4[%c0, %c0_0] : memref<1x128xf32, #tpu.memory_space<vmem>>, vector<1x128xf32>
    %c0_1 = arith.constant 0 : index
    %c0_2 = arith.constant 0 : index
    %1 = vector.load %arg5[%c0_1, %c0_2] : memref<1x128xf32, #tpu.memory_space<vmem>>, vector<1x128xf32>
    %cst = arith.constant 0.000000e+00 : bf16
    %2 = vector.broadcast %cst : bf16 to vector<1x18x128xbf16>
    %cst_3 = arith.constant 0.000000e+00 : bf16
    %3 = vector.broadcast %cst_3 : bf16 to vector<18x1x128xbf16>
    %c0_4 = arith.constant 0 : index
    %c0_5 = arith.constant 0 : index
    %c0_6 = arith.constant 0 : index
    %4 = vector.load %arg7[%c0_4, %c0_5, %c0_6] : memref<18x18x128xbf16, #tpu.memory_space<vmem>>, vector<1x18x128xbf16>
    tpu.vector_store %arg7[%c0_4, %c0_5, %c0_6], %2 {strides = array<i32>} : memref<18x18x128xbf16, #tpu.memory_space<vmem>>, vector<1x18x128xbf16>,
    %c17 = arith.constant 17 : index
    %c0_7 = arith.constant 0 : index
    %c0_8 = arith.constant 0 : index
    %5 = vector.load %arg7[%c17, %c0_7, %c0_8] : memref<18x18x128xbf16, #tpu.memory_space<vmem>>, vector<1x18x128xbf16>
    tpu.vector_store %arg7[%c17, %c0_7, %c0_8], %2 {strides = array<i32>} : memref<18x18x128xbf16, #tpu.memory_space<vmem>>, vector<1x18x128xbf16>,
    %c0_9 = arith.constant 0 : index
    %c0_10 = arith.constant 0 : index
    %c0_11 = arith.constant 0 : index
    %6 = vector.load %arg7[%c0_9, %c0_10, %c0_11] : memref<18x18x128xbf16, #tpu.memory_space<vmem>>, vector<18x1x128xbf16>
    tpu.vector_store %arg7[%c0_9, %c0_10, %c0_11], %3 {strides = array<i32>} : memref<18x18x128xbf16, #tpu.memory_space<vmem>>, vector<18x1x128xbf16>,
    %c0_12 = arith.constant 0 : index
    %c17_13 = arith.constant 17 : index
    %c0_14 = arith.constant 0 : index
    %7 = vector.load %arg7[%c0_12, %c17_13, %c0_14] : memref<18x18x128xbf16, #tpu.memory_space<vmem>>, vector<18x1x128xbf16>
    tpu.vector_store %arg7[%c0_12, %c17_13, %c0_14], %3 {strides = array<i32>} : memref<18x18x128xbf16, #tpu.memory_space<vmem>>, vector<18x1x128xbf16>,
    %cst_15 = arith.constant 0.000000e+00 : f32
    %8 = vector.broadcast %cst_15 : f32 to vector<128x128xf32>
    %c0_16 = arith.constant 0 : index
    %c0_17 = arith.constant 0 : index
    %c0_18 = arith.constant 0 : index
    %c0_19 = arith.constant 0 : index
    %9 = vector.load %arg1[%c0_16, %c0_17, %c0_18, %c0_19] : memref<1x18x18x128xbf16, #tpu.memory_space<vmem>>, vector<1x8x18x128xbf16>
    %10 = vector.shape_cast %9 : vector<1x8x18x128xbf16> to vector<8x18x128xbf16>
    %11 = vector.extract_strided_slice %10 {offsets = [0, 0, 0], sizes = [8, 16, 128], strides = [1, 1, 1]} : vector<8x18x128xbf16> to vector<8x16x128xbf16>
    %12 = vector.extract_strided_slice %10 {offsets = [0, 1, 0], sizes = [8, 16, 128], strides = [1, 1, 1]} : vector<8x18x128xbf16> to vector<8x16x128xbf16>
    %13 = vector.extract_strided_slice %10 {offsets = [0, 2, 0], sizes = [8, 16, 128], strides = [1, 1, 1]} : vector<8x18x128xbf16> to vector<8x16x128xbf16>
    %14 = tpu.concatenate %11, %12, %13 in 2 : vector<8x16x128xbf16>, vector<8x16x128xbf16>, vector<8x16x128xbf16> -> vector<8x16x384xbf16>
    %15 = vector.shape_cast %14 : vector<8x16x384xbf16> to vector<128x384xbf16>
    %c0_20 = arith.constant 0 : index
    %c0_21 = arith.constant 0 : index
    %c0_22 = arith.constant 0 : index
    %16 = vector.load %arg2[%c0_20, %c0_21, %c0_22] : memref<3x384x128xbf16, #tpu.memory_space<vmem>>, vector<1x384x128xbf16>
    %17 = vector.shape_cast %16 : vector<1x384x128xbf16> to vector<384x128xbf16>
    %cst_23 = arith.constant dense<0.000000e+00> : vector<128x128xf32>
    %18 = tpu.matmul %15, %17, %cst_23 {dimension_numbers = #tpu.dot_dimension_numbers<[1], [0], [0], [1], [0, 0, 1, 1], [], []>} : vector<128x384xbf16>, vector<384x128xbf16>, vector<128x128xf32> -> vector<128x128xf32>
    %19 = arith.addf %8, %18 : vector<128x128xf32>
    %c0_24 = arith.constant 0 : index
    %c1 = arith.constant 1 : index
    %c0_25 = arith.constant 0 : index
    %c0_26 = arith.constant 0 : index
    %20 = vector.load %arg1[%c0_24, %c1, %c0_25, %c0_26] : memref<1x18x18x128xbf16, #tpu.memory_space<vmem>>, vector<1x8x18x128xbf16>
    %21 = vector.shape_cast %20 : vector<1x8x18x128xbf16> to vector<8x18x128xbf16>
    %22 = vector.extract_strided_slice %21 {offsets = [0, 0, 0], sizes = [8, 16, 128], strides = [1, 1, 1]} : vector<8x18x128xbf16> to vector<8x16x128xbf16>
    %23 = vector.extract_strided_slice %21 {offsets = [0, 1, 0], sizes = [8, 16, 128], strides = [1, 1, 1]} : vector<8x18x128xbf16> to vector<8x16x128xbf16>
    %24 = vector.extract_strided_slice %21 {offsets = [0, 2, 0], sizes = [8, 16, 128], strides = [1, 1, 1]} : vector<8x18x128xbf16> to vector<8x16x128xbf16>
    %25 = tpu.concatenate %22, %23, %24 in 2 : vector<8x16x128xbf16>, vector<8x16x128xbf16>, vector<8x16x128xbf16> -> vector<8x16x384xbf16>
    %26 = vector.shape_cast %25 : vector<8x16x384xbf16> to vector<128x384xbf16>
    %c1_27 = arith.constant 1 : index
    %c0_28 = arith.constant 0 : index
    %c0_29 = arith.constant 0 : index
    %27 = vector.load %arg2[%c1_27, %c0_28, %c0_29] : memref<3x384x128xbf16, #tpu.memory_space<vmem>>, vector<1x384x128xbf16>
    %28 = vector.shape_cast %27 : vector<1x384x128xbf16> to vector<384x128xbf16>
    %cst_30 = arith.constant dense<0.000000e+00> : vector<128x128xf32>
    %29 = tpu.matmul %26, %28, %cst_30 {dimension_numbers = #tpu.dot_dimension_numbers<[1], [0], [0], [1], [0, 0, 1, 1], [], []>} : vector<128x384xbf16>, vector<384x128xbf16>, vector<128x128xf32> -> vector<128x128xf32>
    %30 = arith.addf %19, %29 : vector<128x128xf32>
    %c0_31 = arith.constant 0 : index
    %c2 = arith.constant 2 : index
    %c0_32 = arith.constant 0 : index
    %c0_33 = arith.constant 0 : index
    %31 = vector.load %arg1[%c0_31, %c2, %c0_32, %c0_33] : memref<1x18x18x128xbf16, #tpu.memory_space<vmem>>, vector<1x8x18x128xbf16>
    %32 = vector.shape_cast %31 : vector<1x8x18x128xbf16> to vector<8x18x128xbf16>
    %33 = vector.extract_strided_slice %32 {offsets = [0, 0, 0], sizes = [8, 16, 128], strides = [1, 1, 1]} : vector<8x18x128xbf16> to vector<8x16x128xbf16>
    %34 = vector.extract_strided_slice %32 {offsets = [0, 1, 0], sizes = [8, 16, 128], strides = [1, 1, 1]} : vector<8x18x128xbf16> to vector<8x16x128xbf16>
    %35 = vector.extract_strided_slice %32 {offsets = [0, 2, 0], sizes = [8, 16, 128], strides = [1, 1, 1]} : vector<8x18x128xbf16> to vector<8x16x128xbf16>
    %36 = tpu.concatenate %33, %34, %35 in 2 : vector<8x16x128xbf16>, vector<8x16x128xbf16>, vector<8x16x128xbf16> -> vector<8x16x384xbf16>
    %37 = vector.shape_cast %36 : vector<8x16x384xbf16> to vector<128x384xbf16>
    %c2_34 = arith.constant 2 : index
    %c0_35 = arith.constant 0 : index
    %c0_36 = arith.constant 0 : index
    %38 = vector.load %arg2[%c2_34, %c0_35, %c0_36] : memref<3x384x128xbf16, #tpu.memory_space<vmem>>, vector<1x384x128xbf16>
    %39 = vector.shape_cast %38 : vector<1x384x128xbf16> to vector<384x128xbf16>
    %cst_37 = arith.constant dense<0.000000e+00> : vector<128x128xf32>
    %40 = tpu.matmul %37, %39, %cst_37 {dimension_numbers = #tpu.dot_dimension_numbers<[1], [0], [0], [1], [0, 0, 1, 1], [], []>} : vector<128x384xbf16>, vector<384x128xbf16>, vector<128x128xf32> -> vector<128x128xf32>
    %41 = arith.addf %30, %40 : vector<128x128xf32>
    %42 = vector.broadcast %0 : vector<1x128xf32> to vector<128x128xf32>
    %43 = arith.addf %41, %42 : vector<128x128xf32>
    %cst_38 = arith.constant 0.000000e+00 : f32
    %44 = vector.broadcast %cst_38 : f32 to vector<128x128xf32>
    %45 = arith.maximumf %43, %44 : vector<128x128xf32>
    %46 = vector.shape_cast %45 : vector<128x128xf32> to vector<8x16x128xf32>
    %47 = arith.truncf %46 : vector<8x16x128xf32> to vector<8x16x128xbf16>
    %c1_39 = arith.constant 1 : index
    %c1_40 = arith.constant 1 : index
    %c0_41 = arith.constant 0 : index
    %48 = vector.load %arg7[%c1_39, %c1_40, %c0_41] : memref<18x18x128xbf16, #tpu.memory_space<vmem>>, vector<8x16x128xbf16>
    tpu.vector_store %arg7[%c1_39, %c1_40, %c0_41], %47 {strides = array<i32>} : memref<18x18x128xbf16, #tpu.memory_space<vmem>>, vector<8x16x128xbf16>,
    %cst_42 = arith.constant 0.000000e+00 : f32
    %49 = vector.broadcast %cst_42 : f32 to vector<128x128xf32>
    %c0_43 = arith.constant 0 : index
    %c8 = arith.constant 8 : index
    %c0_44 = arith.constant 0 : index
    %c0_45 = arith.constant 0 : index
    %50 = vector.load %arg1[%c0_43, %c8, %c0_44, %c0_45] : memref<1x18x18x128xbf16, #tpu.memory_space<vmem>>, vector<1x8x18x128xbf16>
    %51 = vector.shape_cast %50 : vector<1x8x18x128xbf16> to vector<8x18x128xbf16>
    %52 = vector.extract_strided_slice %51 {offsets = [0, 0, 0], sizes = [8, 16, 128], strides = [1, 1, 1]} : vector<8x18x128xbf16> to vector<8x16x128xbf16>
    %53 = vector.extract_strided_slice %51 {offsets = [0, 1, 0], sizes = [8, 16, 128], strides = [1, 1, 1]} : vector<8x18x128xbf16> to vector<8x16x128xbf16>
    %54 = vector.extract_strided_slice %51 {offsets = [0, 2, 0], sizes = [8, 16, 128], strides = [1, 1, 1]} : vector<8x18x128xbf16> to vector<8x16x128xbf16>
    %55 = tpu.concatenate %52, %53, %54 in 2 : vector<8x16x128xbf16>, vector<8x16x128xbf16>, vector<8x16x128xbf16> -> vector<8x16x384xbf16>
    %56 = vector.shape_cast %55 : vector<8x16x384xbf16> to vector<128x384xbf16>
    %c0_46 = arith.constant 0 : index
    %c0_47 = arith.constant 0 : index
    %c0_48 = arith.constant 0 : index
    %57 = vector.load %arg2[%c0_46, %c0_47, %c0_48] : memref<3x384x128xbf16, #tpu.memory_space<vmem>>, vector<1x384x128xbf16>
    %58 = vector.shape_cast %57 : vector<1x384x128xbf16> to vector<384x128xbf16>
    %cst_49 = arith.constant dense<0.000000e+00> : vector<128x128xf32>
    %59 = tpu.matmul %56, %58, %cst_49 {dimension_numbers = #tpu.dot_dimension_numbers<[1], [0], [0], [1], [0, 0, 1, 1], [], []>} : vector<128x384xbf16>, vector<384x128xbf16>, vector<128x128xf32> -> vector<128x128xf32>
    %60 = arith.addf %49, %59 : vector<128x128xf32>
    %c0_50 = arith.constant 0 : index
    %c9 = arith.constant 9 : index
    %c0_51 = arith.constant 0 : index
    %c0_52 = arith.constant 0 : index
    %61 = vector.load %arg1[%c0_50, %c9, %c0_51, %c0_52] : memref<1x18x18x128xbf16, #tpu.memory_space<vmem>>, vector<1x8x18x128xbf16>
    %62 = vector.shape_cast %61 : vector<1x8x18x128xbf16> to vector<8x18x128xbf16>
    %63 = vector.extract_strided_slice %62 {offsets = [0, 0, 0], sizes = [8, 16, 128], strides = [1, 1, 1]} : vector<8x18x128xbf16> to vector<8x16x128xbf16>
    %64 = vector.extract_strided_slice %62 {offsets = [0, 1, 0], sizes = [8, 16, 128], strides = [1, 1, 1]} : vector<8x18x128xbf16> to vector<8x16x128xbf16>
    %65 = vector.extract_strided_slice %62 {offsets = [0, 2, 0], sizes = [8, 16, 128], strides = [1, 1, 1]} : vector<8x18x128xbf16> to vector<8x16x128xbf16>
    %66 = tpu.concatenate %63, %64, %65 in 2 : vector<8x16x128xbf16>, vector<8x16x128xbf16>, vector<8x16x128xbf16> -> vector<8x16x384xbf16>
    %67 = vector.shape_cast %66 : vector<8x16x384xbf16> to vector<128x384xbf16>
    %c1_53 = arith.constant 1 : index
    %c0_54 = arith.constant 0 : index
    %c0_55 = arith.constant 0 : index
    %68 = vector.load %arg2[%c1_53, %c0_54, %c0_55] : memref<3x384x128xbf16, #tpu.memory_space<vmem>>, vector<1x384x128xbf16>
    %69 = vector.shape_cast %68 : vector<1x384x128xbf16> to vector<384x128xbf16>
    %cst_56 = arith.constant dense<0.000000e+00> : vector<128x128xf32>
    %70 = tpu.matmul %67, %69, %cst_56 {dimension_numbers = #tpu.dot_dimension_numbers<[1], [0], [0], [1], [0, 0, 1, 1], [], []>} : vector<128x384xbf16>, vector<384x128xbf16>, vector<128x128xf32> -> vector<128x128xf32>
    %71 = arith.addf %60, %70 : vector<128x128xf32>
    %c0_57 = arith.constant 0 : index
    %c10 = arith.constant 10 : index
    %c0_58 = arith.constant 0 : index
    %c0_59 = arith.constant 0 : index
    %72 = vector.load %arg1[%c0_57, %c10, %c0_58, %c0_59] : memref<1x18x18x128xbf16, #tpu.memory_space<vmem>>, vector<1x8x18x128xbf16>
    %73 = vector.shape_cast %72 : vector<1x8x18x128xbf16> to vector<8x18x128xbf16>
    %74 = vector.extract_strided_slice %73 {offsets = [0, 0, 0], sizes = [8, 16, 128], strides = [1, 1, 1]} : vector<8x18x128xbf16> to vector<8x16x128xbf16>
    %75 = vector.extract_strided_slice %73 {offsets = [0, 1, 0], sizes = [8, 16, 128], strides = [1, 1, 1]} : vector<8x18x128xbf16> to vector<8x16x128xbf16>
    %76 = vector.extract_strided_slice %73 {offsets = [0, 2, 0], sizes = [8, 16, 128], strides = [1, 1, 1]} : vector<8x18x128xbf16> to vector<8x16x128xbf16>
    %77 = tpu.concatenate %74, %75, %76 in 2 : vector<8x16x128xbf16>, vector<8x16x128xbf16>, vector<8x16x128xbf16> -> vector<8x16x384xbf16>
    %78 = vector.shape_cast %77 : vector<8x16x384xbf16> to vector<128x384xbf16>
    %c2_60 = arith.constant 2 : index
    %c0_61 = arith.constant 0 : index
    %c0_62 = arith.constant 0 : index
    %79 = vector.load %arg2[%c2_60, %c0_61, %c0_62] : memref<3x384x128xbf16, #tpu.memory_space<vmem>>, vector<1x384x128xbf16>
    %80 = vector.shape_cast %79 : vector<1x384x128xbf16> to vector<384x128xbf16>
    %cst_63 = arith.constant dense<0.000000e+00> : vector<128x128xf32>
    %81 = tpu.matmul %78, %80, %cst_63 {dimension_numbers = #tpu.dot_dimension_numbers<[1], [0], [0], [1], [0, 0, 1, 1], [], []>} : vector<128x384xbf16>, vector<384x128xbf16>, vector<128x128xf32> -> vector<128x128xf32>
    %82 = arith.addf %71, %81 : vector<128x128xf32>
    %83 = vector.broadcast %0 : vector<1x128xf32> to vector<128x128xf32>
    %84 = arith.addf %82, %83 : vector<128x128xf32>
    %cst_64 = arith.constant 0.000000e+00 : f32
    %85 = vector.broadcast %cst_64 : f32 to vector<128x128xf32>
    %86 = arith.maximumf %84, %85 : vector<128x128xf32>
    %87 = vector.shape_cast %86 : vector<128x128xf32> to vector<8x16x128xf32>
    %88 = arith.truncf %87 : vector<8x16x128xf32> to vector<8x16x128xbf16>
    %c9_65 = arith.constant 9 : index
    %c1_66 = arith.constant 1 : index
    %c0_67 = arith.constant 0 : index
    %89 = vector.load %arg7[%c9_65, %c1_66, %c0_67] : memref<18x18x128xbf16, #tpu.memory_space<vmem>>, vector<8x16x128xbf16>
    tpu.vector_store %arg7[%c9_65, %c1_66, %c0_67], %88 {strides = array<i32>} : memref<18x18x128xbf16, #tpu.memory_space<vmem>>, vector<8x16x128xbf16>,
    %cst_68 = arith.constant 0.000000e+00 : f32
    %90 = vector.broadcast %cst_68 : f32 to vector<128x128xf32>
    %c0_69 = arith.constant 0 : index
    %c0_70 = arith.constant 0 : index
    %c0_71 = arith.constant 0 : index
    %91 = vector.load %arg7[%c0_69, %c0_70, %c0_71] : memref<18x18x128xbf16, #tpu.memory_space<vmem>>, vector<8x18x128xbf16>
    %92 = vector.extract_strided_slice %91 {offsets = [0, 0, 0], sizes = [8, 16, 128], strides = [1, 1, 1]} : vector<8x18x128xbf16> to vector<8x16x128xbf16>
    %93 = vector.extract_strided_slice %91 {offsets = [0, 1, 0], sizes = [8, 16, 128], strides = [1, 1, 1]} : vector<8x18x128xbf16> to vector<8x16x128xbf16>
    %94 = vector.extract_strided_slice %91 {offsets = [0, 2, 0], sizes = [8, 16, 128], strides = [1, 1, 1]} : vector<8x18x128xbf16> to vector<8x16x128xbf16>
    %95 = tpu.concatenate %92, %93, %94 in 2 : vector<8x16x128xbf16>, vector<8x16x128xbf16>, vector<8x16x128xbf16> -> vector<8x16x384xbf16>
    %96 = vector.shape_cast %95 : vector<8x16x384xbf16> to vector<128x384xbf16>
    %c0_72 = arith.constant 0 : index
    %c0_73 = arith.constant 0 : index
    %c0_74 = arith.constant 0 : index
    %97 = vector.load %arg3[%c0_72, %c0_73, %c0_74] : memref<3x384x128xbf16, #tpu.memory_space<vmem>>, vector<1x384x128xbf16>
    %98 = vector.shape_cast %97 : vector<1x384x128xbf16> to vector<384x128xbf16>
    %cst_75 = arith.constant dense<0.000000e+00> : vector<128x128xf32>
    %99 = tpu.matmul %96, %98, %cst_75 {dimension_numbers = #tpu.dot_dimension_numbers<[1], [0], [0], [1], [0, 0, 1, 1], [], []>} : vector<128x384xbf16>, vector<384x128xbf16>, vector<128x128xf32> -> vector<128x128xf32>
    %100 = arith.addf %90, %99 : vector<128x128xf32>
    %c1_76 = arith.constant 1 : index
    %c0_77 = arith.constant 0 : index
    %c0_78 = arith.constant 0 : index
    %101 = vector.load %arg7[%c1_76, %c0_77, %c0_78] : memref<18x18x128xbf16, #tpu.memory_space<vmem>>, vector<8x18x128xbf16>
    %102 = vector.extract_strided_slice %101 {offsets = [0, 0, 0], sizes = [8, 16, 128], strides = [1, 1, 1]} : vector<8x18x128xbf16> to vector<8x16x128xbf16>
    %103 = vector.extract_strided_slice %101 {offsets = [0, 1, 0], sizes = [8, 16, 128], strides = [1, 1, 1]} : vector<8x18x128xbf16> to vector<8x16x128xbf16>
    %104 = vector.extract_strided_slice %101 {offsets = [0, 2, 0], sizes = [8, 16, 128], strides = [1, 1, 1]} : vector<8x18x128xbf16> to vector<8x16x128xbf16>
    %105 = tpu.concatenate %102, %103, %104 in 2 : vector<8x16x128xbf16>, vector<8x16x128xbf16>, vector<8x16x128xbf16> -> vector<8x16x384xbf16>
    %106 = vector.shape_cast %105 : vector<8x16x384xbf16> to vector<128x384xbf16>
    %c1_79 = arith.constant 1 : index
    %c0_80 = arith.constant 0 : index
    %c0_81 = arith.constant 0 : index
    %107 = vector.load %arg3[%c1_79, %c0_80, %c0_81] : memref<3x384x128xbf16, #tpu.memory_space<vmem>>, vector<1x384x128xbf16>
    %108 = vector.shape_cast %107 : vector<1x384x128xbf16> to vector<384x128xbf16>
    %cst_82 = arith.constant dense<0.000000e+00> : vector<128x128xf32>
    %109 = tpu.matmul %106, %108, %cst_82 {dimension_numbers = #tpu.dot_dimension_numbers<[1], [0], [0], [1], [0, 0, 1, 1], [], []>} : vector<128x384xbf16>, vector<384x128xbf16>, vector<128x128xf32> -> vector<128x128xf32>
    %110 = arith.addf %100, %109 : vector<128x128xf32>
    %c2_83 = arith.constant 2 : index
    %c0_84 = arith.constant 0 : index
    %c0_85 = arith.constant 0 : index
    %111 = vector.load %arg7[%c2_83, %c0_84, %c0_85] : memref<18x18x128xbf16, #tpu.memory_space<vmem>>, vector<8x18x128xbf16>
    %112 = vector.extract_strided_slice %111 {offsets = [0, 0, 0], sizes = [8, 16, 128], strides = [1, 1, 1]} : vector<8x18x128xbf16> to vector<8x16x128xbf16>
    %113 = vector.extract_strided_slice %111 {offsets = [0, 1, 0], sizes = [8, 16, 128], strides = [1, 1, 1]} : vector<8x18x128xbf16> to vector<8x16x128xbf16>
    %114 = vector.extract_strided_slice %111 {offsets = [0, 2, 0], sizes = [8, 16, 128], strides = [1, 1, 1]} : vector<8x18x128xbf16> to vector<8x16x128xbf16>
    %115 = tpu.concatenate %112, %113, %114 in 2 : vector<8x16x128xbf16>, vector<8x16x128xbf16>, vector<8x16x128xbf16> -> vector<8x16x384xbf16>
    %116 = vector.shape_cast %115 : vector<8x16x384xbf16> to vector<128x384xbf16>
    %c2_86 = arith.constant 2 : index
    %c0_87 = arith.constant 0 : index
    %c0_88 = arith.constant 0 : index
    %117 = vector.load %arg3[%c2_86, %c0_87, %c0_88] : memref<3x384x128xbf16, #tpu.memory_space<vmem>>, vector<1x384x128xbf16>
    %118 = vector.shape_cast %117 : vector<1x384x128xbf16> to vector<384x128xbf16>
    %cst_89 = arith.constant dense<0.000000e+00> : vector<128x128xf32>
    %119 = tpu.matmul %116, %118, %cst_89 {dimension_numbers = #tpu.dot_dimension_numbers<[1], [0], [0], [1], [0, 0, 1, 1], [], []>} : vector<128x384xbf16>, vector<384x128xbf16>, vector<128x128xf32> -> vector<128x128xf32>
    %120 = arith.addf %110, %119 : vector<128x128xf32>
    %c0_90 = arith.constant 0 : index
    %c1_91 = arith.constant 1 : index
    %c1_92 = arith.constant 1 : index
    %c0_93 = arith.constant 0 : index
    %121 = vector.load %arg1[%c0_90, %c1_91, %c1_92, %c0_93] : memref<1x18x18x128xbf16, #tpu.memory_space<vmem>>, vector<1x8x16x128xbf16>
    %122 = vector.shape_cast %121 : vector<1x8x16x128xbf16> to vector<8x16x128xbf16>
    %123 = arith.extf %122 : vector<8x16x128xbf16> to vector<8x16x128xf32>
    %124 = vector.broadcast %1 : vector<1x128xf32> to vector<128x128xf32>
    %125 = arith.addf %120, %124 : vector<128x128xf32>
    %126 = vector.shape_cast %123 : vector<8x16x128xf32> to vector<128x128xf32>
    %127 = arith.addf %125, %126 : vector<128x128xf32>
    %cst_94 = arith.constant 0.000000e+00 : f32
    %128 = vector.broadcast %cst_94 : f32 to vector<128x128xf32>
    %129 = arith.maximumf %127, %128 : vector<128x128xf32>
    %130 = vector.shape_cast %129 : vector<128x128xf32> to vector<8x16x128xf32>
    %131 = arith.truncf %130 : vector<8x16x128xf32> to vector<8x16x128xbf16>
    %c0_95 = arith.constant 0 : index
    %c0_96 = arith.constant 0 : index
    %c0_97 = arith.constant 0 : index
    %c0_98 = arith.constant 0 : index
    %132 = vector.load %arg6[%c0_95, %c0_96, %c0_97, %c0_98] : memref<1x16x16x128xbf16, #tpu.memory_space<vmem>>, vector<1x8x16x128xbf16>
    %133 = vector.shape_cast %132 : vector<1x8x16x128xbf16> to vector<8x16x128xbf16>
    %134 = vector.shape_cast %131 : vector<8x16x128xbf16> to vector<1x8x16x128xbf16>
    tpu.vector_store %arg6[%c0_95, %c0_96, %c0_97, %c0_98], %134 {strides = array<i32>} : memref<1x16x16x128xbf16, #tpu.memory_space<vmem>>, vector<1x8x16x128xbf16>,
    %cst_99 = arith.constant 0.000000e+00 : f32
    %135 = vector.broadcast %cst_99 : f32 to vector<128x128xf32>
    %c8_100 = arith.constant 8 : index
    %c0_101 = arith.constant 0 : index
    %c0_102 = arith.constant 0 : index
    %136 = vector.load %arg7[%c8_100, %c0_101, %c0_102] : memref<18x18x128xbf16, #tpu.memory_space<vmem>>, vector<8x18x128xbf16>
    %137 = vector.extract_strided_slice %136 {offsets = [0, 0, 0], sizes = [8, 16, 128], strides = [1, 1, 1]} : vector<8x18x128xbf16> to vector<8x16x128xbf16>
    %138 = vector.extract_strided_slice %136 {offsets = [0, 1, 0], sizes = [8, 16, 128], strides = [1, 1, 1]} : vector<8x18x128xbf16> to vector<8x16x128xbf16>
    %139 = vector.extract_strided_slice %136 {offsets = [0, 2, 0], sizes = [8, 16, 128], strides = [1, 1, 1]} : vector<8x18x128xbf16> to vector<8x16x128xbf16>
    %140 = tpu.concatenate %137, %138, %139 in 2 : vector<8x16x128xbf16>, vector<8x16x128xbf16>, vector<8x16x128xbf16> -> vector<8x16x384xbf16>
    %141 = vector.shape_cast %140 : vector<8x16x384xbf16> to vector<128x384xbf16>
    %c0_103 = arith.constant 0 : index
    %c0_104 = arith.constant 0 : index
    %c0_105 = arith.constant 0 : index
    %142 = vector.load %arg3[%c0_103, %c0_104, %c0_105] : memref<3x384x128xbf16, #tpu.memory_space<vmem>>, vector<1x384x128xbf16>
    %143 = vector.shape_cast %142 : vector<1x384x128xbf16> to vector<384x128xbf16>
    %cst_106 = arith.constant dense<0.000000e+00> : vector<128x128xf32>
    %144 = tpu.matmul %141, %143, %cst_106 {dimension_numbers = #tpu.dot_dimension_numbers<[1], [0], [0], [1], [0, 0, 1, 1], [], []>} : vector<128x384xbf16>, vector<384x128xbf16>, vector<128x128xf32> -> vector<128x128xf32>
    %145 = arith.addf %135, %144 : vector<128x128xf32>
    %c9_107 = arith.constant 9 : index
    %c0_108 = arith.constant 0 : index
    %c0_109 = arith.constant 0 : index
    %146 = vector.load %arg7[%c9_107, %c0_108, %c0_109] : memref<18x18x128xbf16, #tpu.memory_space<vmem>>, vector<8x18x128xbf16>
    %147 = vector.extract_strided_slice %146 {offsets = [0, 0, 0], sizes = [8, 16, 128], strides = [1, 1, 1]} : vector<8x18x128xbf16> to vector<8x16x128xbf16>
    %148 = vector.extract_strided_slice %146 {offsets = [0, 1, 0], sizes = [8, 16, 128], strides = [1, 1, 1]} : vector<8x18x128xbf16> to vector<8x16x128xbf16>
    %149 = vector.extract_strided_slice %146 {offsets = [0, 2, 0], sizes = [8, 16, 128], strides = [1, 1, 1]} : vector<8x18x128xbf16> to vector<8x16x128xbf16>
    %150 = tpu.concatenate %147, %148, %149 in 2 : vector<8x16x128xbf16>, vector<8x16x128xbf16>, vector<8x16x128xbf16> -> vector<8x16x384xbf16>
    %151 = vector.shape_cast %150 : vector<8x16x384xbf16> to vector<128x384xbf16>
    %c1_110 = arith.constant 1 : index
    %c0_111 = arith.constant 0 : index
    %c0_112 = arith.constant 0 : index
    %152 = vector.load %arg3[%c1_110, %c0_111, %c0_112] : memref<3x384x128xbf16, #tpu.memory_space<vmem>>, vector<1x384x128xbf16>
    %153 = vector.shape_cast %152 : vector<1x384x128xbf16> to vector<384x128xbf16>
    %cst_113 = arith.constant dense<0.000000e+00> : vector<128x128xf32>
    %154 = tpu.matmul %151, %153, %cst_113 {dimension_numbers = #tpu.dot_dimension_numbers<[1], [0], [0], [1], [0, 0, 1, 1], [], []>} : vector<128x384xbf16>, vector<384x128xbf16>, vector<128x128xf32> -> vector<128x128xf32>
    %155 = arith.addf %145, %154 : vector<128x128xf32>
    %c10_114 = arith.constant 10 : index
    %c0_115 = arith.constant 0 : index
    %c0_116 = arith.constant 0 : index
    %156 = vector.load %arg7[%c10_114, %c0_115, %c0_116] : memref<18x18x128xbf16, #tpu.memory_space<vmem>>, vector<8x18x128xbf16>
    %157 = vector.extract_strided_slice %156 {offsets = [0, 0, 0], sizes = [8, 16, 128], strides = [1, 1, 1]} : vector<8x18x128xbf16> to vector<8x16x128xbf16>
    %158 = vector.extract_strided_slice %156 {offsets = [0, 1, 0], sizes = [8, 16, 128], strides = [1, 1, 1]} : vector<8x18x128xbf16> to vector<8x16x128xbf16>
    %159 = vector.extract_strided_slice %156 {offsets = [0, 2, 0], sizes = [8, 16, 128], strides = [1, 1, 1]} : vector<8x18x128xbf16> to vector<8x16x128xbf16>
    %160 = tpu.concatenate %157, %158, %159 in 2 : vector<8x16x128xbf16>, vector<8x16x128xbf16>, vector<8x16x128xbf16> -> vector<8x16x384xbf16>
    %161 = vector.shape_cast %160 : vector<8x16x384xbf16> to vector<128x384xbf16>
    %c2_117 = arith.constant 2 : index
    %c0_118 = arith.constant 0 : index
    %c0_119 = arith.constant 0 : index
    %162 = vector.load %arg3[%c2_117, %c0_118, %c0_119] : memref<3x384x128xbf16, #tpu.memory_space<vmem>>, vector<1x384x128xbf16>
    %163 = vector.shape_cast %162 : vector<1x384x128xbf16> to vector<384x128xbf16>
    %cst_120 = arith.constant dense<0.000000e+00> : vector<128x128xf32>
    %164 = tpu.matmul %161, %163, %cst_120 {dimension_numbers = #tpu.dot_dimension_numbers<[1], [0], [0], [1], [0, 0, 1, 1], [], []>} : vector<128x384xbf16>, vector<384x128xbf16>, vector<128x128xf32> -> vector<128x128xf32>
    %165 = arith.addf %155, %164 : vector<128x128xf32>
    %c0_121 = arith.constant 0 : index
    %c9_122 = arith.constant 9 : index
    %c1_123 = arith.constant 1 : index
    %c0_124 = arith.constant 0 : index
    %166 = vector.load %arg1[%c0_121, %c9_122, %c1_123, %c0_124] : memref<1x18x18x128xbf16, #tpu.memory_space<vmem>>, vector<1x8x16x128xbf16>
    %167 = vector.shape_cast %166 : vector<1x8x16x128xbf16> to vector<8x16x128xbf16>
    %168 = arith.extf %167 : vector<8x16x128xbf16> to vector<8x16x128xf32>
    %169 = vector.broadcast %1 : vector<1x128xf32> to vector<128x128xf32>
    %170 = arith.addf %165, %169 : vector<128x128xf32>
    %171 = vector.shape_cast %168 : vector<8x16x128xf32> to vector<128x128xf32>
    %172 = arith.addf %170, %171 : vector<128x128xf32>
    %cst_125 = arith.constant 0.000000e+00 : f32
    %173 = vector.broadcast %cst_125 : f32 to vector<128x128xf32>
    %174 = arith.maximumf %172, %173 : vector<128x128xf32>
    %175 = vector.shape_cast %174 : vector<128x128xf32> to vector<8x16x128xf32>
    %176 = arith.truncf %175 : vector<8x16x128xf32> to vector<8x16x128xbf16>
    %c0_126 = arith.constant 0 : index
    %c8_127 = arith.constant 8 : index
    %c0_128 = arith.constant 0 : index
    %c0_129 = arith.constant 0 : index
    %177 = vector.load %arg6[%c0_126, %c8_127, %c0_128, %c0_129] : memref<1x16x16x128xbf16, #tpu.memory_space<vmem>>, vector<1x8x16x128xbf16>
    %178 = vector.shape_cast %177 : vector<1x8x16x128xbf16> to vector<8x16x128xbf16>
    %179 = vector.shape_cast %176 : vector<8x16x128xbf16> to vector<1x8x16x128xbf16>
    tpu.vector_store %arg6[%c0_126, %c8_127, %c0_128, %c0_129], %179 {strides = array<i32>} : memref<1x16x16x128xbf16, #tpu.memory_space<vmem>>, vector<1x8x16x128xbf16>,
    return
  }
  func.func @transform_0(%arg0: i32) -> (i32, i32, i32, i32) {
    %c0_i32 = arith.constant 0 : i32
    %c0_i32_0 = arith.constant 0 : i32
    %c0_i32_1 = arith.constant 0 : i32
    %c0_i32_2 = arith.constant 0 : i32
    return %arg0, %c0_i32, %c0_i32_0, %c0_i32_1 : i32, i32, i32, i32
  }
  func.func @transform_1(%arg0: i32) -> (i32, i32, i32) {
    %c0_i32 = arith.constant 0 : i32
    %c0_i32_0 = arith.constant 0 : i32
    %c0_i32_1 = arith.constant 0 : i32
    %c0_i32_2 = arith.constant 0 : i32
    return %c0_i32, %c0_i32_0, %c0_i32_1 : i32, i32, i32
  }
  func.func @transform_2(%arg0: i32) -> (i32, i32, i32) {
    %c0_i32 = arith.constant 0 : i32
    %c0_i32_0 = arith.constant 0 : i32
    %c0_i32_1 = arith.constant 0 : i32
    %c0_i32_2 = arith.constant 0 : i32
    return %c0_i32, %c0_i32_0, %c0_i32_1 : i32, i32, i32
  }
  func.func @transform_3(%arg0: i32) -> (i32, i32) {
    %c0_i32 = arith.constant 0 : i32
    %c0_i32_0 = arith.constant 0 : i32
    %c0_i32_1 = arith.constant 0 : i32
    return %c0_i32, %c0_i32_0 : i32, i32
  }
  func.func @transform_4(%arg0: i32) -> (i32, i32) {
    %c0_i32 = arith.constant 0 : i32
    %c0_i32_0 = arith.constant 0 : i32
    %c0_i32_1 = arith.constant 0 : i32
    return %c0_i32, %c0_i32_0 : i32, i32
  }
  func.func @transform_5(%arg0: i32) -> (i32, i32, i32, i32) {
    %c0_i32 = arith.constant 0 : i32
    %c0_i32_0 = arith.constant 0 : i32
    %c0_i32_1 = arith.constant 0 : i32
    %c0_i32_2 = arith.constant 0 : i32
    return %arg0, %c0_i32, %c0_i32_0, %c0_i32_1 : i32, i32, i32, i32
  }
}

</mosaic_0001>

<bundles_post_ra>
// kernel: tpu_custom_call.1
= control target key start
LH: loop header
LB: loop body
LE: loop exit
PB: predicated region body
PF: predicated region fallthrough
CT: control target
= control target key end

     0   :  { %10 = vsyncpa [#allocation4], 0  ;;  %s15433_s0 = inlined_call_operand.vmem [shape: bf16[2,18,18,128], index: 0, kind: input, shape index: {}]   ;;  %s15434_s1 = inlined_call_operand.vmem [shape: bf16[3,384,128], index: 1, kind: input, shape index: {}]   ;;  %s15435_s2 = inlined_call_operand.hbm [shape: bf16[3,384,128], index: 2, kind: input, shape index: {}]   ;;  %s15436_s3 = inlined_call_operand.vmem [shape: f32[1,128], index: 3, kind: input, shape index: {}]   ;;  %s15437_s4 = inlined_call_operand.vmem [shape: f32[1,128], index: 4, kind: input, shape index: {}]   ;;  %s15438_s5 = inlined_call_operand.hbm [shape: bf16[2,16,16,128], index: 5, kind: output, shape index: {}]  }
   0x1   :  { %11 = vsyncpa [#allocation5], 0 }
   0x2   :  { %13 = vsyncpa [#allocation5 + $0x1], 0  ;;  %s12560_s18 = smov 0   ;;  %s12562_s19 = smov 0  }
   0x3   :  { %s12564_s20 = smov 0   ;;  %s12566_s21 = smov 0  }
   0x4 LB: > { %s12581_s22 = sadd.s32 4294967295, %s12521_s21   ;;  %s9067_s23 = sadd.s32 4294967294, %s12521_s21   ;;  %s12521_s21 = sphi %s12566_s21, %s15488_s21   ;;  %s12517_s20 = sphi %s12564_s20, %s15487_s20   ;;  %s12513_s19 = sphi %s12562_s19, %s15486_s19   ;;  %s12509_s18 = sphi %s12560_s18, %s15485_s18  }
   0x5   : > { %s12585_s24 = sadd.s32 1, %s12521_s21   ;;  %s136_s25 = sadd.s32 1, %s12517_s20 }
   0x6   : > { %s133_s26 = ssub.s32 %s12521_s21, %s12585_s24  ;;  %p146_p0 = scmp.ne.s32.totalorder %s12517_s20, %s12513_s19 }
   0x7   : > { %p134_p1 = scmp.eq.s32.totalorder %s133_s26, 0  ;;  %p147_p2 = scmp.eq.s32.totalorder %s12581_s22, 1 }
   0x8   : > { %p152_p3 = scmp.ne.s32.totalorder %s12513_s19, %s12509_s18  ;;  %p153_p4 = scmp.eq.s32.totalorder %s9067_s23, 1 }
   0x9   : > { %s12596_s27 = scalar_select %p134_p1, %s12517_s20, %s136_s25  }
   0xa   : > { %p12598_p5 = por %p147_p2, %p146_p0  ;;  %p12602_p6 = por %p153_p4, %p152_p3 }
   0xb   : > { %p9068_p7 = scmp.ge.s32.totalorder %s12521_s21, 1  ;;  %p160_p8 = scmp.lt.s32.totalorder %s12521_s21, 3 }
   0xc   : > { %s15446_s28 = scalar_select %p12598_p5, 1, 0 }
   0xd   : > { %s15447_s29 = scalar_select %p12602_p6, 1, 0 }
   0xe   : > { %p15439_p9 = scmp.eq.s32.totalorder %s12581_s22, 0  ;;  %p12609_p10 = pnand %p9068_p7, %p160_p8 }
   0xf   : > { %s12523_s6 = smov [#allocation3]   ;;  %s12427_s11 = scalar_lea.hbm %s15435_s2, 9216 }
  0x10   : > { %s15448_s30 = scalar_select %p12609_p10, 1, 0 }
  0x11   : > { %s175_s7 = sshll.u32 %s12523_s6, 4  ;;  %p11873_p11 = pneg %p12609_p10  ;;  %s176_s7 = int_to_ptr.vmem [resolvable:$true] %s175_s7 }
  0x12   : > { %p12428_p13 = scmp.ne.s32.totalorder %s15435_s2, %s12427_s11  ;;  %p12434_p3 = scmp.lt.u32.totalorder %s12427_s11, %s15435_s2 }
  0x13   : > { %p12617_p12 = pnand %p15439_p9, %p11873_p11 }
  0x15   : > { %p12429_p0 = pneg %p12617_p12 }
  0x17   : > { %p12430_p1 = pnand %p12429_p0, %p12428_p13 }
  0x19   : > { %p12431_p2 = pneg %p12430_p1 }
  0x1b   : > { %p12436_p4 = pnand %p12434_p3, %p12431_p2 }
  0x1d   : > { %12439 = shalt.err (!%p12436_p4)
}
  0x1e   : > { %s12440_s16 = scalar_lea.vmem %s176_s7, 9216  ;;  %p12448_p9 = scmp.lt.s32.totalorder %s176_s7, %s176_s7 }
  0x1f   : > { %p12441_p7 = scmp.ne.s32.totalorder %s176_s7, %s12440_s16  ;;  %p12449_p6 = scmp.lt.s32.totalorder %s12440_s16, %s12440_s16 }
  0x21   : > { %p12443_p8 = pnand %p12441_p7, %p12429_p0  ;;  %p12450_p5 = por %p12449_p6, %p12448_p9 }
  0x23   : > { %p12444_p11 = pneg %p12443_p8 }
  0x25   : > { %p12451_p10 = pnand %p12450_p5, %p12444_p11 }
  0x27   : > { %12454 = shalt.err (!%p12451_p10)
}
  0x28   : > { %s12524_s17 = smov 64   ;;  %s12525_s23 = smov 4  }
  0x29   : > { %11876 = dma.hbm_to_vmem [thread:$0]  (!%p12617_p12), %s15435_s2, 9216, %s176_s7, [#allocation4], %s12524_s17, %s12524_s17, %s12525_s23  }
  0x2a   : > { %p15450_p13 = scmp.ne.s32.totalorder %s15448_s30, 0 }
  0x2c   : > { %205 = sbr.rel (%p15450_p13) target bundleno = 1064 (0x428), region = 40 }
  0x33   : > { %p15451_p1 = scmp.eq.s32.totalorder %s12581_s22, 0 }
  0x35   : > { %12500 = dma.done.wait (%p15451_p1), [#allocation4], 9216   ;;  %p15452_p0 = pmov %p15451_p1 }
  0x36   : > { %v11922_v0 = vld [vmem:[%s15434_s1 + $0x100] sm:$0xff]   ;;  %v11926_v4 = vld [vmem:[%s15434_s1 + $0x108] sm:$0xff]   ;;  %v11930_v8 = vld [vmem:[%s15434_s1 + $0x110] sm:$0xff]   ;;  %p233_p5 = scmp.lt.s32.totalorder %s12581_s22, 1  ;;  %vm457_vm0 = vsmask.f32 7424 }
  0x37   : > { %12502 = vsyncadd (%p15452_p0), [#allocation4], 4294958080  ;;  %v11923_v1 = vld [vmem:[%s15434_s1 + $0x40] sm:$0xff]   ;;  %10202 = vmatprep.subr.bf16.mxu0 %v11922_v0  ;;  %v11927_v5 = vld [vmem:[%s15434_s1 + $0x48] sm:$0xff]   ;;  %vm562_vm1 = vcmask 1046528   ;;  %vm248_vm2 = vcmask 1040384  }
  0x38   : > { %v11924_v2 = vld [vmem:[%s15434_s1 + $0xc0] sm:$0xff]   ;;  %10282 = vmatprep.subr.bf16.mxu1 %v11923_v1  ;;  %v11928_v6 = vld [vmem:[%s15434_s1 + $0xc8] sm:$0xff]   ;;  %v11931_v9 = vld [vmem:[%s15434_s1 + $0x50] sm:$0xff]   ;;  %s234_s25 = scalar_select %p233_p5, %s12581_s22, 1  ;;  %vm249_vm3 = vsmask.f32 256 }
  0x39   : > { %v11925_v3 = vld [vmem:[%s15434_s1] sm:$0xff]   ;;  %10203 = vmatpush3.bf16.msra.mxu0 %v11924_v2  ;;  %v11929_v7 = vld [vmem:[%s15434_s1 + $0x8] sm:$0xff]   ;;  %v11932_v10 = vld [vmem:[%s15434_s1 + $0xd0] sm:$0xff]   ;;  %vm305_vm5 = vsmask.f32 7938  ;;  %vm2486_vm8 = vcmask 1043456  }
  0x3a   : > { %10283 = vmatpush3.bf16.msra.mxu1 %v11925_v3  ;;  %10204 = vmatprep.subr.bf16.mxu0 %v11926_v4  ;;  %v11933_v11 = vld [vmem:[%s15434_s1 + $0x10] sm:$0xff]   ;;  %v11934_v12 = vld [vmem:[%s15434_s1 + $0x118] sm:$0xff]   ;;  %v11938_v16 = vld [vmem:[%s15434_s1 + $0x120] sm:$0xff]   ;;  %s11866_s12 = smul.u32 216, %s234_s25  ;;  %vm2323_vm7 = vsmask.f32 4368 }
  0x3b   : > { %10284 = vmatprep.subr.bf16.mxu1 %v11927_v5  ;;  %v11935_v13 = vld [vmem:[%s15434_s1 + $0x58] sm:$0xff]   ;;  %v11939_v17 = vld [vmem:[%s15434_s1 + $0x60] sm:$0xff]   ;;  %v11942_v20 = vld [vmem:[%s15434_s1 + $0x128] sm:$0xff]   ;;  %s230_s15 = sand.u32 1, %s12513_s19   ;;  %p15483_p9 = scmp.ne.s32.totalorder %s15446_s28, 0 }
  0x3c   : > { %v11936_v14 = vld [vmem:[%s15434_s1 + $0xd8] sm:$0xff]   ;;  %v11940_v18 = vld [vmem:[%s15434_s1 + $0xe0] sm:$0xff]   ;;  %v11943_v21 = vld [vmem:[%s15434_s1 + $0x68] sm:$0xff]   ;;  %s12741_s10 = scalar_lea.vmem %s15433_s0, %s11866_s12  ;;  %s15147_s16 = sshll.u32 %s230_s15, 7 }
  0x3d   : > { %10205 = vmatpush3.bf16.msra.mxu0 %v11928_v6  ;;  %v11937_v15 = vld [vmem:[%s15434_s1 + $0x18] sm:$0xff]   ;;  %v11941_v19 = vld [vmem:[%s15434_s1 + $0x20] sm:$0xff]   ;;  %v11944_v22 = vld [vmem:[%s15434_s1 + $0xe8] sm:$0xff]   ;;  %s15163_s17 = scalar_lea.vmem [#allocation6], %s15147_s16  ;;  %s12527_s11 = smov [#allocation6]  }
  0x3e   : > { %10285 = vmatpush3.bf16.msra.mxu1 %v11929_v7  ;;  %10206 = vmatprep.subr.bf16.mxu0 %v11930_v8  ;;  %v11945_v23 = vld [vmem:[%s15434_s1 + $0x28] sm:$0xff]   ;;  %v11946_v24 = vld [vmem:[%s15434_s1 + $0x130] sm:$0xff]   ;;  %v11950_v28 = vld [vmem:[%s15434_s1 + $0x138] sm:$0xff]   ;;  %s8993_s23 = sshll.u32 %s15163_s17, 4  ;;  %s12459_s8 = sshll.u32 %s12527_s11, 4  ;;  %s15386_s23 = int_to_ptr.vmem [resolvable:$true] %s8993_s23  ;;  %s12460_s8 = int_to_ptr.vmem [resolvable:$false] %s12459_s8 }
  0x3f   : > { %10286 = vmatprep.subr.bf16.mxu1 %v11931_v9  ;;  %v11947_v25 = vld [vmem:[%s15434_s1 + $0x70] sm:$0xff]   ;;  %v11951_v29 = vld [vmem:[%s15434_s1 + $0x78] sm:$0xff]   ;;  %v12753_v34 = vld [vmem:[%s12741_s10] sm:$0xff]   ;;  %s12455_s9 = scalar_lea.vmem %s15386_s23, 2048  ;;  %s12461_s7 = scalar_lea.vmem %s12460_s8, 4096 }
  0x40   : > { %v11948_v26 = vld [vmem:[%s15434_s1 + $0xf0] sm:$0xff]   ;;  %v11952_v30 = vld [vmem:[%s15434_s1 + $0xf8] sm:$0xff]   ;;  %v12759_v38 = vld [vmem:[%s12741_s10 + $0x8] ss:$0 sps:$4 sm:$0x11]   ;;  %v459_v39 = vshrl.u32 %v12753_v34, 16  ;;  %p12456_p6 = scmp.ne.s32.totalorder %s15386_s23, %s12455_s9  ;;  %p12462_p2 = scmp.lt.s32.totalorder %s15386_s23, %s12460_s8 }
  0x41   : > { %10207 = vmatpush3.bf16.msra.mxu0 %v11932_v10  ;;  %v11949_v27 = vld [vmem:[%s15434_s1 + $0x30] sm:$0xff]   ;;  %v11953_v31 = vld [vmem:[%s15434_s1 + $0x38] sm:$0xff]   ;;  %v461_v40 = vshll.u32 %v12753_v34, 16  ;;  %v466_v43 = vshll.u32 %v12759_v38, 16  ;;  %v11958_v44 = vld [vmem:[%s15434_s1 + $0x80] sm:$0xff]   ;;  %p12463_p3 = scmp.lt.s32.totalorder %s12461_s7, %s12455_s9 }
  0x42   : > { %10287 = vmatpush3.bf16.msra.mxu1 %v11933_v11  ;;  %10208 = vmatprep.subr.bf16.mxu0 %v11934_v12  ;;  %v12747_v32 = vld [vmem:[%s12741_s10 + $0xc] sm:$0xff]   ;;  %v12750_v33 = vld [vmem:[%s12741_s10 + $0x14] ss:$0 sps:$4 sm:$0x11]   ;;  %v12768_v46 = vld [vmem:[%s12741_s10 + $0x18] sm:$0xff]   ;;  %p12457_p10 = pnand %p12456_p6, %p15483_p9 }
  0x43   : > { %10288 = vmatprep.subr.bf16.mxu1 %v11935_v13  ;;  %v741_v35 = vshrl.u32 %v12747_v32, 16  ;;  %v743_v36 = vshll.u32 %v12747_v32, 16  ;;  %v748_v37 = vshll.u32 %v12750_v33, 16  ;;  %v463_v45 = vrot.slane %v461_v40, 1  ;;  %v12778_v55 = vld [vmem:[%s12741_s10 + $0xc] sm:$0xff]   ;;  %v12788_v60 = vld [vmem:[%s12741_s10 + $0x24] sm:$0xff]   ;;  %vm13722_vm4 = vmand %vm248_vm2, %vm249_vm3  ;;  %p12464_p4 = por %p12463_p3, %p12462_p2 }
  0x44   : > { %v468_v48 = vrot.slane %v466_v43, 1  ;;  %v12771_v49 = vld [vmem:[%s12741_s10 + $0x20] ss:$0 sps:$4 sm:$0x11]   ;;  %v753_v51 = vshrl.u32 %v12768_v46, 16  ;;  %v755_v52 = vshll.u32 %v12768_v46, 16  ;;  %vm13733_vm6 = vmand %vm248_vm2, %vm305_vm5  ;;  %p12458_p12 = pneg %p12457_p10 }
  0x45   : > { %10209 = vmatpush3.bf16.msra.mxu0 %v11936_v14  ;;  %v745_v41 = vrot.slane %v743_v36, 1  ;;  %v750_v42 = vrot.slane %v748_v37, 1  ;;  %v464_v50 = vor.u32 %v463_v45, %v459_v39  ;;  %v760_v54 = vshll.u32 %v12771_v49, 16  ;;  %v12781_v56 = vld [vmem:[%s12741_s10 + $0x14] ss:$0 sps:$4 sm:$0x11]   ;;  %vm13974_vm9 = vmand %vm2486_vm8, %vm305_vm5 }
  0x46   : > { %10289 = vmatpush3.bf16.msra.mxu1 %v11937_v15  ;;  %10210 = vmatprep.subr.bf16.mxu0 %v11938_v16  ;;  %v11963_v57 = vld [vmem:[%s15434_s1 + $0x88] sm:$0xff]   ;;  %v757_v59 = vrot.slane %v755_v52, 1  ;;  %v471_v62 = vshrl.u32 %v12778_v55, 16  ;;  %v473_v63 = vshll.u32 %v12778_v55, 16  ;;  %v478_v0 = vshll.u32 %v12781_v56, 16  ;;  %v12801_v7 = vld [vmem:[%s12741_s10 + $0x18] sm:$0xff]   ;;  %vm13986_vm10 = vmor %vm249_vm3, %vm2323_vm7  ;;  %p12465_p7 = pnand %p12464_p4, %p12458_p12 }
  0x47   : > { %10290 = vmatprep.subr.bf16.mxu1 %v11939_v17  ;;  %v746_v47 = vor.u32 %v745_v41, %v741_v35  ;;  %v469_v58 = vsel %vm457_vm0, %v464_v50, %v468_v48  ;;  %v762_v61 = vrot.slane %v760_v54, 1  ;;  %v765_v2 = vshrl.u32 %v12788_v60, 16  ;;  %v12798_v6 = vld [vmem:[%s12741_s10 + $0x2c] ss:$0 sps:$4 sm:$0x11]   ;;  %v11968_v10 = vld [vmem:[%s15434_s1 + $0x90] sm:$0xff]  }
  0x48   : > { %1439 = vmatprep.mubr.bf16.mxu1 %v469_v58  ;;  %v758_v1 = vor.u32 %v757_v59, %v753_v51  ;;  %v767_v3 = vshll.u32 %v12788_v60, 16  ;;  %v475_v4 = vrot.slane %v473_v63, 1  ;;  %v480_v5 = vrot.slane %v478_v0, 1  ;;  %v12809_v13 = vld [vmem:[%s12741_s10 + $0x20] ss:$0 sps:$4 sm:$0x11]  }
  0x49   : > { %10211 = vmatpush3.bf16.msra.mxu0 %v11940_v18  ;;  %v751_v53 = vsel %vm457_vm0, %v746_v47, %v750_v42  ;;  %v772_v12 = vshll.u32 %v12798_v6, 16  ;;  %v483_v15 = vshrl.u32 %v12801_v7, 16  ;;  %v485_v16 = vshll.u32 %v12801_v7, 16  ;;  %v11974_v40 = vld [vmem:[%s15434_s1 + $0x140] sm:$0xff]  }
  0x4a   : > { %10291 = vmatpush3.bf16.msra.mxu1 %v11941_v19  ;;  %10212 = vmatprep.subr.bf16.mxu0 %v11942_v20  ;;  %v763_v8 = vsel %vm457_vm0, %v758_v1, %v762_v61  ;;  %v769_v9 = vrot.slane %v767_v3, 1  ;;  %v476_v11 = vor.u32 %v475_v4, %v471_v62  ;;  %v490_v19 = vshll.u32 %v12809_v13, 16  ;;  %v12844_v45 = vld [vmem:[%s12741_s10 + $0x3c] sm:$0xff]   ;;  %v12847_v48 = vld [vmem:[%s12741_s10 + $0x44] ss:$0 sps:$4 sm:$0x11]  }
  0x4b   : > { %10292 = vmatprep.subr.bf16.mxu1 %v11943_v21  ;;  %1101 = vmatprep.mubr.bf16.mxu0 %v751_v53  ;;  %v774_v18 = vrot.slane %v772_v12, 1  ;;  %v487_v20 = vrot.slane %v485_v16, 1  ;;  %v12816_v21 = vld [vmem:[%s12741_s10 + $0x30] sm:$0xff]   ;;  %v789_v52 = vshrl.u32 %v12844_v45, 16  ;;  %v791_v53 = vshll.u32 %v12844_v45, 16  ;;  %v11979_v1 = vld [vmem:[%s15434_s1 + $0xa0] sm:$0xff]  }
  0x4c   : > { %v770_v14 = vor.u32 %v769_v9, %v765_v2  ;;  %v481_v17 = vsel %vm457_vm0, %v476_v11, %v480_v5  ;;  %v796_v54 = vshll.u32 %v12847_v48, 16  ;;  %v12860_v61 = vld [vmem:[%s12741_s10 + $0x38] ss:$0 sps:$4 sm:$0x11]   ;;  %v11980_v4 = vld [vmem:[%s15434_s1 + $0x148] sm:$0xff]  }
  0x4d   : > { %10213 = vmatpush3.bf16.msra.mxu0 %v11944_v22  ;;  %v793_v59 = vrot.slane %v791_v53, 1  ;;  %v514_v3 = vshll.u32 %v12860_v61, 16  ;;  %v12917_v53 = vld [vmem:[%s12741_s10 + $0x50] ss:$0 sps:$4 sm:$0x11]  }
  0x4e   : > { %10293 = vmatpush3.bf16.msra.mxu1 %v11945_v23  ;;  %10214 = vmatprep.subr.bf16.mxu0 %v11946_v24  ;;  %v775_v22 = vsel %vm457_vm0, %v770_v14, %v774_v18  ;;  %v492_v23 = vrot.slane %v490_v19, 1  ;;  %v12821_v24 = vld [vmem:[%s12741_s10 + $0x38] ss:$0 sps:$4 sm:$0x11]   ;;  %v798_v62 = vrot.slane %v796_v54, 1  ;;  %v11985_v19 = vld [vmem:[%s15434_s1 + $0x150] sm:$0xff]  }
  0x4f   : > { %10294 = vmatprep.subr.bf16.mxu1 %v11947_v25  ;;  %v488_v25 = vor.u32 %v487_v20, %v483_v15  ;;  %v794_v2 = vor.u32 %v793_v59, %v789_v52  ;;  %v516_v9 = vrot.slane %v514_v3, 1  ;;  %v12885_v18 = vld [vmem:[%s12741_s10 + $0x44] ss:$0 sps:$4 sm:$0x11]  }
  0x50   : > { %v11992_v59 = vld [vmem:[%s15434_s1 + $0x160] sm:$0xff]  }
  0x51   : > { %10215 = vmatpush3.bf16.msra.mxu0 %v11948_v26  ;;  %v777_v26 = vshrl.u32 %v12816_v21, 16  ;;  %v493_v35 = vsel %vm457_vm0, %v488_v25, %v492_v23  ;;  %v799_v11 = vsel %vm457_vm0, %v794_v2, %v798_v62  ;;  %v11986_v23 = vld [vmem:[%s15434_s1 + $0xa8] sm:$0xff]  }
  0x52   : > { %10295 = vmatpush3.bf16.msra.mxu1 %v11949_v27  ;;  %10216 = vmatprep.subr.bf16.mxu0 %v11950_v28  ;;  %v779_v27 = vshll.u32 %v12816_v21, 16  ;;  %v12827_v28 = vld [vmem:[%s12741_s10 + $0x24] sm:$0xff]  }
  0x53   : > { %10296 = vmatprep.subr.bf16.mxu1 %v11951_v29  ;;  %v11973_v29 = vld [vmem:[%s15434_s1 + $0x98] sm:$0xff]   ;;  %v495_v37 = vshrl.u32 %v12827_v28, 16  ;;  %v497_v39 = vshll.u32 %v12827_v28, 16 }
  0x54   : > { %v781_v36 = vrot.slane %v779_v27, 1 }
  0x55   : > { %10217 = vmatpush3.bf16.msra.mxu0 %v11952_v30  ;;  %v784_v30 = vshll.u32 %v12821_v24, 16 }
  0x56   : > { %10297 = vmatpush3.bf16.msra.mxu1 %v11953_v31  ;;  %v12834_v31 = vld [vmem:[%s12741_s10 + $0x2c] ss:$0 sps:$4 sm:$0x11]   ;;  %v782_v43 = vor.u32 %v781_v36, %v777_v26  ;;  %11162 = vmatprep.subr.bf16.mxu0 %v11974_v40 }
  0x57   : > { %11194 = vmatprep.subr.bf16.mxu1 %v11958_v44  ;;  %v786_v41 = vrot.slane %v784_v30, 1  ;;  %v502_v42 = vshll.u32 %v12834_v31, 16 }
  0x58   : > { %1102 = vmatmul.mubr.bf16.vlgmr.msra.gmra.mrb[0].mxu0 %v12747_v32 }
  0x59   : > { %1440 = vmatmul.mubr.bf16.vlgmr.msra.gmra.mrb[0].mxu1 %v12753_v34  ;;  %1109 = vmatprep.mubr.bf16.mxu0 %v763_v8  ;;  %v504_v47 = vrot.slane %v502_v42, 1  ;;  %v787_v50 = vsel %vm457_vm0, %v782_v43, %v786_v41  ;;  %v12872_v8 = vld [vmem:[%s12741_s10 + $0x48] sm:$0xff]   ;;  %v12906_v41 = vld [vmem:[%s12741_s10 + $0x5c] ss:$0 sps:$4 sm:$0x11]  }
  0x5a   : > { %11195 = vmatpush3.bf16.msra.mxu1 %v11958_v44  ;;  %1447 = vmatprep.mubr.bf16.mxu1 %v481_v17  ;;  %v499_v44 = vrot.slane %v497_v39, 1  ;;  %v801_v14 = vshrl.u32 %v12872_v8, 16  ;;  %v803_v15 = vshll.u32 %v12872_v8, 16  ;;  %v12882_v17 = vld [vmem:[%s12741_s10 + $0x3c] sm:$0xff]   ;;  %v12903_v39 = vld [vmem:[%s12741_s10 + $0x54] sm:$0xff]   ;;  %v820_v52 = vshll.u32 %v12906_v41, 16 }
  0x5b   : > { %11196 = vmatprep.subr.bf16.mxu1 %v11963_v57  ;;  %11163 = vmatpush3.bf16.msra.mxu0 %v11974_v40  ;;  %v519_v26 = vshrl.u32 %v12882_v17, 16  ;;  %v521_v27 = vshll.u32 %v12882_v17, 16  ;;  %v813_v42 = vshrl.u32 %v12903_v39, 16  ;;  %v815_v43 = vshll.u32 %v12903_v39, 16 }
  0x5c   : > { %v500_v51 = vor.u32 %v499_v44, %v495_v37  ;;  %11164 = vmatprep.subr.bf16.mxu0 %v11980_v4  ;;  %v11987_v37 = vld [vmem:[%s15434_s1 + $0x158] sm:$0xff]   ;;  %v12911_v44 = vld [vmem:[%s12741_s10 + $0x48] sm:$0xff]   ;;  %v822_v62 = vrot.slane %v820_v52, 1 }
  0x5d   : > { %v531_v54 = vshrl.u32 %v12911_v44, 16 }
  0x5e   : > { %11197 = vmatpush3.bf16.msra.mxu1 %v11963_v57  ;;  %v12855_v57 = vld [vmem:[%s12741_s10 + $0x30] sm:$0xff]   ;;  %v505_v58 = vsel %vm457_vm0, %v500_v51, %v504_v47  ;;  %v817_v51 = vrot.slane %v815_v43, 1 }
  0x5f   : > { %11198 = vmatprep.subr.bf16.mxu1 %v11968_v10  ;;  %v507_v63 = vshrl.u32 %v12855_v57, 16  ;;  %v509_v0 = vshll.u32 %v12855_v57, 16  ;;  %11165 = vmatpush3.bf16.msra.mxu0 %v11980_v4  ;;  %v12934_v4 = vld [vmem:[%s12741_s10 + $0x60] sm:$0xff]  }
  0x60   : > { %1110 = vmatmul.mubr.bf16.gmra.mrb[4].mxu0 %v12768_v46  ;;  %11166 = vmatprep.subr.bf16.mxu0 %v11985_v19  ;;  %v818_v2 = vor.u32 %v817_v51, %v813_v42 }
  0x61   : > { %1448 = vmatmul.mubr.bf16.gmra.mrb[4].mxu1 %v12778_v55  ;;  %1117 = vmatprep.mubr.bf16.mxu0 %v775_v22  ;;  %v511_v5 = vrot.slane %v509_v0, 1  ;;  %v805_v22 = vrot.slane %v803_v15, 1  ;;  %v11993_v0 = vld [vmem:[%s15434_s1 + $0xb0] sm:$0xff]   ;;  %v827_v15 = vshll.u32 %v12934_v4, 16 }
  0x62   : > { %11199 = vmatpush3.bf16.msra.mxu1 %v11968_v10  ;;  %1455 = vmatprep.mubr.bf16.mxu1 %v493_v35  ;;  %v12875_v10 = vld [vmem:[%s12741_s10 + $0x50] ss:$0 sps:$4 sm:$0x11]   ;;  %v523_v35 = vrot.slane %v521_v27, 1 }
  0x63   : > { %11200 = vmatprep.subr.bf16.mxu1 %v11973_v29  ;;  %v512_v12 = vor.u32 %v511_v5, %v507_v63  ;;  %v808_v16 = vshll.u32 %v12875_v10, 16  ;;  %v806_v30 = vor.u32 %v805_v22, %v801_v14  ;;  %11167 = vmatpush3.bf16.msra.mxu0 %v11985_v19  ;;  %v538_v63 = vshll.u32 %v12917_v53, 16  ;;  %v12948_v22 = vld [vmem:[%s12741_s10 + $0x5c] ss:$0 sps:$4 sm:$0x11]  }
  0x64   : > { %v524_v40 = vor.u32 %v523_v35, %v519_v26  ;;  %11168 = vmatprep.subr.bf16.mxu0 %v11987_v37  ;;  %v825_v14 = vshrl.u32 %v12934_v4, 16  ;;  %v823_v19 = vsel %vm457_vm0, %v818_v2, %v822_v62  ;;  %v550_v27 = vshll.u32 %v12948_v22, 16 }
  0x65   : > { %v517_v20 = vsel %vm457_vm0, %v512_v12, %v516_v9  ;;  %v810_v25 = vrot.slane %v808_v16, 1  ;;  %v540_v5 = vrot.slane %v538_v63, 1  ;;  %v12937_v9 = vld [vmem:[%s12741_s10 + $0x54] sm:$0xff]   ;;  %v12940_v12 = vld [vmem:[%s12741_s10 + $0x68] ss:$0 sps:$4 sm:$0x11]  }
  0x66   : > { %11201 = vmatpush3.bf16.msra.mxu1 %v11973_v29  ;;  %v526_v29 = vshll.u32 %v12885_v18, 16  ;;  %v543_v16 = vshrl.u32 %v12937_v9, 16  ;;  %v545_v26 = vshll.u32 %v12937_v9, 16  ;;  %v552_v43 = vrot.slane %v550_v27, 1  ;;  %v13032_v27 = vld [vmem:[%s12741_s10 + $0x18] sm:$0xff]  }
  0x67   : > { %11202 = vmatprep.subr.bf16.mxu1 %v11979_v1  ;;  %v811_v47 = vsel %vm457_vm0, %v806_v30, %v810_v25  ;;  %11169 = vmatpush3.bf16.msra.mxu0 %v11987_v37  ;;  %v829_v25 = vrot.slane %v827_v15, 1  ;;  %v12000_v30 = vld [vmem:[%s15434_s1 + $0xb8] sm:$0xff]   ;;  %v564_v62 = vrot.slane %v12759_v38, 1  ;;  %v848_v2 = vrot.slane %v12771_v49, 1  ;;  %v12004_v38 = vld [vmem:[%s15434_s1 + $0x180] sm:$0xff]  }
  0x68   : > { %1118 = vmatmul.mubr.bf16.gmra.mrb[8].mxu0 %v12788_v60  ;;  %v528_v36 = vrot.slane %v526_v29, 1  ;;  %11170 = vmatprep.subr.bf16.mxu0 %v11992_v59  ;;  %v11999_v29 = vld [vmem:[%s15434_s1 + $0x170] sm:$0xff]   ;;  %v547_v35 = vrot.slane %v545_v26, 1  ;;  %v569_v49 = vrot.slane %v12801_v7, 1  ;;  %v572_v15 = vrot.slane %v12827_v28, 1 }
  0x69   : > { %1456 = vmatmul.mubr.bf16.gmra.mrb[8].mxu1 %v12801_v7  ;;  %1125 = vmatprep.mubr.bf16.mxu0 %v787_v50  ;;  %v830_v37 = vor.u32 %v829_v25, %v825_v14  ;;  %v853_v7 = vrot.slane %v12816_v21, 1  ;;  %v854_v14 = vrot.slane %v12821_v24, 1  ;;  %v12010_v24 = vld [vmem:[%s15434_s1 + $0x190] sm:$0xff]   ;;  %v576_v25 = vrot.slane %v12860_v61, 1 }
  0x6a   : > { %1463 = vmatprep.mubr.bf16.mxu1 %v505_v58  ;;  %11203 = vmatpush3.bf16.msra.mxu1 %v11979_v1  ;;  %v529_v50 = vsel %vm457_vm0, %v524_v40, %v528_v36  ;;  %v533_v58 = vshll.u32 %v12911_v44, 16  ;;  %v11994_v1 = vld [vmem:[%s15434_s1 + $0x168] sm:$0xff]   ;;  %v12001_v36 = vld [vmem:[%s15434_s1 + $0x178] sm:$0xff]   ;;  %v548_v42 = vor.u32 %v547_v35, %v543_v16  ;;  %v573_v16 = vrot.slane %v12834_v31, 1 }
  0x6b   : > { %11204 = vmatprep.subr.bf16.mxu1 %v11986_v23  ;;  %11171 = vmatpush3.bf16.msra.mxu0 %v11992_v59  ;;  %v563_v59 = vrot.slane %v12753_v34, 1  ;;  %v850_v34 = vrot.slane %v12788_v60, 1  ;;  %v12007_v60 = vld [vmem:[%s15434_s1 + $0x188] sm:$0xff]   ;;  %v855_v31 = vsel %vm562_vm1, %v853_v7, %v854_v14  ;;  %v12033_v7 = vld [vmem:[%s12741_s10 + $0x38] ss:$0 sps:$4 sm:$0x11]  }
  0x6c   : > { %v535_v3 = vrot.slane %v533_v58, 1  ;;  %11172 = vmatprep.subr.bf16.mxu0 %v11994_v1  ;;  %v553_v52 = vsel %vm457_vm0, %v548_v42, %v552_v43  ;;  %v845_v58 = vrot.slane %v12750_v33, 1  ;;  %v567_v33 = vrot.slane %v12781_v56, 1  ;;  %v12006_v56 = vld [vmem:[%s15434_s1 + $0x208] sm:$0xff]   ;;  %v12015_v42 = vld [vmem:[%s15434_s1 + $0x220] sm:$0xff]   ;;  %v12025_v14 = vld [vmem:[%s15434_s1 + $0x1b8] sm:$0xff]  }
  0x6d   : > { %v574_v26 = vsel %vm562_vm1, %v572_v15, %v573_v16  ;;  %v13052_v43 = vld [vmem:[%s12741_s10 + $0x20] ss:$0 sps:$4 sm:$0x11]  }
  0x6e   : > { %11205 = vmatpush3.bf16.msra.mxu1 %v11986_v23 }
  0x6f   : > { %11206 = vmatprep.subr.bf16.mxu1 %v11993_v0  ;;  %11173 = vmatpush3.bf16.msra.mxu0 %v11994_v1  ;;  %v847_v1 = vrot.slane %v12768_v46, 1 }
  0x70   : > { %1126 = vmatmul.mubr.bf16.gmra.mrb[12].mxu0 %v12816_v21  ;;  %11174 = vmatprep.subr.bf16.mxu0 %v11999_v29  ;;  %v12009_v21 = vld [vmem:[%s15434_s1 + $0x210] sm:$0xff]  }
  0x71   : > { %1464 = vmatmul.mubr.bf16.gmra.mrb[12].mxu1 %v12827_v28  ;;  %1133 = vmatprep.mubr.bf16.mxu0 %v799_v11  ;;  %v536_v11 = vor.u32 %v535_v3, %v531_v54  ;;  %v844_v54 = vrot.slane %v12747_v32, 1  ;;  %v566_v32 = vrot.slane %v12778_v55, 1  ;;  %v851_v3 = vrot.slane %v12798_v6, 1  ;;  %v12005_v55 = vld [vmem:[%s15434_s1 + $0x1c8] sm:$0xff]  }
  0x72   : > { %1471 = vmatprep.mubr.bf16.mxu1 %v517_v20  ;;  %11207 = vmatpush3.bf16.msra.mxu1 %v11993_v0  ;;  %v832_v20 = vshll.u32 %v12940_v12, 16  ;;  %v565_v0 = vsel %vm562_vm1, %v563_v59, %v564_v62  ;;  %v849_v46 = vsel %vm562_vm1, %v847_v1, %v848_v2  ;;  %v857_v28 = vrot.slane %v12847_v48, 1  ;;  %v12012_v48 = vld [vmem:[%s15434_s1 + $0x218] sm:$0xff]   ;;  %v12029_v1 = vld [vmem:[%s12741_s10 + $0x2c] ss:$0 sps:$4 sm:$0x11]  }
  0x73   : > { %v541_v23 = vsel %vm457_vm0, %v536_v11, %v540_v5  ;;  %11208 = vmatprep.subr.bf16.mxu1 %v12000_v30  ;;  %11175 = vmatpush3.bf16.msra.mxu0 %v11999_v29  ;;  %v846_v63 = vsel %vm562_vm1, %v844_v54, %v845_v58  ;;  %v570_v5 = vrot.slane %v12809_v13, 1  ;;  %v568_v11 = vsel %vm562_vm1, %v566_v32, %v567_v33  ;;  %v12019_v54 = vld [vmem:[%s15434_s1 + $0x1a8] sm:$0xff]  }
  0x74   : > { %v834_v40 = vrot.slane %v832_v20, 1  ;;  %11176 = vmatprep.subr.bf16.mxu0 %v12001_v36  ;;  %v852_v6 = vsel %vm562_vm1, %v850_v34, %v851_v3  ;;  %v856_v20 = vrot.slane %v12844_v45, 1  ;;  %v859_v29 = vrot.slane %v12872_v8, 1  ;;  %v12021_v34 = vld [vmem:[%s15434_s1 + $0x230] sm:$0xff]  }
  0x75   : > { %v571_v13 = vsel %vm562_vm1, %v569_v49, %v570_v5  ;;  %v865_v58 = vrot.slane %v12934_v4, 1  ;;  %v1699_v59 = vshrl.u32 %v13032_v27, 16  ;;  %v584_v32 = vrot.slane %v12937_v9, 1 }
  0x76   : > { %11209 = vmatpush3.bf16.msra.mxu1 %v12000_v30  ;;  %v835_v51 = vsel %vm457_vm0, %v830_v37, %v834_v40  ;;  %v858_v61 = vsel %vm562_vm1, %v856_v20, %v857_v28  ;;  %v860_v30 = vrot.slane %v12875_v10, 1  ;;  %v579_v37 = vrot.slane %v12885_v18, 1  ;;  %v12014_v40 = vld [vmem:[%s15434_s1 + $0x1e0] sm:$0xff]  }
  0x77   : > { %11177 = vmatpush3.bf16.msra.mxu0 %v12001_v36  ;;  %v578_v36 = vrot.slane %v12882_v17, 1  ;;  %v863_v10 = vrot.slane %v12906_v41, 1  ;;  %v581_v41 = vrot.slane %v12911_v44, 1  ;;  %v1802_v5 = vrot.slane %v13032_v27, 1 }
  0x78   : > { %1134 = vmatmul.mubr.bf16.gmra.mrb[16].mxu0 %v12844_v45  ;;  %v12011_v45 = vld [vmem:[%s15434_s1 + $0x1d8] sm:$0xff]   ;;  %v861_v18 = vsel %vm562_vm1, %v859_v29, %v860_v30  ;;  %v12031_v29 = vld [vmem:[%s15434_s1 + $0x148] sm:$0xff]  }
  0x79   : > { %1472 = vmatmul.mubr.bf16.gmra.mrb[16].mxu1 %v12855_v57  ;;  %1141 = vmatprep.mubr.bf16.mxu0 %v811_v47  ;;  %v12002_v47 = vld [vmem:[%s15434_s1 + $0x1c0] sm:$0xff]  }
  0x7a   : > { %1479 = vmatprep.mubr.bf16.mxu1 %v529_v50  ;;  %v12003_v50 = vld [vmem:[%s15434_s1 + $0x200] sm:$0xff]   ;;  %10362 = vmatprep.subr.bf16.mxu0 %v12002_v47 }
  0x7b   : > { %11226 = vmatprep.subr.bf16.mxu1 %v12003_v50  ;;  %v12016_v47 = vld [vmem:[%s15434_s1 + $0x1a0] sm:$0xff]  }
  0x80   : > { %1142 = vmatmul.mubr.bf16.gmra.mrb[20].mxu0 %v12872_v8  ;;  %v862_v8 = vrot.slane %v12903_v39, 1 }
  0x81   : > { %1480 = vmatmul.mubr.bf16.gmra.mrb[20].mxu1 %v12882_v17  ;;  %1149 = vmatprep.mubr.bf16.mxu0 %v823_v19  ;;  %v12008_v19 = vld [vmem:[%s15434_s1 + $0x1d0] sm:$0xff]   ;;  %v1701_v17 = vshll.u32 %v13032_v27, 16 }
  0x82   : > { %1487 = vmatprep.mubr.bf16.mxu1 %v541_v23  ;;  %v575_v23 = vrot.slane %v12855_v57, 1  ;;  %v12013_v57 = vld [vmem:[%s15434_s1 + $0x198] sm:$0xff]   ;;  %v864_v62 = vsel %vm562_vm1, %v862_v8, %v863_v10 }
  0x84   : > { %v577_v35 = vsel %vm562_vm1, %v575_v23, %v576_v25  ;;  %v1809_v23 = vrot.slane %v12033_v7, 1  ;;  %v12035_v25 = vld [vmem:[%s12741_s10 + $0x44] ss:$0 sps:$4 sm:$0x11]  }
  0x88   : > { %1150 = vmatmul.mubr.bf16.gmra.mrb[24].mxu0 %v12903_v39  ;;  %v12017_v39 = vld [vmem:[%s15434_s1 + $0x1e8] sm:$0xff]  }
  0x89   : > { %1488 = vmatmul.mubr.bf16.gmra.mrb[24].mxu1 %v12911_v44  ;;  %1157 = vmatprep.mubr.bf16.mxu0 %v835_v51  ;;  %v580_v51 = vsel %vm562_vm1, %v578_v36, %v579_v37  ;;  %v866_v44 = vrot.slane %v12940_v12, 1  ;;  %v12020_v12 = vld [vmem:[%s15434_s1 + $0x1f0] sm:$0xff]  }
  0x8a   : > { %1495 = vmatprep.mubr.bf16.mxu1 %v553_v52  ;;  %v12018_v52 = vld [vmem:[%s15434_s1 + $0x228] sm:$0xff]  }
  0x8b   : > { %v867_v49 = vsel %vm562_vm1, %v865_v58, %v866_v44  ;;  %v12037_v58 = vld [vmem:[%s15434_s1 + $0x158] sm:$0xff]   ;;  %v1742_v44 = vshll.u32 %v12035_v25, 16 }
  0x90   : > { %1158 = vmatmul.mubr.bf16.gmra.mrb[28].mxu0 %v12934_v4  ;;  %v585_v4 = vrot.slane %v12948_v22, 1  ;;  %v12023_v22 = vld [vmem:[%s15434_s1 + $0x1f8] sm:$0xff]  }
  0x91   : > { %1496 = vmatmul.mubr.bf16.gmra.mrb[28].mxu1 %v12937_v9  ;;  %11178 = vmatprep.mubr.bf16.mxu0 %v846_v63  ;;  %v1703_v63 = vrot.slane %v1701_v17, 1  ;;  %v12022_v9 = vld [vmem:[%s15434_s1 + $0x1b0] sm:$0xff]  }
  0x92   : > { %11210 = vmatprep.mubr.bf16.mxu1 %v565_v0  ;;  %v1706_v0 = vshll.u32 %v13052_v43, 16 }
  0x94   : > { %v1708_v3 = vrot.slane %v1706_v0, 1 }
  0x98   : > { %11179 = vmatmul.mubr.bf16.vlgmr.msra.gmra.mrb[32].mxu0 %v849_v46  ;;  %v1718_v46 = vshll.u32 %v12029_v1, 16 }
  0x99   : > { %11211 = vmatmul.mubr.bf16.vlgmr.msra.gmra.mrb[32].mxu1 %v568_v11  ;;  %10363 = vmatpush3.bf16.msra.mxu0 %v12004_v38  ;;  %v1704_v38 = vor.u32 %v1703_v63, %v1699_v59  ;;  %v1803_v11 = vrot.slane %v13052_v43, 1  ;;  %v1812_v43 = vrot.slane %v12035_v25, 1  ;;  %v13164_v59 = vld [vmem:[%s12741_s10 + $0x60] sm:$0xff]   ;;  %v13224_v25 = vld [vmem:[%s12741_s10 + $0x78] sm:$0xff]  }
  0x9a   : > { %11227 = vmatpush3.bf16.msra.mxu1 %v12003_v50  ;;  %10364 = vmatprep.subr.bf16.mxu0 %v12005_v55  ;;  %v582_v50 = vrot.slane %v12917_v53, 1  ;;  %v13075_v53 = vld [vmem:[%s12741_s10 + $0x24] sm:$0xff]  }
  0x9b   : > { %11228 = vmatprep.subr.bf16.mxu1 %v12006_v56  ;;  %11182 = vmatprep.mubr.bf16.mxu0 %v852_v6  ;;  %v1713_v33 = vshll.u32 %v13075_v53, 16  ;;  %v1711_v55 = vshrl.u32 %v13075_v53, 16  ;;  %v1709_v15 = vsel %vm457_vm0, %v1704_v38, %v1708_v3  ;;  %v1805_v16 = vrot.slane %v13075_v53, 1 }
  0x9c   : > { %11214 = vmatprep.mubr.bf16.mxu1 %v571_v13  ;;  %v583_v2 = vsel %vm562_vm1, %v581_v41, %v582_v50  ;;  %v12024_v13 = vld [vmem:[%s15434_s1 + $0x238] sm:$0xff]   ;;  %v1804_v20 = vsel %vm562_vm1, %v1802_v5, %v1803_v11 }
  0x9d   : > { %10365 = vmatpush3.bf16.msra.mxu0 %v12007_v60  ;;  %v586_v60 = vsel %vm562_vm1, %v584_v32, %v585_v4  ;;  %v1715_v6 = vrot.slane %v1713_v33, 1  ;;  %v13150_v41 = vld [vmem:[%s12741_s10 + $0x54] sm:$0xff]   ;;  %v13153_v50 = vld [vmem:[%s12741_s10 + $0x5c] ss:$0 sps:$4 sm:$0x11]   ;;  %v12057_v4 = vld [vmem:[%s15434_s1 + $0x108] sm:$0xff]  }
  0x9e   : > { %11229 = vmatpush3.bf16.msra.mxu1 %v12006_v56  ;;  %10366 = vmatprep.subr.bf16.mxu0 %v12008_v19  ;;  %v13101_v56 = vld [vmem:[%s12741_s10 + $0x30] sm:$0xff]   ;;  %v1806_v19 = vrot.slane %v12029_v1, 1  ;;  %v1817_v32 = vrot.slane %v13150_v41, 1  ;;  %v12058_v33 = vld [vmem:[%s15434_s1 + $0xc8] sm:$0xff]  }
  0x9f   : > { %11230 = vmatprep.subr.bf16.mxu1 %v12009_v21  ;;  %v1716_v28 = vor.u32 %v1715_v6, %v1711_v55  ;;  %v1723_v36 = vshrl.u32 %v13101_v56, 16  ;;  %v13169_v1 = vld [vmem:[%s12741_s10 + $0x6c] sm:$0xff]   ;;  %v13202_v6 = vld [vmem:[%s12741_s10 + $0x74] ss:$0 sps:$4 sm:$0x11]  }
  0xa0   : > { %11183 = vmatmul.mubr.bf16.gmra.mrb[36].mxu0 %v855_v31  ;;  %v1808_v31 = vrot.slane %v13101_v56, 1  ;;  %v1807_v30 = vsel %vm562_vm1, %v1805_v16, %v1806_v19  ;;  %v1823_v5 = vrot.slane %v13169_v1, 1  ;;  %v12043_v55 = vld [vmem:[%s15434_s1 + $0x168] sm:$0xff]  }
  0xa1   : > { %11215 = vmatmul.mubr.bf16.gmra.mrb[36].mxu1 %v574_v26  ;;  %10367 = vmatpush3.bf16.msra.mxu0 %v12010_v24  ;;  %v12030_v24 = vld [vmem:[%s15434_s1 + $0x140] sm:$0xff]   ;;  %v1725_v26 = vshll.u32 %v13101_v56, 16 }
  0xa2   : > { %11231 = vmatpush3.bf16.msra.mxu1 %v12009_v21  ;;  %10368 = vmatprep.subr.bf16.mxu0 %v12011_v45  ;;  %v1720_v21 = vrot.slane %v1718_v46, 1  ;;  %v13121_v45 = vld [vmem:[%s12741_s10 + $0x3c] sm:$0xff]   ;;  %v1810_v8 = vsel %vm562_vm1, %v1808_v31, %v1809_v23  ;;  %v13188_v46 = vld [vmem:[%s12741_s10 + $0x74] ss:$0 sps:$4 sm:$0x11]  }
  0xa3   : > { %11232 = vmatprep.subr.bf16.mxu1 %v12012_v48  ;;  %11186 = vmatprep.mubr.bf16.mxu0 %v858_v61  ;;  %v13127_v61 = vld [vmem:[%s12741_s10 + $0x50] ss:$0 sps:$4 sm:$0x11]   ;;  %v1727_v37 = vrot.slane %v1725_v26, 1  ;;  %v1811_v10 = vrot.slane %v13121_v45, 1  ;;  %v1824_v19 = vrot.slane %v13188_v46, 1 }
  0xa4   : > { %11218 = vmatprep.mubr.bf16.mxu1 %v577_v35  ;;  %v1721_v35 = vsel %vm457_vm0, %v1716_v28, %v1720_v21  ;;  %v1754_v11 = vshll.u32 %v13127_v61, 16  ;;  %v12066_v21 = vld [vmem:[%s15434_s1 + $0xd0] sm:$0xff]   ;;  %v12067_v28 = vld [vmem:[%s15434_s1 + $0x118] sm:$0xff]   ;;  %v3027_v26 = vrot.slane %v13202_v6, 1 }
  0xa5   : > { %10369 = vmatpush3.bf16.msra.mxu0 %v12013_v57  ;;  %v13124_v57 = vld [vmem:[%s12741_s10 + $0x48] sm:$0xff]   ;;  %v12048_v31 = vld [vmem:[%s15434_s1 + $0x170] sm:$0xff]  }
  0xa6   : > { %11233 = vmatpush3.bf16.msra.mxu1 %v12012_v48  ;;  %10370 = vmatprep.subr.bf16.mxu0 %v12014_v40  ;;  %v1730_v48 = vshll.u32 %v12033_v7, 16  ;;  %v12049_v40 = vld [vmem:[%s15434_s1 + $0x100] sm:$0xff]   ;;  %v1749_v3 = vshll.u32 %v13124_v57, 16 }
  0xa7   : > { %11234 = vmatprep.subr.bf16.mxu1 %v12015_v42 }
  0xa8   : > { %11187 = vmatmul.mubr.bf16.gmra.mrb[40].mxu0 %v861_v18  ;;  %v1732_v17 = vrot.slane %v1730_v48, 1  ;;  %v1814_v18 = vrot.slane %v13124_v57, 1  ;;  %v1761_v48 = vshll.u32 %v13150_v41, 16 }
  0xa9   : > { %11219 = vmatmul.mubr.bf16.gmra.mrb[40].mxu1 %v580_v51  ;;  %10371 = vmatpush3.bf16.msra.mxu0 %v12016_v47  ;;  %v12036_v47 = vld [vmem:[%s15434_s1 + $0x150] sm:$0xff]   ;;  %v1737_v51 = vshll.u32 %v13121_v45, 16 }
  0xaa   : > { %11235 = vmatpush3.bf16.msra.mxu1 %v12015_v42  ;;  %10372 = vmatprep.subr.bf16.mxu0 %v12017_v39  ;;  %v12050_v42 = vld [vmem:[%s15434_s1 + $0xc0] sm:$0xff]   ;;  %v1728_v39 = vor.u32 %v1727_v37, %v1723_v36  ;;  %v12051_v36 = vld [vmem:[%s15434_s1 + $0x178] sm:$0xff]   ;;  %v3029_v37 = vrot.slane %v13224_v25, 1 }
  0xab   : > { %11236 = vmatprep.subr.bf16.mxu1 %v12018_v52  ;;  %11190 = vmatprep.mubr.bf16.mxu0 %v864_v62  ;;  %v1813_v62 = vsel %vm562_vm1, %v1811_v10, %v1812_v43  ;;  %v1739_v0 = vrot.slane %v1737_v51, 1  ;;  %v1763_v43 = vrot.slane %v1761_v48, 1  ;;  %v1773_v51 = vshll.u32 %v13164_v59, 16  ;;  %v12089_v48 = vld [vmem:[%s15434_s1 + $0xf8] sm:$0xff]  }
  0xac   : > { %11222 = vmatprep.mubr.bf16.mxu1 %v583_v2  ;;  %v1733_v63 = vsel %vm457_vm0, %v1728_v39, %v1732_v17 }
  0xad   : > { %10373 = vmatpush3.bf16.msra.mxu0 %v12019_v54  ;;  %v13158_v54 = vld [vmem:[%s12741_s10 + $0x68] ss:$0 sps:$4 sm:$0x11]  }
  0xae   : > { %11237 = vmatpush3.bf16.msra.mxu1 %v12018_v52  ;;  %10374 = vmatprep.subr.bf16.mxu0 %v12020_v12  ;;  %v1735_v52 = vshrl.u32 %v13121_v45, 16  ;;  %v1818_v12 = vrot.slane %v13153_v50, 1  ;;  %v1821_v38 = vrot.slane %v13158_v54, 1 }
  0xaf   : > { %11238 = vmatprep.subr.bf16.mxu1 %v12021_v34 }
  0xb0   : > { %11191 = vmatmul.mubr.bf16.gmra.mrb[44].mxu0 %v867_v49  ;;  %v12062_v49 = vld [vmem:[%s15434_s1 + $0x110] sm:$0xff]   ;;  %v1819_v7 = vsel %vm562_vm1, %v1817_v32, %v1818_v12 }
  0xb1   : > { %11223 = vmatmul.mubr.bf16.gmra.mrb[44].mxu1 %v586_v60  ;;  %10375 = vmatpush3.bf16.msra.mxu0 %v12022_v9  ;;  %v1744_v9 = vrot.slane %v1742_v44, 1  ;;  %v13199_v60 = vld [vmem:[%s12741_s10 + $0x6c] sm:$0xff]  }
  0xb2   : > { %11239 = vmatpush3.bf16.msra.mxu1 %v12021_v34  ;;  %10376 = vmatprep.subr.bf16.mxu0 %v12023_v22  ;;  %v12042_v34 = vld [vmem:[%s15434_s1 + $0x160] sm:$0xff]   ;;  %v1820_v22 = vrot.slane %v13164_v59, 1  ;;  %v3026_v23 = vrot.slane %v13199_v60, 1  ;;  %v13264_v44 = vld [vmem:[%s12741_s10 + $0x90] sm:$0xff]  }
  0xb3   : > { %11240 = vmatprep.subr.bf16.mxu1 %v12024_v13  ;;  %2059 = vmatprep.mubr.bf16.mxu0 %v1709_v15  ;;  %v1751_v15 = vrot.slane %v1749_v3, 1  ;;  %v12065_v3 = vld [vmem:[%s15434_s1 + $0x90] sm:$0xff]  }
  0xb4   : > { %11242 = vmatprep.mubr.bf16.mxu1 %v1804_v20  ;;  %v1822_v16 = vsel %vm562_vm1, %v1820_v22, %v1821_v38  ;;  %v1756_v20 = vrot.slane %v1754_v11, 1  ;;  %v3028_v17 = vsel %vm562_vm1, %v3026_v23, %v3027_v26  ;;  %v12082_v22 = vld [vmem:[%s15434_s1 + $0x130] sm:$0xff]  }
  0xb5   : > { %10377 = vmatpush3.bf16.msra.mxu0 %v12025_v14  ;;  %v1747_v14 = vshrl.u32 %v13124_v57, 16 }
  0xb6   : > { %11241 = vmatpush3.bf16.msra.mxu1 %v12024_v13  ;;  %10442 = vmatprep.subr.bf16.mxu0 %v12049_v40  ;;  %v12072_v40 = vld [vmem:[%s15434_s1 + $0x120] sm:$0xff]  }
  0xb7   : > { %11258 = vmatprep.subr.bf16.mxu1 %v12030_v24 }
  0xb8   : > { %2060 = vmatmul.mubr.bf16.vlgmr.msra.gmra.mrb[48].mxu0 %v13032_v27  ;;  %v1815_v27 = vrot.slane %v13127_v61, 1  ;;  %v1766_v61 = vshll.u32 %v13153_v50, 16  ;;  %v12056_v50 = vld [vmem:[%s15434_s1 + $0x80] sm:$0xff]  }
  0xb9   : > { %11243 = vmatmul.mubr.bf16.vlgmr.msra.gmra.mrb[32].mxu1 %v1807_v30  ;;  %2067 = vmatprep.mubr.bf16.mxu0 %v1721_v35  ;;  %v1759_v30 = vshrl.u32 %v13150_v41, 16  ;;  %v13234_v35 = vld [vmem:[%s12741_s10 + $0x84] sm:$0xff]  }
  0xba   : > { %11259 = vmatpush3.bf16.msra.mxu1 %v12030_v24  ;;  %11246 = vmatprep.mubr.bf16.mxu1 %v1810_v8  ;;  %v1816_v2 = vsel %vm562_vm1, %v1814_v18, %v1815_v27  ;;  %v13214_v24 = vld [vmem:[%s12741_s10 + $0x80] ss:$0 sps:$4 sm:$0x11]   ;;  %v1768_v18 = vrot.slane %v1766_v61, 1  ;;  %v3032_v39 = vrot.slane %v13234_v35, 1 }
  0xbb   : > { %11260 = vmatprep.subr.bf16.mxu1 %v12031_v29  ;;  %10443 = vmatpush3.bf16.msra.mxu0 %v12050_v42  ;;  %v1825_v42 = vsel %vm562_vm1, %v1823_v5, %v1824_v19  ;;  %v3030_v10 = vrot.slane %v13214_v24, 1  ;;  %v12076_v27 = vld [vmem:[%s15434_s1 + $0xe0] sm:$0xff]   ;;  %v1783_v19 = vshrl.u32 %v13169_v1, 16 }
  0xbc   : > { %10444 = vmatprep.subr.bf16.mxu0 %v12057_v4  ;;  %v12059_v4 = vld [vmem:[%s15434_s1 + $0x88] sm:$0xff]  }
  0xbd   : > { %v3031_v32 = vsel %vm562_vm1, %v3029_v37, %v3030_v10  ;;  %v2930_v10 = vshll.u32 %v13202_v6, 16 }
  0xbe   : > { %11261 = vmatpush3.bf16.msra.mxu1 %v12031_v29  ;;  %v12069_v29 = vld [vmem:[%s15434_s1 + $0xd8] sm:$0xff]  }
  0xbf   : > { %11262 = vmatprep.subr.bf16.mxu1 %v12036_v47  ;;  %10445 = vmatpush3.bf16.msra.mxu0 %v12058_v33  ;;  %v1771_v33 = vshrl.u32 %v13164_v59, 16 }
  0xc0   : > { %2068 = vmatmul.mubr.bf16.gmra.mrb[52].mxu0 %v13075_v53  ;;  %v1740_v53 = vor.u32 %v1739_v0, %v1735_v52  ;;  %10446 = vmatprep.subr.bf16.mxu0 %v12062_v49  ;;  %v1764_v52 = vor.u32 %v1763_v43, %v1759_v30  ;;  %v13271_v0 = vld [vmem:[%s12741_s10 + $0x9c] sm:$0xff]   ;;  %v2925_v30 = vshll.u32 %v13199_v60, 16  ;;  %v12078_v43 = vld [vmem:[%s15434_s1 + $0xa8] sm:$0xff]  }
  0xc1   : > { %11247 = vmatmul.mubr.bf16.gmra.mrb[36].mxu1 %v1813_v62  ;;  %2075 = vmatprep.mubr.bf16.mxu0 %v1733_v63  ;;  %v13267_v62 = vld [vmem:[%s12741_s10 + $0x98] ss:$0 sps:$4 sm:$0x11]   ;;  %v1778_v63 = vshll.u32 %v13158_v54, 16  ;;  %v3038_v5 = vrot.slane %v13271_v0, 1 }
  0xc2   : > { %11263 = vmatpush3.bf16.msra.mxu1 %v12036_v47  ;;  %11250 = vmatprep.mubr.bf16.mxu1 %v1816_v2  ;;  %v1745_v13 = vsel %vm457_vm0, %v1740_v53, %v1744_v9  ;;  %v13248_v47 = vld [vmem:[%s12741_s10 + $0x8c] ss:$0 sps:$4 sm:$0x11]   ;;  %v1769_v12 = vsel %vm457_vm0, %v1764_v52, %v1768_v18  ;;  %v13283_v54 = vld [vmem:[%s12741_s10 + $0xa4] ss:$0 sps:$4 sm:$0x11]  }
  0xc3   : > { %11264 = vmatprep.subr.bf16.mxu1 %v12037_v58  ;;  %10447 = vmatpush3.bf16.msra.mxu0 %v12066_v21  ;;  %v12079_v2 = vld [vmem:[%s15434_s1 + $0xe8] sm:$0xff]   ;;  %v3035_v53 = vrot.slane %v13264_v44, 1  ;;  %v3036_v38 = vrot.slane %v13267_v62, 1  ;;  %v1780_v49 = vrot.slane %v1778_v63, 1  ;;  %v1790_v21 = vshll.u32 %v13188_v46, 16  ;;  %v12085_v63 = vld [vmem:[%s15434_s1 + $0xb0] sm:$0xff]  }
  0xc4   : > { %10448 = vmatprep.subr.bf16.mxu0 %v12067_v28  ;;  %v2927_v18 = vrot.slane %v2925_v30, 1  ;;  %v13411_v30 = vld [vmem:[%s12741_s10 + $0x90] sm:$0xff]  }
  0xc5   : > { %v3037_v28 = vsel %vm562_vm1, %v3035_v53, %v3036_v38  ;;  %v1792_v37 = vrot.slane %v1790_v21, 1  ;;  %v13377_v53 = vld [vmem:[%s12741_s10 + $0x78] sm:$0xff]   ;;  %v13395_v21 = vld [vmem:[%s12741_s10 + $0x8c] ss:$0 sps:$4 sm:$0x11]  }
  0xc6   : > { %11265 = vmatpush3.bf16.msra.mxu1 %v12037_v58  ;;  %v3033_v58 = vrot.slane %v13248_v47, 1 }
  0xc7   : > { %11266 = vmatprep.subr.bf16.mxu1 %v12042_v34  ;;  %10449 = vmatpush3.bf16.msra.mxu0 %v12069_v29  ;;  %v12075_v29 = vld [vmem:[%s15434_s1 + $0xa0] sm:$0xff]  }
  0xc8   : > { %2076 = vmatmul.mubr.bf16.gmra.mrb[56].mxu0 %v13101_v56  ;;  %v1752_v56 = vor.u32 %v1751_v15, %v1747_v14  ;;  %10450 = vmatprep.subr.bf16.mxu0 %v12072_v40  ;;  %v3034_v9 = vsel %vm562_vm1, %v3032_v39, %v3033_v58  ;;  %v13305_v14 = vld [vmem:[%s12741_s10 + $0xb0] ss:$0 sps:$4 sm:$0x11]   ;;  %v12087_v15 = vld [vmem:[%s15434_s1 + $0x138] sm:$0xff]   ;;  %v2932_v58 = vrot.slane %v2930_v10, 1 }
  0xc9   : > { %11251 = vmatmul.mubr.bf16.gmra.mrb[40].mxu1 %v1819_v7  ;;  %2083 = vmatprep.mubr.bf16.mxu0 %v1745_v13  ;;  %v12086_v7 = vld [vmem:[%s15434_s1 + $0xf0] sm:$0xff]   ;;  %v3039_v13 = vrot.slane %v13283_v54, 1  ;;  %v3042_v61 = vrot.slane %v13305_v14, 1 }
  0xca   : > { %11267 = vmatpush3.bf16.msra.mxu1 %v12042_v34  ;;  %11254 = vmatprep.mubr.bf16.mxu1 %v1822_v16  ;;  %v1757_v8 = vsel %vm457_vm0, %v1752_v56, %v1756_v20  ;;  %v1775_v34 = vrot.slane %v1773_v51, 1  ;;  %v12068_v16 = vld [vmem:[%s15434_s1 + $0x98] sm:$0xff]   ;;  %v13353_v51 = vld [vmem:[%s12741_s10 + $0x68] ss:$0 sps:$4 sm:$0x11]   ;;  %v12102_v10 = vld [vmem:[%s15434_s1 + $0x1d0] sm:$0xff]  }
  0xcb   : > { %11268 = vmatprep.subr.bf16.mxu1 %v12043_v55  ;;  %10451 = vmatpush3.bf16.msra.mxu0 %v12076_v27  ;;  %v13316_v20 = vld [vmem:[%s12741_s10 + $0xbc] ss:$0 sps:$4 sm:$0x11]   ;;  %v13321_v56 = vld [vmem:[%s12741_s10 + $0xb4] sm:$0xff]   ;;  %v3040_v26 = vsel %vm562_vm1, %v3038_v5, %v3039_v13 }
  0xcc   : > { %v1776_v11 = vor.u32 %v1775_v34, %v1771_v33  ;;  %v3044_v40 = vrot.slane %v13321_v56, 1  ;;  %v13369_v33 = vld [vmem:[%s12741_s10 + $0x74] ss:$0 sps:$4 sm:$0x11]   ;;  %v2935_v34 = vshrl.u32 %v13224_v25, 16 }
  0xcd   : > { %v13382_v5 = vld [vmem:[%s12741_s10 + $0x80] ss:$0 sps:$4 sm:$0x11]  }
  0xce   : > { %11269 = vmatpush3.bf16.msra.mxu1 %v12043_v55  ;;  %v13297_v55 = vld [vmem:[%s12741_s10 + $0xa8] sm:$0xff]  }
  0xcf   : > { %11270 = vmatprep.subr.bf16.mxu1 %v12048_v31  ;;  %v3041_v46 = vrot.slane %v13297_v55, 1 }
  0xd0   : > { %2084 = vmatmul.mubr.bf16.gmra.mrb[60].mxu0 %v13121_v45  ;;  %v12077_v45 = vld [vmem:[%s15434_s1 + $0x128] sm:$0xff]  }
  0xd1   : > { %11255 = vmatmul.mubr.bf16.gmra.mrb[44].mxu1 %v1825_v42  ;;  %2091 = vmatprep.mubr.bf16.mxu0 %v1757_v8  ;;  %v3045_v42 = vrot.slane %v13316_v20, 1  ;;  %v13340_v8 = vld [vmem:[%s12741_s10 + $0xc0] sm:$0xff]   ;;  %v3043_v39 = vsel %vm562_vm1, %v3041_v46, %v3042_v61 }
  0xd2   : > { %11271 = vmatpush3.bf16.msra.mxu1 %v12048_v31  ;;  %11274 = vmatprep.mubr.bf16.mxu1 %v3028_v17  ;;  %v1781_v31 = vsel %vm457_vm0, %v1776_v11, %v1780_v49  ;;  %v2923_v17 = vshrl.u32 %v13199_v60, 16 }
  0xd3   : > { %11272 = vmatprep.subr.bf16.mxu1 %v12051_v36  ;;  %10452 = vmatprep.subr.bf16.mxu0 %v12077_v45  ;;  %v3046_v6 = vsel %vm562_vm1, %v3044_v40, %v3045_v42  ;;  %v3047_v45 = vrot.slane %v13340_v8, 1  ;;  %v2755_v42 = vrot.slane %v13395_v21, 1 }
  0xd4   : > { %10453 = vmatpush3.bf16.msra.mxu0 %v12079_v2  ;;  %v2928_v2 = vor.u32 %v2927_v18, %v2923_v17  ;;  %v2757_v18 = vrot.slane %v13411_v30, 1 }
  0xd5   : > { %10454 = vmatprep.subr.bf16.mxu0 %v12082_v22  ;;  %v12088_v22 = vld [vmem:[%s15434_s1 + $0xb8] sm:$0xff]  }
  0xd6   : > { %11273 = vmatpush3.bf16.msra.mxu1 %v12051_v36 }
  0xd7   : > { %11290 = vmatprep.subr.bf16.mxu1 %v12056_v50 }
  0xd8   : > { %2092 = vmatmul.mubr.bf16.gmra.mrb[64].mxu0 %v13124_v57  ;;  %v1785_v57 = vshll.u32 %v13169_v1, 16 }
  0xd9   : > { %11275 = vmatmul.mubr.bf16.vlgmr.msra.gmra.mrb[48].mxu1 %v3031_v32  ;;  %2099 = vmatprep.mubr.bf16.mxu0 %v1769_v12  ;;  %v13366_v12 = vld [vmem:[%s12741_s10 + $0x6c] sm:$0xff]  }
  0xda   : > { %11291 = vmatpush3.bf16.msra.mxu1 %v12056_v50  ;;  %11278 = vmatprep.mubr.bf16.mxu1 %v3034_v9  ;;  %v1787_v23 = vrot.slane %v1785_v57, 1  ;;  %v13350_v50 = vld [vmem:[%s12741_s10 + $0x60] sm:$0xff]   ;;  %v2942_v9 = vshll.u32 %v13214_v24, 16  ;;  %v2748_v24 = vrot.slane %v13366_v12, 1  ;;  %v2749_v57 = vrot.slane %v13369_v33, 1 }
  0xdb   : > { %11292 = vmatprep.subr.bf16.mxu1 %v12059_v4  ;;  %10455 = vmatpush3.bf16.msra.mxu0 %v12086_v7  ;;  %v2745_v32 = vrot.slane %v13350_v50, 1  ;;  %v12094_v7 = vld [vmem:[%s15434_s1 + $0x1c0] sm:$0xff]  }
  0xdc   : > { %10456 = vmatprep.subr.bf16.mxu0 %v12087_v15  ;;  %v1788_v36 = vor.u32 %v1787_v23, %v1783_v19  ;;  %v2944_v15 = vrot.slane %v2942_v9, 1  ;;  %v2752_v19 = vrot.slane %v13382_v5, 1  ;;  %v2947_v23 = vshrl.u32 %v13234_v35, 16  ;;  %v12120_v9 = vld [vmem:[%s15434_s1 + $0x40] sm:$0xff]  }
  0xdd   : > { %v2750_v46 = vsel %vm562_vm1, %v2748_v24, %v2749_v57 }
  0xde   : > { %11293 = vmatpush3.bf16.msra.mxu1 %v12059_v4  ;;  %v1793_v27 = vsel %vm457_vm0, %v1788_v36, %v1792_v37  ;;  %v2937_v4 = vshll.u32 %v13224_v25, 16  ;;  %v12096_v36 = vld [vmem:[%s15434_s1 + $0x1c8] sm:$0xff]  }
  0xdf   : > { %11294 = vmatprep.subr.bf16.mxu1 %v12065_v3  ;;  %10457 = vmatpush3.bf16.msra.mxu0 %v12089_v48  ;;  %v13406_v48 = vld [vmem:[%s12741_s10 + $0x98] ss:$0 sps:$4 sm:$0x11]  }
  0xe0   : > { %2100 = vmatmul.mubr.bf16.gmra.mrb[68].mxu0 %v13150_v41  ;;  %v13335_v41 = vld [vmem:[%s12741_s10 + $0xc8] ss:$0 sps:$4 sm:$0x11]   ;;  %v2939_v49 = vrot.slane %v2937_v4, 1  ;;  %10522 = vmatprep.subr.bf16.mxu0 %v12120_v9 }
  0xe1   : > { %11279 = vmatmul.mubr.bf16.gmra.mrb[52].mxu1 %v3037_v28  ;;  %2107 = vmatprep.mubr.bf16.mxu0 %v1781_v31  ;;  %v3048_v52 = vrot.slane %v13335_v41, 1  ;;  %v12095_v28 = vld [vmem:[%s15434_s1 + $0x180] sm:$0xff]  }
  0xe2   : > { %11295 = vmatpush3.bf16.msra.mxu1 %v12065_v3  ;;  %11282 = vmatprep.mubr.bf16.mxu1 %v3040_v26  ;;  %v2933_v3 = vsel %vm457_vm0, %v2928_v2, %v2932_v58  ;;  %v2940_v13 = vor.u32 %v2939_v49, %v2935_v34  ;;  %v13401_v31 = vld [vmem:[%s12741_s10 + $0x84] sm:$0xff]   ;;  %v2954_v26 = vshll.u32 %v13248_v47, 16  ;;  %v2966_v58 = vshll.u32 %v13267_v62, 16 }
  0xe3   : > { %11296 = vmatprep.subr.bf16.mxu1 %v12068_v16  ;;  %v3049_v38 = vsel %vm562_vm1, %v3047_v45, %v3048_v52  ;;  %v12097_v47 = vld [vmem:[%s15434_s1 + $0x188] sm:$0xff]   ;;  %v2754_v40 = vrot.slane %v13401_v31, 1  ;;  %v12103_v45 = vld [vmem:[%s15434_s1 + $0x190] sm:$0xff]   ;;  %v2959_v52 = vshrl.u32 %v13264_v44, 16 }
  0xe4   : > { %v2945_v61 = vsel %vm457_vm0, %v2940_v13, %v2944_v15  ;;  %v2968_v57 = vrot.slane %v2966_v58, 1  ;;  %v12117_v13 = vld [vmem:[%s12741_s10 + $0xbc] ss:$0 sps:$4 sm:$0x11]  }
  0xe5   : > { %v2756_v4 = vsel %vm562_vm1, %v2754_v40, %v2755_v42  ;;  %v13471_v15 = vld [vmem:[%s12741_s10 + $0x78] sm:$0xff]   ;;  %v13509_v58 = vld [vmem:[%s12741_s10 + $0x8c] ss:$0 sps:$4 sm:$0x11]  }
  0xe6   : > { %11297 = vmatpush3.bf16.msra.mxu1 %v12068_v16  ;;  %v2949_v16 = vshll.u32 %v13234_v35, 16  ;;  %v3880_v40 = vshrl.u32 %v13471_v15, 16 }
  0xe7   : > { %11298 = vmatprep.subr.bf16.mxu1 %v12075_v29 }
  0xe8   : > { %2108 = vmatmul.mubr.bf16.gmra.mrb[72].mxu0 %v13164_v59  ;;  %v2746_v59 = vrot.slane %v13353_v51, 1 }
  0xe9   : > { %11283 = vmatmul.mubr.bf16.gmra.mrb[56].mxu1 %v3043_v39  ;;  %2115 = vmatprep.mubr.bf16.mxu0 %v1793_v27  ;;  %v13429_v39 = vld [vmem:[%s12741_s10 + $0xa4] ss:$0 sps:$4 sm:$0x11]   ;;  %v2758_v27 = vrot.slane %v13406_v48, 1 }
  0xea   : > { %11299 = vmatpush3.bf16.msra.mxu1 %v12075_v29  ;;  %11286 = vmatprep.mubr.bf16.mxu1 %v3046_v6  ;;  %v2747_v11 = vsel %vm562_vm1, %v2745_v32, %v2746_v59  ;;  %v2951_v29 = vrot.slane %v2949_v16, 1  ;;  %v13433_v6 = vld [vmem:[%s12741_s10 + $0x9c] sm:$0xff]   ;;  %v13444_v32 = vld [vmem:[%s12741_s10 + $0xa8] sm:$0xff]   ;;  %v13447_v59 = vld [vmem:[%s12741_s10 + $0xb0] ss:$0 sps:$4 sm:$0x11]  }
  0xeb   : > { %11300 = vmatprep.subr.bf16.mxu1 %v12078_v43  ;;  %v2759_v62 = vsel %vm562_vm1, %v2757_v18, %v2758_v27  ;;  %v2761_v49 = vrot.slane %v13429_v39, 1  ;;  %v13474_v16 = vld [vmem:[%s12741_s10 + $0x80] ss:$0 sps:$4 sm:$0x11]   ;;  %v2767_v27 = vrot.slane %v12117_v13, 1 }
  0xec   : > { %v2952_v17 = vor.u32 %v2951_v29, %v2947_v23  ;;  %v2971_v23 = vshrl.u32 %v13271_v0, 16  ;;  %v3887_v42 = vshll.u32 %v13474_v16, 16 }
  0xee   : > { %11301 = vmatpush3.bf16.msra.mxu1 %v12078_v43  ;;  %v2956_v43 = vrot.slane %v2954_v26, 1  ;;  %v2978_v26 = vshll.u32 %v13283_v54, 16 }
  0xef   : > { %11302 = vmatprep.subr.bf16.mxu1 %v12085_v63 }
  0xf0   : > { %2116 = vmatmul.mubr.bf16.gmra.mrb[76].mxu0 %v13169_v1  ;;  %v2751_v1 = vrot.slane %v13377_v53, 1  ;;  %v2957_v34 = vsel %vm457_vm0, %v2952_v17, %v2956_v43  ;;  %v13498_v43 = vld [vmem:[%s12741_s10 + $0x84] sm:$0xff]  }
  0xf1   : > { %11287 = vmatmul.mubr.bf16.gmra.mrb[60].mxu1 %v3049_v38  ;;  %3282 = vmatprep.mubr.bf16.mxu0 %v2933_v3  ;;  %v12105_v38 = vld [vmem:[%s15434_s1 + $0x198] sm:$0xff]   ;;  %v2760_v3 = vrot.slane %v13433_v6, 1  ;;  %v12113_v17 = vld [vmem:[%s15434_s1 + $0x1a8] sm:$0xff]   ;;  %v3894_v9 = vshll.u32 %v13498_v43, 16 }
  0xf2   : > { %11303 = vmatpush3.bf16.msra.mxu1 %v12085_v63  ;;  %11306 = vmatprep.mubr.bf16.mxu1 %v2747_v11  ;;  %v2753_v37 = vsel %vm562_vm1, %v2751_v1, %v2752_v19  ;;  %v12104_v63 = vld [vmem:[%s15434_s1 + $0x1d8] sm:$0xff]   ;;  %v12110_v11 = vld [vmem:[%s15434_s1 + $0x1e0] sm:$0xff]   ;;  %v2763_v1 = vrot.slane %v13444_v32, 1  ;;  %v2764_v19 = vrot.slane %v13447_v59, 1 }
  0xf3   : > { %11304 = vmatprep.subr.bf16.mxu1 %v12088_v22  ;;  %v2762_v29 = vsel %vm562_vm1, %v2760_v3, %v2761_v49  ;;  %v12122_v3 = vld [vmem:[%s15434_s1 + $0x1f8] sm:$0xff]   ;;  %v2983_v49 = vshrl.u32 %v13297_v55, 16 }
  0xf6   : > { %11305 = vmatpush3.bf16.msra.mxu1 %v12088_v22  ;;  %v12121_v22 = vld [vmem:[%s15434_s1] sm:$0xff]  }
  0xf7   : > { %10602 = vmatprep.subr.bf16.mxu1 %v12094_v7  ;;  %v12116_v7 = vld [vmem:[%s12741_s10 + $0xb4] sm:$0xff]  }
  0xf8   : > { %3283 = vmatmul.mubr.bf16.vlgmr.msra.gmra.mrb[80].mxu0 %v13199_v60  ;;  %v2961_v60 = vshll.u32 %v13264_v44, 16  ;;  %v2766_v18 = vrot.slane %v12116_v7, 1  ;;  %v3892_v7 = vshrl.u32 %v13498_v43, 16 }
  0xf9   : > { %11307 = vmatmul.mubr.bf16.vlgmr.msra.gmra.mrb[48].mxu1 %v2750_v46  ;;  %3290 = vmatprep.mubr.bf16.mxu0 %v2945_v61  ;;  %v3882_v46 = vshll.u32 %v13471_v15, 16  ;;  %v12127_v61 = vld [vmem:[%s15434_s1 + $0x48] sm:$0xff]  }
  0xfa   : > { %10603 = vmatpush3.bf16.msra.mxu1 %v12095_v28  ;;  %11310 = vmatprep.mubr.bf16.mxu1 %v2753_v37  ;;  %v2963_v2 = vrot.slane %v2961_v60, 1  ;;  %v12111_v28 = vld [vmem:[%s15434_s1 + $0x1a0] sm:$0xff]   ;;  %v2765_v60 = vsel %vm562_vm1, %v2763_v1, %v2764_v19  ;;  %v3896_v1 = vrot.slane %v3894_v9, 1  ;;  %v3899_v19 = vshll.u32 %v13509_v58, 16 }
  0xfb   : > { %10604 = vmatprep.subr.bf16.mxu1 %v12096_v36  ;;  %10523 = vmatpush3.bf16.msra.mxu0 %v12121_v22  ;;  %v12112_v36 = vld [vmem:[%s15434_s1 + $0x1e8] sm:$0xff]   ;;  %v3884_v54 = vrot.slane %v3882_v46, 1  ;;  %v12119_v22 = vld [vmem:[%s15434_s1 + $0x1b0] sm:$0xff]   ;;  %v13547_v46 = vld [vmem:[%s12741_s10 + $0x98] ss:$0 sps:$4 sm:$0x11]  }
  0xfc   : > { %v2964_v24 = vor.u32 %v2963_v2, %v2959_v52  ;;  %10524 = vmatprep.subr.bf16.mxu0 %v12127_v61  ;;  %v2980_v52 = vrot.slane %v2978_v26, 1  ;;  %v3889_v2 = vrot.slane %v3887_v42, 1  ;;  %v2997_v26 = vshll.u32 %v13321_v56, 16  ;;  %v12138_v61 = vld [vmem:[%s15434_s1 + $0x60] sm:$0xff]   ;;  %v12141_v42 = vld [vmem:[%s15434_s1 + $0x68] sm:$0xff]  }
  0xfe   : > { %10605 = vmatpush3.bf16.msra.mxu1 %v12097_v47  ;;  %v2969_v37 = vsel %vm457_vm0, %v2964_v24, %v2968_v57  ;;  %v2768_v24 = vsel %vm562_vm1, %v2766_v18, %v2767_v27  ;;  %v3911_v18 = vshll.u32 %v13547_v46, 16 }
  0xff   : > { %10606 = vmatprep.subr.bf16.mxu1 %v12102_v10  ;;  %v12128_v10 = vld [vmem:[%s15434_s1 + $0x8] sm:$0xff]  }
 0x100   : > { %3291 = vmatmul.mubr.bf16.gmra.mrb[84].mxu0 %v13224_v25  ;;  %v2973_v25 = vshll.u32 %v13271_v0, 16 }
 0x101   : > { %11311 = vmatmul.mubr.bf16.gmra.mrb[52].mxu1 %v2756_v4  ;;  %3298 = vmatprep.mubr.bf16.mxu0 %v2957_v34  ;;  %v2985_v4 = vshll.u32 %v13297_v55, 16  ;;  %v3885_v34 = vor.u32 %v3884_v54, %v3880_v40  ;;  %v12140_v54 = vld [vmem:[%s15434_s1 + $0x20] sm:$0xff]  }
 0x102   : > { %10607 = vmatpush3.bf16.msra.mxu1 %v12103_v45  ;;  %11314 = vmatprep.mubr.bf16.mxu1 %v2759_v62  ;;  %v2975_v47 = vrot.slane %v2973_v25, 1  ;;  %v12118_v45 = vld [vmem:[%s15434_s1 + $0x1f0] sm:$0xff]  }
 0x103   : > { %10608 = vmatprep.subr.bf16.mxu1 %v12104_v63  ;;  %v12131_v63 = vld [vmem:[%s15434_s1 + $0x50] sm:$0xff]   ;;  %10525 = vmatpush3.bf16.msra.mxu0 %v12128_v10  ;;  %v2987_v25 = vrot.slane %v2985_v4, 1  ;;  %v3890_v13 = vsel %vm457_vm0, %v3885_v34, %v3889_v2  ;;  %v2995_v10 = vshrl.u32 %v13321_v56, 16  ;;  %v13575_v2 = vld [vmem:[%s12741_s10 + $0x9c] sm:$0xff]  }
 0x104   : > { %v12133_v62 = vld [vmem:[%s15434_s1 + $0x10] sm:$0xff]   ;;  %10526 = vmatprep.subr.bf16.mxu0 %v12131_v63  ;;  %v13579_v4 = vld [vmem:[%s12741_s10 + $0xa4] ss:$0 sps:$4 sm:$0x11]  }
 0x105   : > { %v12145_v34 = vld [vmem:[%s15434_s1 + $0x70] sm:$0xff]  }
 0x106   : > { %10609 = vmatpush3.bf16.msra.mxu1 %v12105_v38  ;;  %v12134_v38 = vld [vmem:[%s15434_s1 + $0x58] sm:$0xff]  }
 0x107   : > { %10610 = vmatprep.subr.bf16.mxu1 %v12110_v11  ;;  %v2990_v11 = vshll.u32 %v13305_v14, 16  ;;  %10527 = vmatpush3.bf16.msra.mxu0 %v12133_v62  ;;  %v12135_v14 = vld [vmem:[%s15434_s1 + $0x18] sm:$0xff]   ;;  %v3009_v62 = vshll.u32 %v13340_v8, 16 }
 0x108   : > { %3299 = vmatmul.mubr.bf16.gmra.mrb[88].mxu0 %v13234_v35  ;;  %v2976_v35 = vor.u32 %v2975_v47, %v2971_v23  ;;  %v12123_v23 = vld [vmem:[%s15434_s1 + $0x1b8] sm:$0xff]   ;;  %10528 = vmatprep.subr.bf16.mxu0 %v12134_v38  ;;  %v3901_v47 = vrot.slane %v3899_v19, 1  ;;  %v3913_v38 = vrot.slane %v3911_v18, 1  ;;  %v3923_v19 = vshll.u32 %v13579_v4, 16 }
 0x109   : > { %11315 = vmatmul.mubr.bf16.gmra.mrb[56].mxu1 %v2762_v29  ;;  %3306 = vmatprep.mubr.bf16.mxu0 %v2969_v37  ;;  %v2988_v29 = vor.u32 %v2987_v25, %v2983_v49  ;;  %v3897_v37 = vor.u32 %v3896_v1, %v3892_v7  ;;  %v3918_v49 = vshll.u32 %v13575_v2, 16  ;;  %v3011_v25 = vrot.slane %v3009_v62, 1 }
 0x10a   : > { %10611 = vmatpush3.bf16.msra.mxu1 %v12111_v28  ;;  %11318 = vmatprep.mubr.bf16.mxu1 %v2765_v60  ;;  %v2981_v57 = vsel %vm457_vm0, %v2976_v35, %v2980_v52  ;;  %v13539_v28 = vld [vmem:[%s12741_s10 + $0x90] sm:$0xff]   ;;  %v2999_v60 = vrot.slane %v2997_v26, 1  ;;  %v12132_v52 = vld [vmem:[%s15434_s1 + $0x208] sm:$0xff]   ;;  %v3014_v7 = vshll.u32 %v13335_v41, 16  ;;  %v3916_v1 = vshrl.u32 %v13575_v2, 16 }
 0x10b   : > { %10612 = vmatprep.subr.bf16.mxu1 %v12112_v36  ;;  %v2992_v36 = vrot.slane %v2990_v11, 1  ;;  %10529 = vmatpush3.bf16.msra.mxu0 %v12135_v14  ;;  %v3906_v40 = vshll.u32 %v13539_v28, 16  ;;  %v3904_v63 = vshrl.u32 %v13539_v28, 16  ;;  %v12147_v11 = vld [vmem:[%s15434_s1 + $0x30] sm:$0xff]   ;;  %v12146_v14 = vld [vmem:[%s15434_s1 + $0x218] sm:$0xff]   ;;  %v13609_v41 = vld [vmem:[%s12741_s10 + $0xa8] sm:$0xff]  }
 0x10c   : > { %10530 = vmatprep.subr.bf16.mxu0 %v12138_v61  ;;  %v3920_v61 = vrot.slane %v3918_v49, 1 }
 0x10d   : > { %v2993_v27 = vsel %vm457_vm0, %v2988_v29, %v2992_v36  ;;  %v3908_v35 = vrot.slane %v3906_v40, 1  ;;  %v3016_v36 = vrot.slane %v3014_v7, 1  ;;  %v13615_v40 = vld [vmem:[%s12741_s10 + $0xb0] ss:$0 sps:$4 sm:$0x11]  }
 0x10e   : > { %10613 = vmatpush3.bf16.msra.mxu1 %v12113_v17  ;;  %v3002_v17 = vshll.u32 %v13316_v20, 16  ;;  %v12142_v20 = vld [vmem:[%s15434_s1 + $0x28] sm:$0xff]  }
 0x10f   : > { %10614 = vmatprep.subr.bf16.mxu1 %v12118_v45  ;;  %v3902_v45 = vsel %vm457_vm0, %v3897_v37, %v3901_v47  ;;  %10531 = vmatpush3.bf16.msra.mxu0 %v12140_v54  ;;  %v3921_v37 = vor.u32 %v3920_v61, %v3916_v1  ;;  %v3925_v47 = vrot.slane %v3923_v19, 1  ;;  %v3930_v54 = vshll.u32 %v13609_v41, 16 }
 0x110   : > { %3307 = vmatmul.mubr.bf16.gmra.mrb[92].mxu0 %v13264_v44  ;;  %v12126_v44 = vld [vmem:[%s15434_s1 + $0x200] sm:$0xff]   ;;  %10532 = vmatprep.subr.bf16.mxu0 %v12141_v42  ;;  %v3004_v9 = vrot.slane %v3002_v17, 1  ;;  %v2642_v42 = vshrl.u32 %v13350_v50, 16  ;;  %v13624_v17 = vld [vmem:[%s12741_s10 + $0xb4] sm:$0xff]  }
 0x111   : > { %11319 = vmatmul.mubr.bf16.gmra.mrb[60].mxu1 %v2768_v24  ;;  %3314 = vmatprep.mubr.bf16.mxu0 %v2981_v57  ;;  %v3007_v24 = vshrl.u32 %v13340_v8, 16  ;;  %v12148_v57 = vld [vmem:[%s15434_s1 + $0x78] sm:$0xff]  }
 0x112   : > { %10615 = vmatpush3.bf16.msra.mxu1 %v12119_v22  ;;  %4239 = vmatprep.mubr.bf16.mxu1 %v3890_v13  ;;  %v3000_v22 = vor.u32 %v2999_v60, %v2995_v10  ;;  %v2649_v60 = vshll.u32 %v13353_v51, 16  ;;  %v2656_v51 = vshll.u32 %v13366_v12, 16 }
 0x113   : > { %10616 = vmatprep.subr.bf16.mxu1 %v12122_v3  ;;  %v3909_v3 = vor.u32 %v3908_v35, %v3904_v63  ;;  %10533 = vmatpush3.bf16.msra.mxu0 %v12142_v20  ;;  %v3012_v29 = vor.u32 %v3011_v25, %v3007_v24  ;;  %v3935_v63 = vshll.u32 %v13615_v40, 16  ;;  %v12155_v35 = vld [vmem:[%s15434_s1 + $0x228] sm:$0xff]   ;;  %v2661_v20 = vshll.u32 %v13369_v33, 16 }
 0x114   : > { %10534 = vmatprep.subr.bf16.mxu0 %v12145_v34  ;;  %v3005_v13 = vsel %vm457_vm0, %v3000_v22, %v3004_v9  ;;  %v3942_v34 = vshll.u32 %v13624_v17, 16  ;;  %v2651_v62 = vrot.slane %v2649_v60, 1  ;;  %v2654_v33 = vshrl.u32 %v13366_v12, 16  ;;  %v13667_v60 = vld [vmem:[%s12741_s10 + $0xc8] ss:$0 sps:$4 sm:$0x11]  }
 0x115   : > { %v3914_v26 = vsel %vm457_vm0, %v3909_v3, %v3913_v38  ;;  %v3017_v18 = vsel %vm457_vm0, %v3012_v29, %v3016_v36  ;;  %v3937_v38 = vrot.slane %v3935_v63, 1  ;;  %v3940_v24 = vshrl.u32 %v13624_v17, 16  ;;  %v13653_v29 = vld [vmem:[%s12741_s10 + $0xc0] sm:$0xff]  }
 0x116   : > { %10617 = vmatpush3.bf16.msra.mxu1 %v12123_v23  ;;  %v12149_v23 = vld [vmem:[%s15434_s1 + $0x38] sm:$0xff]   ;;  %v2663_v7 = vrot.slane %v2661_v20, 1  ;;  %v3987_v63 = vrot.slane %v13509_v58, 1  ;;  %v13677_v20 = vld [vmem:[%s12741_s10 + $0xcc] sm:$0xff]  }
 0x117   : > { %11322 = vmatprep.subr.bf16.mxu1 %v12126_v44  ;;  %10535 = vmatpush3.bf16.msra.mxu0 %v12147_v11  ;;  %v2658_v11 = vrot.slane %v2656_v51, 1 }
 0x118   : > { %3315 = vmatmul.mubr.bf16.gmra.mrb[96].mxu0 %v13271_v0  ;;  %v12139_v0 = vld [vmem:[%s15434_s1 + $0x210] sm:$0xff]   ;;  %10536 = vmatprep.subr.bf16.mxu0 %v12148_v57 }
 0x119   : > { %4240 = vmatmul.mubr.bf16.vlgmr.msra.gmra.mrb[64].mxu1 %v13471_v15  ;;  %3322 = vmatprep.mubr.bf16.mxu0 %v2993_v27  ;;  %v3926_v27 = vsel %vm457_vm0, %v3921_v37, %v3925_v47 }
 0x11a   : > { %11323 = vmatpush3.bf16.msra.mxu1 %v12126_v44  ;;  %4247 = vmatprep.mubr.bf16.mxu1 %v3902_v45  ;;  %v2644_v44 = vshll.u32 %v13350_v50, 16  ;;  %v3928_v45 = vshrl.u32 %v13609_v41, 16 }
 0x11b   : > { %11324 = vmatprep.subr.bf16.mxu1 %v12132_v52  ;;  %10537 = vmatpush3.bf16.msra.mxu0 %v12149_v23 }
 0x11c   : > { %v2646_v10 = vrot.slane %v2644_v44, 1  ;;  %v2666_v44 = vshrl.u32 %v13377_v53, 16 }
 0x11e   : > { %11325 = vmatpush3.bf16.msra.mxu1 %v12132_v52  ;;  %v3932_v52 = vrot.slane %v3930_v54, 1  ;;  %v2647_v9 = vor.u32 %v2646_v10, %v2642_v42  ;;  %v12161_v42 = vld [vmem:[%s15434_s1 + $0x238] sm:$0xff]  }
 0x11f   : > { %11326 = vmatprep.subr.bf16.mxu1 %v12139_v0 }
 0x120   : > { %3323 = vmatmul.mubr.bf16.gmra.mrb[100].mxu0 %v13297_v55  ;;  %v12152_v55 = vld [vmem:[%s15434_s1 + $0x220] sm:$0xff]   ;;  %v3933_v22 = vor.u32 %v3932_v52, %v3928_v45  ;;  %v3984_v45 = vrot.slane %v13474_v16, 1  ;;  %v3986_v52 = vrot.slane %v13498_v43, 1 }
 0x121   : > { %4248 = vmatmul.mubr.bf16.gmra.mrb[68].mxu1 %v13498_v43  ;;  %3330 = vmatprep.mubr.bf16.mxu0 %v3005_v13  ;;  %v3944_v13 = vrot.slane %v3942_v34, 1  ;;  %v12162_v43 = vld [vmem:[#allocation3 + $0x40] sm:$0xff]  }
 0x122   : > { %4255 = vmatprep.mubr.bf16.mxu1 %v3914_v26  ;;  %11327 = vmatpush3.bf16.msra.mxu1 %v12139_v0  ;;  %v13639_v0 = vld [vmem:[%s12741_s10 + $0xbc] ss:$0 sps:$4 sm:$0x11]   ;;  %v2652_v26 = vsel %vm457_vm0, %v2647_v9, %v2651_v62  ;;  %v3938_v37 = vsel %vm457_vm0, %v3933_v22, %v3937_v38  ;;  %v13683_v16 = vsel %vm562_vm1, %v3986_v52, %v3987_v63  ;;  %v3952_v62 = vshrl.u32 %v13653_v29, 16 }
 0x123   : > { %11328 = vmatprep.subr.bf16.mxu1 %v12146_v14  ;;  %v3947_v47 = vshll.u32 %v13639_v0, 16  ;;  %v3945_v51 = vor.u32 %v3944_v13, %v3940_v24  ;;  %v3959_v22 = vshll.u32 %v13667_v60, 16  ;;  %v13692_v24 = vld [vmem:[%s12741_s10 + $0xd4] ss:$0 sps:$4 sm:$0x11]  }
 0x124   : > { %v3971_v63 = vshll.u32 %v13692_v24, 16 }
 0x126   : > { %11329 = vmatpush3.bf16.msra.mxu1 %v12146_v14 }
 0x127   : > { %11330 = vmatprep.subr.bf16.mxu1 %v12152_v55 }
 0x128   : > { %3331 = vmatmul.mubr.bf16.gmra.mrb[104].mxu0 %v13321_v56  ;;  %v12158_v56 = vld [vmem:[%s15434_s1 + $0x230] sm:$0xff]  }
 0x129   : > { %4256 = vmatmul.mubr.bf16.gmra.mrb[72].mxu1 %v13539_v28  ;;  %3338 = vmatprep.mubr.bf16.mxu0 %v3017_v18  ;;  %v3983_v18 = vrot.slane %v13471_v15, 1  ;;  %v3949_v15 = vrot.slane %v3947_v47, 1 }
 0x12a   : > { %4263 = vmatprep.mubr.bf16.mxu1 %v3926_v27  ;;  %11331 = vmatpush3.bf16.msra.mxu1 %v12152_v55  ;;  %v2668_v55 = vshll.u32 %v13377_v53, 16  ;;  %v2673_v27 = vshll.u32 %v13382_v5, 16  ;;  %v12170_v53 = vld [vmem:[#allocation3 + $0x108] sm:$0xff]  }
 0x12b   : > { %11332 = vmatprep.subr.bf16.mxu1 %v12155_v35  ;;  %v10218_v3 = vpop.f32.mrb[0].mxu0  ;;  %v13680_v5 = vsel %vm562_vm1, %v3983_v18, %v3984_v45  ;;  %v3961_v45 = vrot.slane %v3959_v22, 1  ;;  %v310_v22 = vld [vmem:[#allocation2 + $0x14] sm:$0x1] }
 0x12c   : > { %v10298_v49 = vpop.f32.mrb[0].mxu1  ;;  %v10219_v57 = vpop.f32.mrb[1].mxu0  ;;  %v2670_v34 = vrot.slane %v2668_v55, 1  ;;  %v12168_v55 = vld [vmem:[#allocation3 + $0xc0] sm:$0xff]  }
 0x12d   : > { %v10299_v25 = vpop.f32.mrb[1].mxu1  ;;  %v13646_v1 = vadd.f32 %v10219_v57, %v10218_v3  ;;  %v10221_v19 = vpop.f32.mrb[2].mxu0  ;;  %v2680_v3 = vshll.u32 %v13401_v31, 16  ;;  %v12166_v57 = vld [vmem:[#allocation3 + $0x100] sm:$0xff]  }
 0x12e   : > { %v13648_v14 = vadd.f32 %v10299_v25, %v10298_v49  ;;  %v10301_v23 = vpop.f32.mrb[2].mxu1  ;;  %11333 = vmatpush3.bf16.msra.mxu1 %v12155_v35  ;;  %v10222_v61 = vpop.f32.mrb[3].mxu0  ;;  %v2659_v35 = vor.u32 %v2658_v11, %v2654_v33  ;;  %10682 = vmatprep.subr.bf16.mxu0 %v12166_v57 }
 0x12f   : > { %v10302_v36 = vpop.f32.mrb[3].mxu1  ;;  %v13657_v54 = vadd.f32 %v10222_v61, %v10221_v19  ;;  %11334 = vmatprep.subr.bf16.mxu1 %v12158_v56  ;;  %v3966_v61 = vshll.u32 %v13677_v20, 16 }
 0x130   : > { %v13663_v10 = vadd.f32 %v10302_v36, %v10301_v23  ;;  %3339 = vmatmul.mubr.bf16.gmra.mrb[108].mxu0 %v13340_v8  ;;  %v3954_v8 = vshll.u32 %v13653_v29, 16  ;;  %v2664_v19 = vsel %vm457_vm0, %v2659_v35, %v2663_v7  ;;  %v2678_v7 = vshrl.u32 %v13401_v31, 16 }
 0x131   : > { %4264 = vmatmul.mubr.bf16.gmra.mrb[76].mxu1 %v13575_v2  ;;  %3620 = vmatprep.mubr.bf16.mxu0 %v2652_v26  ;;  %v2671_v35 = vor.u32 %v2670_v34, %v2666_v44 }
 0x132   : > { %4271 = vmatprep.mubr.bf16.mxu1 %v3938_v37  ;;  %11335 = vmatpush3.bf16.msra.mxu1 %v12158_v56  ;;  %v2685_v56 = vshll.u32 %v13395_v21, 16  ;;  %v3956_v23 = vrot.slane %v3954_v8, 1  ;;  %v3950_v21 = vsel %vm457_vm0, %v3945_v51, %v3949_v15  ;;  %v2675_v37 = vrot.slane %v2673_v27, 1 }
 0x133   : > { %v10224_v9 = vpop.f32.mrb[4].mxu0  ;;  %11336 = vmatprep.subr.bf16.mxu1 %v12161_v42  ;;  %v3964_v27 = vshrl.u32 %v13677_v20, 16  ;;  %v3968_v8 = vrot.slane %v3966_v61, 1  ;;  %v2692_v15 = vshll.u32 %v13411_v30, 16  ;;  %v2697_v61 = vshll.u32 %v13406_v48, 16 }
 0x134   : > { %v10304_v58 = vpop.f32.mrb[4].mxu1  ;;  %v10225_v38 = vpop.f32.mrb[5].mxu0  ;;  %v13706_v52 = vrot.slane %v2685_v56, 1  ;;  %v3957_v51 = vor.u32 %v3956_v23, %v3952_v62  ;;  %v2676_v62 = vsel %vm457_vm0, %v2671_v35, %v2675_v37  ;;  %v3973_v23 = vrot.slane %v3971_v63, 1  ;;  %v313_v35 = vld [vmem:[#allocation2 + $0x20] sm:$0x1] }
 0x135   : > { %v10305_v49 = vpop.f32.mrb[5].mxu1  ;;  %v13689_v33 = vadd.f32 %v10225_v38, %v10224_v9  ;;  %v10227_v11 = vpop.f32.mrb[6].mxu0  ;;  %v254_v9 = vld [vmem:[#allocation2 + $0xc] sm:$0x1]  ;;  %v257_v38 = vld [vmem:[#allocation2 + $0x18] sm:$0x1] }
 0x136   : > { %v13694_v25 = vadd.f32 %v10305_v49, %v10304_v58  ;;  %v10307_v13 = vpop.f32.mrb[6].mxu1  ;;  %v10228_v26 = vpop.f32.mrb[7].mxu0  ;;  %11337 = vmatpush3.bf16.msra.mxu1 %v12161_v42  ;;  %v2682_v42 = vrot.slane %v2680_v3, 1  ;;  %v258_v48 = vsel %vm13722_vm4, 0, %v257_v38  ;;  %v12172_v38 = vld [vmem:[#allocation3 + $0xc8] sm:$0xff]  }
 0x137   : > { %v10308_v36 = vpop.f32.mrb[7].mxu1  ;;  %v13699_v47 = vadd.f32 %v10228_v26, %v10227_v11  ;;  %10762 = vmatprep.subr.bf16.mxu1 %v12162_v43  ;;  %v3962_v11 = vsel %vm457_vm0, %v3957_v51, %v3961_v45  ;;  %v2694_v45 = vrot.slane %v2692_v15, 1  ;;  %259 = vst [vmem:[#allocation2 + $0x18] sm:$0x1] %v258_v48  ;;  %v12526_v51 = vmov 0  }
 0x138   : > { %v13701_v18 = vadd.f32 %v10308_v36, %v10307_v13  ;;  %3621 = vmatmul.mubr.bf16.vlgmr.msra.gmra.mrb[112].mxu0 %v13350_v50  ;;  %v2690_v50 = vshrl.u32 %v13411_v30, 16  ;;  %v255_v36 = vsel %vm13722_vm4, 0, %v254_v9  ;;  %v2683_v63 = vor.u32 %v2682_v42, %v2678_v7  ;;  %241 = vst [vmem:[#allocation2] sm:$0xf] %v12526_v51  ;;  %242 = vst [vmem:[#allocation2 + $0x4] sm:$0xf] %v12526_v51 }
 0x139   : > { %4272 = vmatmul.mubr.bf16.gmra.mrb[80].mxu1 %v13609_v41  ;;  %3628 = vmatprep.mubr.bf16.mxu0 %v2664_v19  ;;  %256 = vst [vmem:[#allocation2 + $0xc] sm:$0x1] %v255_v36  ;;  %243 = vst [vmem:[#allocation2 + $0x8] sm:$0x1] %v12526_v51  ;;  %v314_v9 = vsel %vm13733_vm6, 0, %v313_v35  ;;  %v2704_v42 = vshll.u32 %v13433_v6, 16 }
 0x13a   : > { %4279 = vmatprep.mubr.bf16.mxu1 %v3950_v21  ;;  %10683 = vmatpush3.bf16.msra.mxu0 %v12168_v55  ;;  %v15455_v21 = vmov 0  ;;  %v311_v55 = vsel %vm13733_vm6, 0, %v310_v22  ;;  %245 = vst [vmem:[#allocation2 + $0xcc] sm:$0xf] %v12526_v51  ;;  %246 = vst [vmem:[#allocation2 + $0xd0] sm:$0xf] %v12526_v51 }
 0x13b   : > { %v10230_v31 = vpop.f32.mrb[8].mxu0  ;;  %v15456_v21 = vsel %vm13733_vm6, 4294967295, %v15455_v21  ;;  %10684 = vmatprep.subr.bf16.mxu0 %v12170_v53  ;;  %312 = vst [vmem:[#allocation2 + $0x14] sm:$0x1] %v311_v55  ;;  %247 = vst [vmem:[#allocation2 + $0xd4] sm:$0x1] %v12526_v51 }
 0x13c   : > { %v10310_v43 = vpop.f32.mrb[8].mxu1  ;;  %v10231_v58 = vpop.f32.mrb[9].mxu0  ;;  %15457 = vst [vmem:[#allocation9_spill] sm:$0xff] %v15456_v21  ;;  %315 = vst [vmem:[#allocation2 + $0x20] sm:$0x1] %v314_v9  ;;  %v12402_v55 = vld [vmem:[%s12741_s10 + $0x78] sm:$0xff]  }
 0x13d   : > { %v10311_v3 = vpop.f32.mrb[9].mxu1  ;;  %v13714_v56 = vadd.f32 %v10231_v58, %v10230_v31  ;;  %v10233_v49 = vpop.f32.mrb[10].mxu0  ;;  %v260_v53 = vld [vmem:[#allocation2 + $0x24] sm:$0x1]  ;;  %v2699_v48 = vrot.slane %v2697_v61, 1  ;;  %v12174_v35 = vld [vmem:[#allocation3 + $0x110] sm:$0xff]  }
 0x13e   : > { %v13716_v44 = vadd.f32 %v10311_v3, %v10310_v43  ;;  %v10313_v34 = vpop.f32.mrb[10].mxu1  ;;  %v10234_v57 = vpop.f32.mrb[11].mxu0  ;;  %10685 = vmatpush3.bf16.msra.mxu0 %v12172_v38  ;;  %v3990_v51 = vrot.slane %v13547_v46, 1  ;;  %v12176_v9 = vld [vmem:[#allocation3 + $0xd0] sm:$0xff]  }
 0x13f   : > { %v10314_v19 = vpop.f32.mrb[11].mxu1  ;;  %v13726_v26 = vadd.f32 %v10234_v57, %v10233_v49  ;;  %v2709_v57 = vshll.u32 %v13429_v39, 16  ;;  %v2695_v39 = vor.u32 %v2694_v45, %v2690_v50  ;;  %10686 = vmatprep.subr.bf16.mxu0 %v12174_v35  ;;  %v316_v50 = vld [vmem:[#allocation2 + $0x2c] sm:$0x1]  ;;  %v12180_v35 = vld [vmem:[#allocation3 + $0xd8] sm:$0xff]  }
 0x140   : > { %v13737_v37 = vadd.f32 %v10314_v19, %v10313_v34  ;;  %3629 = vmatmul.mubr.bf16.gmra.mrb[116].mxu0 %v13366_v12  ;;  %v3969_v12 = vor.u32 %v3968_v8, %v3964_v27  ;;  %v2688_v27 = vsel %vm457_vm0, %v2683_v63, %v13706_v52  ;;  %v261_v19 = vsel %vm13722_vm4, 0, %v260_v53 }
 0x141   : > { %4280 = vmatmul.mubr.bf16.gmra.mrb[84].mxu1 %v13624_v17  ;;  %3636 = vmatprep.mubr.bf16.mxu0 %v2676_v62  ;;  %v2702_v52 = vshrl.u32 %v13433_v6, 16  ;;  %v3989_v63 = vrot.slane %v13539_v28, 1  ;;  %262 = vst [vmem:[#allocation2 + $0x24] sm:$0x1] %v261_v19  ;;  %v2711_v61 = vrot.slane %v2709_v57, 1  ;;  %v3993_v6 = vrot.slane %v13579_v4, 1 }
 0x142   : > { %4287 = vmatprep.mubr.bf16.mxu1 %v3962_v11  ;;  %v3974_v62 = vsel %vm457_vm0, %v3969_v12, %v3973_v23  ;;  %v2706_v23 = vrot.slane %v2704_v42, 1  ;;  %v3992_v12 = vrot.slane %v13575_v2, 1  ;;  %10687 = vmatpush3.bf16.msra.mxu0 %v12176_v9  ;;  %v2714_v53 = vshrl.u32 %v13444_v32, 16  ;;  %v12403_v9 = vld [vmem:[%s12741_s10 + $0x84] sm:$0xff]  }
 0x143   : > { %v10236_v31 = vpop.f32.mrb[12].mxu0  ;;  %v2721_v19 = vshll.u32 %v13447_v59, 16  ;;  %v12167_v28 = vld [vmem:[#allocation3 + $0x50] sm:$0xff]   ;;  %v15458_v4 = vrot.slane %v13609_v41, 1 }
 0x144   : > { %v10316_v43 = vpop.f32.mrb[12].mxu1  ;;  %v10237_v58 = vpop.f32.mrb[13].mxu0 }
 0x145   : > { %v10317_v15 = vpop.f32.mrb[13].mxu1  ;;  %v13747_v22 = vadd.f32 %v10237_v58, %v10236_v31  ;;  %v10239_v7 = vpop.f32.mrb[14].mxu0 }
 0x146   : > { %v13750_v3 = vadd.f32 %v10317_v15, %v10316_v43  ;;  %v10319_v49 = vpop.f32.mrb[14].mxu1  ;;  %v10240_v8 = vpop.f32.mrb[15].mxu0  ;;  %v2716_v15 = vshll.u32 %v13444_v32, 16 }
 0x147   : > { %v10320_v34 = vpop.f32.mrb[15].mxu1  ;;  %v13755_v11 = vadd.f32 %v10240_v8, %v10239_v7  ;;  %v12178_v7 = vld [vmem:[#allocation3 + $0x118] sm:$0xff]  }
 0x148   : > { %v13760_v36 = vadd.f32 %v10320_v34, %v10319_v49  ;;  %3637 = vmatmul.mubr.bf16.gmra.mrb[120].mxu0 %v12402_v55  ;;  %v317_v34 = vsel %vm13733_vm6, 0, %v316_v50  ;;  %10688 = vmatprep.subr.bf16.mxu0 %v12178_v7  ;;  %v2718_v32 = vrot.slane %v2716_v15, 1 }
 0x149   : > { %4288 = vmatmul.mubr.bf16.gmra.mrb[88].mxu1 %v13653_v29  ;;  %3644 = vmatprep.mubr.bf16.mxu0 %v2688_v27  ;;  %v2700_v27 = vsel %vm457_vm0, %v2695_v39, %v2699_v48  ;;  %318 = vst [vmem:[#allocation2 + $0x2c] sm:$0x1] %v317_v34  ;;  %v3996_v48 = vrot.slane %v13615_v40, 1  ;;  %v2707_v39 = vor.u32 %v2706_v23, %v2702_v52  ;;  %v12164_v52 = vld [vmem:[#allocation3 + $0x48] sm:$0xff]   ;;  %v12184_v23 = vld [vmem:[#allocation3 + $0xe0] sm:$0xff]  }
 0x14a   : > { %4295 = vmatprep.mubr.bf16.mxu1 %v3974_v62  ;;  %10689 = vmatpush3.bf16.msra.mxu0 %v12180_v35  ;;  %v322_v40 = vld [vmem:[#allocation2 + $0x44] sm:$0x1] }
 0x14b   : > { %v10242_v31 = vpop.f32.mrb[16].mxu0  ;;  %v3997_v2 = vsel %vm562_vm1, %v15458_v4, %v3996_v48  ;;  %v323_v48 = vsel %vm13733_vm6, 0, %v322_v40 }
 0x14c   : > { %v10322_v43 = vpop.f32.mrb[16].mxu1  ;;  %v10243_v58 = vpop.f32.mrb[17].mxu0  ;;  %324 = vst [vmem:[#allocation2 + $0x44] sm:$0x1] %v323_v48 }
 0x14d   : > { %v10323_v42 = vpop.f32.mrb[17].mxu1  ;;  %v13772_v38 = vadd.f32 %v10243_v58, %v10242_v31  ;;  %v10245_v30 = vpop.f32.mrb[18].mxu0  ;;  %v13790_v58 = vrot.slane %v2721_v19, 1  ;;  %v2712_v19 = vsel %vm457_vm0, %v2707_v39, %v2711_v61  ;;  %v12186_v61 = vld [vmem:[#allocation3 + $0x128] sm:$0xff]  }
 0x14e   : > { %v13774_v45 = vadd.f32 %v10323_v42, %v10322_v43  ;;  %v10325_v49 = vpop.f32.mrb[18].mxu1  ;;  %v10246_v8 = vpop.f32.mrb[19].mxu0  ;;  %v263_v43 = vld [vmem:[#allocation2 + $0x30] sm:$0x1]  ;;  %v12182_v42 = vld [vmem:[#allocation3 + $0x120] sm:$0xff]  }
 0x14f   : > { %v10326_v62 = vpop.f32.mrb[19].mxu1  ;;  %v13780_v57 = vadd.f32 %v10246_v8, %v10245_v30  ;;  %v264_v7 = vsel %vm13722_vm4, 0, %v263_v43  ;;  %10690 = vmatprep.subr.bf16.mxu0 %v12182_v42  ;;  %v13802_v43 = vld [vmem:[%s12741_s10 + $0xb4] sm:$0xff]   ;;  %v3991_v42 = vsel %vm562_vm1, %v3989_v63, %v3990_v51  ;;  %v2719_v63 = vor.u32 %v2718_v32, %v2714_v53  ;;  %v12406_v51 = vld [vmem:[%s12741_s10 + $0xbc] ss:$0 sps:$4 sm:$0x11]  }
 0x150   : > { %v13784_v31 = vadd.f32 %v10326_v62, %v10325_v49  ;;  %3645 = vmatmul.mubr.bf16.gmra.mrb[124].mxu0 %v12403_v9  ;;  %v12163_v49 = vld [vmem:[#allocation3] sm:$0xff]   ;;  %265 = vst [vmem:[#allocation2 + $0x30] sm:$0x1] %v264_v7  ;;  %v12165_v9 = vld [vmem:[#allocation3 + $0x8] sm:$0xff]  }
 0x151   : > { %4296 = vmatmul.mubr.bf16.gmra.mrb[92].mxu1 %v13677_v20  ;;  %3652 = vmatprep.mubr.bf16.mxu0 %v2700_v27 }
 0x152   : > { %11338 = vmatprep.mubr.bf16.mxu1 %v13680_v5  ;;  %10691 = vmatpush3.bf16.msra.mxu0 %v12184_v23  ;;  %v2726_v5 = vshrl.u32 %v13802_v43, 16  ;;  %v12188_v23 = vld [vmem:[#allocation3 + $0xe8] sm:$0xff]  }
 0x153   : > { %v10248_v59 = vpop.f32.mrb[20].mxu0  ;;  %10692 = vmatprep.subr.bf16.mxu0 %v12186_v61  ;;  %v3994_v61 = vsel %vm562_vm1, %v3992_v12, %v3993_v6  ;;  %v12192_v6 = vld [vmem:[#allocation3 + $0x130] sm:$0xff]  }
 0x154   : > { %v10328_v30 = vpop.f32.mrb[20].mxu1  ;;  %v10249_v50 = vpop.f32.mrb[21].mxu0 }
 0x155   : > { %v10329_v15 = vpop.f32.mrb[21].mxu1  ;;  %v13794_v27 = vadd.f32 %v10249_v50, %v10248_v59  ;;  %v10251_v8 = vpop.f32.mrb[22].mxu0  ;;  %v2728_v59 = vshll.u32 %v13802_v43, 16 }
 0x156   : > { %v13797_v34 = vadd.f32 %v10329_v15, %v10328_v30  ;;  %v10331_v62 = vpop.f32.mrb[22].mxu1  ;;  %v10252_v35 = vpop.f32.mrb[23].mxu0  ;;  %v319_v30 = vld [vmem:[#allocation2 + $0x38] sm:$0x1]  ;;  %v12405_v15 = vld [vmem:[%s12741_s10 + $0x90] sm:$0xff]   ;;  %10693 = vmatpush3.bf16.msra.mxu0 %v12188_v23 }
 0x157   : > { %v10332_v7 = vpop.f32.mrb[23].mxu1  ;;  %v13810_v50 = vadd.f32 %v10252_v35, %v10251_v8  ;;  %v320_v46 = vsel %vm13733_vm6, 0, %v319_v30  ;;  %v2733_v8 = vshll.u32 %v12406_v51, 16  ;;  %v2730_v35 = vrot.slane %v2728_v59, 1  ;;  %10694 = vmatprep.subr.bf16.mxu0 %v12192_v6 }
 0x158   : > { %v13812_v39 = vadd.f32 %v10332_v7, %v10331_v62  ;;  %3653 = vmatmul.mubr.bf16.gmra.mrb[128].mxu0 %v12405_v15  ;;  %321 = vst [vmem:[#allocation2 + $0x38] sm:$0x1] %v320_v46  ;;  %v4001_v7 = vrot.slane %v13653_v29, 1  ;;  %v4002_v15 = vrot.slane %v13667_v60, 1  ;;  %v307_v46 = vld [vmem:[#allocation2 + $0x8] sm:$0x1] }
 0x159   : > { %11339 = vmatmul.mubr.bf16.vlgmr.msra.gmra.mrb[48].mxu1 %v13683_v16  ;;  %3660 = vmatprep.mubr.bf16.mxu0 %v2712_v19  ;;  %v12169_v16 = vld [vmem:[#allocation3 + $0x10] sm:$0xff]   ;;  %v251_v19 = vld [vmem:[#allocation2] sm:$0x1]  ;;  %v308_v59 = vsel %vm13733_vm6, 0, %v307_v46  ;;  %v2731_v41 = vor.u32 %v2730_v35, %v2726_v5  ;;  %v272_v35 = vld [vmem:[#allocation2 + $0x54] sm:$0x1] }
 0x15a   : > { %11342 = vmatprep.mubr.bf16.mxu1 %v3991_v42  ;;  %10763 = vmatpush3.bf16.msra.mxu1 %v12163_v49  ;;  %v252_v49 = vsel %vm13722_vm4, 0, %v251_v19  ;;  %309 = vst [vmem:[#allocation2 + $0x8] sm:$0x1] %v308_v59  ;;  %v12175_v59 = vld [vmem:[#allocation3 + $0x60] sm:$0xff]   ;;  %v15460_v6 = vrot.slane %v13624_v17, 1  ;;  %v4003_v17 = vsel %vm562_vm1, %v4001_v7, %v4002_v15 }
 0x15b   : > { %v10254_v62 = vpop.f32.mrb[24].mxu0  ;;  %10764 = vmatprep.subr.bf16.mxu1 %v12164_v52  ;;  %253 = vst [vmem:[#allocation2] sm:$0x1] %v252_v49  ;;  %v275_v29 = vld [vmem:[#allocation2 + $0x60] sm:$0x1]  ;;  %v13884_v7 = vld [vmem:[#allocation3 + $0x140] sm:$0xff]  }
 0x15c   : > { %v10334_v30 = vpop.f32.mrb[24].mxu1  ;;  %v10255_v55 = vpop.f32.mrb[25].mxu0 }
 0x15d   : > { %v10335_v42 = vpop.f32.mrb[25].mxu1  ;;  %v13822_v53 = vadd.f32 %v10255_v55, %v10254_v62  ;;  %v10257_v32 = vpop.f32.mrb[26].mxu0  ;;  %v2724_v55 = vsel %vm457_vm0, %v2719_v63, %v13790_v58  ;;  %v266_v62 = vld [vmem:[#allocation2 + $0x3c] sm:$0x1]  ;;  %v2735_v63 = vrot.slane %v2733_v8, 1 }
 0x15e   : > { %v13828_v51 = vadd.f32 %v10335_v42, %v10334_v30  ;;  %v10337_v52 = vpop.f32.mrb[26].mxu1  ;;  %v10258_v23 = vpop.f32.mrb[27].mxu0  ;;  %10765 = vmatpush3.bf16.msra.mxu1 %v12165_v9  ;;  %v12171_v30 = vld [vmem:[#allocation3 + $0x58] sm:$0xff]   ;;  %v267_v12 = vsel %vm13722_vm4, 0, %v266_v62  ;;  %v12407_v9 = vld [vmem:[%s12741_s10 + $0x9c] sm:$0xff]  }
 0x15f   : > { %v10338_v19 = vpop.f32.mrb[27].mxu1  ;;  %v13837_v46 = vadd.f32 %v10258_v23, %v10257_v32  ;;  %10766 = vmatprep.subr.bf16.mxu1 %v12167_v28  ;;  %v12173_v42 = vld [vmem:[#allocation3 + $0x18] sm:$0xff]   ;;  %268 = vst [vmem:[#allocation2 + $0x3c] sm:$0x1] %v267_v12  ;;  %v12193_v32 = vld [vmem:[#allocation3 + $0xf0] sm:$0xff]   ;;  %v15459_v12 = vrot.slane %v13639_v0, 1  ;;  %v2736_v40 = vsel %vm457_vm0, %v2731_v41, %v2735_v63 }
 0x160   : > { %v13846_v58 = vadd.f32 %v10338_v19, %v10337_v52  ;;  %3661 = vmatmul.mubr.bf16.gmra.mrb[132].mxu0 %v12407_v9  ;;  %v12194_v28 = vld [vmem:[#allocation3 + $0x138] sm:$0xff]   ;;  %v269_v52 = vld [vmem:[#allocation2 + $0x48] sm:$0x1]  ;;  %v12177_v19 = vld [vmem:[#allocation3 + $0x20] sm:$0xff]   ;;  %v273_v63 = vsel %vm13722_vm4, 0, %v272_v35  ;;  %v4004_v35 = vrot.slane %v13677_v20, 1 }
 0x161   : > { %11343 = vmatmul.mubr.bf16.gmra.mrb[52].mxu1 %v3994_v61  ;;  %3668 = vmatprep.mubr.bf16.mxu0 %v2724_v55  ;;  %v325_v8 = vld [vmem:[#allocation2 + $0x50] sm:$0x1]  ;;  %v270_v61 = vsel %vm13722_vm4, 0, %v269_v52  ;;  %v4000_v9 = vsel %vm562_vm1, %v15460_v6, %v15459_v12  ;;  %v12179_v0 = vld [vmem:[#allocation3 + $0x68] sm:$0xff]   ;;  %274 = vst [vmem:[#allocation2 + $0x54] sm:$0x1] %v273_v63 }
 0x162   : > { %11346 = vmatprep.mubr.bf16.mxu1 %v3997_v2  ;;  %10767 = vmatpush3.bf16.msra.mxu1 %v12169_v16  ;;  %v326_v5 = vsel %vm13733_vm6, 0, %v325_v8  ;;  %271 = vst [vmem:[#allocation2 + $0x48] sm:$0x1] %v270_v61  ;;  %v13865_v48 = vld [vmem:[#allocation2] sm:$0xff]   ;;  %v12195_v8 = vld [vmem:[#allocation3 + $0xf8] sm:$0xff]  }
 0x163   : > { %v10260_v49 = vpop.f32.mrb[28].mxu0  ;;  %10768 = vmatprep.subr.bf16.mxu1 %v12171_v30  ;;  %10695 = vmatpush3.bf16.msra.mxu0 %v12193_v32  ;;  %327 = vst [vmem:[#allocation2 + $0x50] sm:$0x1] %v326_v5  ;;  %v4813_v61 = vshll.u32 %v13865_v48, 16  ;;  %v331_v5 = vld [vmem:[#allocation2 + $0x68] sm:$0x1] }
 0x164   : > { %v10340_v23 = vpop.f32.mrb[28].mxu1  ;;  %v10261_v62 = vpop.f32.mrb[29].mxu0  ;;  %10696 = vmatprep.subr.bf16.mxu0 %v12194_v28  ;;  %v332_v6 = vsel %vm13733_vm6, 0, %v331_v5 }
 0x165   : > { %v10341_v16 = vpop.f32.mrb[29].mxu1  ;;  %v13855_v55 = vadd.f32 %v10261_v62, %v10260_v49  ;;  %v10263_v4 = vpop.f32.mrb[30].mxu0  ;;  %v13867_v49 = vld [vmem:[#allocation2 + $0x8] ss:$0 sps:$4 sm:$0x11]   ;;  %v4811_v62 = vshrl.u32 %v13865_v48, 16 }
 0x166   : > { %v13857_v2 = vadd.f32 %v10341_v16, %v10340_v23  ;;  %v10343_v30 = vpop.f32.mrb[30].mxu1  ;;  %v10264_v32 = vpop.f32.mrb[31].mxu0  ;;  %10769 = vmatpush3.bf16.msra.mxu1 %v12173_v42  ;;  %v328_v42 = vld [vmem:[#allocation2 + $0x5c] sm:$0x1]  ;;  %v12408_v23 = vld [vmem:[%s12741_s10 + $0xa8] sm:$0xff]   ;;  %v4818_v60 = vshll.u32 %v13867_v49, 16 }
 0x167   : > { %v10344_v28 = vpop.f32.mrb[31].mxu1  ;;  %v13869_v52 = vadd.f32 %v10264_v32, %v10263_v4  ;;  %10770 = vmatprep.subr.bf16.mxu1 %v12175_v59  ;;  %v329_v15 = vsel %vm13733_vm6, 0, %v328_v42  ;;  %v276_v59 = vsel %vm13722_vm4, 0, %v275_v29  ;;  %v4005_v16 = vrot.slane %v13692_v24, 1  ;;  %v12181_v4 = vld [vmem:[#allocation3 + $0x28] sm:$0xff]   ;;  %10697 = vmatpush3.bf16.msra.mxu0 %v12195_v8  ;;  %v12185_v8 = vld [vmem:[#allocation3 + $0x30] sm:$0xff]  }
 0x168   : > { %v13878_v41 = vadd.f32 %v10344_v28, %v10343_v30  ;;  %3669 = vmatmul.mubr.bf16.gmra.mrb[136].mxu0 %v12408_v23  ;;  %v12183_v30 = vld [vmem:[#allocation3 + $0x70] sm:$0xff]   ;;  %v4815_v12 = vrot.slane %v4813_v61, 1  ;;  %330 = vst [vmem:[#allocation2 + $0x5c] sm:$0x1] %v329_v15  ;;  %277 = vst [vmem:[#allocation2 + $0x60] sm:$0x1] %v276_v59  ;;  %11354 = vmatprep.subr.bf16.mxu0 %v13884_v7 }
 0x169   : > { %11347 = vmatmul.mubr.bf16.gmra.mrb[56].mxu1 %v4000_v9  ;;  %3676 = vmatprep.mubr.bf16.mxu0 %v2736_v40  ;;  %v4820_v32 = vrot.slane %v4818_v60, 1  ;;  %333 = vst [vmem:[#allocation2 + $0x68] sm:$0x1] %v332_v6 }
 0x16a   : > { %11350 = vmatprep.mubr.bf16.mxu1 %v4003_v17  ;;  %10771 = vmatpush3.bf16.msra.mxu1 %v12177_v19  ;;  %v4816_v20 = vor.u32 %v4815_v12, %v4811_v62  ;;  %v12187_v62 = vld [vmem:[#allocation3 + $0x78] sm:$0xff]  }
 0x16b   : > { %v11180_v9 = vpop.f32.mrb[32].mxu0  ;;  %10772 = vmatprep.subr.bf16.mxu1 %v12179_v0  ;;  %v4006_v0 = vsel %vm562_vm1, %v4004_v35, %v4005_v16 }
 0x16c   : > { %v1209_v40 = vadd.f32 %v11180_v9, %v13689_v33  ;;  %v1200_v28 = vpop.f32.mrb[33].mxu0  ;;  %v4821_v61 = vsel %vm457_vm0, %v4816_v20, %v4820_v32 }
 0x16d   : > { %v1201_v24 = vadd.f32 %v13646_v1, %v1200_v28  ;;  %v11181_v19 = vpop.f32.mrb[34].mxu0 }
 0x16e   : > { %v13898_v17 = vadd.f32 %v13694_v25, %v1209_v40  ;;  %v1212_v63 = vadd.f32 %v11181_v19, %v13699_v47  ;;  %v1203_v42 = vpop.f32.mrb[35].mxu0  ;;  %10773 = vmatpush3.bf16.msra.mxu1 %v12181_v4  ;;  %v12189_v47 = vld [vmem:[#allocation3 + $0x38] sm:$0xff]  }
 0x16f   : > { %v1442_v23 = vadd.f32 %v13648_v14, %v1201_v24  ;;  %v1204_v33 = vadd.f32 %v13657_v54, %v1203_v42  ;;  %10774 = vmatprep.subr.bf16.mxu1 %v12183_v30 }
 0x170   : > { %v13906_v1 = vadd.f32 %v13701_v18, %v1212_v63  ;;  %3677 = vmatmul.mubr.bf16.gmra.mrb[140].mxu0 %v13802_v43 }
 0x171   : > { %v1445_v25 = vadd.f32 %v13663_v10, %v1204_v33  ;;  %11351 = vmatmul.mubr.bf16.gmra.mrb[60].mxu1 %v4006_v0 }
 0x172   : > { %10775 = vmatpush3.bf16.msra.mxu1 %v12185_v8  ;;  %5789 = vmatprep.mubr.bf16.mxu1 %v4821_v61 }
 0x173   : > { %v11184_v60 = vpop.f32.mrb[36].mxu0  ;;  %10776 = vmatprep.subr.bf16.mxu1 %v12187_v62 }
 0x174   : > { %v1225_v14 = vadd.f32 %v11184_v60, %v13747_v22  ;;  %v1216_v54 = vpop.f32.mrb[37].mxu0 }
 0x175   : > { %v1217_v29 = vadd.f32 %v13714_v56, %v1216_v54  ;;  %v11185_v15 = vpop.f32.mrb[38].mxu0 }
 0x176   : > { %v13913_v59 = vadd.f32 %v13750_v3, %v1225_v14  ;;  %v1228_v18 = vadd.f32 %v11185_v15, %v13755_v11  ;;  %v1219_v43 = vpop.f32.mrb[39].mxu0  ;;  %10777 = vmatpush3.bf16.msra.mxu1 %v12189_v47 }
 0x177   : > { %v13917_v10 = vadd.f32 %v13716_v44, %v1217_v29  ;;  %v1220_v5 = vadd.f32 %v13726_v26, %v1219_v43 }
 0x178   : > { %v13921_v35 = vadd.f32 %v13760_v36, %v1228_v18 }
 0x179   : > { %v13924_v22 = vadd.f32 %v13737_v37, %v1220_v5  ;;  %5790 = vmatmul.mubr.bf16.vlgmr.msra.gmra.mrb[96].mxu1 %v13865_v48 }
 0x17b   : > { %v11188_v56 = vpop.f32.mrb[40].mxu0 }
 0x17c   : > { %v1241_v3 = vadd.f32 %v11188_v56, %v13794_v27  ;;  %v1232_v16 = vpop.f32.mrb[41].mxu0 }
 0x17d   : > { %v1233_v11 = vadd.f32 %v13772_v38, %v1232_v16  ;;  %v11189_v4 = vpop.f32.mrb[42].mxu0  ;;  %v12242_v16 = vld [vmem:[#allocation3 + $0x100] sm:$0xff]  }
 0x17e   : > { %v13930_v44 = vadd.f32 %v13797_v34, %v1241_v3  ;;  %v1244_v26 = vadd.f32 %v11189_v4, %v13810_v50  ;;  %v1235_v30 = vpop.f32.mrb[43].mxu0  ;;  %10922 = vmatprep.subr.bf16.mxu1 %v12242_v16  ;;  %v2495_v16 = vld [vmem:[#allocation2 + $0x18] sm:$0xf] }
 0x17f   : > { %v13934_v36 = vadd.f32 %v13774_v45, %v1233_v11  ;;  %v1236_v37 = vadd.f32 %v13780_v57, %v1235_v30  ;;  %v2488_v30 = vld [vmem:[#allocation2 + $0xc] sm:$0xf] }
 0x180   : > { %v13938_v12 = vadd.f32 %v13812_v39, %v1244_v26 }
 0x181   : > { %v13941_v27 = vadd.f32 %v13784_v31, %v1236_v37 }
 0x183   : > { %v11192_v6 = vpop.f32.mrb[44].mxu0 }
 0x184   : > { %v1257_v38 = vadd.f32 %v11192_v6, %v13855_v55  ;;  %v1248_v9 = vpop.f32.mrb[45].mxu0 }
 0x185   : > { %v1249_v34 = vadd.f32 %v13822_v53, %v1248_v9  ;;  %v11193_v32 = vpop.f32.mrb[46].mxu0 }
 0x186   : > { %v13946_v50 = vadd.f32 %v13857_v2, %v1257_v38  ;;  %v1260_v45 = vadd.f32 %v11193_v32, %v13869_v52  ;;  %v1251_v40 = vpop.f32.mrb[47].mxu0  ;;  %v13962_v52 = vld [vmem:[%s15436_s3] ss:$0 sm:$0xff] }
 0x187   : > { %v13950_v57 = vadd.f32 %v13828_v51, %v1249_v34  ;;  %v1252_v39 = vadd.f32 %v13837_v46, %v1251_v40  ;;  %v2492_v40 = vld [vmem:[#allocation2 + $0x14] sm:$0x1] }
 0x188   : > { %v13954_v31 = vadd.f32 %v13878_v41, %v1260_v45  ;;  %v12243_v45 = vld [vmem:[#allocation3 + $0xc0] sm:$0xff]  }
 0x189   : > { %v13957_v55 = vadd.f32 %v13846_v58, %v1252_v39  ;;  %10923 = vmatpush3.bf16.msra.mxu1 %v12243_v45 }
 0x18b   : > { %v10378_v28 = vpop.f32.mrb[48].mxu0 }
 0x18c   : > { %v11244_v53 = vpop.f32.mrb[32].mxu1  ;;  %v10379_v20 = vpop.f32.mrb[49].mxu0 }
 0x18d   : > { %v10380_v24 = vadd.f32 %v10379_v20, %v10378_v28  ;;  %v2158_v2 = vpop.f32.mrb[33].mxu1  ;;  %v10381_v19 = vpop.f32.mrb[50].mxu0  ;;  %v4915_v20 = vrot.slane %v13867_v49, 1 }
 0x18e   : > { %v11245_v51 = vpop.f32.mrb[34].mxu1  ;;  %v10382_v63 = vpop.f32.mrb[51].mxu0 }
 0x18f   : > { %v11552_v46 = vadd.f32 %v10380_v24, %v1442_v23  ;;  %v10383_v42 = vadd.f32 %v10382_v63, %v10381_v19  ;;  %v2161_v41 = vpop.f32.mrb[35].mxu1 }
 0x191   : > { %v11553_v0 = vadd.f32 %v11552_v46, %v2158_v2  ;;  %v11560_v8 = vadd.f32 %v10383_v42, %v1445_v25 }
 0x193   : > { %v2243_v58 = vadd.f32 %v11553_v0, %v13962_v52  ;;  %v11561_v33 = vadd.f32 %v11560_v8, %v2161_v41  ;;  %v10384_v62 = vpop.f32.mrb[52].mxu0 }
 0x194   : > { %v13965_v61 = vpop.f32.mrb[36].mxu1  ;;  %v10385_v47 = vpop.f32.mrb[53].mxu0 }
 0x195   : > { %v2259_v60 = vmax.f32 %v2243_v58, 0.0  ;;  %v2244_v14 = vadd.f32 %v11561_v33, %v13962_v52  ;;  %v10386_v54 = vadd.f32 %v10385_v47, %v10384_v62  ;;  %v2174_v29 = vpop.f32.mrb[37].mxu1  ;;  %v10387_v15 = vpop.f32.mrb[54].mxu0 }
 0x196   : > { %v13968_v18 = vpop.f32.mrb[38].mxu1  ;;  %v10388_v23 = vpop.f32.mrb[55].mxu0 }
 0x197   : > { %v10002_v43 = vpack.c.bf16 %v2259_v60, %v2259_v60  ;;  %v2260_v5 = vmax.f32 %v2244_v14, 0.0  ;;  %v11548_v25 = vadd.f32 %v10386_v54, %v13898_v17  ;;  %v10389_v56 = vadd.f32 %v10388_v23, %v10387_v15  ;;  %v2177_v3 = vpop.f32.mrb[39].mxu1 }
 0x199   : > { %v2326_v11 = vshrl.u32 %v10002_v43, 16  ;;  %v10003_v4 = vpack.c.bf16 %v2260_v5, %v2260_v5  ;;  %v11549_v26 = vadd.f32 %v11548_v25, %v11244_v53  ;;  %v11556_v37 = vadd.f32 %v10389_v56, %v13906_v1 }
 0x19a   : > { %v2329_v38 = vshll.u32 %v10002_v43, 16  ;;  %v4914_v1 = vrot.slane %v13865_v48, 1  ;;  %v12247_v43 = vld [vmem:[#allocation3 + $0x108] sm:$0xff]  }
 0x19b   : > { %v2328_v6 = vrot.slane %v2326_v11, 7  ;;  %v2334_v9 = vshrl.u32 %v10003_v4, 16  ;;  %v2245_v34 = vadd.f32 %v11549_v26, %v13962_v52  ;;  %v10390_v32 = vpop.f32.mrb[56].mxu0  ;;  %v11557_v39 = vadd.f32 %v11556_v37, %v11245_v51  ;;  %10924 = vmatprep.subr.bf16.mxu1 %v12247_v43 }
 0x19c   : > { %v13978_v28 = vpop.f32.mrb[40].mxu1  ;;  %v10391_v53 = vpop.f32.mrb[57].mxu0  ;;  %v2337_v19 = vshll.u32 %v10003_v4, 16  ;;  %v13994_v58 = vsel %vm562_vm1, %v4914_v1, %v4915_v20 }
 0x19d   : > { %v2331_v24 = vor.u32 %v2329_v38, %v2328_v6  ;;  %v2336_v2 = vrot.slane %v2334_v9, 7  ;;  %v2261_v63 = vmax.f32 %v2245_v34, 0.0  ;;  %v13982_v46 = vpop.f32.mrb[41].mxu1  ;;  %v10393_v42 = vpop.f32.mrb[58].mxu0  ;;  %v2332_v41 = vrot.slane %v2328_v6, 4  ;;  %v12249_v6 = vld [vmem:[#allocation3 + $0xc8] sm:$0xff]  }
 0x19e   : > { %v2246_v0 = vadd.f32 %v11557_v39, %v13962_v52  ;;  %v10392_v48 = vadd.f32 %v10391_v53, %v10390_v32  ;;  %v13991_v8 = vpop.f32.mrb[42].mxu1  ;;  %v10394_v49 = vpop.f32.mrb[59].mxu0  ;;  %v2499_v39 = vld [vmem:[#allocation2 + $0x20] sm:$0x1]  ;;  %10925 = vmatpush3.bf16.msra.mxu1 %v12249_v6 }
 0x19f   : > { %v2489_v33 = vsel %vm13974_vm9, %v2331_v24, %v2488_v30  ;;  %v2339_v62 = vor.u32 %v2337_v19, %v2336_v2  ;;  %v2341_v47 = vrot.slane %v2336_v2, 4  ;;  %v10004_v60 = vpack.c.bf16 %v2261_v63, %v2261_v63  ;;  %v13998_v14 = vpop.f32.mrb[43].mxu1 }
 0x1a0   : > { %2490 = vst [vmem:[#allocation2 + $0xc] sm:$0xf] %v2489_v33  ;;  %v2262_v54 = vmax.f32 %v2246_v0, 0.0  ;;  %v11568_v15 = vadd.f32 %v10392_v48, %v13917_v10  ;;  %v10395_v23 = vadd.f32 %v10394_v49, %v10393_v42 }
 0x1a1   : > { %v2340_v5 = vsel %vm13986_vm10, %v2332_v41, %v2339_v62  ;;  %v2493_v25 = vsel %vm13722_vm4, %v2341_v47, %v2492_v40  ;;  %v2343_v56 = vshrl.u32 %v10004_v60, 16  ;;  %v2346_v37 = vshll.u32 %v10004_v60, 16  ;;  %v12253_v60 = vld [vmem:[#allocation3 + $0x110] sm:$0xff]  }
 0x1a2   : > { %2491 = vst [vmem:[#allocation2 + $0x10] sm:$0xf] %v2340_v5  ;;  %2494 = vst [vmem:[#allocation2 + $0x14] sm:$0x1] %v2493_v25  ;;  %v10005_v11 = vpack.c.bf16 %v2262_v54, %v2262_v54  ;;  %v11569_v4 = vadd.f32 %v11568_v15, %v2174_v29  ;;  %v11576_v26 = vadd.f32 %v10395_v23, %v13924_v22  ;;  %10926 = vmatprep.subr.bf16.mxu1 %v12253_v60 }
 0x1a3   : > { %v2345_v30 = vrot.slane %v2343_v56, 7  ;;  %v10396_v10 = vpop.f32.mrb[60].mxu0 }
 0x1a4   : > { %v2351_v38 = vshrl.u32 %v10005_v11, 16  ;;  %v2247_v9 = vadd.f32 %v11569_v4, %v13962_v52  ;;  %v11577_v34 = vadd.f32 %v11576_v26, %v2177_v3  ;;  %v14007_v32 = vpop.f32.mrb[44].mxu1  ;;  %v10397_v45 = vpop.f32.mrb[61].mxu0  ;;  %v2354_v20 = vshll.u32 %v10005_v11, 16 }
 0x1a5   : > { %v2348_v40 = vor.u32 %v2346_v37, %v2345_v30  ;;  %v10398_v53 = vadd.f32 %v10397_v45, %v10396_v10  ;;  %v14009_v1 = vpop.f32.mrb[45].mxu1  ;;  %v10399_v29 = vpop.f32.mrb[62].mxu0  ;;  %v2349_v42 = vrot.slane %v2345_v30, 4 }
 0x1a6   : > { %v2353_v22 = vrot.slane %v2351_v38, 7  ;;  %v2263_v24 = vmax.f32 %v2247_v9, 0.0  ;;  %v2248_v2 = vadd.f32 %v11577_v34, %v13962_v52  ;;  %v14012_v19 = vpop.f32.mrb[46].mxu1  ;;  %v10400_v63 = vpop.f32.mrb[63].mxu0  ;;  %v12255_v34 = vld [vmem:[#allocation3 + $0xd0] sm:$0xff]  }
 0x1a7   : > { %v2496_v3 = vsel %vm13974_vm9, %v2348_v40, %v2495_v16  ;;  %v11564_v41 = vadd.f32 %v10398_v53, %v13913_v59  ;;  %v10401_v0 = vadd.f32 %v10400_v63, %v10399_v29  ;;  %v14017_v48 = vpop.f32.mrb[47].mxu1  ;;  %10927 = vmatpush3.bf16.msra.mxu1 %v12255_v34 }
 0x1a8   : > { %2497 = vst [vmem:[#allocation2 + $0x18] sm:$0xf] %v2496_v3  ;;  %v2356_v49 = vor.u32 %v2354_v20, %v2353_v22  ;;  %v2358_v33 = vrot.slane %v2353_v22, 4  ;;  %v10006_v62 = vpack.c.bf16 %v2263_v24, %v2263_v24  ;;  %v2264_v47 = vmax.f32 %v2248_v2, 0.0 }
 0x1a9   : > { %v11565_v54 = vadd.f32 %v11564_v41, %v13965_v61  ;;  %v11572_v15 = vadd.f32 %v10401_v0, %v13921_v35  ;;  %v14021_v23 = vld [vmem:[#allocation2 + $0xc] sm:$0xff]   ;;  %v14027_v56 = vld [vmem:[#allocation2 + $0x14] ss:$0 sps:$4 sm:$0x11]   ;;  %v2502_v61 = vld [vmem:[#allocation2 + $0x24] sm:$0xf] }
 0x1aa   : > { %v2357_v43 = vsel %vm13986_vm10, %v2349_v42, %v2356_v49  ;;  %v2500_v59 = vsel %vm13722_vm4, %v2358_v33, %v2499_v39  ;;  %v2360_v5 = vshrl.u32 %v10006_v62, 16  ;;  %v2363_v25 = vshll.u32 %v10006_v62, 16  ;;  %v14029_v16 = vld [vmem:[#allocation2 + $0xc] sm:$0xff]   ;;  %v12199_v60 = vld [vmem:[#allocation2 + $0x14] ss:$0 sps:$4 sm:$0x11]  }
 0x1ab   : > { %2498 = vst [vmem:[#allocation2 + $0x1c] sm:$0xf] %v2357_v43  ;;  %2501 = vst [vmem:[#allocation2 + $0x20] sm:$0x1] %v2500_v59  ;;  %v10007_v11 = vpack.c.bf16 %v2264_v47, %v2264_v47  ;;  %v2249_v35 = vadd.f32 %v11565_v54, %v13962_v52  ;;  %v11573_v4 = vadd.f32 %v11572_v15, %v13968_v18  ;;  %v10402_v26 = vpop.f32.mrb[64].mxu0  ;;  %v5091_v30 = vshrl.u32 %v14021_v23, 16 }
 0x1ac   : > { %v2362_v37 = vrot.slane %v2360_v5, 7  ;;  %v10403_v10 = vpop.f32.mrb[65].mxu0  ;;  %v5093_v6 = vshll.u32 %v14021_v23, 16  ;;  %v5098_v38 = vshll.u32 %v14027_v56, 16  ;;  %v4823_v9 = vshrl.u32 %v14029_v16, 16  ;;  %v12259_v5 = vld [vmem:[#allocation3 + $0x118] sm:$0xff]  }
 0x1ad   : > { %v2368_v45 = vshrl.u32 %v10007_v11, 16  ;;  %v2371_v40 = vshll.u32 %v10007_v11, 16  ;;  %v2265_v39 = vmax.f32 %v2249_v35, 0.0  ;;  %v2250_v53 = vadd.f32 %v11573_v4, %v13962_v52  ;;  %v10405_v29 = vpop.f32.mrb[66].mxu0  ;;  %v2506_v49 = vld [vmem:[#allocation2 + $0x2c] sm:$0x1]  ;;  %10928 = vmatprep.subr.bf16.mxu1 %v12259_v5 }
 0x1ae   : > { %v2365_v22 = vor.u32 %v2363_v25, %v2362_v37  ;;  %v2366_v18 = vrot.slane %v2362_v37, 4  ;;  %v10404_v20 = vadd.f32 %v10403_v10, %v10402_v26  ;;  %v10406_v24 = vpop.f32.mrb[67].mxu0  ;;  %v5095_v2 = vrot.slane %v5093_v6, 1  ;;  %v2509_v37 = vld [vmem:[#allocation2 + $0x30] sm:$0xf] }
 0x1af   : > { %v2370_v63 = vrot.slane %v2368_v45, 7  ;;  %v10008_v42 = vpack.c.bf16 %v2265_v39, %v2265_v39  ;;  %v2266_v3 = vmax.f32 %v2250_v53, 0.0  ;;  %v10407_v41 = vadd.f32 %v10406_v24, %v10405_v29  ;;  %v12222_v39 = vld [vmem:[#allocation3 + $0x150] sm:$0xff]  }
 0x1b0   : > { %v2503_v0 = vsel %vm13974_vm9, %v2365_v22, %v2502_v61  ;;  %v11584_v33 = vadd.f32 %v10404_v20, %v13934_v36  ;;  %v5096_v62 = vor.u32 %v5095_v2, %v5091_v30  ;;  %v5100_v47 = vrot.slane %v5098_v38, 1  ;;  %v12217_v61 = vld [vmem:[#allocation3 + $0x148] sm:$0xff]   ;;  %v2513_v22 = vld [vmem:[#allocation2 + $0x38] sm:$0x1] }
 0x1b1   : > { %2504 = vst [vmem:[#allocation2 + $0x24] sm:$0xf] %v2503_v0  ;;  %v2373_v54 = vor.u32 %v2371_v40, %v2370_v63  ;;  %v2375_v15 = vrot.slane %v2370_v63, 4  ;;  %v2377_v43 = vshrl.u32 %v10008_v42, 16  ;;  %v2380_v59 = vshll.u32 %v10008_v42, 16 }
 0x1b2   : > { %v10009_v25 = vpack.c.bf16 %v2266_v3, %v2266_v3  ;;  %v11585_v11 = vadd.f32 %v11584_v33, %v13982_v46  ;;  %v11592_v35 = vadd.f32 %v10407_v41, %v13941_v27  ;;  %v5101_v4 = vsel %vm457_vm0, %v5096_v62, %v5100_v47  ;;  %v14052_v40 = vld [vmem:[#allocation2 + $0x18] sm:$0xff]   ;;  %v14056_v41 = vld [vmem:[#allocation2 + $0x20] ss:$0 sps:$4 sm:$0x11]  }
 0x1b3   : > { %v2374_v36 = vsel %vm13986_vm10, %v2366_v18, %v2373_v54  ;;  %v2507_v26 = vsel %vm13722_vm4, %v2375_v15, %v2506_v49  ;;  %v2379_v30 = vrot.slane %v2377_v43, 7  ;;  %v10408_v10 = vpop.f32.mrb[68].mxu0  ;;  %5451 = vmatprep.mubr.bf16.mxu0 %v5101_v4  ;;  %v4825_v6 = vshll.u32 %v14029_v16, 16  ;;  %v14062_v47 = vld [vmem:[#allocation2 + $0x18] sm:$0xff]  }
 0x1b4   : > { %2505 = vst [vmem:[#allocation2 + $0x28] sm:$0xf] %v2374_v36  ;;  %2508 = vst [vmem:[#allocation2 + $0x2c] sm:$0x1] %v2507_v26  ;;  %v2385_v46 = vshrl.u32 %v10009_v25, 16  ;;  %v2388_v27 = vshll.u32 %v10009_v25, 16  ;;  %v2251_v38 = vadd.f32 %v11585_v11, %v13962_v52  ;;  %v11593_v34 = vadd.f32 %v11592_v35, %v13998_v14  ;;  %5452 = vmatmul.mubr.bf16.vlgmr.msra.gmra.mrb[144].mxu0 %v14021_v23 }
 0x1b5   : > { %v10409_v45 = vpop.f32.mrb[69].mxu0  ;;  %v2382_v53 = vor.u32 %v2380_v59, %v2379_v30  ;;  %v2383_v29 = vrot.slane %v2379_v30, 4  ;;  %v4827_v18 = vrot.slane %v4825_v6, 1  ;;  %v4830_v20 = vshll.u32 %v12199_v60, 16  ;;  %11355 = vmatpush3.bf16.msra.mxu0 %v13884_v7  ;;  %v12261_v7 = vld [vmem:[#allocation3 + $0xd8] sm:$0xff]  }
 0x1b6   : > { %v10411_v24 = vpop.f32.mrb[70].mxu0  ;;  %v2387_v2 = vrot.slane %v2385_v46, 7  ;;  %v2267_v63 = vmax.f32 %v2251_v38, 0.0  ;;  %v2252_v42 = vadd.f32 %v11593_v34, %v13962_v52  ;;  %v10410_v3 = vadd.f32 %v10409_v45, %v10408_v10  ;;  %11356 = vmatprep.subr.bf16.mxu0 %v12217_v61  ;;  %10929 = vmatpush3.bf16.msra.mxu1 %v12261_v7  ;;  %v14072_v26 = vld [vmem:[#allocation2 + $0x20] ss:$0 sps:$4 sm:$0x11]  }
 0x1b7   : > { %v10412_v14 = vpop.f32.mrb[71].mxu0  ;;  %v2510_v0 = vsel %vm13974_vm9, %v2382_v53, %v2509_v37  ;;  %v4828_v49 = vor.u32 %v4827_v18, %v4823_v9  ;;  %v4832_v33 = vrot.slane %v4830_v20, 1  ;;  %v5103_v11 = vshrl.u32 %v14052_v40, 16  ;;  %v12223_v30 = vld [vmem:[#allocation3 + $0x158] sm:$0xff]   ;;  %v2516_v45 = vld [vmem:[#allocation2 + $0x3c] sm:$0xf] }
 0x1b8   : > { %v10413_v62 = vadd.f32 %v10412_v14, %v10411_v24  ;;  %2511 = vst [vmem:[#allocation2 + $0x30] sm:$0xf] %v2510_v0  ;;  %v2390_v60 = vor.u32 %v2388_v27, %v2387_v2  ;;  %v2392_v54 = vrot.slane %v2387_v2, 4  ;;  %v10010_v15 = vpack.c.bf16 %v2267_v63, %v2267_v63  ;;  %v2520_v24 = vld [vmem:[#allocation2 + $0x44] sm:$0x1] }
 0x1b9   : > { %v2268_v43 = vmax.f32 %v2252_v42, 0.0  ;;  %v4833_v59 = vsel %vm457_vm0, %v4828_v49, %v4832_v33  ;;  %v11580_v5 = vadd.f32 %v10410_v3, %v13930_v44  ;;  %11357 = vmatpush3.bf16.msra.mxu0 %v12217_v61  ;;  %v5105_v10 = vshll.u32 %v14052_v40, 16 }
 0x1ba   : > { %v11588_v25 = vadd.f32 %v10413_v62, %v13938_v12  ;;  %v2391_v9 = vsel %vm13986_vm10, %v2383_v29, %v2390_v60  ;;  %v2514_v35 = vsel %vm13722_vm4, %v2392_v54, %v2513_v22  ;;  %v2394_v4 = vshrl.u32 %v10010_v15, 16  ;;  %5797 = vmatprep.mubr.bf16.mxu1 %v4833_v59  ;;  %11358 = vmatprep.subr.bf16.mxu0 %v12222_v39  ;;  %v12229_v54 = vld [vmem:[#allocation3 + $0x168] sm:$0xff]  }
 0x1bb   : > { %v2397_v36 = vshll.u32 %v10010_v15, 16  ;;  %2512 = vst [vmem:[#allocation2 + $0x34] sm:$0xf] %v2391_v9  ;;  %2515 = vst [vmem:[#allocation2 + $0x38] sm:$0x1] %v2514_v35  ;;  %v10011_v44 = vpack.c.bf16 %v2268_v43, %v2268_v43  ;;  %v11581_v12 = vadd.f32 %v11580_v5, %v13978_v28  ;;  %5798 = vmatmul.mubr.bf16.gmra.mrb[100].mxu1 %v14029_v16  ;;  %v10414_v37 = vpop.f32.mrb[72].mxu0 }
 0x1bc   : > { %v11589_v61 = vadd.f32 %v11588_v25, %v13991_v8  ;;  %v2396_v6 = vrot.slane %v2394_v4, 7  ;;  %v5110_v46 = vshll.u32 %v14056_v41, 16  ;;  %v4835_v27 = vshrl.u32 %v14062_v47, 16  ;;  %v10415_v34 = vpop.f32.mrb[73].mxu0  ;;  %v12228_v8 = vld [vmem:[#allocation3 + $0x160] sm:$0xff]   ;;  %v14088_v25 = vld [vmem:[#allocation2 + $0x24] sm:$0xff]  }
 0x1bd   : > { %v4837_v38 = vshll.u32 %v14062_v47, 16  ;;  %v2402_v53 = vshrl.u32 %v10011_v44, 16  ;;  %v2405_v29 = vshll.u32 %v10011_v44, 16  ;;  %v2253_v28 = vadd.f32 %v11581_v12, %v13962_v52  ;;  %v10417_v22 = vpop.f32.mrb[74].mxu0  ;;  %11359 = vmatpush3.bf16.msra.mxu0 %v12222_v39 }
 0x1be   : > { %v2254_v16 = vadd.f32 %v11589_v61, %v13962_v52  ;;  %v2399_v18 = vor.u32 %v2397_v36, %v2396_v6  ;;  %v2400_v20 = vrot.slane %v2396_v6, 4  ;;  %v5107_v2 = vrot.slane %v5105_v10, 1  ;;  %v10418_v42 = vpop.f32.mrb[75].mxu0  ;;  %11360 = vmatprep.subr.bf16.mxu0 %v12223_v30  ;;  %v14086_v39 = vld [vmem:[#allocation2 + $0x2c] ss:$0 sps:$4 sm:$0x11]  }
 0x1bf   : > { %v5112_v63 = vrot.slane %v5110_v46, 1  ;;  %v2404_v3 = vrot.slane %v2402_v53, 7  ;;  %v2269_v14 = vmax.f32 %v2253_v28, 0.0  ;;  %v4839_v49 = vrot.slane %v4837_v38, 1  ;;  %v14092_v36 = vld [vmem:[#allocation2 + $0x24] sm:$0xff]  }
 0x1c0   : > { %v2270_v0 = vmax.f32 %v2254_v16, 0.0  ;;  %v2517_v33 = vsel %vm13974_vm9, %v2399_v18, %v2516_v45  ;;  %v5108_v62 = vor.u32 %v5107_v2, %v5103_v11  ;;  %v4842_v7 = vshll.u32 %v14072_v26, 16  ;;  %v14101_v38 = vld [vmem:[#allocation2 + $0x2c] ss:$0 sps:$4 sm:$0x11]  }
 0x1c1   : > { %v10416_v60 = vadd.f32 %v10415_v34, %v10414_v37  ;;  %2518 = vst [vmem:[#allocation2 + $0x3c] sm:$0xf] %v2517_v33  ;;  %v2407_v15 = vor.u32 %v2405_v29, %v2404_v3  ;;  %v2409_v43 = vrot.slane %v2404_v3, 4  ;;  %v10012_v59 = vpack.c.bf16 %v2269_v14, %v2269_v14  ;;  %11361 = vmatpush3.bf16.msra.mxu0 %v12223_v30  ;;  %v2523_v30 = vld [vmem:[#allocation2 + $0x48] sm:$0xf] }
 0x1c2   : > { %v10013_v5 = vpack.c.bf16 %v2270_v0, %v2270_v0  ;;  %v5113_v9 = vsel %vm457_vm0, %v5108_v62, %v5112_v63  ;;  %v4840_v35 = vor.u32 %v4839_v49, %v4835_v27  ;;  %v4844_v4 = vrot.slane %v4842_v7, 1  ;;  %11362 = vmatprep.subr.bf16.mxu0 %v12228_v8  ;;  %v12232_v63 = vld [vmem:[#allocation3 + $0x170] sm:$0xff]   ;;  %v12267_v7 = vld [vmem:[#allocation3 + $0x120] sm:$0xff]  }
 0x1c3   : > { %v11600_v11 = vadd.f32 %v10416_v60, %v13950_v57  ;;  %v2408_v44 = vsel %vm13986_vm10, %v2400_v20, %v2407_v15  ;;  %v2521_v12 = vsel %vm13722_vm4, %v2409_v43, %v2520_v24  ;;  %v2411_v61 = vshrl.u32 %v10012_v59, 16  ;;  %5459 = vmatprep.mubr.bf16.mxu0 %v5113_v9  ;;  %v10420_v10 = vpop.f32.mrb[76].mxu0  ;;  %10930 = vmatprep.subr.bf16.mxu1 %v12267_v7  ;;  %v12273_v7 = vld [vmem:[#allocation3 + $0xe8] sm:$0xff]  }
 0x1c4   : > { %v2414_v37 = vshll.u32 %v10012_v59, 16  ;;  %2519 = vst [vmem:[#allocation2 + $0x40] sm:$0xf] %v2408_v44  ;;  %2522 = vst [vmem:[#allocation2 + $0x44] sm:$0x1] %v2521_v12  ;;  %v2419_v6 = vshrl.u32 %v10013_v5, 16  ;;  %v4845_v57 = vsel %vm457_vm0, %v4840_v35, %v4844_v4  ;;  %5460 = vmatmul.mubr.bf16.gmra.mrb[148].mxu0 %v14052_v40  ;;  %v10419_v53 = vadd.f32 %v10418_v42, %v10417_v22 }
 0x1c5   : > { %v2422_v46 = vshll.u32 %v10013_v5, 16  ;;  %v11601_v27 = vadd.f32 %v11600_v11, %v14009_v1  ;;  %v10421_v34 = vpop.f32.mrb[77].mxu0  ;;  %v2413_v45 = vrot.slane %v2411_v61, 7  ;;  %5805 = vmatprep.mubr.bf16.mxu1 %v4845_v57  ;;  %v5115_v29 = vshrl.u32 %v14088_v25, 16  ;;  %11363 = vmatpush3.bf16.msra.mxu0 %v12228_v8  ;;  %v2527_v42 = vld [vmem:[#allocation2 + $0x50] sm:$0x1] }
 0x1c6   : > { %v5117_v28 = vshll.u32 %v14088_v25, 16  ;;  %v10423_v16 = vpop.f32.mrb[78].mxu0  ;;  %v2421_v18 = vrot.slane %v2419_v6, 7  ;;  %5806 = vmatmul.mubr.bf16.gmra.mrb[104].mxu1 %v14062_v47  ;;  %v5122_v1 = vshll.u32 %v14086_v39, 16  ;;  %v4847_v24 = vshrl.u32 %v14092_v36, 16  ;;  %11364 = vmatprep.subr.bf16.mxu0 %v12229_v54  ;;  %v14114_v5 = vld [vmem:[#allocation2 + $0x30] sm:$0xff]  }
 0x1c7   : > { %v2255_v20 = vadd.f32 %v11601_v27, %v13962_v52  ;;  %v10424_v2 = vpop.f32.mrb[79].mxu0  ;;  %v2416_v3 = vor.u32 %v2414_v37, %v2413_v45  ;;  %v2417_v22 = vrot.slane %v2413_v45, 4  ;;  %v11608_v14 = vadd.f32 %v10419_v53, %v13957_v55  ;;  %v14121_v11 = vld [vmem:[#allocation2 + $0x38] ss:$0 sps:$4 sm:$0x11]  }
 0x1c8   : > { %v5119_v0 = vrot.slane %v5117_v28, 1  ;;  %v2424_v49 = vor.u32 %v2422_v46, %v2421_v18  ;;  %v2426_v8 = vrot.slane %v2421_v18, 4  ;;  %v5124_v62 = vrot.slane %v5122_v1, 1  ;;  %v12269_v44 = vld [vmem:[#allocation3 + $0xe0] sm:$0xff]  }
 0x1c9   : > { %v2271_v33 = vmax.f32 %v2255_v20, 0.0  ;;  %v2524_v60 = vsel %vm13974_vm9, %v2416_v3, %v2523_v30  ;;  %v11609_v15 = vadd.f32 %v11608_v14, %v14017_v48  ;;  %v4849_v59 = vshll.u32 %v14092_v36, 16  ;;  %11365 = vmatpush3.bf16.msra.mxu0 %v12229_v54  ;;  %v12233_v48 = vld [vmem:[#allocation3 + $0x178] sm:$0xff]   ;;  %10931 = vmatpush3.bf16.msra.mxu1 %v12269_v44  ;;  %v14130_v18 = vld [vmem:[#allocation2 + $0x38] ss:$0 sps:$4 sm:$0x11]  }
 0x1ca   : > { %v5120_v43 = vor.u32 %v5119_v0, %v5115_v29  ;;  %2525 = vst [vmem:[#allocation2 + $0x48] sm:$0xf] %v2524_v60  ;;  %v2425_v55 = vsel %vm13986_vm10, %v2417_v22, %v2424_v49  ;;  %v2528_v9 = vsel %vm13722_vm4, %v2426_v8, %v2527_v42  ;;  %v4854_v4 = vshll.u32 %v14101_v38, 16  ;;  %11366 = vmatprep.subr.bf16.mxu0 %v12232_v63  ;;  %v14125_v30 = vld [vmem:[#allocation2 + $0x30] sm:$0xff]   ;;  %v12272_v0 = vld [vmem:[#allocation3 + $0x128] sm:$0xff]  }
 0x1cb   : > { %v10014_v35 = vpack.c.bf16 %v2271_v33, %v2271_v33  ;;  %2526 = vst [vmem:[#allocation2 + $0x4c] sm:$0xf] %v2425_v55  ;;  %2529 = vst [vmem:[#allocation2 + $0x50] sm:$0x1] %v2528_v9  ;;  %v2256_v54 = vadd.f32 %v11609_v15, %v13962_v52  ;;  %v4851_v61 = vrot.slane %v4849_v59, 1  ;;  %v10422_v37 = vadd.f32 %v10421_v34, %v10420_v10  ;;  %v14142_v42 = vld [vmem:[#allocation2 + $0x3c] sm:$0xff]  }
 0x1cc   : > { %v5125_v12 = vsel %vm457_vm0, %v5120_v43, %v5124_v62  ;;  %v4856_v57 = vrot.slane %v4854_v4, 1  ;;  %v10425_v27 = vadd.f32 %v10424_v2, %v10423_v16  ;;  %v5127_v28 = vshrl.u32 %v14114_v5, 16  ;;  %v2530_v10 = vld [vmem:[#allocation2 + $0x54] sm:$0xf]  ;;  %v14137_v2 = vpop.f32.mrb[80].mxu0  ;;  %10932 = vmatprep.subr.bf16.mxu1 %v12272_v0 }
 0x1cd   : > { %v2428_v6 = vshrl.u32 %v10014_v35, 16  ;;  %v2431_v46 = vshll.u32 %v10014_v35, 16  ;;  %5467 = vmatprep.mubr.bf16.mxu0 %v5125_v12  ;;  %v2272_v45 = vmax.f32 %v2256_v54, 0.0  ;;  %v4852_v53 = vor.u32 %v4851_v61, %v4847_v24  ;;  %11367 = vmatpush3.bf16.msra.mxu0 %v12232_v63  ;;  %v14144_v14 = vpop.f32.mrb[81].mxu0 }
 0x1ce   : > { %v11596_v29 = vadd.f32 %v10422_v37, %v13946_v50  ;;  %5468 = vmatmul.mubr.bf16.gmra.mrb[152].mxu0 %v14088_v25  ;;  %v11604_v34 = vadd.f32 %v10425_v27, %v13954_v31  ;;  %v5129_v1 = vshll.u32 %v14114_v5, 16  ;;  %v5134_v16 = vshll.u32 %v14121_v11, 16  ;;  %11368 = vmatprep.subr.bf16.mxu0 %v12233_v48  ;;  %v14146_v31 = vld [vmem:[#allocation3 + $0x80] sm:$0xff]   ;;  %v14151_v62 = vld [vmem:[#allocation2 + $0x44] ss:$0 sps:$4 sm:$0x11]  }
 0x1cf   : > { %v14132_v20 = vrot.slane %v2428_v6, 7  ;;  %v10015_v24 = vpack.c.bf16 %v2272_v45, %v2272_v45  ;;  %v4857_v50 = vsel %vm457_vm0, %v4852_v53, %v4856_v57  ;;  %v4859_v22 = vshrl.u32 %v14125_v30, 16  ;;  %10933 = vmatpush3.bf16.msra.mxu1 %v12273_v7  ;;  %v2534_v37 = vld [vmem:[#allocation2 + $0x5c] sm:$0x1] }
 0x1d0   : > { %v11597_v3 = vadd.f32 %v11596_v29, %v14007_v32  ;;  %5813 = vmatprep.mubr.bf16.mxu1 %v4857_v50  ;;  %v11605_v63 = vadd.f32 %v11604_v34, %v14012_v19  ;;  %v5131_v33 = vrot.slane %v5129_v1, 1  ;;  %v14153_v32 = vpop.f32.mrb[82].mxu0  ;;  %v5136_v59 = vrot.slane %v5134_v16, 1  ;;  %v14168_v27 = vld [vmem:[#allocation2 + $0x3c] sm:$0xff]  }
 0x1d1   : > { %v2433_v49 = vor.u32 %v2431_v46, %v14132_v20  ;;  %v2434_v8 = vrot.slane %v14132_v20, 4  ;;  %v2436_v60 = vshrl.u32 %v10015_v24, 16  ;;  %v2439_v15 = vshll.u32 %v10015_v24, 16  ;;  %5814 = vmatmul.mubr.bf16.gmra.mrb[108].mxu1 %v14092_v36  ;;  %v14157_v55 = vpop.f32.mrb[83].mxu0  ;;  %11369 = vmatpush3.bf16.msra.mxu0 %v12233_v48 }
 0x1d2   : > { %v2257_v43 = vadd.f32 %v11597_v3, %v13962_v52  ;;  %v2258_v19 = vadd.f32 %v11605_v63, %v13962_v52  ;;  %v5132_v35 = vor.u32 %v5131_v33, %v5127_v28  ;;  %v4861_v4 = vshll.u32 %v14125_v30, 16  ;;  %11386 = vmatprep.subr.bf16.mxu0 %v14146_v31  ;;  %v14172_v1 = vld [vmem:[#allocation2 + $0x44] ss:$0 sps:$4 sm:$0x11]   ;;  %v14174_v16 = vld [vmem:[#allocation2 + $0x48] sm:$0xff]  }
 0x1d3   : > { %v2531_v9 = vsel %vm13974_vm9, %v2433_v49, %v2530_v10  ;;  %v2438_v44 = vrot.slane %v2436_v60, 7  ;;  %v4866_v12 = vshll.u32 %v14130_v18, 16  ;;  %v5139_v61 = vshrl.u32 %v14142_v42, 16  ;;  %v14180_v49 = vld [vmem:[#allocation2 + $0x50] ss:$0 sps:$4 sm:$0x11]  }
 0x1d4   : > { %2532 = vst [vmem:[#allocation2 + $0x54] sm:$0xf] %v2531_v9  ;;  %v2273_v54 = vmax.f32 %v2257_v43, 0.0  ;;  %v2274_v6 = vmax.f32 %v2258_v19, 0.0  ;;  %v5137_v46 = vsel %vm457_vm0, %v5132_v35, %v5136_v59  ;;  %v4863_v57 = vrot.slane %v4861_v4, 1  ;;  %v10464_v63 = vpop.f32.mrb[84].mxu0 }
 0x1d5   : > { %v5141_v52 = vshll.u32 %v14142_v42, 16  ;;  %v2441_v48 = vor.u32 %v2439_v15, %v2438_v44  ;;  %v2443_v45 = vrot.slane %v2438_v44, 4  ;;  %5475 = vmatprep.mubr.bf16.mxu0 %v5137_v46  ;;  %v4868_v29 = vrot.slane %v4866_v12, 1  ;;  %v2537_v33 = vld [vmem:[#allocation2 + $0x60] sm:$0xf]  ;;  %v10465_v59 = vpop.f32.mrb[85].mxu0 }
 0x1d6   : > { %v10016_v53 = vpack.c.bf16 %v2273_v54, %v2273_v54  ;;  %v10017_v28 = vpack.c.bf16 %v2274_v6, %v2274_v6  ;;  %v4864_v20 = vor.u32 %v4863_v57, %v4859_v22  ;;  %5476 = vmatmul.mubr.bf16.gmra.mrb[156].mxu0 %v14114_v5  ;;  %v5146_v34 = vshll.u32 %v14151_v62, 16  ;;  %v14182_v22 = vld [vmem:[#allocation2 + $0x48] sm:$0xff]   ;;  %v14187_v54 = vld [vmem:[#allocation2 + $0x50] ss:$0 sps:$4 sm:$0x11]   ;;  %v10467_v12 = vpop.f32.mrb[86].mxu0 }
 0x1d7   : > { %v5143_v10 = vrot.slane %v5141_v52, 1  ;;  %v2442_v24 = vsel %vm13986_vm10, %v2434_v8, %v2441_v48  ;;  %v2535_v50 = vsel %vm13722_vm4, %v2443_v45, %v2534_v37  ;;  %v12276_v8 = vld [vmem:[#allocation3 + $0x130] sm:$0xff]   ;;  %v4871_v4 = vshrl.u32 %v14168_v27, 16 }
 0x1d8   : > { %v2445_v3 = vshrl.u32 %v10016_v53, 16  ;;  %v2448_v0 = vshll.u32 %v10016_v53, 16  ;;  %2533 = vst [vmem:[#allocation2 + $0x58] sm:$0xf] %v2442_v24  ;;  %2536 = vst [vmem:[#allocation2 + $0x5c] sm:$0x1] %v2535_v50  ;;  %v4869_v15 = vsel %vm457_vm0, %v4864_v20, %v4868_v29  ;;  %10934 = vmatprep.subr.bf16.mxu1 %v12276_v8 }
 0x1d9   : > { %v2453_v7 = vshrl.u32 %v10017_v28, 16  ;;  %v2456_v60 = vshll.u32 %v10017_v28, 16  ;;  %v5144_v43 = vor.u32 %v5143_v10, %v5139_v61  ;;  %v2541_v19 = vld [vmem:[#allocation2 + $0x68] sm:$0x1]  ;;  %5821 = vmatprep.mubr.bf16.mxu1 %v4869_v15  ;;  %v5148_v35 = vrot.slane %v5146_v34, 1  ;;  %v10468_v29 = vpop.f32.mrb[87].mxu0 }
 0x1da   : > { %v2447_v9 = vrot.slane %v2445_v3, 7  ;;  %v4873_v44 = vshll.u32 %v14168_v27, 16  ;;  %v12277_v37 = vld [vmem:[#allocation3 + $0xf0] sm:$0xff]   ;;  %5822 = vmatmul.mubr.bf16.gmra.mrb[112].mxu1 %v14125_v30  ;;  %v4878_v46 = vshll.u32 %v14172_v1, 16  ;;  %v5151_v61 = vshrl.u32 %v14174_v16, 16 }
 0x1db   : > { %v2455_v6 = vrot.slane %v2453_v7, 7  ;;  %v5153_v57 = vshll.u32 %v14174_v16, 16  ;;  %v5149_v45 = vsel %vm457_vm0, %v5144_v43, %v5148_v35  ;;  %10935 = vmatpush3.bf16.msra.mxu1 %v12277_v37  ;;  %v10470_v24 = vpop.f32.mrb[88].mxu0  ;;  %v5158_v7 = vshll.u32 %v14180_v49, 16 }
 0x1dc   : > { %v2450_v52 = vor.u32 %v2448_v0, %v2447_v9  ;;  %v2451_v48 = vrot.slane %v2447_v9, 4  ;;  %v4875_v53 = vrot.slane %v4873_v44, 1  ;;  %5483 = vmatprep.mubr.bf16.mxu0 %v5149_v45  ;;  %v4880_v10 = vrot.slane %v4878_v46, 1  ;;  %v10471_v15 = vpop.f32.mrb[89].mxu0 }
 0x1dd   : > { %v2458_v28 = vor.u32 %v2456_v60, %v2455_v6  ;;  %v2460_v20 = vrot.slane %v2455_v6, 4  ;;  %v5155_v34 = vrot.slane %v5153_v57, 1  ;;  %v4883_v0 = vshrl.u32 %v14182_v22, 16  ;;  %v10473_v35 = vpop.f32.mrb[90].mxu0 }
 0x1de   : > { %v2538_v50 = vsel %vm13974_vm9, %v2450_v52, %v2537_v33  ;;  %v4876_v3 = vor.u32 %v4875_v53, %v4871_v4  ;;  %5484 = vmatmul.mubr.bf16.gmra.mrb[160].mxu0 %v14142_v42  ;;  %v4885_v9 = vshll.u32 %v14182_v22, 16  ;;  %v5160_v4 = vrot.slane %v5158_v7, 1 }
 0x1df   : > { %2539 = vst [vmem:[#allocation2 + $0x60] sm:$0xf] %v2538_v50  ;;  %v2459_v43 = vsel %vm13986_vm10, %v2451_v48, %v2458_v28  ;;  %v2542_v60 = vsel %vm13722_vm4, %v2460_v20, %v2541_v19  ;;  %v5156_v8 = vor.u32 %v5155_v34, %v5151_v61  ;;  %v4890_v44 = vshll.u32 %v14187_v54, 16  ;;  %v14210_v19 = vld [vmem:[#allocation2 + $0x54] sm:$0xff]  }
 0x1e0   : > { %2540 = vst [vmem:[#allocation2 + $0x64] sm:$0xf] %v2459_v43  ;;  %2543 = vst [vmem:[#allocation2 + $0x68] sm:$0x1] %v2542_v60  ;;  %v4881_v33 = vsel %vm457_vm0, %v4876_v3, %v4880_v10  ;;  %v14208_v37 = vadd.f32 %v14144_v14, %v14137_v2  ;;  %v4887_v6 = vrot.slane %v4885_v9, 1  ;;  %v14214_v61 = vld [vmem:[#allocation2 + $0x54] sm:$0xff]   ;;  %v14218_v57 = vadd.f32 %v14157_v55, %v14153_v32 }
 0x1e1   : > { %5829 = vmatprep.mubr.bf16.mxu1 %v4881_v33  ;;  %v14212_v46 = vld [vmem:[#allocation2 + $0x5c] ss:$0 sps:$4 sm:$0x11]   ;;  %v14220_v52 = vadd.f32 %v10465_v59, %v10464_v63  ;;  %v14222_v48 = vadd.f32 %v10468_v29, %v10467_v12  ;;  %v5161_v45 = vsel %vm457_vm0, %v5156_v8, %v5160_v4  ;;  %v5194_v2 = vrot.slane %v14021_v23, 1  ;;  %v10474_v12 = vpop.f32.mrb[91].mxu0 }
 0x1e2   : > { %v14226_v14 = vadd.f32 %v10471_v15, %v10470_v24  ;;  %5830 = vmatmul.mubr.bf16.gmra.mrb[116].mxu1 %v14168_v27  ;;  %5491 = vmatprep.mubr.bf16.mxu0 %v5161_v45  ;;  %v4888_v53 = vor.u32 %v4887_v6, %v4883_v0  ;;  %v4892_v28 = vrot.slane %v4890_v44, 1  ;;  %v5165_v20 = vshll.u32 %v14210_v19, 16  ;;  %v14231_v55 = vld [vmem:[#allocation2 + $0x5c] ss:$0 sps:$4 sm:$0x11]  }
 0x1e3   : > { %v5170_v32 = vshll.u32 %v14212_v46, 16  ;;  %v4897_v63 = vshll.u32 %v14214_v61, 16  ;;  %v5195_v59 = vrot.slane %v14027_v56, 1  ;;  %v5163_v29 = vshrl.u32 %v14210_v19, 16  ;;  %v10476_v24 = vpop.f32.mrb[92].mxu0 }
 0x1e4   : > { %v4893_v23 = vsel %vm457_vm0, %v4888_v53, %v4892_v28  ;;  %v5167_v10 = vrot.slane %v5165_v20, 1  ;;  %v4902_v34 = vshll.u32 %v14231_v55, 16  ;;  %v4895_v50 = vshrl.u32 %v14214_v61, 16  ;;  %v10477_v0 = vpop.f32.mrb[93].mxu0 }
 0x1e5   : > { %5837 = vmatprep.mubr.bf16.mxu1 %v4893_v23  ;;  %v4899_v3 = vrot.slane %v4897_v63, 1  ;;  %v14240_v7 = vsel %vm562_vm1, %v5194_v2, %v5195_v59  ;;  %v5172_v15 = vrot.slane %v5170_v32, 1  ;;  %v14245_v60 = vadd.f32 %v10474_v12, %v10473_v35  ;;  %v10479_v44 = vpop.f32.mrb[94].mxu0  ;;  %v12280_v35 = vld [vmem:[#allocation3 + $0x138] sm:$0xff]   ;;  %v12286_v23 = vld [vmem:[#allocation3 + $0x140] sm:$0xff]  }
 0x1e6   : > { %5492 = vmatmul.mubr.bf16.gmra.mrb[164].mxu0 %v14174_v16  ;;  %v5168_v56 = vor.u32 %v5167_v10, %v5163_v29  ;;  %v14247_v8 = vadd.f32 %v10477_v0, %v10476_v24  ;;  %v4904_v33 = vrot.slane %v4902_v34, 1  ;;  %v10480_v2 = vpop.f32.mrb[95].mxu0  ;;  %v12281_v59 = vld [vmem:[#allocation3 + $0xf8] sm:$0xff]   ;;  %10936 = vmatprep.subr.bf16.mxu1 %v12280_v35  ;;  %v4923_v35 = vrot.slane %v14092_v36, 1 }
 0x1e7   : > { %v14243_v43 = vld [vmem:[#allocation2 + $0x60] sm:$0xff]   ;;  %v4900_v9 = vor.u32 %v4899_v3, %v4895_v50  ;;  %v14249_v4 = vld [vmem:[#allocation2 + $0x68] ss:$0 sps:$4 sm:$0x11]   ;;  %v14255_v20 = vadd.f32 %v10480_v2, %v10479_v44  ;;  %10937 = vmatpush3.bf16.msra.mxu1 %v12281_v59  ;;  %v4921_v2 = vrot.slane %v14072_v26, 1  ;;  %v4930_v36 = vrot.slane %v14172_v1, 1 }
 0x1e8   : > { %v5173_v6 = vsel %vm457_vm0, %v5168_v56, %v5172_v15  ;;  %v5177_v45 = vshll.u32 %v14243_v43, 16  ;;  %v5182_v28 = vshll.u32 %v14249_v4, 16  ;;  %v5175_v32 = vshrl.u32 %v14243_v43, 16  ;;  %11450 = vmatprep.subr.bf16.mxu1 %v12286_v23  ;;  %v337_v59 = vld [vmem:[#allocation2 + $0x80] sm:$0x1] }
 0x1e9   : > { %5499 = vmatprep.mubr.bf16.mxu0 %v5173_v6  ;;  %v4905_v53 = vsel %vm457_vm0, %v4900_v9, %v4904_v33  ;;  %v4926_v23 = vrot.slane %v14125_v30, 1  ;;  %v287_v26 = vld [vmem:[#allocation2 + $0x90] sm:$0x1] }
 0x1ea   : > { %5838 = vmatmul.mubr.bf16.gmra.mrb[120].mxu1 %v14182_v22  ;;  %v5179_v63 = vrot.slane %v5177_v45, 1  ;;  %v5184_v34 = vrot.slane %v5182_v28, 1  ;;  %v4920_v45 = vrot.slane %v14062_v47, 1  ;;  %v4929_v47 = vrot.slane %v14168_v27, 1 }
 0x1eb   : > { %5845 = vmatprep.mubr.bf16.mxu1 %v4905_v53  ;;  %v10482_v12 = vpop.f32.mrb[96].mxu0  ;;  %v281_v53 = vld [vmem:[#allocation2 + $0x78] sm:$0x1] }
 0x1ec   : > { %v10618_v29 = vpop.f32.mrb[64].mxu1  ;;  %v5180_v10 = vor.u32 %v5179_v63, %v5175_v32  ;;  %v10483_v24 = vpop.f32.mrb[97].mxu0  ;;  %v4924_v32 = vrot.slane %v14101_v38, 1  ;;  %v278_v63 = vld [vmem:[#allocation2 + $0x6c] sm:$0x1]  ;;  %v4932_v38 = vrot.slane %v14182_v22, 1  ;;  %v14295_v22 = vsel %vm562_vm1, %v4929_v47, %v4930_v36 }
 0x1ed   : > { %v10619_v50 = vpop.f32.mrb[65].mxu1  ;;  %v14259_v3 = vadd.f32 %v10483_v24, %v10482_v12  ;;  %v10485_v0 = vpop.f32.mrb[98].mxu0  ;;  %v14274_v12 = vsel %vm562_vm1, %v4920_v45, %v4921_v2  ;;  %v4933_v24 = vrot.slane %v14187_v54, 1  ;;  %v279_v27 = vsel %vm13722_vm4, 0, %v278_v63  ;;  %v340_v2 = vld [vmem:[#allocation2 + $0x8c] sm:$0x1] }
 0x1ee   : > { %5500 = vmatmul.mubr.bf16.gmra.mrb[168].mxu0 %v14210_v19  ;;  %v5185_v56 = vsel %vm457_vm0, %v5180_v10, %v5184_v34  ;;  %v14263_v15 = vadd.f32 %v10619_v50, %v10618_v29  ;;  %v10621_v9 = vpop.f32.mrb[66].mxu1  ;;  %v10486_v33 = vpop.f32.mrb[99].mxu0  ;;  %v4927_v29 = vrot.slane %v14130_v18, 1  ;;  %v334_v10 = vld [vmem:[#allocation2 + $0x74] sm:$0x1]  ;;  %v14281_v34 = vsel %vm562_vm1, %v4923_v35, %v4924_v32 }
 0x1ef   : > { %5507 = vmatprep.mubr.bf16.mxu0 %v5185_v56  ;;  %v10622_v44 = vpop.f32.mrb[67].mxu1  ;;  %v14265_v6 = vadd.f32 %v10486_v33, %v10485_v0  ;;  %v284_v50 = vld [vmem:[#allocation2 + $0x84] sm:$0x1]  ;;  %v282_v18 = vsel %vm13722_vm4, 0, %v281_v53  ;;  %v4935_v56 = vrot.slane %v14214_v61, 1  ;;  %v14298_v54 = vsel %vm562_vm1, %v4932_v38, %v4933_v24 }
 0x1f0   : > { %v14269_v28 = vadd.f32 %v10622_v44, %v10621_v9  ;;  %v14287_v30 = vsel %vm562_vm1, %v4926_v23, %v4927_v29  ;;  %v343_v9 = vld [vmem:[#allocation2 + $0x98] sm:$0x1]  ;;  %283 = vst [vmem:[#allocation2 + $0x78] sm:$0x1] %v282_v18  ;;  %280 = vst [vmem:[#allocation2 + $0x6c] sm:$0x1] %v279_v27 }
 0x1f1   : > { %v4936_v44 = vrot.slane %v14231_v55, 1  ;;  %v338_v45 = vsel %vm13733_vm6, 0, %v337_v59  ;;  %v5198_v35 = vrot.slane %v14056_v41, 1  ;;  %v293_v23 = vld [vmem:[#allocation2 + $0xa8] sm:$0x1]  ;;  %v335_v59 = vsel %vm13733_vm6, 0, %v334_v10 }
 0x1f2   : > { %5846 = vmatmul.mubr.bf16.gmra.mrb[124].mxu1 %v14214_v61  ;;  %v5197_v61 = vrot.slane %v14052_v40, 1  ;;  %339 = vst [vmem:[#allocation2 + $0x80] sm:$0x1] %v338_v45  ;;  %v288_v40 = vsel %vm13722_vm4, 0, %v287_v26  ;;  %v290_v41 = vld [vmem:[#allocation2 + $0x9c] sm:$0x1] }
 0x1f3   : > { %v10488_v0 = vpop.f32.mrb[100].mxu0  ;;  %v14311_v36 = vsel %vm562_vm1, %v4935_v56, %v4936_v44  ;;  %336 = vst [vmem:[#allocation2 + $0x74] sm:$0x1] %v335_v59  ;;  %289 = vst [vmem:[#allocation2 + $0x90] sm:$0x1] %v288_v40  ;;  %v5200_v27 = vrot.slane %v14088_v25, 1 }
 0x1f4   : > { %v10624_v33 = vpop.f32.mrb[68].mxu1  ;;  %v10489_v1 = vpop.f32.mrb[101].mxu0  ;;  %v349_v18 = vld [vmem:[#allocation2 + $0xb0] sm:$0x1]  ;;  %v5201_v56 = vrot.slane %v14086_v39, 1  ;;  %v344_v26 = vsel %vm13733_vm6, 0, %v343_v9  ;;  %v5199_v9 = vsel %vm562_vm1, %v5197_v61, %v5198_v35 }
 0x1f5   : > { %v10625_v53 = vpop.f32.mrb[69].mxu1  ;;  %v14305_v32 = vadd.f32 %v10489_v1, %v10488_v0  ;;  %v10491_v63 = vpop.f32.mrb[102].mxu0  ;;  %v285_v0 = vsel %vm13722_vm4, 0, %v284_v50  ;;  %345 = vst [vmem:[#allocation2 + $0x98] sm:$0x1] %v344_v26  ;;  %v294_v1 = vsel %vm13722_vm4, 0, %v293_v23 }
 0x1f6   : > { %5508 = vmatmul.mubr.bf16.gmra.mrb[172].mxu0 %v14243_v43  ;;  %v14308_v29 = vadd.f32 %v10625_v53, %v10624_v33  ;;  %v10627_v47 = vpop.f32.mrb[70].mxu1  ;;  %v10492_v55 = vpop.f32.mrb[103].mxu0  ;;  %286 = vst [vmem:[#allocation2 + $0x84] sm:$0x1] %v285_v0  ;;  %v341_v33 = vsel %vm13733_vm6, 0, %v340_v2  ;;  %v291_v39 = vsel %vm13722_vm4, 0, %v290_v41  ;;  %v5202_v61 = vsel %vm562_vm1, %v5200_v27, %v5201_v56 }
 0x1f7   : > { %11370 = vmatprep.mubr.bf16.mxu0 %v14240_v7  ;;  %v10628_v38 = vpop.f32.mrb[71].mxu1  ;;  %v14318_v24 = vadd.f32 %v10492_v55, %v10491_v63  ;;  %v346_v7 = vld [vmem:[#allocation2 + $0xa4] sm:$0x1]  ;;  %v299_v50 = vld [vmem:[#allocation2 + $0xc0] sm:$0x1]  ;;  %v350_v25 = vsel %vm13733_vm6, 0, %v349_v18 }
 0x1f8   : > { %v14324_v10 = vadd.f32 %v10628_v38, %v10627_v47  ;;  %342 = vst [vmem:[#allocation2 + $0x8c] sm:$0x1] %v341_v33  ;;  %295 = vst [vmem:[#allocation2 + $0xa8] sm:$0x1] %v294_v1  ;;  %v296_v44 = vld [vmem:[#allocation2 + $0xb4] sm:$0x1] }
 0x1f9   : > { %292 = vst [vmem:[#allocation2 + $0x9c] sm:$0x1] %v291_v39  ;;  %351 = vst [vmem:[#allocation2 + $0xb0] sm:$0x1] %v350_v25  ;;  %v12235_v53 = vld [vmem:[#allocation3 + $0x88] sm:$0xff]   ;;  %v347_v40 = vsel %vm13733_vm6, 0, %v346_v7 }
 0x1fa   : > { %v355_v47 = vld [vmem:[#allocation2 + $0xc8] sm:$0x1]  ;;  %v300_v41 = vsel %vm13722_vm4, 0, %v299_v50  ;;  %v297_v38 = vsel %vm13722_vm4, 0, %v296_v44  ;;  %348 = vst [vmem:[#allocation2 + $0xa4] sm:$0x1] %v347_v40 }
 0x1fb   : > { %v10494_v45 = vpop.f32.mrb[104].mxu0  ;;  %301 = vst [vmem:[#allocation2 + $0xc0] sm:$0x1] %v300_v41  ;;  %298 = vst [vmem:[#allocation2 + $0xb4] sm:$0x1] %v297_v38  ;;  %v12236_v1 = vld [vmem:[#allocation3 + $0x90] sm:$0xff]  }
 0x1fc   : > { %v10630_v2 = vpop.f32.mrb[72].mxu1  ;;  %v10495_v63 = vpop.f32.mrb[105].mxu0  ;;  %v352_v26 = vld [vmem:[#allocation2 + $0xbc] sm:$0x1]  ;;  %v356_v27 = vsel %vm13733_vm6, 0, %v355_v47  ;;  %v5203_v56 = vrot.slane %v14114_v5, 1 }
 0x1fd   : > { %v10631_v23 = vpop.f32.mrb[73].mxu1  ;;  %v14337_v55 = vadd.f32 %v10495_v63, %v10494_v45  ;;  %v10497_v59 = vpop.f32.mrb[106].mxu0  ;;  %v5204_v39 = vrot.slane %v14121_v11, 1  ;;  %357 = vst [vmem:[#allocation2 + $0xc8] sm:$0x1] %v356_v27  ;;  %v353_v25 = vsel %vm13733_vm6, 0, %v352_v26 }
 0x1fe   : > { %11371 = vmatmul.mubr.bf16.vlgmr.msra.gmra.mrb[176].mxu0 %v5199_v9  ;;  %v14346_v35 = vadd.f32 %v10631_v23, %v10630_v2  ;;  %v10633_v0 = vpop.f32.mrb[74].mxu1  ;;  %v10498_v18 = vpop.f32.mrb[107].mxu0  ;;  %v5207_v44 = vrot.slane %v14151_v62, 1  ;;  %354 = vst [vmem:[#allocation2 + $0xbc] sm:$0x1] %v353_v25  ;;  %v12237_v45 = vld [vmem:[#allocation3 + $0x98] sm:$0xff]  }
 0x1ff   : > { %11374 = vmatprep.mubr.bf16.mxu0 %v5202_v61  ;;  %11387 = vmatpush3.bf16.msra.mxu0 %v14146_v31  ;;  %v10634_v7 = vpop.f32.mrb[75].mxu1  ;;  %v14349_v33 = vadd.f32 %v10498_v18, %v10497_v59  ;;  %v5206_v31 = vrot.slane %v14142_v42, 1  ;;  %v5205_v47 = vsel %vm562_vm1, %v5203_v56, %v5204_v39  ;;  %v12238_v38 = vld [vmem:[#allocation3 + $0xa0] sm:$0xff]   ;;  %v5210_v18 = vrot.slane %v14180_v49, 1  ;;  %v12239_v56 = vld [vmem:[#allocation3 + $0xa8] sm:$0xff]  }
 0x200   : > { %11388 = vmatprep.subr.bf16.mxu0 %v12235_v53  ;;  %v14351_v50 = vadd.f32 %v10634_v7, %v10633_v0  ;;  %v5209_v0 = vrot.slane %v14174_v16, 1  ;;  %v5212_v26 = vrot.slane %v14210_v19, 1  ;;  %v5213_v7 = vrot.slane %v14212_v46, 1 }
 0x201   : > { %v5208_v59 = vsel %vm562_vm1, %v5206_v31, %v5207_v44 }
 0x202   : > { %v5211_v25 = vsel %vm562_vm1, %v5209_v0, %v5210_v18  ;;  %v5214_v16 = vsel %vm562_vm1, %v5212_v26, %v5213_v7 }
 0x203   : > { %11389 = vmatpush3.bf16.msra.mxu0 %v12235_v53  ;;  %v10500_v9 = vpop.f32.mrb[108].mxu0 }
 0x204   : > { %11390 = vmatprep.subr.bf16.mxu0 %v12236_v1  ;;  %v10636_v2 = vpop.f32.mrb[76].mxu1  ;;  %v10501_v63 = vpop.f32.mrb[109].mxu0 }
 0x205   : > { %v10637_v5 = vpop.f32.mrb[77].mxu1  ;;  %v14362_v23 = vadd.f32 %v10501_v63, %v10500_v9  ;;  %v10503_v11 = vpop.f32.mrb[110].mxu0 }
 0x206   : > { %11375 = vmatmul.mubr.bf16.gmra.mrb[180].mxu0 %v5205_v47  ;;  %v14365_v40 = vadd.f32 %v10637_v5, %v10636_v2  ;;  %v10639_v42 = vpop.f32.mrb[78].mxu1  ;;  %v10504_v62 = vpop.f32.mrb[111].mxu0  ;;  %v14380_v47 = vld [vmem:[#allocation2 + $0x18] sm:$0xff]   ;;  %v12240_v5 = vld [vmem:[#allocation3 + $0xb0] sm:$0xff]  }
 0x207   : > { %15465 = vst [vmem:[#allocation10_spill] sm:$0xff] %v14362_v23  ;;  %11378 = vmatprep.mubr.bf16.mxu0 %v5208_v59  ;;  %11391 = vmatpush3.bf16.msra.mxu0 %v12236_v1  ;;  %v10640_v53 = vpop.f32.mrb[79].mxu1  ;;  %v14367_v41 = vadd.f32 %v10504_v62, %v10503_v11  ;;  %v12265_v59 = vld [vmem:[#allocation2 + $0x20] ss:$0 sps:$4 sm:$0x11]   ;;  %v5216_v62 = vrot.slane %v14249_v4, 1 }
 0x208   : > { %11392 = vmatprep.subr.bf16.mxu0 %v12237_v45  ;;  %v14369_v61 = vadd.f32 %v10640_v53, %v10639_v42  ;;  %v5215_v42 = vrot.slane %v14243_v43, 1  ;;  %v6051_v18 = vshll.u32 %v14380_v47, 16 }
 0x209   : > { %15466 = vst [vmem:[#allocation11_spill] sm:$0xff] %v14367_v41  ;;  %v12251_v41 = vld [vmem:[#allocation3 + $0x190] sm:$0xff]  }
 0x20a   : > { %v5217_v43 = vsel %vm562_vm1, %v5215_v42, %v5216_v62  ;;  %v12410_v42 = vld [vmem:[#allocation2 + $0x14] ss:$0 sps:$4 sm:$0x11]  }
 0x20b   : > { %11393 = vmatpush3.bf16.msra.mxu0 %v12237_v45  ;;  %v10538_v27 = vpop.f32.mrb[112].mxu0  ;;  %v4918_v62 = vrot.slane %v12410_v42, 1 }
 0x20c   : > { %11394 = vmatprep.subr.bf16.mxu0 %v12238_v38  ;;  %v10642_v1 = vpop.f32.mrb[80].mxu1  ;;  %v10539_v39 = vpop.f32.mrb[113].mxu0 }
 0x20d   : > { %v10540_v31 = vadd.f32 %v10539_v39, %v10538_v27  ;;  %v10643_v44 = vpop.f32.mrb[81].mxu1  ;;  %v10541_v9 = vpop.f32.mrb[114].mxu0 }
 0x20e   : > { %11379 = vmatmul.mubr.bf16.gmra.mrb[184].mxu0 %v5211_v25  ;;  %v14377_v2 = vadd.f32 %v10643_v44, %v10642_v1  ;;  %v10645_v49 = vpop.f32.mrb[82].mxu1  ;;  %v10542_v19 = vpop.f32.mrb[115].mxu0  ;;  %v14397_v44 = vld [vmem:[#allocation2 + $0x24] sm:$0xff]  }
 0x20f   : > { %11382 = vmatprep.mubr.bf16.mxu0 %v5214_v16  ;;  %11395 = vmatpush3.bf16.msra.mxu0 %v12238_v38  ;;  %v11613_v46 = vadd.f32 %v10540_v31, %v14208_v37  ;;  %v10543_v45 = vadd.f32 %v10542_v19, %v10541_v9  ;;  %v10646_v63 = vpop.f32.mrb[83].mxu1  ;;  %v12241_v38 = vld [vmem:[#allocation3 + $0xb8] sm:$0xff]   ;;  %v6056_v31 = vshll.u32 %v12265_v59, 16  ;;  %v12245_v59 = vld [vmem:[#allocation3 + $0x180] sm:$0xff]  }
 0x210   : > { %11396 = vmatprep.subr.bf16.mxu0 %v12239_v56  ;;  %v14382_v11 = vadd.f32 %v10646_v63, %v10645_v49  ;;  %v12271_v49 = vld [vmem:[#allocation2 + $0x2c] ss:$0 sps:$4 sm:$0x11]   ;;  %v14401_v19 = vld [vmem:[#allocation2 + $0x30] sm:$0xff]  }
 0x211   : > { %v11619_v53 = vadd.f32 %v10543_v45, %v14218_v57  ;;  %v14388_v0 = vadd.f32 %v11613_v46, %v14263_v15  ;;  %v12244_v15 = vld [vmem:[#allocation3 + $0x1c0] sm:$0xff]   ;;  %15467 = vst [vmem:[#allocation12_spill] sm:$0xff] %v14401_v19  ;;  %v12409_v45 = vld [vmem:[#allocation2 + $0xc] sm:$0xff]  }
 0x212   : > { %v12275_v46 = vld [vmem:[#allocation2 + $0x38] ss:$0 sps:$4 sm:$0x11]   ;;  %v4917_v63 = vrot.slane %v12409_v45, 1  ;;  %v6068_v45 = vshll.u32 %v12271_v49, 16 }
 0x213   : > { %11397 = vmatpush3.bf16.msra.mxu0 %v12239_v56  ;;  %v10544_v37 = vpop.f32.mrb[116].mxu0  ;;  %v14392_v26 = vadd.f32 %v11619_v53, %v14269_v28  ;;  %v6080_v42 = vshll.u32 %v12275_v46, 16  ;;  %v12283_v49 = vld [vmem:[#allocation2 + $0x50] ss:$0 sps:$4 sm:$0x11]  }
 0x214   : > { %11398 = vmatprep.subr.bf16.mxu0 %v12240_v5  ;;  %v10648_v7 = vpop.f32.mrb[84].mxu1  ;;  %v10545_v27 = vpop.f32.mrb[117].mxu0 }
 0x215   : > { %v10546_v1 = vadd.f32 %v10545_v27, %v10544_v37  ;;  %v10649_v4 = vpop.f32.mrb[85].mxu1  ;;  %v10547_v39 = vpop.f32.mrb[118].mxu0  ;;  %v14410_v37 = vrot.slane %v6051_v18, 1  ;;  %v12246_v27 = vld [vmem:[#allocation3 + $0x1c8] sm:$0xff]  }
 0x216   : > { %11383 = vmatmul.mubr.bf16.gmra.mrb[188].mxu0 %v5217_v43  ;;  %v14395_v57 = vadd.f32 %v10649_v4, %v10648_v7  ;;  %v10651_v25 = vpop.f32.mrb[86].mxu1  ;;  %v10548_v56 = vpop.f32.mrb[119].mxu0  ;;  %v14412_v7 = vld [vmem:[#allocation2 + $0x3c] sm:$0xff]   ;;  %v14414_v43 = vrot.slane %v6056_v31, 1 }
 0x217   : > { %11399 = vmatpush3.bf16.msra.mxu0 %v12240_v5  ;;  %11402 = vmatprep.mubr.bf16.mxu0 %v13994_v58  ;;  %v11610_v28 = vadd.f32 %v10546_v1, %v14220_v52  ;;  %v10549_v9 = vadd.f32 %v10548_v56, %v10547_v39  ;;  %v10652_v16 = vpop.f32.mrb[87].mxu1  ;;  %15468 = vst [vmem:[#allocation13_spill] sm:$0xff] %v14412_v7  ;;  %v6061_v1 = vshrl.u32 %v14397_v44, 16  ;;  %v14422_v56 = vld [vmem:[#allocation2 + $0x44] ss:$0 sps:$4 sm:$0x11]  }
 0x218   : > { %11400 = vmatprep.subr.bf16.mxu0 %v12241_v38  ;;  %v14403_v53 = vadd.f32 %v10652_v16, %v10651_v25 }
 0x219   : > { %v11616_v5 = vadd.f32 %v10549_v9, %v14222_v48  ;;  %v14407_v58 = vadd.f32 %v11610_v28, %v14308_v29  ;;  %v6063_v48 = vshll.u32 %v14397_v44, 16  ;;  %v4919_v29 = vsel %vm562_vm1, %v4917_v63, %v4918_v62  ;;  %v12248_v28 = vld [vmem:[#allocation3 + $0x188] sm:$0xff]  }
 0x21b   : > { %11401 = vmatpush3.bf16.msra.mxu0 %v12241_v38  ;;  %v10550_v4 = vpop.f32.mrb[120].mxu0  ;;  %v14418_v39 = vadd.f32 %v11616_v5, %v14324_v10  ;;  %v6075_v38 = vshll.u32 %v14401_v19, 16  ;;  %v12250_v5 = vld [vmem:[#allocation3 + $0x1d0] sm:$0xff]  }
 0x21c   : > { %10842 = vmatprep.subr.bf16.mxu0 %v12244_v15  ;;  %v10654_v25 = vpop.f32.mrb[88].mxu1  ;;  %v10551_v18 = vpop.f32.mrb[121].mxu0 }
 0x21d   : > { %v10552_v9 = vadd.f32 %v10551_v18, %v10550_v4  ;;  %v10655_v31 = vpop.f32.mrb[89].mxu1  ;;  %v10553_v16 = vpop.f32.mrb[122].mxu0  ;;  %v6087_v4 = vshll.u32 %v14412_v7, 16  ;;  %v14430_v18 = vld [vmem:[#allocation2 + $0x48] sm:$0xff]  }
 0x21e   : > { %11403 = vmatmul.mubr.bf16.vlgmr.msra.gmra.mrb[176].mxu0 %v4919_v29  ;;  %v14425_v10 = vadd.f32 %v10655_v31, %v10654_v25  ;;  %v10657_v52 = vpop.f32.mrb[90].mxu1  ;;  %v10554_v21 = vpop.f32.mrb[123].mxu0  ;;  %15470 = vst [vmem:[#allocation15_spill] sm:$0xff] %v14430_v18  ;;  %v6065_v29 = vrot.slane %v6063_v48, 1  ;;  %v6073_v25 = vshrl.u32 %v14401_v19, 16  ;;  %v14435_v31 = vld [vmem:[#allocation2 + $0x54] sm:$0xff]  }
 0x21f   : > { %11406 = vmatprep.mubr.bf16.mxu0 %v14274_v12  ;;  %10843 = vmatpush3.bf16.msra.mxu0 %v12245_v59  ;;  %v11625_v15 = vadd.f32 %v10552_v9, %v14226_v14  ;;  %v10555_v63 = vadd.f32 %v10554_v21, %v10553_v16  ;;  %v10658_v62 = vpop.f32.mrb[91].mxu1  ;;  %v14441_v21 = vrot.slane %v6068_v45, 1  ;;  %v6077_v59 = vrot.slane %v6075_v38, 1  ;;  %v12252_v9 = vld [vmem:[#allocation3 + $0x1d8] sm:$0xff]   ;;  %v12257_v19 = vld [vmem:[#allocation3 + $0x1a0] sm:$0xff]  }
 0x220   : > { %15469 = vst [vmem:[#allocation14_spill] sm:$0xff] %v14425_v10  ;;  %10844 = vmatprep.subr.bf16.mxu0 %v12246_v27  ;;  %v14432_v46 = vadd.f32 %v10658_v62, %v10657_v52  ;;  %v6082_v16 = vrot.slane %v6080_v42, 1  ;;  %v6092_v27 = vshll.u32 %v14422_v56, 16  ;;  %v6089_v62 = vrot.slane %v6087_v4, 1  ;;  %v12256_v56 = vld [vmem:[#allocation3 + $0x1e0] sm:$0xff]  }
 0x221   : > { %v11631_v12 = vadd.f32 %v10555_v63, %v14245_v60  ;;  %v14439_v14 = vadd.f32 %v11625_v15, %v14346_v35  ;;  %v12254_v60 = vld [vmem:[#allocation3 + $0x198] sm:$0xff]   ;;  %v6099_v45 = vshll.u32 %v14430_v18, 16  ;;  %v6104_v38 = vshll.u32 %v12283_v49, 16 }
 0x222   : > { %15471 = vst [vmem:[#allocation16_spill] sm:$0xff] %v14432_v46  ;;  %v6066_v4 = vor.u32 %v6065_v29, %v6061_v1  ;;  %v6078_v1 = vor.u32 %v6077_v59, %v6073_v25  ;;  %v6094_v29 = vrot.slane %v6092_v27, 1  ;;  %v12260_v27 = vld [vmem:[#allocation3 + $0x1a8] sm:$0xff]  }
 0x223   : > { %10845 = vmatpush3.bf16.msra.mxu0 %v12248_v28  ;;  %v10556_v52 = vpop.f32.mrb[124].mxu0  ;;  %v14445_v48 = vadd.f32 %v11631_v12, %v14351_v50  ;;  %v15473_v50 = vshrl.u32 %v14380_v47, 16  ;;  %v14454_v12 = vld [vmem:[#allocation2 + $0x5c] ss:$0 sps:$4 sm:$0x11]  }
 0x224   : > { %10846 = vmatprep.subr.bf16.mxu0 %v12250_v5  ;;  %v10660_v46 = vpop.f32.mrb[92].mxu1  ;;  %v10557_v23 = vpop.f32.mrb[125].mxu0 }
 0x225   : > { %v10558_v63 = vadd.f32 %v10557_v23, %v10556_v52  ;;  %v10661_v35 = vpop.f32.mrb[93].mxu1  ;;  %v10559_v15 = vpop.f32.mrb[126].mxu0  ;;  %v6054_v5 = vor.u32 %v14410_v37, %v15473_v50  ;;  %v6111_v23 = vshll.u32 %v14435_v31, 16  ;;  %v6085_v52 = vshrl.u32 %v14412_v7, 16 }
 0x226   : > { %11407 = vmatmul.mubr.bf16.gmra.mrb[180].mxu0 %v14281_v34  ;;  %v14449_v42 = vadd.f32 %v10661_v35, %v10660_v46  ;;  %v10663_v28 = vpop.f32.mrb[94].mxu1  ;;  %v10560_v10 = vpop.f32.mrb[127].mxu0  ;;  %v6097_v35 = vshrl.u32 %v14430_v18, 16  ;;  %v6109_v50 = vshrl.u32 %v14435_v31, 16  ;;  %v6116_v7 = vshll.u32 %v14454_v12, 16 }
 0x227   : > { %11410 = vmatprep.mubr.bf16.mxu0 %v14287_v30  ;;  %10847 = vmatpush3.bf16.msra.mxu0 %v12251_v41  ;;  %v11622_v49 = vadd.f32 %v10558_v63, %v14247_v8  ;;  %v10561_v34 = vadd.f32 %v10560_v10, %v10559_v15  ;;  %v10664_v46 = vpop.f32.mrb[95].mxu1  ;;  %v6101_v41 = vrot.slane %v6099_v45, 1  ;;  %v6106_v10 = vrot.slane %v6104_v38, 1  ;;  %v12258_v63 = vld [vmem:[#allocation3 + $0x1e8] sm:$0xff]  }
 0x228   : > { %15472 = vst [vmem:[#allocation17_spill] sm:$0xff] %v14449_v42  ;;  %v14461_v42 = vld [vmem:[#allocation2 + $0x60] sm:$0xff]   ;;  %10848 = vmatprep.subr.bf16.mxu0 %v12252_v9  ;;  %v14463_v37 = vadd.f32 %v10664_v46, %v10663_v28  ;;  %v6090_v15 = vor.u32 %v6089_v62, %v6085_v52  ;;  %v6113_v18 = vrot.slane %v6111_v23, 1  ;;  %v12298_v9 = vld [vmem:[#allocation2 + $0x68] ss:$0 sps:$4 sm:$0x11]  }
 0x229   : > { %v11628_v30 = vadd.f32 %v10561_v34, %v14255_v20  ;;  %v14468_v8 = vadd.f32 %v11622_v49, %v14365_v40  ;;  %v6123_v31 = vshll.u32 %v14461_v42, 16  ;;  %v14477_v40 = vsel %vm457_vm0, %v6054_v5, %v14414_v43  ;;  %v12262_v46 = vld [vmem:[#allocation3 + $0x1f0] sm:$0xff]  }
 0x22a   : > { %v14490_v5 = vsel %vm457_vm0, %v6090_v15, %v6094_v29  ;;  %v6114_v49 = vor.u32 %v6113_v18, %v6109_v50  ;;  %v6121_v34 = vshrl.u32 %v14461_v42, 16  ;;  %v6128_v52 = vshll.u32 %v12298_v9, 16  ;;  %v12263_v29 = vld [vmem:[#allocation3 + $0x1b0] sm:$0xff]  }
 0x22b   : > { %10849 = vmatpush3.bf16.msra.mxu0 %v12254_v60  ;;  %v10562_v28 = vpop.f32.mrb[128].mxu0  ;;  %v14472_v25 = vadd.f32 %v11628_v30, %v14369_v61  ;;  %v14482_v60 = vsel %vm457_vm0, %v6066_v4, %v14441_v21  ;;  %v14485_v61 = vsel %vm457_vm0, %v6078_v1, %v6082_v16  ;;  %v14496_v21 = vld [vmem:[%s15436_s3] ss:$0 sm:$0xff]  ;;  %v14510_v15 = vrot.slane %v6123_v31, 1 }
 0x22c   : > { %10850 = vmatprep.subr.bf16.mxu0 %v12256_v56  ;;  %v11340_v20 = vpop.f32.mrb[48].mxu1  ;;  %v10563_v59 = vpop.f32.mrb[129].mxu0  ;;  %v14521_v31 = vrot.slane %v6128_v52, 1 }
 0x22d   : > { %v11612_v62 = vadd.f32 %v14407_v58, %v11340_v20  ;;  %v10564_v45 = vadd.f32 %v10563_v59, %v10562_v28  ;;  %v4338_v38 = vpop.f32.mrb[49].mxu1  ;;  %v10565_v12 = vpop.f32.mrb[130].mxu0  ;;  %v6102_v58 = vor.u32 %v6101_v41, %v6097_v35 }
 0x22e   : > { %11411 = vmatmul.mubr.bf16.gmra.mrb[184].mxu0 %v14295_v22  ;;  %v11615_v56 = vadd.f32 %v14388_v0, %v4338_v38  ;;  %v11341_v23 = vpop.f32.mrb[50].mxu1  ;;  %v10566_v43 = vpop.f32.mrb[131].mxu0 }
 0x22f   : > { %11414 = vmatprep.mubr.bf16.mxu0 %v14298_v54  ;;  %10851 = vmatpush3.bf16.msra.mxu0 %v12257_v19  ;;  %v4419_v16 = vadd.f32 %v14496_v21, %v11612_v62  ;;  %v11637_v22 = vadd.f32 %v10564_v45, %v14259_v3  ;;  %v11618_v0 = vadd.f32 %v14418_v39, %v11341_v23  ;;  %v4341_v4 = vpop.f32.mrb[51].mxu1  ;;  %v6118_v3 = vrot.slane %v6116_v7, 1 }
 0x230   : > { %10852 = vmatprep.subr.bf16.mxu0 %v12258_v63  ;;  %v4417_v18 = vadd.f32 %v14496_v21, %v11615_v56  ;;  %v10567_v54 = vadd.f32 %v10566_v43, %v10565_v12  ;;  %v11621_v19 = vadd.f32 %v14392_v26, %v4341_v4  ;;  %v12266_v63 = vld [vmem:[#allocation3 + $0x1f8] sm:$0xff]   ;;  %v14513_v20 = vsel %vm457_vm0, %v6102_v58, %v6106_v10  ;;  %v4665_v58 = vld [vmem:[#allocation2 + $0x78] sm:$0xf] }
 0x231   : > { %v4435_v35 = vmax.f32 %v4419_v16, 0.0  ;;  %v4420_v1 = vadd.f32 %v14496_v21, %v11618_v0  ;;  %v14506_v50 = vadd.f32 %v11637_v22, %v14377_v2  ;;  %v14516_v59 = vsel %vm457_vm0, %v6114_v49, %v6118_v3  ;;  %v12268_v56 = vld [vmem:[#allocation3 + $0x1b8] sm:$0xff]  }
 0x232   : > { %v4433_v39 = vmax.f32 %v4417_v18, 0.0  ;;  %v11643_v30 = vadd.f32 %v10567_v54, %v14265_v6  ;;  %v4418_v41 = vadd.f32 %v14496_v21, %v11621_v19 }
 0x233   : > { %10853 = vmatpush3.bf16.msra.mxu0 %v12260_v27  ;;  %v10020_v28 = vpack.c.bf16 %v4435_v35, %v4435_v35  ;;  %v4436_v26 = vmax.f32 %v4420_v1, 0.0  ;;  %v10568_v9 = vpop.f32.mrb[132].mxu0  ;;  %v4669_v1 = vld [vmem:[#allocation2 + $0x80] sm:$0x1] }
 0x234   : > { %v10018_v2 = vpack.c.bf16 %v4433_v39, %v4433_v39  ;;  %10854 = vmatprep.subr.bf16.mxu0 %v12262_v46  ;;  %v4434_v7 = vmax.f32 %v4418_v41, 0.0  ;;  %v11344_v62 = vpop.f32.mrb[52].mxu1  ;;  %v10569_v6 = vpop.f32.mrb[133].mxu0  ;;  %v14519_v45 = vadd.f32 %v11643_v30, %v14382_v11  ;;  %v4658_v46 = vld [vmem:[#allocation2 + $0x6c] sm:$0xf]  ;;  %v12289_v30 = vld [vmem:[#allocation3 + $0x200] sm:$0xff]  }
 0x235   : > { %v4515_v27 = vshrl.u32 %v10020_v28, 16  ;;  %v4518_v38 = vshll.u32 %v10020_v28, 16  ;;  %v10021_v12 = vpack.c.bf16 %v4436_v26, %v4436_v26  ;;  %v11624_v10 = vadd.f32 %v14468_v8, %v11344_v62  ;;  %v4354_v23 = vpop.f32.mrb[53].mxu1  ;;  %v14524_v43 = vpop.f32.mrb[134].mxu0 }
 0x236   : > { %v4498_v49 = vshrl.u32 %v10018_v2, 16  ;;  %v4501_v16 = vshll.u32 %v10018_v2, 16  ;;  %11415 = vmatmul.mubr.bf16.gmra.mrb[188].mxu0 %v14311_v36  ;;  %v10019_v22 = vpack.c.bf16 %v4434_v7, %v4434_v7  ;;  %v10570_v0 = vadd.f32 %v10569_v6, %v10568_v9  ;;  %v11345_v11 = vpop.f32.mrb[54].mxu1  ;;  %v10572_v4 = vpop.f32.mrb[135].mxu0  ;;  %v4662_v9 = vld [vmem:[#allocation2 + $0x74] sm:$0x1] }
 0x237   : > { %v4517_v18 = vrot.slane %v4515_v27, 7  ;;  %v4523_v54 = vshrl.u32 %v10021_v12, 16  ;;  %v4526_v19 = vshll.u32 %v10021_v12, 16  ;;  %10855 = vmatpush3.bf16.msra.mxu0 %v12263_v29  ;;  %6409 = vmatprep.mubr.bf16.mxu0 %v14477_v40  ;;  %v4423_v8 = vadd.f32 %v14496_v21, %v11624_v10  ;;  %v4357_v52 = vpop.f32.mrb[55].mxu1 }
 0x238   : > { %v4500_v35 = vrot.slane %v4498_v49, 7  ;;  %v4506_v3 = vshrl.u32 %v10019_v22, 16  ;;  %v4509_v39 = vshll.u32 %v10019_v22, 16  ;;  %10856 = vmatprep.subr.bf16.mxu0 %v12266_v63  ;;  %v11634_v36 = vadd.f32 %v10570_v0, %v14305_v32 }
 0x239   : > { %v4520_v41 = vor.u32 %v4518_v38, %v4517_v18  ;;  %v4521_v28 = vrot.slane %v4517_v18, 4  ;;  %v4525_v26 = vrot.slane %v4523_v54, 7  ;;  %v4439_v2 = vmax.f32 %v4423_v8, 0.0 }
 0x23a   : > { %v4503_v7 = vor.u32 %v4501_v16, %v4500_v35  ;;  %v4504_v29 = vrot.slane %v4500_v35, 4  ;;  %v4508_v62 = vrot.slane %v4506_v3, 7  ;;  %v11627_v40 = vadd.f32 %v14439_v14, %v4354_v23  ;;  %v12292_v14 = vld [vmem:[#allocation3 + $0x208] sm:$0xff]  }
 0x23b   : > { %v4666_v6 = vsel %vm13974_vm9, %v4520_v41, %v4665_v58  ;;  %v4528_v27 = vor.u32 %v4526_v19, %v4525_v26  ;;  %v4530_v12 = vrot.slane %v4525_v26, 4  ;;  %10857 = vmatpush3.bf16.msra.mxu0 %v12268_v56  ;;  %v10024_v63 = vpack.c.bf16 %v4439_v2, %v4439_v2  ;;  %v10574_v10 = vpop.f32.mrb[136].mxu0  ;;  %v12296_v41 = vld [vmem:[#allocation3 + $0x210] sm:$0xff]   ;;  %v4679_v26 = vld [vmem:[#allocation2 + $0x90] sm:$0xf] }
 0x23c   : > { %4667 = vst [vmem:[#allocation2 + $0x78] sm:$0xf] %v4666_v6  ;;  %v4659_v32 = vsel %vm13974_vm9, %v4503_v7, %v4658_v46  ;;  %v4511_v38 = vor.u32 %v4509_v39, %v4508_v62  ;;  %v4513_v49 = vrot.slane %v4508_v62, 4  ;;  %v4421_v16 = vadd.f32 %v14496_v21, %v11627_v40  ;;  %v11348_v22 = vpop.f32.mrb[56].mxu1  ;;  %v10575_v0 = vpop.f32.mrb[137].mxu0  ;;  %11418 = vmatprep.subr.bf16.mxu0 %v12289_v30 }
 0x23d   : > { %4660 = vst [vmem:[#allocation2 + $0x6c] sm:$0xf] %v4659_v32  ;;  %v4529_v23 = vsel %vm13986_vm10, %v4521_v28, %v4528_v27  ;;  %v4670_v56 = vsel %vm13722_vm4, %v4530_v12, %v4669_v1  ;;  %v4549_v58 = vshrl.u32 %v10024_v63, 16  ;;  %v4552_v18 = vshll.u32 %v10024_v63, 16  ;;  %v4370_v54 = vpop.f32.mrb[57].mxu1  ;;  %v10577_v19 = vpop.f32.mrb[138].mxu0 }
 0x23e   : > { %4668 = vst [vmem:[#allocation2 + $0x7c] sm:$0xf] %v4529_v23  ;;  %4671 = vst [vmem:[#allocation2 + $0x80] sm:$0x1] %v4670_v56  ;;  %v4512_v46 = vsel %vm13986_vm10, %v4504_v29, %v4511_v38  ;;  %v4663_v8 = vsel %vm13722_vm4, %v4513_v49, %v4662_v9  ;;  %v4437_v35 = vmax.f32 %v4421_v16, 0.0  ;;  %6410 = vmatmul.mubr.bf16.vlgmr.msra.gmra.mrb[192].mxu0 %v14380_v47  ;;  %v14546_v39 = vpop.f32.mrb[58].mxu1 }
 0x23f   : > { %v11630_v3 = vadd.f32 %v14472_v25, %v11345_v11  ;;  %v10578_v1 = vpop.f32.mrb[139].mxu0  ;;  %4661 = vst [vmem:[#allocation2 + $0x70] sm:$0xf] %v4512_v46  ;;  %4664 = vst [vmem:[#allocation2 + $0x74] sm:$0x1] %v4663_v8  ;;  %v14548_v28 = vrot.slane %v4549_v58, 7  ;;  %6417 = vmatprep.mubr.bf16.mxu0 %v14482_v60  ;;  %v10573_v2 = vadd.f32 %v10572_v4, %v14524_v43  ;;  %11419 = vmatpush3.bf16.msra.mxu0 %v12289_v30 }
 0x240   : > { %v11633_v9 = vadd.f32 %v14445_v48, %v4357_v52  ;;  %v11635_v7 = vadd.f32 %v11634_v36, %v14395_v57  ;;  %v4373_v47 = vpop.f32.mrb[59].mxu1  ;;  %v10022_v25 = vpack.c.bf16 %v4437_v35, %v4437_v35  ;;  %v10576_v29 = vadd.f32 %v10575_v0, %v10574_v10  ;;  %11420 = vmatprep.subr.bf16.mxu0 %v12292_v14  ;;  %v4672_v30 = vld [vmem:[#allocation2 + $0x84] sm:$0xf] }
 0x241   : > { %v4424_v11 = vadd.f32 %v14496_v21, %v11630_v3  ;;  %v11639_v62 = vadd.f32 %v14506_v50, %v4370_v54  ;;  %v4554_v40 = vor.u32 %v4552_v18, %v14548_v28  ;;  %v4555_v6 = vrot.slane %v14548_v28, 4 }
 0x242   : > { %v11640_v60 = vadd.f32 %v10573_v2, %v14318_v24  ;;  %v4422_v43 = vadd.f32 %v14496_v21, %v11633_v9  ;;  %v4532_v48 = vshrl.u32 %v10022_v25, 16  ;;  %v4535_v4 = vshll.u32 %v10022_v25, 16  ;;  %v12303_v25 = vld [vmem:[#allocation3 + $0x220] sm:$0xff]  }
 0x243   : > { %v4440_v57 = vmax.f32 %v4424_v11, 0.0  ;;  %v11636_v52 = vadd.f32 %v11635_v7, %v11348_v22  ;;  %v4680_v36 = vsel %vm13974_vm9, %v4554_v40, %v4679_v26  ;;  %v14563_v50 = vadd.f32 %v10576_v29, %v14337_v55  ;;  %v14566_v63 = vpop.f32.mrb[140].mxu0  ;;  %11421 = vmatpush3.bf16.msra.mxu0 %v12292_v14  ;;  %v12299_v22 = vld [vmem:[#allocation3 + $0x218] sm:$0xff]   ;;  %v4683_v7 = vld [vmem:[#allocation2 + $0x98] sm:$0x1] }
 0x244   : > { %v4438_v27 = vmax.f32 %v4422_v43, 0.0  ;;  %v4425_v12 = vadd.f32 %v14496_v21, %v11639_v62  ;;  %4681 = vst [vmem:[#allocation2 + $0x90] sm:$0xf] %v4680_v36  ;;  %v4534_v24 = vrot.slane %v4532_v48, 7  ;;  %v11641_v38 = vadd.f32 %v11640_v60, %v14403_v53  ;;  %v14570_v49 = vpop.f32.mrb[60].mxu1  ;;  %v14572_v16 = vpop.f32.mrb[141].mxu0  ;;  %11422 = vmatprep.subr.bf16.mxu0 %v12296_v41 }
 0x245   : > { %v10025_v10 = vpack.c.bf16 %v4440_v57, %v4440_v57  ;;  %v4427_v32 = vadd.f32 %v14496_v21, %v11636_v52  ;;  %v10579_v23 = vadd.f32 %v10578_v1, %v10577_v19  ;;  %v11645_v56 = vadd.f32 %v14519_v45, %v4373_v47  ;;  %v14575_v58 = vpop.f32.mrb[61].mxu1  ;;  %v14577_v14 = vpop.f32.mrb[142].mxu0 }
 0x246   : > { %v10023_v55 = vpack.c.bf16 %v4438_v27, %v4438_v27  ;;  %v4441_v0 = vmax.f32 %v4425_v12, 0.0  ;;  %v4537_v18 = vor.u32 %v4535_v4, %v4534_v24  ;;  %v4538_v54 = vrot.slane %v4534_v24, 4  ;;  %6418 = vmatmul.mubr.bf16.gmra.mrb[196].mxu0 %v14397_v44  ;;  %v14580_v53 = vpop.f32.mrb[62].mxu1  ;;  %v14582_v35 = vpop.f32.mrb[143].mxu0  ;;  %v4693_v27 = vld [vmem:[#allocation2 + $0xa8] sm:$0xf] }
 0x247   : > { %v4557_v46 = vshrl.u32 %v10025_v10, 16  ;;  %v4560_v8 = vshll.u32 %v10025_v10, 16  ;;  %v4443_v2 = vmax.f32 %v4427_v32, 0.0  ;;  %6425 = vmatprep.mubr.bf16.mxu0 %v14485_v61  ;;  %v14585_v45 = vpop.f32.mrb[63].mxu1  ;;  %11423 = vmatpush3.bf16.msra.mxu0 %v12296_v41  ;;  %v11642_v44 = vadd.f32 %v11641_v38, %v14546_v39  ;;  %v4676_v41 = vld [vmem:[#allocation2 + $0x8c] sm:$0x1] }
 0x248   : > { %v4540_v3 = vshrl.u32 %v10023_v55, 16  ;;  %v4543_v26 = vshll.u32 %v10023_v55, 16  ;;  %v10026_v19 = vpack.c.bf16 %v4441_v0, %v4441_v0  ;;  %v4673_v1 = vsel %vm13974_vm9, %v4537_v18, %v4672_v30  ;;  %11424 = vmatprep.subr.bf16.mxu0 %v12299_v22  ;;  %v4686_v38 = vld [vmem:[#allocation2 + $0x9c] sm:$0xf] }
 0x249   : > { %v4559_v9 = vrot.slane %v4557_v46, 7  ;;  %v14591_v47 = vadd.f32 %v10579_v23, %v14349_v33  ;;  %4674 = vst [vmem:[#allocation2 + $0x84] sm:$0xf] %v4673_v1  ;;  %v10028_v29 = vpack.c.bf16 %v4443_v2, %v4443_v2  ;;  %v4428_v43 = vadd.f32 %v14496_v21, %v11642_v44  ;;  %v12306_v33 = vld [vmem:[#allocation3 + $0x228] sm:$0xff]  }
 0x24a   : > { %v4542_v11 = vrot.slane %v4540_v3, 7  ;;  %v4566_v62 = vshrl.u32 %v10026_v19, 16  ;;  %v4569_v61 = vshll.u32 %v10026_v19, 16  ;;  %v4426_v48 = vadd.f32 %v14496_v21, %v11645_v56  ;;  %v15475_v2 = vld [vmem:[#allocation14_spill] sm:$0xff] }
 0x24b   : > { %v4562_v40 = vor.u32 %v4560_v8, %v4559_v9  ;;  %v4564_v60 = vrot.slane %v4559_v9, 4  ;;  %v4583_v39 = vshrl.u32 %v10028_v29, 16  ;;  %v4586_v52 = vshll.u32 %v10028_v29, 16  ;;  %11425 = vmatpush3.bf16.msra.mxu0 %v12299_v22 }
 0x24c   : > { %v4545_v4 = vor.u32 %v4543_v26, %v4542_v11  ;;  %v4547_v57 = vrot.slane %v4542_v11, 4  ;;  %v14601_v12 = vrot.slane %v4566_v62, 7  ;;  %v4444_v24 = vmax.f32 %v4428_v43, 0.0  ;;  %11426 = vmatprep.subr.bf16.mxu0 %v12303_v25  ;;  %v14609_v55 = vpop.f32.mrb[96].mxu1  ;;  %v12310_v11 = vld [vmem:[#allocation3 + $0x230] sm:$0xff]  }
 0x24d   : > { %v4563_v36 = vsel %vm13986_vm10, %v4555_v6, %v4562_v40  ;;  %v4684_v30 = vsel %vm13722_vm4, %v4564_v60, %v4683_v7  ;;  %v4585_v28 = vrot.slane %v4583_v39, 7  ;;  %v4442_v22 = vmax.f32 %v4426_v48, 0.0  ;;  %v14607_v6 = vld [vmem:[#allocation2 + $0x6c] sm:$0xff]   ;;  %v14616_v46 = vpop.f32.mrb[97].mxu1  ;;  %v4690_v60 = vld [vmem:[#allocation2 + $0xa4] sm:$0x1] }
 0x24e   : > { %4682 = vst [vmem:[#allocation2 + $0x94] sm:$0xf] %v4563_v36  ;;  %4685 = vst [vmem:[#allocation2 + $0x98] sm:$0x1] %v4684_v30  ;;  %v4546_v10 = vsel %vm13986_vm10, %v4538_v54, %v4545_v4  ;;  %v4677_v32 = vsel %vm13722_vm4, %v4547_v57, %v4676_v41  ;;  %v4571_v0 = vor.u32 %v4569_v61, %v14601_v12  ;;  %v4572_v23 = vrot.slane %v14601_v12, 4  ;;  %v15474_v54 = vld [vmem:[#allocation12_spill] sm:$0xff] }
 0x24f   : > { %4675 = vst [vmem:[#allocation2 + $0x88] sm:$0xf] %v4546_v10  ;;  %4678 = vst [vmem:[#allocation2 + $0x8c] sm:$0x1] %v4677_v32  ;;  %v10029_v56 = vpack.c.bf16 %v4444_v24, %v4444_v24  ;;  %v10582_v18 = vadd.f32 %v14572_v16, %v14566_v63  ;;  %6426 = vmatmul.mubr.bf16.gmra.mrb[200].mxu0 %v15474_v54  ;;  %v4588_v8 = vor.u32 %v4586_v52, %v4585_v28  ;;  %v14621_v1 = vpop.f32.mrb[98].mxu1  ;;  %v15476_v16 = vld [vmem:[#allocation10_spill] sm:$0xff] }
 0x250   : > { %v4589_v3 = vrot.slane %v4585_v28, 4  ;;  %v10027_v26 = vpack.c.bf16 %v4442_v22, %v4442_v22  ;;  %v11650_v19 = vadd.f32 %v14563_v50, %v15475_v2  ;;  %6433 = vmatprep.mubr.bf16.mxu0 %v14490_v5  ;;  %11427 = vmatpush3.bf16.msra.mxu0 %v12303_v25  ;;  %v4687_v9 = vsel %vm13974_vm9, %v4571_v0, %v4686_v38  ;;  %v14626_v29 = vpop.f32.mrb[99].mxu1  ;;  %v4697_v50 = vld [vmem:[#allocation2 + $0xb0] sm:$0x1]  ;;  %v15477_v41 = vld [vmem:[#allocation17_spill] sm:$0xff]  ;;  %v15479_v10 = vld [vmem:[#allocation11_spill] sm:$0xff] }
 0x251   : > { %v4591_v7 = vshrl.u32 %v10029_v56, 16  ;;  %v4594_v63 = vshll.u32 %v10029_v56, 16  ;;  %v11646_v44 = vadd.f32 %v10582_v18, %v15476_v16  ;;  %11428 = vmatprep.subr.bf16.mxu0 %v12306_v33  ;;  %v4694_v62 = vsel %vm13974_vm9, %v4588_v8, %v4693_v27  ;;  %4688 = vst [vmem:[#allocation2 + $0x9c] sm:$0xf] %v4687_v9  ;;  %v15478_v4 = vld [vmem:[#allocation16_spill] sm:$0xff]  ;;  %v12315_v16 = vld [vmem:[#allocation3 + $0x40] sm:$0xff]  }
 0x252   : > { %v4574_v5 = vshrl.u32 %v10027_v26, 16  ;;  %v4577_v25 = vshll.u32 %v10027_v26, 16  ;;  %v11651_v61 = vadd.f32 %v11650_v19, %v14575_v58  ;;  %4695 = vst [vmem:[#allocation2 + $0xa8] sm:$0xf] %v4694_v62  ;;  %v10585_v48 = vadd.f32 %v14582_v35, %v14577_v14  ;;  %v12311_v14 = vld [vmem:[#allocation3 + $0x238] sm:$0xff]  }
 0x253   : > { %v4593_v40 = vrot.slane %v4591_v7, 7  ;;  %v11647_v43 = vadd.f32 %v11646_v44, %v15477_v41  ;;  %v11656_v57 = vadd.f32 %v14591_v47, %v15478_v4  ;;  %v14636_v39 = vld [vmem:[#allocation2 + $0x74] ss:$0 sps:$4 sm:$0x11]   ;;  %v7228_v30 = vshrl.u32 %v14607_v6, 16 }
 0x254   : > { %v4576_v52 = vrot.slane %v4574_v5, 7  ;;  %v4429_v36 = vadd.f32 %v14496_v21, %v11651_v61  ;;  %v7230_v58 = vshll.u32 %v14607_v6, 16  ;;  %11429 = vmatpush3.bf16.msra.mxu0 %v12306_v33  ;;  %v11652_v32 = vadd.f32 %v10585_v48, %v15479_v10  ;;  %v14659_v26 = vld [vmem:[#allocation2 + $0x80] ss:$0 sps:$4 sm:$0x11]   ;;  %v15481_v10 = vld [vmem:[#allocation15_spill] sm:$0xff] }
 0x255   : > { %v4596_v27 = vor.u32 %v4594_v63, %v4593_v40  ;;  %v4598_v12 = vrot.slane %v4593_v40, 4  ;;  %v11648_v24 = vadd.f32 %v11647_v43, %v14570_v49  ;;  %11430 = vmatprep.subr.bf16.mxu0 %v12310_v11  ;;  %v11657_v38 = vadd.f32 %v11656_v57, %v14585_v45  ;;  %v15480_v49 = vld [vmem:[#allocation13_spill] sm:$0xff]  ;;  %v4700_v62 = vld [vmem:[#allocation2 + $0xb4] sm:$0xf]  ;;  %v12293_v43 = vld [vmem:[#allocation3 + $0x148] sm:$0xff]  }
 0x256   : > { %v4579_v35 = vor.u32 %v4577_v25, %v4576_v52  ;;  %v4581_v47 = vrot.slane %v4576_v52, 4  ;;  %v4445_v28 = vmax.f32 %v4429_v36, 0.0  ;;  %v11653_v56 = vadd.f32 %v11652_v32, %v14463_v37  ;;  %v14675_v36 = vld [vmem:[#allocation2 + $0x8c] ss:$0 sps:$4 sm:$0x11]  }
 0x257   : > { %v4597_v22 = vsel %vm13986_vm10, %v4589_v3, %v4596_v27  ;;  %v4698_v0 = vsel %vm13722_vm4, %v4598_v12, %v4697_v50  ;;  %v4431_v33 = vadd.f32 %v14496_v21, %v11648_v24  ;;  %6434 = vmatmul.mubr.bf16.gmra.mrb[204].mxu0 %v15480_v49  ;;  %v4430_v8 = vadd.f32 %v14496_v21, %v11657_v38  ;;  %v14657_v3 = vld [vmem:[#allocation2 + $0x78] sm:$0xff]   ;;  %v12300_v38 = vld [vmem:[#allocation3 + $0x150] sm:$0xff]   ;;  %v14684_v49 = vld [vmem:[#allocation2 + $0x90] sm:$0xff]  }
 0x258   : > { %4696 = vst [vmem:[#allocation2 + $0xac] sm:$0xf] %v4597_v22  ;;  %4699 = vst [vmem:[#allocation2 + $0xb0] sm:$0x1] %v4698_v0  ;;  %v4580_v18 = vsel %vm13986_vm10, %v4572_v23, %v4579_v35  ;;  %v4691_v45 = vsel %vm13722_vm4, %v4581_v47, %v4690_v60  ;;  %v10030_v54 = vpack.c.bf16 %v4445_v28, %v4445_v28  ;;  %6441 = vmatprep.mubr.bf16.mxu0 %v14513_v20  ;;  %v14671_v60 = vld [vmem:[#allocation2 + $0x84] sm:$0xff]   ;;  %v12412_v47 = vld [vmem:[#allocation3 + $0x140] sm:$0xff]  }
 0x259   : > { %4689 = vst [vmem:[#allocation2 + $0xa0] sm:$0xf] %v4580_v18  ;;  %4692 = vst [vmem:[#allocation2 + $0xa4] sm:$0x1] %v4691_v45  ;;  %v4447_v37 = vmax.f32 %v4431_v33, 0.0  ;;  %v11654_v2 = vadd.f32 %v11653_v56, %v14580_v53  ;;  %v7232_v19 = vrot.slane %v7230_v58, 1  ;;  %11431 = vmatpush3.bf16.msra.mxu0 %v12310_v11  ;;  %v14666_v20 = vor.u32 %v14510_v15, %v6121_v34 }
 0x25a   : > { %v7235_v23 = vshll.u32 %v14636_v39, 16  ;;  %v4600_v9 = vshrl.u32 %v10030_v54, 16  ;;  %v4603_v7 = vshll.u32 %v10030_v54, 16  ;;  %v4446_v63 = vmax.f32 %v4430_v8, 0.0  ;;  %11432 = vmatprep.subr.bf16.mxu0 %v12311_v14  ;;  %v4704_v12 = vld [vmem:[#allocation2 + $0xbc] sm:$0x1] }
 0x25b   : > { %v10032_v44 = vpack.c.bf16 %v4447_v37, %v4447_v37  ;;  %v4432_v50 = vadd.f32 %v14496_v21, %v11654_v2  ;;  %v7233_v5 = vor.u32 %v7232_v19, %v7228_v30  ;;  %v7242_v11 = vshll.u32 %v14657_v3, 16  ;;  %v4707_v21 = vld [vmem:[#allocation2 + $0xc0] sm:$0xf]  ;;  %v4711_v18 = vld [vmem:[#allocation2 + $0xc8] sm:$0x1]  ;;  %v14686_v2 = vld [vmem:[#allocation2 + $0x6c] sm:$0xff]  }
 0x25c   : > { %v7237_v53 = vrot.slane %v7235_v23, 1  ;;  %v4602_v25 = vrot.slane %v4600_v9, 7  ;;  %v10031_v61 = vpack.c.bf16 %v4446_v63, %v4446_v63  ;;  %v7247_v40 = vshll.u32 %v14659_v26, 16 }
 0x25d   : > { %v4617_v42 = vshrl.u32 %v10032_v44, 16  ;;  %v4448_v41 = vmax.f32 %v4432_v50, 0.0  ;;  %v7240_v15 = vshrl.u32 %v14657_v3, 16  ;;  %11433 = vmatpush3.bf16.msra.mxu0 %v12311_v14  ;;  %v4620_v48 = vshll.u32 %v10032_v44, 16 }
 0x25e   : > { %v7238_v34 = vsel %vm457_vm0, %v7233_v5, %v7237_v53  ;;  %v4605_v4 = vor.u32 %v4603_v7, %v4602_v25  ;;  %v4606_v57 = vrot.slane %v4602_v25, 4  ;;  %v4608_v52 = vshrl.u32 %v10031_v61, 16  ;;  %11002 = vmatprep.subr.bf16.mxu0 %v12315_v16  ;;  %v14691_v7 = vld [vmem:[#allocation2 + $0x74] ss:$0 sps:$4 sm:$0x11]  }
 0x25f   : > { %7587 = vmatprep.mubr.bf16.mxu1 %v7238_v34  ;;  %v4619_v30 = vrot.slane %v4617_v42, 7  ;;  %v10033_v58 = vpack.c.bf16 %v4448_v41, %v4448_v41  ;;  %v4611_v27 = vshll.u32 %v10031_v61, 16  ;;  %v7244_v24 = vrot.slane %v7242_v11, 1  ;;  %6442 = vmatmul.mubr.bf16.gmra.mrb[208].mxu0 %v15481_v10  ;;  %v14698_v50 = vld [vmem:[#allocation2 + $0x98] ss:$0 sps:$4 sm:$0x11]  }
 0x260   : > { %7588 = vmatmul.mubr.bf16.vlgmr.msra.gmra.mrb[128].mxu1 %v14607_v6  ;;  %v4701_v32 = vsel %vm13974_vm9, %v4605_v4, %v4700_v62  ;;  %v4610_v14 = vrot.slane %v4608_v52, 7  ;;  %v7249_v35 = vrot.slane %v7247_v40, 1  ;;  %6449 = vmatprep.mubr.bf16.mxu0 %v14516_v59  ;;  %v7254_v28 = vshll.u32 %v14671_v60, 16  ;;  %v12307_v40 = vld [vmem:[#allocation3 + $0x158] sm:$0xff]  }
 0x261   : > { %11451 = vmatpush3.bf16.msra.mxu1 %v12412_v47  ;;  %v4622_v22 = vor.u32 %v4620_v48, %v4619_v30  ;;  %v4623_v0 = vrot.slane %v4619_v30, 4  ;;  %4702 = vst [vmem:[#allocation2 + $0xb4] sm:$0xf] %v4701_v32  ;;  %v4625_v33 = vshrl.u32 %v10033_v58, 16  ;;  %v7252_v56 = vshrl.u32 %v14671_v60, 16  ;;  %v14714_v48 = vld [vmem:[#allocation2 + $0x9c] sm:$0xff]  }
 0x262   : > { %11452 = vmatprep.subr.bf16.mxu1 %v12293_v43  ;;  %v4613_v45 = vor.u32 %v4611_v27, %v4610_v14  ;;  %v4615_v54 = vrot.slane %v4610_v14, 4  ;;  %v7245_v8 = vor.u32 %v7244_v24, %v7240_v15  ;;  %v7256_v37 = vrot.slane %v7254_v28, 1  ;;  %v14711_v15 = vld [vmem:[#allocation2 + $0x54] sm:$0xff]   ;;  %v14729_v32 = vld [vmem:[#allocation2 + $0xa4] ss:$0 sps:$4 sm:$0x11]  }
 0x263   : > { %v4708_v59 = vsel %vm13974_vm9, %v4622_v22, %v4707_v21  ;;  %v4627_v19 = vrot.slane %v4625_v33, 7  ;;  %v4628_v23 = vshll.u32 %v10033_v58, 16  ;;  %v7259_v9 = vshll.u32 %v14675_v36, 16  ;;  %v12317_v14 = vld [vmem:[#allocation3 + $0x168] sm:$0xff]  }
 0x264   : > { %4709 = vst [vmem:[#allocation2 + $0xc0] sm:$0xf] %v4708_v59  ;;  %v4614_v63 = vsel %vm13986_vm10, %v4606_v57, %v4613_v45  ;;  %v4705_v16 = vsel %vm13722_vm4, %v4615_v54, %v4704_v12  ;;  %v7250_v44 = vsel %vm457_vm0, %v7245_v8, %v7249_v35  ;;  %v7257_v62 = vor.u32 %v7256_v37, %v7252_v56  ;;  %v12312_v57 = vld [vmem:[#allocation3 + $0x160] sm:$0xff]   ;;  %v12416_v56 = vld [vmem:[#allocation2 + $0x20] ss:$0 sps:$4 sm:$0x11]  }
 0x265   : > { %11453 = vmatpush3.bf16.msra.mxu1 %v12293_v43  ;;  %v4630_v17 = vor.u32 %v4628_v23, %v4627_v19  ;;  %v4632_v5 = vrot.slane %v4627_v19, 4  ;;  %4703 = vst [vmem:[#allocation2 + $0xb8] sm:$0xf] %v4614_v63  ;;  %4706 = vst [vmem:[#allocation2 + $0xbc] sm:$0x1] %v4705_v16  ;;  %7595 = vmatprep.mubr.bf16.mxu1 %v7250_v44  ;;  %v7261_v53 = vrot.slane %v7259_v9, 1 }
 0x266   : > { %11454 = vmatprep.subr.bf16.mxu1 %v12300_v38  ;;  %v7266_v25 = vshll.u32 %v14684_v49, 16  ;;  %v6131_v61 = vsel %vm457_vm0, %v14666_v20, %v14521_v31  ;;  %v6135_v11 = vshll.u32 %v14686_v2, 16  ;;  %v7264_v31 = vshrl.u32 %v14684_v49, 16  ;;  %v14742_v54 = vld [vmem:[#allocation2 + $0xb0] ss:$0 sps:$4 sm:$0x11]  }
 0x267   : > { %v4631_v42 = vsel %vm13986_vm10, %v4623_v0, %v4630_v17  ;;  %v4712_v41 = vsel %vm13722_vm4, %v4632_v5, %v4711_v18  ;;  %v7262_v34 = vsel %vm457_vm0, %v7257_v62, %v7261_v53  ;;  %6450 = vmatmul.mubr.bf16.gmra.mrb[212].mxu0 %v14711_v15  ;;  %v7271_v20 = vshll.u32 %v14698_v50, 16  ;;  %v12415_v0 = vld [vmem:[#allocation2 + $0x18] sm:$0xff]   ;;  %v12331_v37 = vld [vmem:[#allocation3 + $0x178] sm:$0xff]   ;;  %v12417_v44 = vld [vmem:[#allocation2 + $0x24] sm:$0xff]  }
 0x268   : > { %7596 = vmatmul.mubr.bf16.gmra.mrb[132].mxu1 %v14657_v3  ;;  %v7268_v43 = vrot.slane %v7266_v25, 1  ;;  %4710 = vst [vmem:[#allocation2 + $0xc4] sm:$0xf] %v4631_v42  ;;  %4713 = vst [vmem:[#allocation2 + $0xc8] sm:$0x1] %v4712_v41  ;;  %6457 = vmatprep.mubr.bf16.mxu0 %v6131_v61  ;;  %v6137_v51 = vrot.slane %v6135_v11, 1  ;;  %v14722_v52 = vadd.f32 %v14616_v46, %v14609_v55 }
 0x269   : > { %7603 = vmatprep.mubr.bf16.mxu1 %v7262_v34  ;;  %11455 = vmatpush3.bf16.msra.mxu1 %v12300_v38  ;;  %v6133_v21 = vshrl.u32 %v14686_v2, 16  ;;  %v6140_v4 = vshll.u32 %v14691_v7, 16  ;;  %v7278_v27 = vshll.u32 %v14714_v48, 16  ;;  %v14727_v12 = vadd.f32 %v14626_v29, %v14621_v1  ;;  %v14733_v46 = vld [vmem:[#allocation2 + $0x60] sm:$0xff]   ;;  %v14737_v1 = vld [vmem:[#allocation2 + $0xa8] sm:$0xff]   ;;  %v12419_v53 = vld [vmem:[#allocation2 + $0x30] sm:$0xff]  }
 0x26a   : > { %11456 = vmatprep.subr.bf16.mxu1 %v12307_v40  ;;  %v7269_v30 = vor.u32 %v7268_v43, %v7264_v31  ;;  %v7273_v24 = vrot.slane %v7271_v20, 1  ;;  %v7276_v29 = vshrl.u32 %v14714_v48, 16  ;;  %v7283_v28 = vshll.u32 %v14729_v32, 16  ;;  %v12324_v38 = vld [vmem:[#allocation3 + $0x170] sm:$0xff]   ;;  %v14752_v61 = vld [vmem:[#allocation3 + $0x80] sm:$0xff]   ;;  %v12318_v20 = vld [vmem:[#allocation3 + $0x48] sm:$0xff]  }
 0x26b   : > { %v6138_v58 = vor.u32 %v6137_v51, %v6133_v21  ;;  %v6142_v10 = vrot.slane %v6140_v4, 1  ;;  %v7280_v47 = vrot.slane %v7278_v27, 1  ;;  %v6152_v33 = vrot.slane %v12415_v0, 1  ;;  %v12418_v17 = vld [vmem:[#allocation2 + $0x2c] ss:$0 sps:$4 sm:$0x11]  }
 0x26c   : > { %v7274_v55 = vsel %vm457_vm0, %v7269_v30, %v7273_v24  ;;  %v6153_v18 = vrot.slane %v12416_v56, 1  ;;  %v7290_v45 = vshll.u32 %v14737_v1, 16  ;;  %v7285_v8 = vrot.slane %v7283_v28, 1  ;;  %v14748_v9 = vld [vmem:[#allocation2 + $0xb4] sm:$0xff]   ;;  %v12321_v24 = vld [vmem:[#allocation3 + $0x8] sm:$0xff]   ;;  %v12423_v28 = vld [vmem:[#allocation2 + $0x48] sm:$0xff]  }
 0x26d   : > { %11457 = vmatpush3.bf16.msra.mxu1 %v12307_v40  ;;  %v6143_v35 = vsel %vm457_vm0, %v6138_v58, %v6142_v10  ;;  %v7281_v22 = vor.u32 %v7280_v47, %v7276_v29  ;;  %v7288_v63 = vshrl.u32 %v14737_v1, 16  ;;  %v7295_v16 = vshll.u32 %v14742_v54, 16  ;;  %v12420_v40 = vld [vmem:[#allocation2 + $0x38] ss:$0 sps:$4 sm:$0x11]   ;;  %v12421_v10 = vld [vmem:[#allocation2 + $0x3c] sm:$0xff]  }
 0x26e   : > { %11458 = vmatprep.subr.bf16.mxu1 %v12312_v57  ;;  %v6154_v19 = vsel %vm562_vm1, %v6152_v33, %v6153_v18  ;;  %v7292_v23 = vrot.slane %v7290_v45, 1  ;;  %v6155_v62 = vrot.slane %v12417_v44, 1  ;;  %v6156_v5 = vrot.slane %v12418_v17, 1  ;;  %v12316_v34 = vld [vmem:[#allocation3] sm:$0xff]   ;;  %v12322_v47 = vld [vmem:[#allocation3 + $0x50] sm:$0xff]  }
 0x26f   : > { %6458 = vmatmul.mubr.bf16.gmra.mrb[216].mxu0 %v14733_v46  ;;  %v7286_v59 = vsel %vm457_vm0, %v7281_v22, %v7285_v8  ;;  %v6158_v25 = vrot.slane %v12419_v53, 1  ;;  %v6159_v42 = vrot.slane %v12420_v40, 1  ;;  %v7302_v41 = vshll.u32 %v14748_v9, 16  ;;  %v14755_v51 = vld [vmem:[#allocation2 + $0xbc] ss:$0 sps:$4 sm:$0x11]  }
 0x270   : > { %7604 = vmatmul.mubr.bf16.gmra.mrb[136].mxu1 %v14671_v60  ;;  %6465 = vmatprep.mubr.bf16.mxu0 %v6143_v35  ;;  %v7293_v11 = vor.u32 %v7292_v23, %v7288_v63  ;;  %v7297_v43 = vrot.slane %v7295_v16, 1  ;;  %v6157_v31 = vsel %vm562_vm1, %v6155_v62, %v6156_v5  ;;  %v14762_v30 = vld [vmem:[#allocation2 + $0xc0] sm:$0xff]   ;;  %v7300_v58 = vshrl.u32 %v14748_v9, 16  ;;  %v12424_v22 = vld [vmem:[#allocation2 + $0x50] ss:$0 sps:$4 sm:$0x11]  }
 0x271   : > { %7611 = vmatprep.mubr.bf16.mxu1 %v7274_v55  ;;  %11459 = vmatpush3.bf16.msra.mxu1 %v12312_v57  ;;  %v6160_v4 = vsel %vm562_vm1, %v6158_v25, %v6159_v42  ;;  %v7304_v57 = vrot.slane %v7302_v41, 1  ;;  %v7307_v27 = vshll.u32 %v14755_v51, 16  ;;  %v12422_v55 = vld [vmem:[#allocation2 + $0x44] ss:$0 sps:$4 sm:$0x11]   ;;  %v6165_v0 = vrot.slane %v12424_v22, 1 }
 0x272   : > { %11460 = vmatprep.subr.bf16.mxu1 %v12317_v14  ;;  %v7298_v21 = vsel %vm457_vm0, %v7293_v11, %v7297_v43  ;;  %v6162_v35 = vrot.slane %v12422_v55, 1  ;;  %v7314_v33 = vshll.u32 %v14762_v30, 16  ;;  %v12323_v56 = vld [vmem:[#allocation3 + $0x10] sm:$0xff]   ;;  %v14773_v63 = vld [vmem:[#allocation2 + $0x60] sm:$0xff]   ;;  %v6167_v16 = vrot.slane %v14711_v15, 1  ;;  %v12328_v25 = vld [vmem:[#allocation3 + $0x18] sm:$0xff]  }
 0x273   : > { %v7305_v29 = vor.u32 %v7304_v57, %v7300_v58  ;;  %v7309_v18 = vrot.slane %v7307_v27, 1  ;;  %v14767_v45 = vld [vmem:[#allocation2 + $0xc8] ss:$0 sps:$4 sm:$0x11]   ;;  %v7312_v5 = vshrl.u32 %v14762_v30, 16  ;;  %v12329_v40 = vld [vmem:[#allocation3 + $0x60] sm:$0xff]  }
 0x274   : > { %v7316_v23 = vrot.slane %v7314_v33, 1  ;;  %v12425_v44 = vld [vmem:[#allocation2 + $0x5c] ss:$0 sps:$4 sm:$0x11]   ;;  %v7319_v53 = vshll.u32 %v14767_v45, 16  ;;  %v6170_v43 = vrot.slane %v14733_v46, 1 }
 0x275   : > { %11461 = vmatpush3.bf16.msra.mxu1 %v12317_v14  ;;  %v6161_v14 = vrot.slane %v12421_v10, 1  ;;  %v6168_v62 = vrot.slane %v12425_v44, 1  ;;  %v6948_v33 = vshrl.u32 %v14773_v63, 16  ;;  %v12335_v44 = vld [vmem:[#allocation3 + $0x30] sm:$0xff]  }
 0x276   : > { %11462 = vmatprep.subr.bf16.mxu1 %v12324_v38  ;;  %v7321_v27 = vrot.slane %v7319_v53, 1 }
 0x277   : > { %6466 = vmatmul.mubr.bf16.gmra.mrb[220].mxu0 %v14686_v2  ;;  %v6163_v8 = vsel %vm562_vm1, %v6161_v14, %v6162_v35  ;;  %v6169_v10 = vsel %vm562_vm1, %v6167_v16, %v6168_v62  ;;  %v12332_v14 = vld [vmem:[#allocation3 + $0x68] sm:$0xff]  }
 0x278   : > { %7612 = vmatmul.mubr.bf16.gmra.mrb[140].mxu1 %v14684_v49  ;;  %11434 = vmatprep.mubr.bf16.mxu0 %v6154_v19 }
 0x279   : > { %7619 = vmatprep.mubr.bf16.mxu1 %v7286_v59  ;;  %11463 = vmatpush3.bf16.msra.mxu1 %v12324_v38  ;;  %v6164_v38 = vrot.slane %v12423_v28, 1  ;;  %v7310_v59 = vsel %vm457_vm0, %v7305_v29, %v7309_v18  ;;  %v12333_v28 = vld [vmem:[#allocation3 + $0x28] sm:$0xff]   ;;  %v14795_v18 = vld [vmem:[#allocation2 + $0x6c] sm:$0xff]  }
 0x27a   : > { %11464 = vmatprep.subr.bf16.mxu1 %v12331_v37  ;;  %v6962_v62 = vshll.u32 %v14795_v18, 16 }
 0x27b   : > { %v6166_v19 = vsel %vm562_vm1, %v6164_v38, %v6165_v0  ;;  %v6173_v0 = vrot.slane %v14686_v2, 1 }
 0x27d   : > { %11465 = vmatpush3.bf16.msra.mxu1 %v12331_v37  ;;  %v12325_v37 = vld [vmem:[#allocation3 + $0x58] sm:$0xff]  }
 0x27e   : > { %11482 = vmatprep.subr.bf16.mxu1 %v14752_v61 }
 0x27f   : > { %11435 = vmatmul.mubr.bf16.vlgmr.msra.gmra.mrb[176].mxu0 %v6157_v31  ;;  %v12426_v31 = vld [vmem:[#allocation2 + $0x68] ss:$0 sps:$4 sm:$0x11]  }
 0x280   : > { %7620 = vmatmul.mubr.bf16.gmra.mrb[144].mxu1 %v14714_v48  ;;  %11438 = vmatprep.mubr.bf16.mxu0 %v6160_v4  ;;  %v12330_v4 = vld [vmem:[#allocation3 + $0x20] sm:$0xff]  }
 0x281   : > { %7627 = vmatprep.mubr.bf16.mxu1 %v7298_v21  ;;  %11003 = vmatpush3.bf16.msra.mxu0 %v12316_v34  ;;  %v7317_v34 = vor.u32 %v7316_v23, %v7312_v5  ;;  %v6950_v21 = vshll.u32 %v14773_v63, 16  ;;  %v12338_v5 = vld [vmem:[#allocation3 + $0x78] sm:$0xff]  }
 0x282   : > { %11004 = vmatprep.subr.bf16.mxu0 %v12318_v20  ;;  %v6171_v20 = vrot.slane %v12426_v31, 1  ;;  %v6964_v31 = vrot.slane %v6962_v62, 1  ;;  %v7341_v62 = vrot.slane %v14698_v50, 1 }
 0x283   : > { %v7322_v55 = vsel %vm457_vm0, %v7317_v34, %v7321_v27  ;;  %v7338_v34 = vrot.slane %v14675_v36, 1  ;;  %v358_v27 = vld [vmem:[#allocation2 + $0xd4] sm:$0x1] }
 0x285   : > { %11005 = vmatpush3.bf16.msra.mxu0 %v12321_v24  ;;  %v14783_v24 = vld [vmem:[#allocation2 + $0x68] ss:$0 sps:$4 sm:$0x11]  }
 0x286   : > { %11006 = vmatprep.subr.bf16.mxu0 %v12322_v47  ;;  %v6952_v47 = vrot.slane %v6950_v21, 1 }
 0x287   : > { %11439 = vmatmul.mubr.bf16.gmra.mrb[180].mxu0 %v6163_v8  ;;  %v10698_v17 = vpop.f32.mrb[144].mxu0 }
 0x288   : > { %7628 = vmatmul.mubr.bf16.gmra.mrb[148].mxu1 %v14737_v1  ;;  %11442 = vmatprep.mubr.bf16.mxu0 %v6166_v19  ;;  %v10699_v11 = vpop.f32.mrb[145].mxu0  ;;  %v7332_v19 = vrot.slane %v14636_v39, 1  ;;  %v6953_v16 = vor.u32 %v6952_v47, %v6948_v33  ;;  %v7334_v39 = vrot.slane %v14657_v3, 1 }
 0x289   : > { %7635 = vmatprep.mubr.bf16.mxu1 %v7310_v59  ;;  %11007 = vmatpush3.bf16.msra.mxu0 %v12323_v56  ;;  %v10700_v42 = vadd.f32 %v10699_v11, %v10698_v17  ;;  %v10701_v41 = vpop.f32.mrb[146].mxu0  ;;  %v6955_v56 = vshll.u32 %v14783_v24, 16  ;;  %v7331_v59 = vrot.slane %v14607_v6, 1  ;;  %v14808_v11 = vld [vmem:[#allocation2 + $0x78] sm:$0xff]  }
 0x28a   : > { %11008 = vmatprep.subr.bf16.mxu0 %v12325_v37  ;;  %v10702_v15 = vpop.f32.mrb[147].mxu0  ;;  %v6174_v37 = vrot.slane %v14691_v7, 1  ;;  %v12340_v7 = vld [vmem:[#allocation3 + $0x38] sm:$0xff]  }
 0x28b   : > { %v14781_v57 = vadd.f32 %v14722_v52, %v10700_v42  ;;  %v10703_v58 = vadd.f32 %v10702_v15, %v10701_v41  ;;  %v6172_v52 = vsel %vm562_vm1, %v6170_v43, %v6171_v20  ;;  %v6957_v2 = vrot.slane %v6955_v56, 1  ;;  %v302_v20 = vld [vmem:[#allocation2 + $0xcc] sm:$0x1] }
 0x28c   : > { %v6175_v17 = vsel %vm562_vm1, %v6173_v0, %v6174_v37  ;;  %v7333_v53 = vsel %vm562_vm1, %v7331_v59, %v7332_v19  ;;  %v7335_v42 = vrot.slane %v14659_v26, 1  ;;  %v7337_v41 = vrot.slane %v14671_v60, 1  ;;  %v12344_v19 = vld [vmem:[#allocation3 + $0x90] sm:$0xff]  }
 0x28d   : > { %11009 = vmatpush3.bf16.msra.mxu0 %v12328_v25  ;;  %v14787_v46 = vadd.f32 %v14727_v12, %v10703_v58  ;;  %v12334_v12 = vld [vmem:[#allocation3 + $0x70] sm:$0xff]   ;;  %v6958_v6 = vsel %vm457_vm0, %v6953_v16, %v6957_v2  ;;  %v14806_v25 = vld [vmem:[#allocation2 + $0x74] ss:$0 sps:$4 sm:$0x11]   ;;  %v303_v58 = vsel %vm13722_vm4, 0, %v302_v20  ;;  %v7340_v2 = vrot.slane %v14684_v49, 1 }
 0x28e   : > { %11010 = vmatprep.subr.bf16.mxu0 %v12329_v40  ;;  %v10784_v35 = vpop.f32.mrb[100].mxu1  ;;  %v6967_v60 = vshll.u32 %v14806_v25, 16  ;;  %304 = vst [vmem:[#allocation2 + $0xcc] sm:$0x1] %v303_v58  ;;  %v7336_v0 = vsel %vm562_vm1, %v7334_v39, %v7335_v42  ;;  %v7339_v56 = vsel %vm562_vm1, %v7337_v41, %v7338_v34  ;;  %v12345_v49 = vld [vmem:[#allocation3 + $0x98] sm:$0xff]  }
 0x28f   : > { %11443 = vmatmul.mubr.bf16.gmra.mrb[184].mxu0 %v6169_v10  ;;  %v10785_v29 = vpop.f32.mrb[101].mxu1 }
 0x290   : > { %7636 = vmatmul.mubr.bf16.gmra.mrb[152].mxu1 %v14748_v9  ;;  %11446 = vmatprep.mubr.bf16.mxu0 %v6172_v52  ;;  %v10786_v38 = vadd.f32 %v10785_v29, %v10784_v35  ;;  %v10787_v22 = vpop.f32.mrb[102].mxu1 }
 0x291   : > { %7643 = vmatprep.mubr.bf16.mxu1 %v7322_v55  ;;  %11011 = vmatpush3.bf16.msra.mxu0 %v12330_v4  ;;  %v10788_v8 = vpop.f32.mrb[103].mxu1  ;;  %v6960_v4 = vshrl.u32 %v14795_v18, 16 }
 0x292   : > { %11012 = vmatprep.subr.bf16.mxu0 %v12332_v14  ;;  %v10789_v23 = vadd.f32 %v10788_v8, %v10787_v22  ;;  %v359_v14 = vsel %vm13733_vm6, 0, %v358_v27  ;;  %v6974_v22 = vshll.u32 %v14808_v11, 16  ;;  %v14826_v8 = vld [vmem:[#allocation2 + $0x80] ss:$0 sps:$4 sm:$0x11]  }
 0x293   : > { %360 = vst [vmem:[#allocation2 + $0xd4] sm:$0x1] %v359_v14  ;;  %v6965_v13 = vor.u32 %v6964_v31, %v6960_v4  ;;  %v6979_v39 = vshll.u32 %v14826_v8, 16  ;;  %v7346_v14 = vrot.slane %v14737_v1, 1 }
 0x294   : > { %v6976_v16 = vrot.slane %v6974_v22, 1 }
 0x295   : > { %11013 = vmatpush3.bf16.msra.mxu0 %v12333_v28  ;;  %v12341_v28 = vld [vmem:[#allocation3 + $0x88] sm:$0xff]  }
 0x296   : > { %11014 = vmatprep.subr.bf16.mxu0 %v12334_v12 }
 0x297   : > { %11447 = vmatmul.mubr.bf16.gmra.mrb[188].mxu0 %v6175_v17  ;;  %v10704_v40 = vpop.f32.mrb[148].mxu0  ;;  %v7343_v17 = vrot.slane %v14714_v48, 1 }
 0x298   : > { %7644 = vmatmul.mubr.bf16.gmra.mrb[156].mxu1 %v14762_v30  ;;  %7925 = vmatprep.mubr.bf16.mxu0 %v6958_v6  ;;  %v10705_v43 = vpop.f32.mrb[149].mxu0  ;;  %v6972_v6 = vshrl.u32 %v14808_v11, 16 }
 0x299   : > { %11466 = vmatprep.mubr.bf16.mxu1 %v7333_v53  ;;  %11015 = vmatpush3.bf16.msra.mxu0 %v12335_v44  ;;  %v10790_v15 = vpop.f32.mrb[104].mxu1  ;;  %v10706_v3 = vadd.f32 %v10705_v43, %v10704_v40  ;;  %v10707_v21 = vpop.f32.mrb[150].mxu0  ;;  %v7344_v53 = vrot.slane %v14729_v32, 1  ;;  %v7342_v43 = vsel %vm562_vm1, %v7340_v2, %v7341_v62 }
 0x29a   : > { %11016 = vmatprep.subr.bf16.mxu0 %v12338_v5  ;;  %v10791_v10 = vpop.f32.mrb[105].mxu1  ;;  %v10708_v26 = vpop.f32.mrb[151].mxu0  ;;  %v6977_v34 = vor.u32 %v6976_v16, %v6972_v6 }
 0x29b   : > { %v14819_v55 = vadd.f32 %v10786_v38, %v10706_v3  ;;  %v10792_v52 = vadd.f32 %v10791_v10, %v10790_v15  ;;  %v10793_v35 = vpop.f32.mrb[106].mxu1  ;;  %v10709_v47 = vadd.f32 %v10708_v26, %v10707_v21  ;;  %v6969_v38 = vrot.slane %v6967_v60, 1  ;;  %v14846_v21 = vld [vmem:[#allocation2 + $0x8c] ss:$0 sps:$4 sm:$0x11]   ;;  %v12348_v10 = vld [vmem:[#allocation3 + $0xa0] sm:$0xff]  }
 0x29c   : > { %v10794_v29 = vpop.f32.mrb[107].mxu1  ;;  %v7345_v20 = vsel %vm562_vm1, %v7343_v17, %v7344_v53  ;;  %v6981_v3 = vrot.slane %v6979_v39, 1  ;;  %v14850_v60 = vld [vmem:[#allocation2 + $0x90] sm:$0xff]   ;;  %v12352_v53 = vld [vmem:[#allocation3 + $0xb0] sm:$0xff]   ;;  %v14869_v39 = vld [vmem:[#allocation2 + $0x9c] sm:$0xff]  }
 0x29d   : > { %11017 = vmatpush3.bf16.msra.mxu0 %v12340_v7  ;;  %v14823_v12 = vadd.f32 %v10789_v23, %v10709_v47  ;;  %v10795_v33 = vadd.f32 %v10794_v29, %v10793_v35  ;;  %v6970_v37 = vsel %vm457_vm0, %v6965_v13, %v6969_v38  ;;  %v14831_v23 = vld [vmem:[#allocation2 + $0x84] sm:$0xff]   ;;  %v7349_v47 = vrot.slane %v14748_v9, 1 }
 0x29e   : > { %v6986_v50 = vshll.u32 %v14831_v23, 16  ;;  %v6982_v27 = vsel %vm457_vm0, %v6977_v34, %v6981_v3  ;;  %v7350_v29 = vrot.slane %v14755_v51, 1  ;;  %v6991_v13 = vshll.u32 %v14846_v21, 16 }
 0x29f   : > { %v6998_v1 = vshll.u32 %v14850_v60, 16 }
 0x2a0   : > { %11467 = vmatmul.mubr.bf16.vlgmr.msra.gmra.mrb[160].mxu1 %v7336_v0  ;;  %7926 = vmatmul.mubr.bf16.vlgmr.msra.gmra.mrb[224].mxu0 %v14773_v63  ;;  %v6988_v26 = vrot.slane %v6986_v50, 1  ;;  %v6993_v16 = vrot.slane %v6991_v13, 1  ;;  %v7051_v50 = vrot.slane %v14773_v63, 1  ;;  %v12356_v13 = vld [vmem:[#allocation3 + $0x1c0] sm:$0xff]  }
 0x2a1   : > { %11470 = vmatprep.mubr.bf16.mxu1 %v7339_v56  ;;  %11483 = vmatpush3.bf16.msra.mxu1 %v14752_v61  ;;  %v10710_v59 = vpop.f32.mrb[152].mxu0  ;;  %v12349_v56 = vld [vmem:[#allocation3 + $0xa8] sm:$0xff]   ;;  %v7000_v6 = vrot.slane %v6998_v1, 1  ;;  %v7055_v1 = vrot.slane %v14806_v25, 1 }
 0x2a2   : > { %11484 = vmatprep.subr.bf16.mxu1 %v12341_v28  ;;  %7933 = vmatprep.mubr.bf16.mxu0 %v6970_v37  ;;  %v10711_v44 = vpop.f32.mrb[153].mxu0 }
 0x2a3   : > { %v10712_v5 = vadd.f32 %v10711_v44, %v10710_v59  ;;  %v10713_v61 = vpop.f32.mrb[154].mxu0  ;;  %v14863_v44 = vld [vmem:[#allocation2 + $0x98] ss:$0 sps:$4 sm:$0x11]  }
 0x2a4   : > { %v10714_v7 = vpop.f32.mrb[155].mxu0  ;;  %v10796_v40 = vpop.f32.mrb[108].mxu1 }
 0x2a5   : > { %11485 = vmatpush3.bf16.msra.mxu1 %v12341_v28  ;;  %v14839_v42 = vadd.f32 %v10792_v52, %v10712_v5  ;;  %v10715_v41 = vadd.f32 %v10714_v7, %v10713_v61  ;;  %v10797_v48 = vpop.f32.mrb[109].mxu1  ;;  %v7347_v52 = vrot.slane %v14742_v54, 1  ;;  %v6984_v28 = vshrl.u32 %v14831_v23, 16 }
 0x2a6   : > { %11486 = vmatprep.subr.bf16.mxu1 %v12344_v19  ;;  %v10798_v31 = vadd.f32 %v10797_v48, %v10796_v40  ;;  %v10799_v32 = vpop.f32.mrb[110].mxu1  ;;  %v7052_v48 = vrot.slane %v14783_v24, 1 }
 0x2a7   : > { %v14844_v15 = vadd.f32 %v10795_v33, %v10715_v41  ;;  %v10800_v4 = vpop.f32.mrb[111].mxu1  ;;  %v6989_v38 = vor.u32 %v6988_v26, %v6984_v28  ;;  %v7348_v9 = vsel %vm562_vm1, %v7346_v14, %v7347_v52  ;;  %v7352_v41 = vrot.slane %v14762_v30, 1  ;;  %v14882_v14 = vld [vmem:[#allocation2 + $0xa4] ss:$0 sps:$4 sm:$0x11]  }
 0x2a8   : > { %11471 = vmatmul.mubr.bf16.gmra.mrb[164].mxu1 %v7342_v43  ;;  %v10801_v58 = vadd.f32 %v10800_v4, %v10799_v32  ;;  %7934 = vmatmul.mubr.bf16.gmra.mrb[228].mxu0 %v14795_v18  ;;  %v6996_v43 = vshrl.u32 %v14850_v60, 16  ;;  %v12353_v4 = vld [vmem:[#allocation3 + $0xb8] sm:$0xff]   ;;  %v7010_v30 = vshll.u32 %v14869_v39, 16  ;;  %v7053_v26 = vsel %vm562_vm1, %v7051_v50, %v7052_v48 }
 0x2a9   : > { %11474 = vmatprep.mubr.bf16.mxu1 %v7345_v20  ;;  %11487 = vmatpush3.bf16.msra.mxu1 %v12344_v19  ;;  %v10716_v36 = vpop.f32.mrb[156].mxu0  ;;  %v7351_v19 = vsel %vm562_vm1, %v7349_v47, %v7350_v29  ;;  %v6994_v61 = vsel %vm457_vm0, %v6989_v38, %v6993_v16  ;;  %v7054_v38 = vrot.slane %v14795_v18, 1 }
 0x2aa   : > { %11488 = vmatprep.subr.bf16.mxu1 %v12345_v49  ;;  %7941 = vmatprep.mubr.bf16.mxu0 %v6982_v27  ;;  %v10717_v35 = vpop.f32.mrb[157].mxu0 }
 0x2ab   : > { %v10718_v22 = vadd.f32 %v10717_v35, %v10716_v36  ;;  %v10719_v0 = vpop.f32.mrb[158].mxu0 }
 0x2ac   : > { %v10720_v33 = vpop.f32.mrb[159].mxu0 }
 0x2ad   : > { %11489 = vmatpush3.bf16.msra.mxu1 %v12345_v49  ;;  %v10802_v37 = vpop.f32.mrb[112].mxu1  ;;  %v14859_v54 = vadd.f32 %v10798_v31, %v10718_v22  ;;  %v10721_v59 = vadd.f32 %v10720_v33, %v10719_v0  ;;  %v7353_v49 = vrot.slane %v14767_v45, 1  ;;  %v7003_v31 = vshll.u32 %v14863_v44, 16  ;;  %v14888_v0 = vld [vmem:[#allocation2 + $0xa8] sm:$0xff]  }
 0x2ae   : > { %11490 = vmatprep.subr.bf16.mxu1 %v12348_v10  ;;  %v10803_v51 = vpop.f32.mrb[113].mxu1  ;;  %v7012_v22 = vrot.slane %v7010_v30, 1  ;;  %v7022_v18 = vshll.u32 %v14888_v0, 16 }
 0x2af   : > { %v10804_v2 = vadd.f32 %v10803_v51, %v10802_v37  ;;  %v10805_v62 = vpop.f32.mrb[114].mxu1  ;;  %v14865_v17 = vadd.f32 %v10801_v58, %v10721_v59  ;;  %v7001_v58 = vor.u32 %v7000_v6, %v6996_v43  ;;  %v7354_v63 = vsel %vm562_vm1, %v7352_v41, %v7353_v49  ;;  %v14901_v49 = vld [vmem:[#allocation2 + $0xb0] ss:$0 sps:$4 sm:$0x11]   ;;  %v12361_v43 = vld [vmem:[#allocation3 + $0x188] sm:$0xff]  }
 0x2b0   : > { %11475 = vmatmul.mubr.bf16.gmra.mrb[168].mxu1 %v7348_v9  ;;  %v10806_v5 = vpop.f32.mrb[115].mxu1  ;;  %7942 = vmatmul.mubr.bf16.gmra.mrb[232].mxu0 %v14808_v11  ;;  %v7005_v36 = vrot.slane %v7003_v31, 1  ;;  %v7057_v9 = vrot.slane %v14808_v11, 1  ;;  %v7058_v59 = vrot.slane %v14826_v8, 1  ;;  %v7008_v51 = vshrl.u32 %v14869_v39, 16 }
 0x2b1   : > { %11478 = vmatprep.mubr.bf16.mxu1 %v7351_v19  ;;  %11491 = vmatpush3.bf16.msra.mxu1 %v12348_v10  ;;  %v10807_v7 = vadd.f32 %v10806_v5, %v10805_v62  ;;  %v10722_v40 = vpop.f32.mrb[160].mxu0  ;;  %v7015_v19 = vshll.u32 %v14882_v14, 16  ;;  %v12357_v62 = vld [vmem:[#allocation3 + $0x180] sm:$0xff]   ;;  %v7056_v11 = vsel %vm562_vm1, %v7054_v38, %v7055_v1 }
 0x2b2   : > { %11492 = vmatprep.subr.bf16.mxu1 %v12349_v56  ;;  %7949 = vmatprep.mubr.bf16.mxu0 %v6994_v61  ;;  %v10723_v34 = vpop.f32.mrb[161].mxu0  ;;  %v7006_v28 = vsel %vm457_vm0, %v7001_v58, %v7005_v36  ;;  %v12358_v61 = vld [vmem:[#allocation3 + $0x1c8] sm:$0xff]   ;;  %v7020_v36 = vshrl.u32 %v14888_v0, 16 }
 0x2b3   : > { %v10724_v32 = vadd.f32 %v10723_v34, %v10722_v40  ;;  %v10725_v20 = vpop.f32.mrb[162].mxu0  ;;  %v7059_v40 = vsel %vm562_vm1, %v7057_v9, %v7058_v59  ;;  %v7017_v41 = vrot.slane %v7015_v19, 1  ;;  %v14920_v9 = vld [vmem:[#allocation2 + $0xbc] ss:$0 sps:$4 sm:$0x11]  }
 0x2b4   : > { %v10726_v3 = vpop.f32.mrb[163].mxu0  ;;  %v14922_v59 = vld [vmem:[#allocation2 + $0x78] sm:$0xff]  }
 0x2b5   : > { %11493 = vmatpush3.bf16.msra.mxu1 %v12349_v56  ;;  %v10808_v27 = vpop.f32.mrb[116].mxu1  ;;  %v14878_v45 = vadd.f32 %v10804_v2, %v10724_v32  ;;  %v10727_v10 = vadd.f32 %v10726_v3, %v10725_v20  ;;  %v12362_v20 = vld [vmem:[#allocation3 + $0x1d0] sm:$0xff]   ;;  %v7024_v3 = vrot.slane %v7022_v18, 1 }
 0x2b6   : > { %11494 = vmatprep.subr.bf16.mxu1 %v12352_v53  ;;  %v10809_v24 = vpop.f32.mrb[117].mxu1 }
 0x2b7   : > { %v10810_v52 = vadd.f32 %v10809_v24, %v10808_v27  ;;  %v10811_v35 = vpop.f32.mrb[118].mxu1  ;;  %v14884_v47 = vadd.f32 %v10807_v7, %v10727_v10  ;;  %v7060_v27 = vrot.slane %v14831_v23, 1  ;;  %v7063_v24 = vrot.slane %v14850_v60, 1 }
 0x2b8   : > { %11479 = vmatmul.mubr.bf16.gmra.mrb[172].mxu1 %v7354_v63  ;;  %v10812_v29 = vpop.f32.mrb[119].mxu1  ;;  %7950 = vmatmul.mubr.bf16.gmra.mrb[236].mxu0 %v14831_v23  ;;  %v7061_v63 = vrot.slane %v14846_v21, 1 }
 0x2b9   : > { %11495 = vmatpush3.bf16.msra.mxu1 %v12352_v53  ;;  %11498 = vmatprep.mubr.bf16.mxu1 %v7053_v26  ;;  %v10813_v33 = vadd.f32 %v10812_v29, %v10811_v35  ;;  %v10728_v56 = vpop.f32.mrb[164].mxu0  ;;  %v7013_v53 = vor.u32 %v7012_v22, %v7008_v51  ;;  %v7064_v26 = vrot.slane %v14863_v44, 1  ;;  %v12364_v22 = vld [vmem:[#allocation3 + $0x1d8] sm:$0xff]  }
 0x2ba   : > { %11496 = vmatprep.subr.bf16.mxu1 %v12353_v4  ;;  %7957 = vmatprep.mubr.bf16.mxu0 %v7006_v28  ;;  %v10729_v37 = vpop.f32.mrb[165].mxu0  ;;  %v12363_v28 = vld [vmem:[#allocation3 + $0x190] sm:$0xff]  }
 0x2bb   : > { %v10730_v16 = vadd.f32 %v10729_v37, %v10728_v56  ;;  %v10731_v2 = vpop.f32.mrb[166].mxu0  ;;  %v7018_v32 = vsel %vm457_vm0, %v7013_v53, %v7017_v41  ;;  %v7065_v1 = vsel %vm562_vm1, %v7063_v24, %v7064_v26  ;;  %v7070_v41 = vrot.slane %v14901_v49, 1  ;;  %v14941_v26 = vld [vmem:[#allocation2 + $0x84] sm:$0xff]  }
 0x2bc   : > { %v10732_v5 = vpop.f32.mrb[167].mxu0 }
 0x2bd   : > { %11497 = vmatpush3.bf16.msra.mxu1 %v12353_v4  ;;  %v10814_v25 = vpop.f32.mrb[120].mxu1  ;;  %v14897_v6 = vadd.f32 %v10810_v52, %v10730_v16  ;;  %v10733_v8 = vadd.f32 %v10732_v5, %v10731_v2  ;;  %v14907_v4 = vld [vmem:[#allocation2 + $0xb4] sm:$0xff]   ;;  %v7027_v52 = vshll.u32 %v14901_v49, 16 }
 0x2be   : > { %11082 = vmatprep.subr.bf16.mxu1 %v12356_v13  ;;  %v10815_v7 = vpop.f32.mrb[121].mxu1  ;;  %v7034_v23 = vshll.u32 %v14907_v4, 16  ;;  %v12367_v2 = vld [vmem:[#allocation3 + $0x198] sm:$0xff]  }
 0x2bf   : > { %v10816_v34 = vadd.f32 %v10815_v7, %v10814_v25  ;;  %v10817_v50 = vpop.f32.mrb[122].mxu1  ;;  %v14903_v48 = vadd.f32 %v10813_v33, %v10733_v8  ;;  %v7025_v33 = vor.u32 %v7024_v3, %v7020_v36  ;;  %v7029_v37 = vrot.slane %v7027_v52, 1  ;;  %v12373_v52 = vld [vmem:[#allocation3 + $0x1a8] sm:$0xff]  }
 0x2c0   : > { %11499 = vmatmul.mubr.bf16.vlgmr.msra.gmra.mrb[160].mxu1 %v7056_v11  ;;  %v10818_v31 = vpop.f32.mrb[123].mxu1  ;;  %7958 = vmatmul.mubr.bf16.gmra.mrb[240].mxu0 %v14850_v60  ;;  %v7062_v60 = vsel %vm562_vm1, %v7060_v27, %v7061_v63  ;;  %v7036_v53 = vrot.slane %v7034_v23, 1  ;;  %v7066_v11 = vrot.slane %v14869_v39, 1  ;;  %v7067_v8 = vrot.slane %v14882_v14, 1 }
 0x2c1   : > { %11502 = vmatprep.mubr.bf16.mxu1 %v7059_v40  ;;  %11083 = vmatpush3.bf16.msra.mxu1 %v12357_v62  ;;  %v10819_v58 = vadd.f32 %v10818_v31, %v10817_v50  ;;  %v10734_v30 = vpop.f32.mrb[168].mxu0  ;;  %v7030_v5 = vsel %vm457_vm0, %v7025_v33, %v7029_v37  ;;  %v7069_v7 = vrot.slane %v14888_v0, 1  ;;  %v7039_v50 = vshll.u32 %v14920_v9, 16  ;;  %v14935_v14 = vld [vmem:[#allocation2 + $0x80] ss:$0 sps:$4 sm:$0x11]  }
 0x2c2   : > { %11084 = vmatprep.subr.bf16.mxu1 %v12358_v61  ;;  %7965 = vmatprep.mubr.bf16.mxu0 %v7018_v32  ;;  %v10735_v10 = vpop.f32.mrb[169].mxu0  ;;  %v12368_v61 = vld [vmem:[#allocation3 + $0x1e0] sm:$0xff]   ;;  %v7068_v49 = vsel %vm562_vm1, %v7066_v11, %v7067_v8  ;;  %v7073_v33 = vrot.slane %v14920_v9, 1  ;;  %v12379_v9 = vld [vmem:[#allocation3 + $0x1b8] sm:$0xff]  }
 0x2c3   : > { %v10736_v35 = vadd.f32 %v10735_v10, %v10734_v30  ;;  %v10737_v29 = vpop.f32.mrb[170].mxu0  ;;  %v7071_v63 = vsel %vm562_vm1, %v7069_v7, %v7070_v41  ;;  %v7041_v10 = vrot.slane %v7039_v50, 1  ;;  %v14962_v11 = vld [vmem:[#allocation2 + $0x98] ss:$0 sps:$4 sm:$0x11]   ;;  %v14966_v7 = vld [vmem:[#allocation2 + $0x9c] sm:$0xff]  }
 0x2c4   : > { %v10738_v13 = vpop.f32.mrb[171].mxu0  ;;  %v8216_v41 = vshll.u32 %v14962_v11, 16 }
 0x2c5   : > { %11085 = vmatpush3.bf16.msra.mxu1 %v12361_v43  ;;  %v10820_v21 = vpop.f32.mrb[124].mxu1  ;;  %v14916_v56 = vadd.f32 %v10816_v34, %v10736_v35  ;;  %v10739_v44 = vadd.f32 %v10738_v13, %v10737_v29  ;;  %v7032_v34 = vshrl.u32 %v14907_v4, 16  ;;  %v8187_v43 = vshll.u32 %v14922_v59, 16  ;;  %v12374_v29 = vld [vmem:[#allocation3 + $0x1f0] sm:$0xff]  }
 0x2c6   : > { %11086 = vmatprep.subr.bf16.mxu1 %v12362_v20  ;;  %v10821_v38 = vpop.f32.mrb[125].mxu1  ;;  %v12369_v20 = vld [vmem:[#allocation3 + $0x1a0] sm:$0xff]   ;;  %v8192_v13 = vshll.u32 %v14935_v14, 16 }
 0x2c7   : > { %v10822_v51 = vadd.f32 %v10821_v38, %v10820_v21  ;;  %v10823_v19 = vpop.f32.mrb[126].mxu1  ;;  %v14924_v16 = vadd.f32 %v10819_v58, %v10739_v44  ;;  %v7037_v58 = vor.u32 %v7036_v53, %v7032_v34  ;;  %v8189_v24 = vrot.slane %v8187_v43, 1  ;;  %v12378_v44 = vld [vmem:[#allocation3 + $0x1f8] sm:$0xff]   ;;  %v14952_v38 = vld [vmem:[#allocation2 + $0x8c] ss:$0 sps:$4 sm:$0x11]  }
 0x2c8   : > { %11503 = vmatmul.mubr.bf16.gmra.mrb[164].mxu1 %v7062_v60  ;;  %v10824_v62 = vpop.f32.mrb[127].mxu1  ;;  %7966 = vmatmul.mubr.bf16.gmra.mrb[244].mxu0 %v14869_v39  ;;  %v12370_v39 = vld [vmem:[#allocation3 + $0x1e8] sm:$0xff]   ;;  %v8199_v21 = vshll.u32 %v14941_v26, 16  ;;  %v12375_v60 = vld [vmem:[#allocation3 + $0x1b0] sm:$0xff]   ;;  %v8223_v43 = vshll.u32 %v14966_v7, 16 }
 0x2c9   : > { %11506 = vmatprep.mubr.bf16.mxu1 %v7065_v1  ;;  %11087 = vmatpush3.bf16.msra.mxu1 %v12363_v28  ;;  %v10825_v18 = vadd.f32 %v10824_v62, %v10823_v19  ;;  %v10740_v25 = vpop.f32.mrb[172].mxu0  ;;  %v7042_v35 = vsel %vm457_vm0, %v7037_v58, %v7041_v10  ;;  %v8185_v28 = vshrl.u32 %v14922_v59, 16  ;;  %v14956_v19 = vld [vmem:[#allocation2 + $0x90] sm:$0xff]   ;;  %v8197_v62 = vshrl.u32 %v14941_v26, 16  ;;  %v12386_v34 = vld [vmem:[#allocation3 + $0x210] sm:$0xff]  }
 0x2ca   : > { %11088 = vmatprep.subr.bf16.mxu1 %v12364_v22  ;;  %7973 = vmatprep.mubr.bf16.mxu0 %v7030_v5  ;;  %v10741_v40 = vpop.f32.mrb[173].mxu0  ;;  %v7072_v22 = vrot.slane %v14907_v4, 1  ;;  %v8204_v5 = vshll.u32 %v14952_v38, 16  ;;  %v8211_v53 = vshll.u32 %v14956_v19, 16  ;;  %v14975_v58 = vld [vmem:[#allocation2 + $0xa8] sm:$0xff]  }
 0x2cb   : > { %v10742_v31 = vadd.f32 %v10741_v40, %v10740_v25  ;;  %v10743_v32 = vpop.f32.mrb[174].mxu0  ;;  %v8190_v23 = vor.u32 %v8189_v24, %v8185_v28  ;;  %v12383_v25 = vld [vmem:[#allocation3 + $0x208] sm:$0xff]   ;;  %v8209_v40 = vshrl.u32 %v14956_v19, 16  ;;  %v8235_v24 = vshll.u32 %v14975_v58, 16 }
 0x2cc   : > { %v10744_v3 = vpop.f32.mrb[175].mxu0  ;;  %v7074_v1 = vsel %vm562_vm1, %v7072_v22, %v7073_v33  ;;  %v14984_v22 = vld [vmem:[#allocation2 + $0xb4] sm:$0xff]   ;;  %v8233_v33 = vshrl.u32 %v14975_v58, 16 }
 0x2cd   : > { %11089 = vmatpush3.bf16.msra.mxu1 %v12367_v2  ;;  %v14937_v30 = vadd.f32 %v10822_v51, %v10742_v31  ;;  %v10745_v27 = vadd.f32 %v10744_v3, %v10743_v32  ;;  %v8201_v51 = vrot.slane %v8199_v21, 1  ;;  %v12380_v2 = vld [vmem:[#allocation3 + $0x200] sm:$0xff]   ;;  %v8218_v31 = vrot.slane %v8216_v41, 1  ;;  %v14971_v32 = vld [vmem:[#allocation2 + $0xa4] ss:$0 sps:$4 sm:$0x11]  }
 0x2ce   : > { %11090 = vmatprep.subr.bf16.mxu1 %v12368_v61  ;;  %v12398_v21 = vld [vmem:[#allocation3 + $0x230] sm:$0xff]  }
 0x2cf   : > { %v14943_v36 = vadd.f32 %v10825_v18, %v10745_v27  ;;  %v8202_v61 = vor.u32 %v8201_v51, %v8197_v62  ;;  %v8206_v18 = vrot.slane %v8204_v5, 1  ;;  %v8228_v27 = vshll.u32 %v14971_v32, 16 }
 0x2d0   : > { %11507 = vmatmul.mubr.bf16.gmra.mrb[168].mxu1 %v7068_v49  ;;  %7974 = vmatmul.mubr.bf16.gmra.mrb[248].mxu0 %v14888_v0  ;;  %v8194_v0 = vrot.slane %v8192_v13, 1  ;;  %v8221_v49 = vshrl.u32 %v14966_v7, 16  ;;  %v8237_v13 = vrot.slane %v8235_v24, 1  ;;  %v8245_v62 = vshrl.u32 %v14984_v22, 16 }
 0x2d1   : > { %11510 = vmatprep.mubr.bf16.mxu1 %v7071_v63  ;;  %11091 = vmatpush3.bf16.msra.mxu1 %v12369_v20  ;;  %v8207_v8 = vsel %vm457_vm0, %v8202_v61, %v8206_v18  ;;  %v12389_v20 = vld [vmem:[#allocation3 + $0x218] sm:$0xff]   ;;  %v12392_v63 = vld [vmem:[#allocation3 + $0x220] sm:$0xff]  }
 0x2d2   : > { %11092 = vmatprep.subr.bf16.mxu1 %v12370_v39  ;;  %7981 = vmatprep.mubr.bf16.mxu0 %v7042_v35  ;;  %v8195_v37 = vsel %vm457_vm0, %v8190_v23, %v8194_v0  ;;  %v8225_v39 = vrot.slane %v8223_v43, 1  ;;  %v14980_v35 = vld [vmem:[#allocation2 + $0xb0] ss:$0 sps:$4 sm:$0x11]   ;;  %v8247_v0 = vshll.u32 %v14984_v22, 16 }
 0x2d3   : > { %v8240_v23 = vshll.u32 %v14980_v35, 16 }
 0x2d4   : > { %v8226_v10 = vor.u32 %v8225_v39, %v8221_v49 }
 0x2d5   : > { %11093 = vmatpush3.bf16.msra.mxu1 %v12373_v52  ;;  %v8230_v52 = vrot.slane %v8228_v27, 1 }
 0x2d6   : > { %11094 = vmatprep.subr.bf16.mxu1 %v12374_v29  ;;  %v12395_v29 = vld [vmem:[#allocation3 + $0x228] sm:$0xff]  }
 0x2d7   : > { %v8231_v28 = vsel %vm457_vm0, %v8226_v10, %v8230_v52 }
 0x2d8   : > { %11511 = vmatmul.mubr.bf16.gmra.mrb[172].mxu1 %v7074_v1  ;;  %7982 = vmatmul.mubr.bf16.gmra.mrb[252].mxu0 %v14907_v4  ;;  %v8213_v4 = vrot.slane %v8211_v53, 1  ;;  %v14989_v1 = vld [vmem:[#allocation2 + $0xbc] ss:$0 sps:$4 sm:$0x11]  }
 0x2d9   : > { %11095 = vmatpush3.bf16.msra.mxu1 %v12375_v60  ;;  %8544 = vmatprep.mubr.bf16.mxu1 %v8195_v37  ;;  %v8238_v60 = vor.u32 %v8237_v13, %v8233_v33  ;;  %v12401_v37 = vld [vmem:[#allocation3 + $0x238] sm:$0xff]   ;;  %v8252_v5 = vshll.u32 %v14989_v1, 16  ;;  %v8289_v13 = vrot.slane %v14935_v14, 1  ;;  %v8292_v14 = vrot.slane %v14952_v38, 1 }
 0x2da   : > { %11096 = vmatprep.subr.bf16.mxu1 %v12378_v44  ;;  %v8214_v50 = vor.u32 %v8213_v4, %v8209_v40  ;;  %v8242_v44 = vrot.slane %v8240_v23, 1 }
 0x2db   : > { %v8254_v18 = vrot.slane %v8252_v5, 1  ;;  %v8295_v5 = vrot.slane %v14962_v11, 1  ;;  %v8298_v11 = vrot.slane %v14971_v32, 1 }
 0x2dc   : > { %v8219_v3 = vsel %vm457_vm0, %v8214_v50, %v8218_v31  ;;  %v8243_v51 = vsel %vm457_vm0, %v8238_v60, %v8242_v44  ;;  %v15006_v50 = vld [vmem:[#allocation2 + $0xd4] ss:$0 sps:$4 sm:$0x11]  }
 0x2dd   : > { %11097 = vmatpush3.bf16.msra.mxu1 %v12379_v9  ;;  %v8249_v9 = vrot.slane %v8247_v0, 1  ;;  %v8276_v49 = vshll.u32 %v15006_v50, 16 }
 0x2de   : > { %11514 = vmatprep.subr.bf16.mxu1 %v12380_v2 }
 0x2df   : > { %v8250_v61 = vor.u32 %v8249_v9, %v8245_v62  ;;  %v8278_v10 = vrot.slane %v8276_v49, 1  ;;  %v8294_v62 = vrot.slane %v14956_v19, 1 }
 0x2e0   : > { %8545 = vmatmul.mubr.bf16.vlgmr.msra.gmra.mrb[176].mxu1 %v14922_v59 }
 0x2e1   : > { %8552 = vmatprep.mubr.bf16.mxu1 %v8207_v8  ;;  %11515 = vmatpush3.bf16.msra.mxu1 %v12380_v2  ;;  %v14993_v2 = vld [vmem:[#allocation2 + $0xc0] sm:$0xff]   ;;  %v15000_v8 = vld [vmem:[#allocation2 + $0xcc] sm:$0xff]   ;;  %v8255_v4 = vsel %vm457_vm0, %v8250_v61, %v8254_v18 }
 0x2e2   : > { %11516 = vmatprep.subr.bf16.mxu1 %v12383_v25  ;;  %v8259_v53 = vshll.u32 %v14993_v2, 16  ;;  %v8257_v41 = vshrl.u32 %v14993_v2, 16  ;;  %v8271_v43 = vshll.u32 %v15000_v8, 16 }
 0x2e4   : > { %v8261_v40 = vrot.slane %v8259_v53, 1  ;;  %v8273_v39 = vrot.slane %v8271_v43, 1  ;;  %v8301_v43 = vrot.slane %v14980_v35, 1  ;;  %v8304_v35 = vrot.slane %v14989_v1, 1 }
 0x2e5   : > { %11517 = vmatpush3.bf16.msra.mxu1 %v12383_v25  ;;  %v14998_v25 = vld [vmem:[#allocation2 + $0xc8] ss:$0 sps:$4 sm:$0x11]   ;;  %v8310_v1 = vrot.slane %v15006_v50, 1 }
 0x2e6   : > { %11518 = vmatprep.subr.bf16.mxu1 %v12386_v34  ;;  %v8262_v31 = vor.u32 %v8261_v40, %v8257_v41 }
 0x2e8   : > { %8553 = vmatmul.mubr.bf16.gmra.mrb[180].mxu1 %v14941_v26 }
 0x2e9   : > { %8560 = vmatprep.mubr.bf16.mxu1 %v8219_v3  ;;  %11519 = vmatpush3.bf16.msra.mxu1 %v12386_v34  ;;  %v8264_v34 = vshll.u32 %v14998_v25, 16  ;;  %v8269_v3 = vshrl.u32 %v15000_v8, 16 }
 0x2ea   : > { %11520 = vmatprep.subr.bf16.mxu1 %v12389_v20 }
 0x2ed   : > { %11521 = vmatpush3.bf16.msra.mxu1 %v12389_v20  ;;  %v8266_v20 = vrot.slane %v8264_v34, 1  ;;  %v8300_v34 = vrot.slane %v14975_v58, 1 }
 0x2ee   : > { %11522 = vmatprep.subr.bf16.mxu1 %v12392_v63 }
 0x2ef   : > { %v8267_v27 = vsel %vm457_vm0, %v8262_v31, %v8266_v20 }
 0x2f0   : > { %8561 = vmatmul.mubr.bf16.gmra.mrb[184].mxu1 %v14956_v19  ;;  %v8297_v19 = vrot.slane %v14966_v7, 1 }
 0x2f1   : > { %8568 = vmatprep.mubr.bf16.mxu1 %v8231_v28  ;;  %11523 = vmatpush3.bf16.msra.mxu1 %v12392_v63  ;;  %v8274_v63 = vor.u32 %v8273_v39, %v8269_v3  ;;  %v8288_v28 = vrot.slane %v14922_v59, 1  ;;  %v8291_v59 = vrot.slane %v14941_v26, 1 }
 0x2f2   : > { %11524 = vmatprep.subr.bf16.mxu1 %v12395_v29  ;;  %v8299_v3 = vsel %vm562_vm1, %v8297_v19, %v8298_v11 }
 0x2f3   : > { %v8279_v24 = vsel %vm457_vm0, %v8274_v63, %v8278_v10  ;;  %v8290_v44 = vsel %vm562_vm1, %v8288_v28, %v8289_v13  ;;  %v8293_v18 = vsel %vm562_vm1, %v8291_v59, %v8292_v14  ;;  %v8306_v63 = vrot.slane %v14993_v2, 1 }
 0x2f4   : > { %v8307_v10 = vrot.slane %v14998_v25, 1 }
 0x2f5   : > { %11525 = vmatpush3.bf16.msra.mxu1 %v12395_v29 }
 0x2f6   : > { %11526 = vmatprep.subr.bf16.mxu1 %v12398_v21 }
 0x2f8   : > { %8569 = vmatmul.mubr.bf16.gmra.mrb[188].mxu1 %v14966_v7 }
 0x2f9   : > { %8576 = vmatprep.mubr.bf16.mxu1 %v8243_v51  ;;  %11527 = vmatpush3.bf16.msra.mxu1 %v12398_v21 }
 0x2fa   : > { %11528 = vmatprep.subr.bf16.mxu1 %v12401_v37 }
 0x2fd   : > { %11529 = vmatpush3.bf16.msra.mxu1 %v12401_v37 }
 0x300   : > { %8577 = vmatmul.mubr.bf16.gmra.mrb[192].mxu1 %v14975_v58  ;;  %v8303_v58 = vrot.slane %v14984_v22, 1 }
 0x301   : > { %8584 = vmatprep.mubr.bf16.mxu1 %v8255_v4 }
 0x308   : > { %8585 = vmatmul.mubr.bf16.gmra.mrb[196].mxu1 %v14984_v22  ;;  %v8309_v22 = vrot.slane %v15000_v8, 1 }
 0x309   : > { %8592 = vmatprep.mubr.bf16.mxu1 %v8267_v27 }
 0x310   : > { %8593 = vmatmul.mubr.bf16.gmra.mrb[200].mxu1 %v14993_v2 }
 0x311   : > { %8600 = vmatprep.mubr.bf16.mxu1 %v8279_v24  ;;  %v10858_v52 = vpop.f32.mrb[192].mxu0 }
 0x312   : > { %v10859_v29 = vpop.f32.mrb[193].mxu0 }
 0x313   : > { %v10860_v33 = vadd.f32 %v10859_v29, %v10858_v52  ;;  %v10861_v23 = vpop.f32.mrb[194].mxu0  ;;  %v8305_v29 = vsel %vm562_vm1, %v8303_v58, %v8304_v35  ;;  %v10179_v58 = vld [vmem:[%s12741_s10 + $0x18] sm:$0xff]  }
 0x314   : > { %v10862_v21 = vpop.f32.mrb[195].mxu0 }
 0x315   : > { %v10863_v60 = vadd.f32 %v10862_v21, %v10861_v23  ;;  %v15018_v0 = vadd.f32 %v14781_v57, %v10860_v33 }
 0x317   : > { %v15023_v37 = vadd.f32 %v14787_v46, %v10863_v60  ;;  %v8296_v46 = vsel %vm562_vm1, %v8294_v62, %v8295_v5 }
 0x318   : > { %8601 = vmatmul.mubr.bf16.gmra.mrb[204].mxu1 %v15000_v8 }
 0x319   : > { %11530 = vmatprep.mubr.bf16.mxu1 %v8290_v44  ;;  %v10864_v51 = vpop.f32.mrb[196].mxu0 }
 0x31a   : > { %v10865_v9 = vpop.f32.mrb[197].mxu0 }
 0x31b   : > { %v10866_v57 = vadd.f32 %v10865_v9, %v10864_v51  ;;  %v10867_v61 = vpop.f32.mrb[198].mxu0  ;;  %v8311_v51 = vsel %vm562_vm1, %v8309_v22, %v8310_v1 }
 0x31c   : > { %v10868_v53 = vpop.f32.mrb[199].mxu0 }
 0x31d   : > { %v10869_v4 = vadd.f32 %v10868_v53, %v10867_v61  ;;  %v15031_v40 = vadd.f32 %v14819_v55, %v10866_v57 }
 0x31f   : > { %v15035_v26 = vadd.f32 %v14823_v12, %v10869_v4  ;;  %v8302_v12 = vsel %vm562_vm1, %v8300_v34, %v8301_v43 }
 0x320   : > { %11531 = vmatmul.mubr.bf16.vlgmr.msra.gmra.mrb[160].mxu1 %v8293_v18 }
 0x321   : > { %11534 = vmatprep.mubr.bf16.mxu1 %v8296_v46 }
 0x322   : > { %v10870_v38 = vpop.f32.mrb[200].mxu0 }
 0x323   : > { %v10871_v41 = vpop.f32.mrb[201].mxu0 }
 0x324   : > { %v10872_v31 = vadd.f32 %v10871_v41, %v10870_v38  ;;  %v10873_v55 = vpop.f32.mrb[202].mxu0 }
 0x325   : > { %v10874_v20 = vpop.f32.mrb[203].mxu0 }
 0x326   : > { %v10875_v39 = vadd.f32 %v10874_v20, %v10873_v55  ;;  %v15043_v49 = vadd.f32 %v14839_v42, %v10872_v31 }
 0x328   : > { %11535 = vmatmul.mubr.bf16.gmra.mrb[164].mxu1 %v8299_v3  ;;  %v15047_v7 = vadd.f32 %v14844_v15, %v10875_v39  ;;  %v8308_v15 = vsel %vm562_vm1, %v8306_v63, %v8307_v10 }
 0x329   : > { %11538 = vmatprep.mubr.bf16.mxu1 %v8302_v12 }
 0x32a   : > { %v10876_v32 = vpop.f32.mrb[204].mxu0 }
 0x32b   : > { %v10877_v27 = vpop.f32.mrb[205].mxu0 }
 0x32c   : > { %v10878_v24 = vadd.f32 %v10877_v27, %v10876_v32  ;;  %v10879_v42 = vpop.f32.mrb[206].mxu0 }
 0x32d   : > { %v10880_v52 = vpop.f32.mrb[207].mxu0 }
 0x32e   : > { %v10881_v28 = vadd.f32 %v10880_v52, %v10879_v42  ;;  %v15055_v13 = vadd.f32 %v14859_v54, %v10878_v24  ;;  %v9782_v24 = vld [vmem:[%s12741_s10 + $0x14] sm:$0x1]  ;;  %v10069_v52 = vunpack.c.l.bf16 %v10179_v58 }
 0x330   : > { %11539 = vmatmul.mubr.bf16.gmra.mrb[168].mxu1 %v8305_v29  ;;  %v15061_v2 = vadd.f32 %v14865_v17, %v10881_v28  ;;  %v10070_v29 = vunpack.c.h.bf16 %v10179_v58  ;;  %v15115_v58 = vld [vmem:[%s15437_s4] ss:$0 sm:$0xff] }
 0x331   : > { %11542 = vmatprep.mubr.bf16.mxu1 %v8308_v15 }
 0x332   : > { %v10882_v33 = vpop.f32.mrb[208].mxu0 }
 0x333   : > { %v10938_v25 = vpop.f32.mrb[128].mxu1  ;;  %v10883_v21 = vpop.f32.mrb[209].mxu0 }
 0x334   : > { %v10939_v23 = vpop.f32.mrb[129].mxu1  ;;  %v10884_v54 = vadd.f32 %v10883_v21, %v10882_v33  ;;  %v10885_v59 = vpop.f32.mrb[210].mxu0  ;;  %v10180_v21 = vld [vmem:[%s12741_s10 + $0x30] sm:$0xff]  }
 0x335   : > { %v15063_v60 = vadd.f32 %v10939_v23, %v10938_v25  ;;  %v10941_v44 = vpop.f32.mrb[130].mxu1  ;;  %v10886_v9 = vpop.f32.mrb[211].mxu0  ;;  %v6613_v25 = vunpack.c.l.bf16 %v9782_v24 }
 0x336   : > { %v10942_v14 = vpop.f32.mrb[131].mxu1  ;;  %v10887_v8 = vadd.f32 %v10886_v9, %v10885_v59  ;;  %v15069_v50 = vadd.f32 %v14878_v45, %v10884_v54  ;;  %v6688_v59 = vrot.slane %v10070_v29, 1 }
 0x337   : > { %v15066_v62 = vadd.f32 %v10942_v14, %v10941_v44  ;;  %v9786_v14 = vld [vmem:[%s12741_s10 + $0x24] sm:$0xff]  }
 0x338   : > { %11543 = vmatmul.mubr.bf16.gmra.mrb[172].mxu1 %v8311_v51  ;;  %v15072_v17 = vadd.f32 %v14884_v47, %v10887_v8  ;;  %v6687_v51 = vrot.slane %v10069_v52, 1 }
 0x33a   : > { %v10888_v57 = vpop.f32.mrb[212].mxu0 }
 0x33b   : > { %v10944_v5 = vpop.f32.mrb[132].mxu1  ;;  %v10889_v53 = vpop.f32.mrb[213].mxu0 }
 0x33c   : > { %v10945_v61 = vpop.f32.mrb[133].mxu1  ;;  %v10890_v46 = vadd.f32 %v10889_v53, %v10888_v57  ;;  %v10891_v38 = vpop.f32.mrb[214].mxu0 }
 0x33d   : > { %v15074_v18 = vadd.f32 %v10945_v61, %v10944_v5  ;;  %v10947_v4 = vpop.f32.mrb[134].mxu1  ;;  %v10892_v11 = vpop.f32.mrb[215].mxu0  ;;  %v9791_v61 = vld [vmem:[%s12741_s10 + $0x38] sm:$0x1] }
 0x33e   : > { %v10948_v19 = vpop.f32.mrb[135].mxu1  ;;  %v10893_v45 = vadd.f32 %v10892_v11, %v10891_v38  ;;  %v15079_v34 = vadd.f32 %v14897_v6, %v10890_v46  ;;  %v9780_v6 = vld [vmem:[%s12741_s10 + $0xc] sm:$0xff]   ;;  %v6685_v38 = vrot.slane %v6613_v25, 1  ;;  %v10074_v11 = vunpack.c.h.bf16 %v10180_v21 }
 0x33f   : > { %v15076_v41 = vadd.f32 %v10948_v19, %v10947_v4  ;;  %v6611_v28 = vunpack.c.l.bf16 %v9780_v6  ;;  %v6612_v15 = vunpack.c.h.bf16 %v9780_v6  ;;  %v10073_v19 = vunpack.c.l.bf16 %v10180_v21  ;;  %v10181_v6 = vld [vmem:[%s12741_s10 + $0x48] sm:$0xff]  }
 0x340   : > { %v15082_v47 = vadd.f32 %v14903_v48, %v10893_v45  ;;  %v9785_v48 = vld [vmem:[%s12741_s10 + $0x20] sm:$0x1] }
 0x341   : > { %v6616_v1 = vunpack.c.l.bf16 %v9785_v48  ;;  %v6682_v57 = vrot.slane %v6611_v28, 1  ;;  %v6697_v52 = vrot.slane %v10073_v19, 1  ;;  %v9792_v28 = vld [vmem:[%s12741_s10 + $0x3c] sm:$0xff]  }
 0x342   : > { %v10894_v31 = vpop.f32.mrb[216].mxu0 }
 0x343   : > { %v10950_v43 = vpop.f32.mrb[136].mxu1  ;;  %v10895_v20 = vpop.f32.mrb[217].mxu0  ;;  %v6690_v46 = vrot.slane %v6616_v1, 1 }
 0x344   : > { %v10951_v55 = vpop.f32.mrb[137].mxu1  ;;  %v10896_v12 = vadd.f32 %v10895_v20, %v10894_v31  ;;  %v10897_v32 = vpop.f32.mrb[218].mxu0  ;;  %v6617_v31 = vunpack.c.l.bf16 %v9786_v14  ;;  %v6618_v20 = vunpack.c.h.bf16 %v9786_v14 }
 0x345   : > { %v15084_v3 = vadd.f32 %v10951_v55, %v10950_v43  ;;  %v10953_v39 = vpop.f32.mrb[138].mxu1  ;;  %v10898_v27 = vpop.f32.mrb[219].mxu0 }
 0x346   : > { %v10954_v35 = vpop.f32.mrb[139].mxu1  ;;  %v10899_v10 = vadd.f32 %v10898_v27, %v10897_v32  ;;  %v15093_v42 = vadd.f32 %v14916_v56, %v10896_v12  ;;  %v9788_v12 = vld [vmem:[%s12741_s10 + $0x2c] sm:$0x1]  ;;  %v6692_v29 = vrot.slane %v6617_v31, 1  ;;  %v9794_v31 = vld [vmem:[%s12741_s10 + $0x44] sm:$0x1] }
 0x347   : > { %v15088_v63 = vadd.f32 %v10954_v35, %v10953_v39  ;;  %v6622_v39 = vunpack.c.l.bf16 %v9791_v61  ;;  %v6689_v35 = vsel %vm562_vm1, %v6687_v51, %v6688_v59  ;;  %v6619_v21 = vunpack.c.l.bf16 %v9788_v12 }
 0x348   : > { %v15096_v22 = vadd.f32 %v14924_v16, %v10899_v10  ;;  %v6683_v16 = vrot.slane %v6612_v15, 1  ;;  %v6623_v61 = vunpack.c.l.bf16 %v9792_v28 }
 0x34a   : > { %v10900_v23 = vpop.f32.mrb[220].mxu0  ;;  %v6684_v27 = vsel %vm562_vm1, %v6682_v57, %v6683_v16  ;;  %v6686_v24 = vsel %vm562_vm1, %v6683_v16, %v6685_v38 }
 0x34b   : > { %v10956_v33 = vpop.f32.mrb[140].mxu1  ;;  %v10901_v54 = vpop.f32.mrb[221].mxu0 }
 0x34c   : > { %v10957_v44 = vpop.f32.mrb[141].mxu1  ;;  %v10902_v8 = vadd.f32 %v10901_v54, %v10900_v23  ;;  %v10903_v5 = vpop.f32.mrb[222].mxu0  ;;  %v6700_v23 = vrot.slane %v6622_v39, 1 }
 0x34d   : > { %v15100_v56 = vadd.f32 %v10957_v44, %v10956_v33  ;;  %v10959_v9 = vpop.f32.mrb[142].mxu1  ;;  %v10904_v4 = vpop.f32.mrb[223].mxu0  ;;  %v15124_v33 = vrot.slane %v6618_v20, 1  ;;  %v9797_v44 = vld [vmem:[%s12741_s10 + $0x50] sm:$0x1] }
 0x34e   : > { %v10960_v53 = vpop.f32.mrb[143].mxu1  ;;  %v10905_v43 = vadd.f32 %v10904_v4, %v10903_v5  ;;  %v15106_v55 = vadd.f32 %v14937_v30, %v10902_v8  ;;  %v6691_v30 = vsel %vm562_vm1, %v6688_v59, %v6690_v46  ;;  %v10078_v8 = vunpack.c.h.bf16 %v10181_v6 }
 0x34f   : > { %v15103_v45 = vadd.f32 %v10960_v53, %v10959_v9  ;;  %v10077_v9 = vunpack.c.l.bf16 %v10181_v6  ;;  %v6624_v53 = vunpack.c.h.bf16 %v9792_v28  ;;  %v6628_v38 = vunpack.c.l.bf16 %v9797_v44 }
 0x350   : > { %v15110_v32 = vadd.f32 %v14943_v36, %v10905_v43  ;;  %v6698_v36 = vrot.slane %v10074_v11, 1  ;;  %v6695_v6 = vrot.slane %v6619_v21, 1  ;;  %v6702_v28 = vrot.slane %v6623_v61, 1 }
 0x352   : > { %v11436_v48 = vpop.f32.mrb[176].mxu0  ;;  %v6699_v43 = vsel %vm562_vm1, %v6697_v52, %v6698_v36  ;;  %v6701_v12 = vsel %vm562_vm1, %v6698_v36, %v6700_v23 }
 0x353   : > { %v10962_v10 = vpop.f32.mrb[144].mxu1  ;;  %v11660_v1 = vadd.f32 %v15031_v40, %v11436_v48  ;;  %v6508_v25 = vpop.f32.mrb[177].mxu0  ;;  %v6708_v48 = vrot.slane %v10078_v8, 1 }
 0x354   : > { %v10963_v15 = vpop.f32.mrb[145].mxu1  ;;  %v11663_v59 = vadd.f32 %v15018_v0, %v6508_v25  ;;  %v11437_v14 = vpop.f32.mrb[178].mxu0  ;;  %v6625_v25 = vunpack.c.l.bf16 %v9794_v31 }
 0x355   : > { %v15127_v54 = vadd.f32 %v10963_v15, %v10962_v10  ;;  %v10965_v51 = vpop.f32.mrb[146].mxu1  ;;  %v6643_v57 = vadd.f32 %v11660_v1, %v15115_v58  ;;  %v11666_v40 = vadd.f32 %v15035_v26, %v11437_v14  ;;  %v6511_v16 = vpop.f32.mrb[179].mxu0  ;;  %v6694_v26 = vsel %vm562_vm1, %v6692_v29, %v15124_v33  ;;  %v10182_v10 = vld [vmem:[%s12741_s10 + $0x60] sm:$0xff]  }
 0x356   : > { %v10966_v5 = vpop.f32.mrb[147].mxu1  ;;  %v6641_v46 = vadd.f32 %v11663_v59, %v15115_v58  ;;  %v11669_v0 = vadd.f32 %v15023_v37, %v6511_v16  ;;  %v15149_v29 = vrot.slane %v6624_v53, 1  ;;  %v10081_v59 = vunpack.c.l.bf16 %v10182_v10 }
 0x357   : > { %v15132_v4 = vadd.f32 %v10966_v5, %v10965_v51  ;;  %v6740_v19 = vadd.f32 %v6689_v35, %v6643_v57  ;;  %v6644_v11 = vadd.f32 %v11666_v40, %v15115_v58  ;;  %v6707_v35 = vrot.slane %v10077_v9, 1  ;;  %v9798_v57 = vld [vmem:[%s12741_s10 + $0x54] sm:$0xff]  }
 0x358   : > { %v6738_v20 = vadd.f32 %v6684_v27, %v6641_v46  ;;  %v6642_v39 = vadd.f32 %v11669_v0, %v15115_v58  ;;  %v6710_v27 = vrot.slane %v6628_v38, 1  ;;  %v10082_v46 = vunpack.c.h.bf16 %v10182_v10 }
 0x359   : > { %v6741_v37 = vadd.f32 %v6691_v30, %v6644_v11  ;;  %v6756_v44 = vmax.f32 %v6740_v19, 0.0 }
 0x35a   : > { %v6739_v15 = vadd.f32 %v6686_v24, %v6642_v39  ;;  %v11440_v1 = vpop.f32.mrb[180].mxu0  ;;  %v6754_v14 = vmax.f32 %v6738_v20, 0.0  ;;  %v6629_v20 = vunpack.c.l.bf16 %v9798_v57  ;;  %v9803_v39 = vld [vmem:[%s12741_s10 + $0x68] sm:$0x1] }
 0x35b   : > { %v10968_v52 = vpop.f32.mrb[148].mxu1  ;;  %v6757_v51 = vmax.f32 %v6741_v37, 0.0  ;;  %v11672_v23 = vadd.f32 %v15055_v13, %v11440_v1  ;;  %v6524_v21 = vpop.f32.mrb[181].mxu0  ;;  %v6711_v1 = vsel %vm562_vm1, %v6708_v48, %v6710_v27 }
 0x35c   : > { %v10969_v36 = vpop.f32.mrb[149].mxu1  ;;  %v6755_v30 = vmax.f32 %v6739_v15, 0.0  ;;  %v11675_v8 = vadd.f32 %v15043_v49, %v6524_v21  ;;  %v11441_v5 = vpop.f32.mrb[182].mxu0  ;;  %v6709_v15 = vsel %vm562_vm1, %v6707_v35, %v6708_v48  ;;  %v6634_v21 = vunpack.c.l.bf16 %v9803_v39 }
 0x35d   : > { %v15152_v9 = vadd.f32 %v10969_v36, %v10968_v52  ;;  %v10971_v24 = vpop.f32.mrb[150].mxu1  ;;  %v10091_v40 = vpack.c.bf16 %v6757_v51, %v6756_v44  ;;  %v6647_v61 = vadd.f32 %v11672_v23, %v15115_v58  ;;  %v11678_v53 = vadd.f32 %v15061_v2, %v11441_v5  ;;  %v6527_v13 = vpop.f32.mrb[183].mxu0 }
 0x35e   : > { %v10972_v16 = vpop.f32.mrb[151].mxu1  ;;  %v10086_v0 = vpack.c.bf16 %v6755_v30, %v6754_v14  ;;  %v6645_v19 = vadd.f32 %v11675_v8, %v15115_v58  ;;  %v11681_v11 = vadd.f32 %v15047_v7, %v6527_v13  ;;  %v6696_v2 = vsel %vm562_vm1, %v15124_v33, %v6695_v6 }
 0x35f   : > { %v15158_v38 = vadd.f32 %v10972_v16, %v10971_v24  ;;  %10183 = vst [vmem:[%s15163_s17 + $0x8] sm:$0xff] %v10091_v40   ;;  %v6744_v49 = vadd.f32 %v6699_v43, %v6647_v61  ;;  %v6648_v31 = vadd.f32 %v11678_v53, %v15115_v58  ;;  %v6704_v7 = vsel %vm562_vm1, %v6702_v28, %v15149_v29 }
 0x360   : > { %10087 = vst [vmem:[%s15163_s17] sm:$0xff] %v10086_v0   ;;  %v6742_v10 = vadd.f32 %v6694_v26, %v6645_v19  ;;  %v6646_v37 = vadd.f32 %v11681_v11, %v15115_v58  ;;  %v6705_v43 = vrot.slane %v6625_v25, 1  ;;  %v6630_v44 = vunpack.c.h.bf16 %v9798_v57  ;;  %v9800_v57 = vld [vmem:[%s12741_s10 + $0x5c] sm:$0x1] }
 0x361   : > { %v6745_v52 = vadd.f32 %v6701_v12, %v6648_v31  ;;  %v6717_v33 = vrot.slane %v10081_v59, 1  ;;  %v6718_v6 = vrot.slane %v10082_v46, 1  ;;  %v6760_v26 = vmax.f32 %v6744_v49, 0.0 }
 0x362   : > { %v6743_v51 = vadd.f32 %v6696_v2, %v6646_v37  ;;  %v11444_v23 = vpop.f32.mrb[184].mxu0  ;;  %v6712_v8 = vrot.slane %v6629_v20, 1  ;;  %v6758_v28 = vmax.f32 %v6742_v10, 0.0  ;;  %v6713_v53 = vrot.slane %v6630_v44, 1 }
 0x363   : > { %v10974_v36 = vpop.f32.mrb[152].mxu1  ;;  %v6761_v14 = vmax.f32 %v6745_v52, 0.0  ;;  %v11684_v35 = vadd.f32 %v15079_v34, %v11444_v23  ;;  %v6540_v24 = vpop.f32.mrb[185].mxu0  ;;  %v6706_v49 = vsel %vm562_vm1, %v15149_v29, %v6705_v43  ;;  %v6631_v31 = vunpack.c.l.bf16 %v9800_v57 }
 0x364   : > { %v10975_v30 = vpop.f32.mrb[153].mxu1  ;;  %v6759_v12 = vmax.f32 %v6743_v51, 0.0  ;;  %v11687_v25 = vadd.f32 %v15069_v50, %v6540_v24  ;;  %v11445_v5 = vpop.f32.mrb[186].mxu0  ;;  %v6720_v39 = vrot.slane %v6634_v21, 1  ;;  %v6719_v44 = vsel %vm562_vm1, %v6717_v33, %v6718_v6 }
 0x365   : > { %v15177_v48 = vadd.f32 %v10975_v30, %v10974_v36  ;;  %v10977_v27 = vpop.f32.mrb[154].mxu1  ;;  %v10101_v59 = vpack.c.bf16 %v6761_v14, %v6760_v26  ;;  %v6651_v16 = vadd.f32 %v11684_v35, %v15115_v58  ;;  %v11690_v61 = vadd.f32 %v15082_v47, %v11445_v5  ;;  %v6543_v34 = vpop.f32.mrb[187].mxu0 }
 0x366   : > { %v10978_v40 = vpop.f32.mrb[155].mxu1  ;;  %v10096_v13 = vpack.c.bf16 %v6759_v12, %v6758_v28  ;;  %v6649_v0 = vadd.f32 %v11687_v25, %v15115_v58  ;;  %v11693_v19 = vadd.f32 %v15072_v17, %v6543_v34  ;;  %v6714_v17 = vsel %vm562_vm1, %v6712_v8, %v6713_v53 }
 0x367   : > { %v15183_v46 = vadd.f32 %v10978_v40, %v10977_v27  ;;  %10185 = vst [vmem:[%s15163_s17 + $0x18] sm:$0xff] %v10101_v59   ;;  %v6748_v50 = vadd.f32 %v6709_v15, %v6651_v16  ;;  %v6652_v11 = vadd.f32 %v11690_v61, %v15115_v58  ;;  %v6715_v43 = vrot.slane %v6631_v31, 1 }
 0x368   : > { %10184 = vst [vmem:[%s15163_s17 + $0x10] sm:$0xff] %v10096_v13   ;;  %v6746_v2 = vadd.f32 %v6704_v7, %v6649_v0  ;;  %v6650_v47 = vadd.f32 %v11693_v19, %v15115_v58 }
 0x369   : > { %v6749_v20 = vadd.f32 %v6711_v1, %v6652_v11  ;;  %v6764_v15 = vmax.f32 %v6748_v50, 0.0  ;;  %v6716_v59 = vsel %vm562_vm1, %v6713_v53, %v6715_v43 }
 0x36a   : > { %v6747_v10 = vadd.f32 %v6706_v49, %v6650_v47  ;;  %v11448_v52 = vpop.f32.mrb[188].mxu0  ;;  %v6762_v26 = vmax.f32 %v6746_v2, 0.0 }
 0x36b   : > { %v10980_v37 = vpop.f32.mrb[156].mxu1  ;;  %v6765_v51 = vmax.f32 %v6749_v20, 0.0  ;;  %v11696_v23 = vadd.f32 %v15106_v55, %v11448_v52  ;;  %v6556_v29 = vpop.f32.mrb[189].mxu0  ;;  %v6721_v55 = vsel %vm562_vm1, %v6718_v6, %v6720_v39 }
 0x36c   : > { %v10981_v36 = vpop.f32.mrb[157].mxu1  ;;  %v6763_v7 = vmax.f32 %v6747_v10, 0.0  ;;  %v11699_v21 = vadd.f32 %v15093_v42, %v6556_v29  ;;  %v11449_v30 = vpop.f32.mrb[190].mxu0 }
 0x36d   : > { %v15196_v14 = vadd.f32 %v10981_v36, %v10980_v37  ;;  %v10983_v1 = vpop.f32.mrb[158].mxu1  ;;  %v10111_v33 = vpack.c.bf16 %v6765_v51, %v6764_v15  ;;  %v6655_v24 = vadd.f32 %v11696_v23, %v15115_v58  ;;  %v11702_v8 = vadd.f32 %v15110_v32, %v11449_v30  ;;  %v6559_v28 = vpop.f32.mrb[191].mxu0 }
 0x36e   : > { %v10984_v35 = vpop.f32.mrb[159].mxu1  ;;  %v10106_v12 = vpack.c.bf16 %v6763_v7, %v6762_v26  ;;  %v6653_v25 = vadd.f32 %v11699_v21, %v15115_v58  ;;  %v11705_v5 = vadd.f32 %v15096_v22, %v6559_v28 }
 0x36f   : > { %v15202_v27 = vadd.f32 %v10984_v35, %v10983_v1  ;;  %10187 = vst [vmem:[%s15163_s17 + $0x28] sm:$0xff] %v10111_v33   ;;  %v6752_v42 = vadd.f32 %v6719_v44, %v6655_v24  ;;  %v6656_v57 = vadd.f32 %v11702_v8, %v15115_v58 }
 0x370   : > { %10186 = vst [vmem:[%s15163_s17 + $0x20] sm:$0xff] %v10106_v12   ;;  %v6750_v40 = vadd.f32 %v6714_v17, %v6653_v25  ;;  %v6654_v32 = vadd.f32 %v11705_v5, %v15115_v58 }
 0x371   : > { %v6753_v6 = vadd.f32 %v6721_v55, %v6656_v57  ;;  %v6768_v61 = vmax.f32 %v6752_v42, 0.0 }
 0x372   : > { %v6751_v16 = vadd.f32 %v6716_v59, %v6654_v32  ;;  %v6766_v13 = vmax.f32 %v6750_v40, 0.0 }
 0x373   : > { %v6769_v34 = vmax.f32 %v6753_v6, 0.0  ;;  %v11018_v19 = vpop.f32.mrb[224].mxu0 }
 0x374   : > { %v6767_v0 = vmax.f32 %v6751_v16, 0.0  ;;  %v11019_v50 = vpop.f32.mrb[225].mxu0 }
 0x375   : > { %v10121_v22 = vpack.c.bf16 %v6769_v34, %v6768_v61  ;;  %v11020_v49 = vadd.f32 %v11019_v50, %v11018_v19  ;;  %v11021_v31 = vpop.f32.mrb[226].mxu0 }
 0x376   : > { %v10116_v11 = vpack.c.bf16 %v6767_v0, %v6766_v13  ;;  %v11022_v53 = vpop.f32.mrb[227].mxu0 }
 0x377   : > { %10189 = vst [vmem:[%s15163_s17 + $0x38] sm:$0xff] %v10121_v22   ;;  %v15214_v2 = vadd.f32 %v11020_v49, %v15063_v60  ;;  %v11023_v47 = vadd.f32 %v11022_v53, %v11021_v31 }
 0x378   : > { %10188 = vst [vmem:[%s15163_s17 + $0x30] sm:$0xff] %v10116_v11  }
 0x379   : > { %v15217_v20 = vadd.f32 %v11023_v47, %v15066_v62 }
 0x37b   : > { %v11024_v39 = vpop.f32.mrb[228].mxu0 }
 0x37c   : > { %v11025_v10 = vpop.f32.mrb[229].mxu0 }
 0x37d   : > { %v11026_v37 = vadd.f32 %v11025_v10, %v11024_v39  ;;  %v11027_v52 = vpop.f32.mrb[230].mxu0 }
 0x37e   : > { %v11028_v44 = vpop.f32.mrb[231].mxu0 }
 0x37f   : > { %v15220_v17 = vadd.f32 %v11026_v37, %v15074_v18  ;;  %v11029_v15 = vadd.f32 %v11028_v44, %v11027_v52 }
 0x381   : > { %v15223_v51 = vadd.f32 %v11029_v15, %v15076_v41 }
 0x383   : > { %v11030_v36 = vpop.f32.mrb[232].mxu0 }
 0x384   : > { %v11031_v23 = vpop.f32.mrb[233].mxu0 }
 0x385   : > { %v11032_v60 = vadd.f32 %v11031_v23, %v11030_v36  ;;  %v11033_v29 = vpop.f32.mrb[234].mxu0 }
 0x386   : > { %v11034_v43 = vpop.f32.mrb[235].mxu0 }
 0x387   : > { %v15226_v62 = vadd.f32 %v11032_v60, %v15084_v3  ;;  %v11035_v26 = vadd.f32 %v11034_v43, %v11033_v29 }
 0x389   : > { %v15229_v7 = vadd.f32 %v11035_v26, %v15088_v63 }
 0x38b   : > { %v11036_v1 = vpop.f32.mrb[236].mxu0 }
 0x38c   : > { %v11037_v21 = vpop.f32.mrb[237].mxu0 }
 0x38d   : > { %v11038_v18 = vadd.f32 %v11037_v21, %v11036_v1  ;;  %v11039_v30 = vpop.f32.mrb[238].mxu0 }
 0x38e   : > { %v11040_v33 = vpop.f32.mrb[239].mxu0 }
 0x38f   : > { %v15232_v41 = vadd.f32 %v11038_v18, %v15100_v56  ;;  %v11041_v35 = vadd.f32 %v11040_v33, %v11039_v30 }
 0x391   : > { %v15235_v24 = vadd.f32 %v11041_v35, %v15103_v45 }
 0x393   : > { %v11042_v8 = vpop.f32.mrb[240].mxu0 }
 0x394   : > { %v11043_v55 = vpop.f32.mrb[241].mxu0 }
 0x395   : > { %v11044_v3 = vadd.f32 %v11043_v55, %v11042_v8  ;;  %v11045_v28 = vpop.f32.mrb[242].mxu0 }
 0x396   : > { %v11046_v12 = vpop.f32.mrb[243].mxu0 }
 0x397   : > { %v15238_v63 = vadd.f32 %v11044_v3, %v15127_v54  ;;  %v11047_v25 = vadd.f32 %v11046_v12, %v11045_v28 }
 0x399   : > { %v15241_v5 = vadd.f32 %v11047_v25, %v15132_v4 }
 0x39b   : > { %v11048_v42 = vpop.f32.mrb[244].mxu0 }
 0x39c   : > { %v11049_v57 = vpop.f32.mrb[245].mxu0 }
 0x39d   : > { %v11050_v56 = vadd.f32 %v11049_v57, %v11048_v42  ;;  %v11051_v59 = vpop.f32.mrb[246].mxu0 }
 0x39e   : > { %v11052_v40 = vpop.f32.mrb[247].mxu0 }
 0x39f   : > { %v15244_v45 = vadd.f32 %v11050_v56, %v15152_v9  ;;  %v11053_v32 = vadd.f32 %v11052_v40, %v11051_v59 }
 0x3a1   : > { %v15247_v6 = vadd.f32 %v11053_v32, %v15158_v38 }
 0x3a3   : > { %v11054_v16 = vpop.f32.mrb[248].mxu0 }
 0x3a4   : > { %v11055_v61 = vpop.f32.mrb[249].mxu0 }
 0x3a5   : > { %v11056_v54 = vadd.f32 %v11055_v61, %v11054_v16  ;;  %v11057_v34 = vpop.f32.mrb[250].mxu0 }
 0x3a6   : > { %v11058_v13 = vpop.f32.mrb[251].mxu0 }
 0x3a7   : > { %v15250_v4 = vadd.f32 %v11056_v54, %v15177_v48  ;;  %v11059_v0 = vadd.f32 %v11058_v13, %v11057_v34 }
 0x3a9   : > { %v15253_v19 = vadd.f32 %v11059_v0, %v15183_v46 }
 0x3ab   : > { %v11060_v22 = vpop.f32.mrb[252].mxu0 }
 0x3ac   : > { %v11061_v50 = vpop.f32.mrb[253].mxu0 }
 0x3ad   : > { %v11062_v9 = vadd.f32 %v11061_v50, %v11060_v22  ;;  %v11063_v11 = vpop.f32.mrb[254].mxu0 }
 0x3ae   : > { %v11064_v49 = vpop.f32.mrb[255].mxu0 }
 0x3af   : > { %v15256_v38 = vadd.f32 %v11062_v9, %v15196_v14  ;;  %v11065_v31 = vadd.f32 %v11064_v49, %v11063_v11  ;;  %v10190_v49 = vld [vmem:[%s12741_s10 + $0x78] sm:$0xff]  }
 0x3b1   : > { %v15259_v53 = vadd.f32 %v11065_v31, %v15202_v27  ;;  %v9941_v31 = vld [vmem:[%s12741_s10 + $0x6c] sm:$0xff]  }
 0x3b3   : > { %v11098_v47 = vpop.f32.mrb[176].mxu1 }
 0x3b4   : > { %v11099_v39 = vpop.f32.mrb[177].mxu1 }
 0x3b5   : > { %v11100_v48 = vadd.f32 %v11099_v39, %v11098_v47  ;;  %v11101_v10 = vpop.f32.mrb[178].mxu1  ;;  %v9946_v47 = vld [vmem:[%s12741_s10 + $0x80] sm:$0x1]  ;;  %v10125_v39 = vunpack.c.l.bf16 %v10190_v49 }
 0x3b6   : > { %v11102_v37 = vpop.f32.mrb[179].mxu1 }
 0x3b7   : > { %v11103_v52 = vadd.f32 %v11102_v37, %v11101_v10  ;;  %v15262_v46 = vadd.f32 %v15214_v2, %v11100_v48  ;;  %v10126_v48 = vunpack.c.h.bf16 %v10190_v49  ;;  %v8746_v37 = vunpack.c.l.bf16 %v9941_v31  ;;  %v9953_v49 = vld [vmem:[%s12741_s10 + $0x9c] sm:$0xff]  }
 0x3b9   : > { %v15265_v44 = vadd.f32 %v15217_v20, %v11103_v52  ;;  %v8747_v52 = vunpack.c.h.bf16 %v9941_v31 }
 0x3bb   : > { %v11104_v15 = vpop.f32.mrb[180].mxu1 }
 0x3bc   : > { %v11105_v36 = vpop.f32.mrb[181].mxu1 }
 0x3bd   : > { %v11106_v14 = vadd.f32 %v11105_v36, %v11104_v15  ;;  %v11107_v23 = vpop.f32.mrb[182].mxu1  ;;  %v8751_v15 = vunpack.c.l.bf16 %v9946_v47 }
 0x3be   : > { %v11108_v60 = vpop.f32.mrb[183].mxu1 }
 0x3bf   : > { %v11109_v29 = vadd.f32 %v11108_v60, %v11107_v23  ;;  %v15268_v27 = vadd.f32 %v15220_v17, %v11106_v14  ;;  %v10191_v60 = vld [vmem:[%s12741_s10 + $0x90] sm:$0xff]  }
 0x3c1   : > { %v15271_v43 = vadd.f32 %v15223_v51, %v11109_v29  ;;  %v9947_v29 = vld [vmem:[%s12741_s10 + $0x84] sm:$0xff]  }
 0x3c3   : > { %v11110_v26 = vpop.f32.mrb[184].mxu1 }
 0x3c4   : > { %v11111_v1 = vpop.f32.mrb[185].mxu1 }
 0x3c5   : > { %v11112_v21 = vadd.f32 %v11111_v1, %v11110_v26  ;;  %v11113_v2 = vpop.f32.mrb[186].mxu1  ;;  %v8815_v1 = vrot.slane %v10125_v39, 1 }
 0x3c6   : > { %v11114_v18 = vpop.f32.mrb[187].mxu1 }
 0x3c7   : > { %v11115_v30 = vadd.f32 %v11114_v18, %v11113_v2  ;;  %v15274_v20 = vadd.f32 %v15226_v62, %v11112_v21  ;;  %v8816_v21 = vrot.slane %v10126_v48, 1  ;;  %v9952_v2 = vld [vmem:[%s12741_s10 + $0x98] sm:$0x1]  ;;  %v8810_v18 = vrot.slane %v8746_v37, 1 }
 0x3c9   : > { %v15277_v33 = vadd.f32 %v15229_v7, %v11115_v30  ;;  %v8811_v30 = vrot.slane %v8747_v52, 1  ;;  %v9958_v52 = vld [vmem:[%s12741_s10 + $0xb0] sm:$0x1] }
 0x3cb   : > { %v11116_v35 = vpop.f32.mrb[188].mxu1 }
 0x3cc   : > { %v11117_v8 = vpop.f32.mrb[189].mxu1 }
 0x3cd   : > { %v11118_v55 = vadd.f32 %v11117_v8, %v11116_v35  ;;  %v11119_v17 = vpop.f32.mrb[190].mxu1  ;;  %v8818_v35 = vrot.slane %v8751_v15, 1 }
 0x3ce   : > { %v11120_v3 = vpop.f32.mrb[191].mxu1 }
 0x3cf   : > { %v11121_v28 = vadd.f32 %v11120_v3, %v11119_v17  ;;  %v15280_v51 = vadd.f32 %v15232_v41, %v11118_v55  ;;  %v10129_v55 = vunpack.c.l.bf16 %v10191_v60  ;;  %v10130_v17 = vunpack.c.h.bf16 %v10191_v60 }
 0x3d0   : > { %v8752_v3 = vunpack.c.l.bf16 %v9947_v29  ;;  %v8759_v60 = vunpack.c.h.bf16 %v9953_v49 }
 0x3d1   : > { %v15283_v12 = vadd.f32 %v15235_v24, %v11121_v28 }
 0x3d3   : > { %v11122_v25 = vpop.f32.mrb[192].mxu1 }
 0x3d4   : > { %v11123_v42 = vpop.f32.mrb[193].mxu1 }
 0x3d5   : > { %v11124_v57 = vadd.f32 %v11123_v42, %v11122_v25  ;;  %v11125_v62 = vpop.f32.mrb[194].mxu1  ;;  %v8753_v25 = vunpack.c.h.bf16 %v9947_v29  ;;  %v8757_v42 = vunpack.c.l.bf16 %v9952_v2  ;;  %v8763_v2 = vunpack.c.l.bf16 %v9958_v52  ;;  %v9964_v52 = vld [vmem:[%s12741_s10 + $0xc8] sm:$0x1] }
 0x3d6   : > { %v11126_v56 = vpop.f32.mrb[195].mxu1 }
 0x3d7   : > { %v11127_v59 = vadd.f32 %v11126_v56, %v11125_v62  ;;  %v15286_v7 = vadd.f32 %v15238_v63, %v11124_v57  ;;  %v8817_v62 = vsel %vm562_vm1, %v8815_v1, %v8816_v21 }
 0x3d9   : > { %v15289_v40 = vadd.f32 %v15241_v5, %v11127_v59  ;;  %v8812_v59 = vsel %vm562_vm1, %v8810_v18, %v8811_v30 }
 0x3db   : > { %v11128_v32 = vpop.f32.mrb[196].mxu1 }
 0x3dc   : > { %v11129_v41 = vpop.f32.mrb[197].mxu1 }
 0x3dd   : > { %v11130_v16 = vadd.f32 %v11129_v41, %v11128_v32  ;;  %v11131_v24 = vpop.f32.mrb[198].mxu1  ;;  %v8819_v32 = vsel %vm562_vm1, %v8816_v21, %v8818_v35 }
 0x3de   : > { %v11132_v61 = vpop.f32.mrb[199].mxu1 }
 0x3df   : > { %v11133_v54 = vadd.f32 %v11132_v61, %v11131_v24  ;;  %v15292_v34 = vadd.f32 %v15244_v45, %v11130_v16  ;;  %v9949_v16 = vld [vmem:[%s12741_s10 + $0x8c] sm:$0x1] }
 0x3e0   : > { %v10192_v24 = vld [vmem:[%s12741_s10 + $0xa8] sm:$0xff]  }
 0x3e1   : > { %v15295_v13 = vadd.f32 %v15247_v6, %v11133_v54  ;;  %v8825_v54 = vrot.slane %v10129_v55, 1  ;;  %v10133_v39 = vunpack.c.l.bf16 %v10192_v24  ;;  %v10134_v37 = vunpack.c.h.bf16 %v10192_v24 }
 0x3e3   : > { %v11134_v63 = vpop.f32.mrb[200].mxu1  ;;  %v8835_v21 = vrot.slane %v10133_v39, 1  ;;  %v8836_v55 = vrot.slane %v10134_v37, 1 }
 0x3e4   : > { %v11135_v0 = vpop.f32.mrb[201].mxu1 }
 0x3e5   : > { %v11136_v22 = vadd.f32 %v11135_v0, %v11134_v63  ;;  %v11137_v5 = vpop.f32.mrb[202].mxu1  ;;  %v8826_v63 = vrot.slane %v10130_v17, 1  ;;  %v8820_v0 = vrot.slane %v8752_v3, 1 }
 0x3e6   : > { %v11138_v50 = vpop.f32.mrb[203].mxu1 }
 0x3e7   : > { %v11139_v9 = vadd.f32 %v11138_v50, %v11137_v5  ;;  %v15298_v11 = vadd.f32 %v15250_v4, %v11136_v22  ;;  %v9943_v4 = vld [vmem:[%s12741_s10 + $0x74] sm:$0x1]  ;;  %v8821_v50 = vrot.slane %v8753_v25, 1 }
 0x3e8   : > { %v8748_v8 = vunpack.c.l.bf16 %v9943_v4 }
 0x3e9   : > { %v15304_v45 = vadd.f32 %v15253_v19, %v11139_v9  ;;  %v8828_v9 = vrot.slane %v8757_v42, 1 }
 0x3ea   : > { %v8813_v41 = vrot.slane %v8748_v8, 1 }
 0x3eb   : > { %v11140_v6 = vpop.f32.mrb[204].mxu1 }
 0x3ec   : > { %v11141_v10 = vpop.f32.mrb[205].mxu1 }
 0x3ed   : > { %v11142_v36 = vadd.f32 %v11141_v10, %v11140_v6  ;;  %v11143_v14 = vpop.f32.mrb[206].mxu1  ;;  %v8754_v6 = vunpack.c.l.bf16 %v9949_v16  ;;  %v8814_v10 = vsel %vm562_vm1, %v8811_v30, %v8813_v41  ;;  %v8831_v41 = vrot.slane %v8759_v60, 1 }
 0x3ee   : > { %v11144_v23 = vpop.f32.mrb[207].mxu1 }
 0x3ef   : > { %v11145_v26 = vadd.f32 %v11144_v23, %v11143_v14  ;;  %v15311_v19 = vadd.f32 %v15256_v38, %v11142_v36  ;;  %v8827_v36 = vsel %vm562_vm1, %v8825_v54, %v8826_v63  ;;  %v8758_v14 = vunpack.c.l.bf16 %v9953_v49 }
 0x3f0   : > { %v8822_v23 = vsel %vm562_vm1, %v8820_v0, %v8821_v50  ;;  %v8823_v1 = vrot.slane %v8754_v6, 1  ;;  %v10193_v0 = vld [vmem:[%s12741_s10 + $0xc0] sm:$0xff]  }
 0x3f1   : > { %v15314_v28 = vadd.f32 %v15259_v53, %v11145_v26  ;;  %v10137_v6 = vunpack.c.l.bf16 %v10193_v0 }
 0x3f2   : > { %v8824_v54 = vsel %vm562_vm1, %v8821_v50, %v8823_v1  ;;  %v10138_v50 = vunpack.c.h.bf16 %v10193_v0 }
 0x3f3   : > { %v11532_v57 = vpop.f32.mrb[160].mxu1 }
 0x3f4   : > { %v11708_v38 = vadd.f32 %v15268_v27, %v11532_v57  ;;  %v8643_v56 = vpop.f32.mrb[161].mxu1  ;;  %v8830_v57 = vrot.slane %v8758_v14, 1 }
 0x3f5   : > { %v11711_v61 = vadd.f32 %v15262_v46, %v8643_v56  ;;  %v11533_v53 = vpop.f32.mrb[162].mxu1 }
 0x3f6   : > { %v8772_v22 = vadd.f32 %v11708_v38, %v15115_v58  ;;  %v11714_v27 = vadd.f32 %v15271_v43, %v11533_v53  ;;  %v8646_v5 = vpop.f32.mrb[163].mxu1 }
 0x3f7   : > { %v8770_v31 = vadd.f32 %v11711_v61, %v15115_v58  ;;  %v11717_v47 = vadd.f32 %v15265_v44, %v8646_v5  ;;  %v8829_v44 = vsel %vm562_vm1, %v8826_v63, %v8828_v9  ;;  %v8838_v61 = vrot.slane %v8763_v2, 1 }
 0x3f8   : > { %v8868_v46 = vadd.f32 %v8817_v62, %v8772_v22  ;;  %v8773_v48 = vadd.f32 %v11714_v27, %v15115_v58  ;;  %v9955_v62 = vld [vmem:[%s12741_s10 + $0xa4] sm:$0x1]  ;;  %v8837_v5 = vsel %vm562_vm1, %v8835_v21, %v8836_v55  ;;  %v8832_v9 = vsel %vm562_vm1, %v8830_v57, %v8831_v41 }
 0x3f9   : > { %v8866_v15 = vadd.f32 %v8812_v59, %v8770_v31  ;;  %v8771_v43 = vadd.f32 %v11717_v47, %v15115_v58  ;;  %v8760_v63 = vunpack.c.l.bf16 %v9955_v62  ;;  %v8839_v47 = vsel %vm562_vm1, %v8836_v55, %v8838_v61 }
 0x3fa   : > { %v8869_v4 = vadd.f32 %v8819_v32, %v8773_v48  ;;  %v8884_v18 = vmax.f32 %v8868_v46, 0.0 }
 0x3fb   : > { %v8867_v29 = vadd.f32 %v8814_v10, %v8771_v43  ;;  %v11536_v26 = vpop.f32.mrb[164].mxu1  ;;  %v8882_v17 = vmax.f32 %v8866_v15, 0.0  ;;  %v8833_v37 = vrot.slane %v8760_v63, 1 }
 0x3fc   : > { %v8885_v30 = vmax.f32 %v8869_v4, 0.0  ;;  %v11720_v35 = vadd.f32 %v15280_v51, %v11536_v26  ;;  %v8659_v8 = vpop.f32.mrb[165].mxu1 }
 0x3fd   : > { %v8883_v3 = vmax.f32 %v8867_v29, 0.0  ;;  %v11723_v25 = vadd.f32 %v15274_v20, %v8659_v8  ;;  %v11537_v42 = vpop.f32.mrb[166].mxu1 }
 0x3fe   : > { %v10147_v38 = vpack.c.bf16 %v8885_v30, %v8884_v18  ;;  %v8776_v56 = vadd.f32 %v11720_v35, %v15115_v58  ;;  %v11726_v59 = vadd.f32 %v15283_v12, %v11537_v42  ;;  %v8662_v32 = vpop.f32.mrb[167].mxu1  ;;  %v8769_v18 = vunpack.c.l.bf16 %v9964_v52 }
 0x3ff   : > { %v10142_v51 = vpack.c.bf16 %v8883_v3, %v8882_v17  ;;  %v8774_v16 = vadd.f32 %v11723_v25, %v15115_v58  ;;  %v11729_v24 = vadd.f32 %v15277_v33, %v8662_v32  ;;  %v9959_v33 = vld [vmem:[%s12741_s10 + $0xb4] sm:$0xff]   ;;  %v8834_v35 = vsel %vm562_vm1, %v8831_v41, %v8833_v37 }
 0x400   : > { %10195 = vst [vmem:[%s15163_s17 + $0x48] sm:$0xff] %v10147_v38   ;;  %v8872_v20 = vadd.f32 %v8827_v36, %v8776_v56  ;;  %v8777_v53 = vadd.f32 %v11726_v59, %v15115_v58  ;;  %v8764_v4 = vunpack.c.l.bf16 %v9959_v33  ;;  %v8765_v1 = vunpack.c.h.bf16 %v9959_v33 }
 0x401   : > { %10194 = vst [vmem:[%s15163_s17 + $0x40] sm:$0xff] %v10142_v51   ;;  %v8870_v22 = vadd.f32 %v8822_v23, %v8774_v16  ;;  %v8775_v12 = vadd.f32 %v11729_v24, %v15115_v58  ;;  %v9961_v23 = vld [vmem:[%s12741_s10 + $0xbc] sm:$0x1]  ;;  %v8846_v3 = vrot.slane %v10138_v50, 1  ;;  %s10066_s10 = sshll.u32 %s12581_s22, 11  ;;  %s15392_s22 = scalar_lea.sflag [#allocation5], %s230_s15 }
 0x402   : > { %v8873_v27 = vadd.f32 %v8829_v44, %v8777_v53  ;;  %v8888_v39 = vmax.f32 %v8872_v20, 0.0  ;;  %v8766_v8 = vunpack.c.l.bf16 %v9961_v23  ;;  %v8840_v42 = vrot.slane %v8764_v4, 1  ;;  %s15384_s25 = scalar_lea.hbm %s15438_s5, %s10066_s10 }
 0x403   : > { %v8871_v49 = vadd.f32 %v8824_v54, %v8775_v12  ;;  %v11540_v31 = vpop.f32.mrb[168].mxu1  ;;  %v8886_v15 = vmax.f32 %v8870_v22, 0.0  ;;  %v8841_v57 = vrot.slane %v8765_v1, 1 }
 0x404   : > { %v8889_v46 = vmax.f32 %v8873_v27, 0.0  ;;  %v11732_v48 = vadd.f32 %v15292_v34, %v11540_v31  ;;  %v8675_v10 = vpop.f32.mrb[169].mxu1  ;;  %v8843_v41 = vrot.slane %v8766_v8, 1 }
 0x405   : > { %v8887_v43 = vmax.f32 %v8871_v49, 0.0  ;;  %v11735_v36 = vadd.f32 %v15286_v7, %v8675_v10  ;;  %v11541_v14 = vpop.f32.mrb[170].mxu1  ;;  %v8842_v0 = vsel %vm562_vm1, %v8840_v42, %v8841_v57 }
 0x406   : > { %v10157_v44 = vpack.c.bf16 %v8889_v46, %v8888_v39  ;;  %v8780_v60 = vadd.f32 %v11732_v48, %v15115_v58  ;;  %v11738_v29 = vadd.f32 %v15295_v13, %v11541_v14  ;;  %v8678_v26 = vpop.f32.mrb[171].mxu1  ;;  %v8845_v13 = vrot.slane %v10137_v6, 1 }
 0x407   : > { %v10152_v34 = vpack.c.bf16 %v8887_v43, %v8886_v15  ;;  %v8778_v21 = vadd.f32 %v11735_v36, %v15115_v58  ;;  %v11741_v2 = vadd.f32 %v15289_v40, %v8678_v26  ;;  %v8848_v40 = vrot.slane %v8769_v18, 1 }
 0x408   : > { %10197 = vst [vmem:[%s15163_s17 + $0x58] sm:$0xff] %v10157_v44   ;;  %v8876_v30 = vadd.f32 %v8837_v5, %v8780_v60  ;;  %v8781_v7 = vadd.f32 %v11738_v29, %v15115_v58  ;;  %v8847_v61 = vsel %vm562_vm1, %v8845_v13, %v8846_v3  ;;  %v8844_v49 = vsel %vm562_vm1, %v8841_v57, %v8843_v41 }
 0x409   : > { %10196 = vst [vmem:[%s15163_s17 + $0x50] sm:$0xff] %v10152_v34   ;;  %v8874_v55 = vadd.f32 %v8832_v9, %v8778_v21  ;;  %v8779_v17 = vadd.f32 %v11741_v2, %v15115_v58  ;;  %v8849_v5 = vsel %vm562_vm1, %v8846_v3, %v8848_v40 }
 0x40a   : > { %v8877_v25 = vadd.f32 %v8839_v47, %v8781_v7  ;;  %v8892_v56 = vmax.f32 %v8876_v30, 0.0 }
 0x40b   : > { %v8875_v62 = vadd.f32 %v8834_v35, %v8779_v17  ;;  %v11544_v38 = vpop.f32.mrb[172].mxu1  ;;  %v8890_v16 = vmax.f32 %v8874_v55, 0.0 }
 0x40c   : > { %v8893_v59 = vmax.f32 %v8877_v25, 0.0  ;;  %v11744_v32 = vadd.f32 %v15311_v19, %v11544_v38  ;;  %v8691_v51 = vpop.f32.mrb[173].mxu1 }
 0x40d   : > { %v8891_v24 = vmax.f32 %v8875_v62, 0.0  ;;  %v11747_v20 = vadd.f32 %v15298_v11, %v8691_v51  ;;  %v11545_v53 = vpop.f32.mrb[174].mxu1 }
 0x40e   : > { %v10167_v54 = vpack.c.bf16 %v8893_v59, %v8892_v56  ;;  %v8784_v63 = vadd.f32 %v11744_v32, %v15115_v58  ;;  %v11750_v22 = vadd.f32 %v15314_v28, %v11545_v53  ;;  %v8694_v19 = vpop.f32.mrb[175].mxu1 }
 0x40f   : > { %v10162_v12 = vpack.c.bf16 %v8891_v24, %v8890_v16  ;;  %v8782_v27 = vadd.f32 %v11747_v20, %v15115_v58  ;;  %v11753_v9 = vadd.f32 %v15304_v45, %v8694_v19 }
 0x410   : > { %10199 = vst [vmem:[%s15163_s17 + $0x68] sm:$0xff] %v10167_v54   ;;  %v8880_v11 = vadd.f32 %v8847_v61, %v8784_v63  ;;  %v8785_v33 = vadd.f32 %v11750_v22, %v15115_v58 }
 0x411   : > { %10198 = vst [vmem:[%s15163_s17 + $0x60] sm:$0xff] %v10162_v12   ;;  %v8878_v31 = vadd.f32 %v8842_v0, %v8782_v27  ;;  %v8783_v28 = vadd.f32 %v11753_v9, %v15115_v58 }
 0x412   : > { %v8881_v47 = vadd.f32 %v8849_v5, %v8785_v33  ;;  %v8896_v50 = vmax.f32 %v8880_v11, 0.0 }
 0x413   : > { %v8879_v6 = vadd.f32 %v8844_v49, %v8783_v28  ;;  %v8894_v39 = vmax.f32 %v8878_v31, 0.0 }
 0x414   : > { %v8897_v45 = vmax.f32 %v8881_v47, 0.0 }
 0x415   : > { %v8895_v46 = vmax.f32 %v8879_v6, 0.0 }
 0x416   : > { %v10177_v48 = vpack.c.bf16 %v8897_v45, %v8896_v50 }
 0x417   : > { %v10172_v58 = vpack.c.bf16 %v8895_v46, %v8894_v39 }
 0x418   : > { %10201 = vst [vmem:[%s15163_s17 + $0x78] sm:$0xff] %v10177_v48  }
 0x419   : > { %10200 = vst [vmem:[%s15163_s17 + $0x70] sm:$0xff] %v10172_v58  }
 0x41a   : > { %12468 = shalt.err (!%p12465_p7)
}
 0x41b   : > { %s12469_s30 = scalar_lea.hbm %s15384_s25, 2048  ;;  %s12473_s14 = scalar_lea.hbm %s15438_s5, 4096 }
 0x41c   : > { %p12470_p8 = scmp.ne.s32.totalorder %s15384_s25, %s12469_s30  ;;  %p12474_p1 = scmp.lt.u32.totalorder %s15384_s25, %s15438_s5 }
 0x41d   : > { %p12475_p0 = scmp.lt.u32.totalorder %s12473_s14, %s12469_s30  ;;  %p12477_p6 = scmp.lt.u32.totalorder %s12469_s30, %s15384_s25 }
 0x41e   : > { %p12471_p11 = pnand %p12470_p8, %p15483_p9 }
 0x41f   : > { %p12476_p5 = por %p12475_p0, %p12474_p1 }
 0x420   : > { %p12472_p13 = pneg %p12471_p11 }
 0x421   : > { %p12478_p10 = por %p12477_p6, %p12476_p5 }
 0x423   : > { %p12479_p12 = pnand %p12478_p10, %p12472_p13 }
 0x425   : > { %12482 = shalt.err (!%p12479_p12)
}
 0x426   : > { %s12528_s17 = smov 64   ;;  %s12529_s10 = smov 4  }
 0x427   : > { %11871 = dma.vmem_to_hbm [thread:$0]  (%p15483_p9), %s15386_s23, 2048, %s15384_s25, %s15392_s22, %s12528_s17, %s12528_s17, %s12529_s10  }
 0x428 PF: > { %p11883_p2 = scmp.ge.s32.totalorder %s12521_s21, 2  ;;  %s9008_s26 = sand.u32 1, %s12509_s18  }
 0x429   : > { %p15484_p3 = scmp.ne.s32.totalorder %s15447_s29, 0  ;;  %s9009_s6 = scalar_lea.sflag [#allocation5], %s9008_s26 }
 0x42b   : > { %p11878_p4 = pnand %p11883_p2, %p15484_p3 }
 0x42d   : > { %12504 = dma.done.wait (!%p11878_p4), %s9009_s6, 2048  }
 0x42e   : > { %12506 = vsyncadd (!%p11878_p4), %s9009_s6, 4294965248  ;;  %p16_p7 = scmp.ge.s32.totalorder %s12585_s24, 4   ;;  %s15485_s18 = smov %s12513_s19 }
 0x42f   : > { %s15486_s19 = smov %s12517_s20  ;;  %s15487_s20 = smov %s12596_s27 }
 0x430   : > { %s15488_s21 = smov %s12585_s24  ;;  %18 = sbr.rel (!%p16_p7) target bundleno = 4 (0x4), region = 96 }
 0x437   :  { %9014 = vsyncpa [#allocation4], 1 }
 0x438   :  { %9016 = vsyncpa [#allocation4 + $0x1], 1 }
 0x439   :  { %9017 = vsyncpa [#allocation5], 1 }
 0x43a   :  { %9019 = vsyncpa [#allocation5 + $0x1], 1 }

</bundles_post_ra>
